<compile_context>
chip_gen: v6e
topology: v6e:2x2x1
jax: 0.10.0
libtpu: 0.0.40
codegen_flags: <defaults>
</compile_context>

<pallas_src>
import jax
import jax.numpy as jnp
import numpy as np
from jax.experimental import pallas as pl
from jax.experimental.pallas import tpu as pltpu

C = 768            # channels per modality
G = 32             # GroupNorm groups per modality
CPG = C // G       # 24 channels per group
C2 = 2 * C         # concatenated channels
G2 = 2 * G         # concatenated groups
H1, H2, OUT = 512, 256, 2
OUT_PAD = 128      # lane-padded logits width (sliced back to OUT in wrapper)
EPS = 1e-5
INV_CPG = 1.0 / CPG


def _pick_seq_tile(S, B, max_seq_tile, bytes_budget=4 * 1024 * 1024):
    """Largest multiple-of-8 seq tile whose (B, ts, C) f32 block fits the budget."""
    ts = bytes_budget // (B * C * 4)
    ts = max(8, (min(ts, max_seq_tile) // 8) * 8)
    return S if S <= ts else ts


# ---------------------------------------------------------------------------
# Fused kernel: streaming mean-pool (both modalities) + GroupNorm + MLP head.
# ---------------------------------------------------------------------------
def fused_student_forward(text_hidden, audio_hidden, p, *, max_seq_tile=2048):
    """text [B,S_t,C] f32, audio [B,S_a,C] f32 -> [B, OUT] f32 logits."""
    B, S_t, Ct = text_hidden.shape
    Ba, S_a, Ca = audio_hidden.shape
    assert Ct == C and Ca == C and Ba == B

    ts_t = _pick_seq_tile(S_t, B, max_seq_tile)
    ts_a = _pick_seq_tile(S_a, B, max_seq_tile)
    ns_t = pl.cdiv(S_t, ts_t)
    ns_a = pl.cdiv(S_a, ts_a)
    ns_total = ns_t + ns_a

    # Per-column 1/S so the two modalities share one accumulator finalize.
    inv_cnt = jnp.concatenate(
        [jnp.full((1, C), 1.0 / S_t, jnp.float32),
         jnp.full((1, C), 1.0 / S_a, jnp.float32)], axis=1)

    def kernel(t_ref, a_ref, mask_ref, inv_ref, w1_ref, b1_ref,
               w2_ref, b2_ref, w3_ref, b3_ref, out_ref, acc_ref):
        s = pl.program_id(0)

        @pl.when(s == 0)
        def _():
            acc_ref[...] = jnp.zeros_like(acc_ref)

        def accumulate(ref, local_s, S, ts, col):
            x = ref[...]                                    # (B, ts, C) f32
            if S % ts:                                      # ragged tail block
                rem = S - local_s * ts
                row = jax.lax.broadcasted_iota(jnp.int32, (1, ts, 1), 1)
                x = jnp.where(row < rem, x, 0.0)
            acc_ref[:, col:col + C] += jnp.sum(x, axis=1)

        @pl.when(s < ns_t)
        def _():
            accumulate(t_ref, s, S_t, ts_t, 0)

        @pl.when(s >= ns_t)
        def _():
            accumulate(a_ref, s - ns_t, S_a, ts_a, C)

        # Final step: GroupNorm (both modalities via one 0/1 channel->group
        # one-hot) + 3-layer MLP.  gamma/beta are pre-folded into w1/b1.
        @pl.when(s == ns_total - 1)
        def _():
            x = acc_ref[...] * inv_ref[...]                       # (B, 2C) means
            mask = mask_ref[...].astype(jnp.float32)              # (2C, 2G) 0/1
            mean_g = jnp.dot(x, mask, preferred_element_type=jnp.float32) * INV_CPG
            mean_c = jax.lax.dot_general(mean_g, mask, (((1,), (1,)), ((), ())),
                                         preferred_element_type=jnp.float32)
            d = x - mean_c
            var_g = jnp.dot(d * d, mask, preferred_element_type=jnp.float32) * INV_CPG
            var_c = jax.lax.dot_general(var_g, mask, (((1,), (1,)), ((), ())),
                                        preferred_element_type=jnp.float32)
            y = d * jax.lax.rsqrt(var_c + EPS)
            h1 = jnp.maximum(
                jnp.dot(y, w1_ref[...], preferred_element_type=jnp.float32)
                + b1_ref[...], 0.0)
            h2 = jnp.maximum(
                jnp.dot(h1, w2_ref[...], preferred_element_type=jnp.float32)
                + b2_ref[...], 0.0)
            out_ref[...] = (jnp.dot(h2, w3_ref[...],
                                    preferred_element_type=jnp.float32)
                            + b3_ref[...])

    weight_args = (p["mask"], inv_cnt, p["w1g"], p["b1g"],
                   p["w2b"], p["b2"], p["w3pb"], p["b3p"])
    # Full-shape, constant-index blocks: loaded once, resident for all steps.
    weight_specs = [pl.BlockSpec(a.shape, lambda s: (0, 0)) for a in weight_args]

    out = pl.pallas_call(
        kernel,
        out_shape=jax.ShapeDtypeStruct((B, OUT_PAD), jnp.float32),
        grid=(ns_total,),
        in_specs=[
            pl.BlockSpec((B, ts_t, C),
                         lambda s: (0, jnp.minimum(s, ns_t - 1), 0)),
            pl.BlockSpec((B, ts_a, C),
                         lambda s: (0, jnp.minimum(jnp.maximum(s - ns_t, 0),
                                                   ns_a - 1), 0)),
        ] + weight_specs,
        out_specs=pl.BlockSpec((B, OUT_PAD), lambda s: (0, 0)),
        scratch_shapes=[pltpu.VMEM((B, C2), jnp.float32)],
        compiler_params=pltpu.CompilerParams(
            dimension_semantics=("arbitrary",),
            vmem_limit_bytes=32 * 1024 * 1024,
        ),
    )(text_hidden, audio_hidden, *weight_args)
    return out[:, :OUT]


def student_model(text_hidden, audio_hidden, params, *, max_seq_tile=2048):
    return fused_student_forward(text_hidden, audio_hidden, params,
                                 max_seq_tile=max_seq_tile)


# ---------------------------------------------------------------------------
# Parameters + pure-JAX references
# ---------------------------------------------------------------------------
def make_params(key):
    ks = jax.random.split(key, 10)
    # fc[0]: kaiming normal, fan_in = 2C, relu  -> std = sqrt(2 / fan_in)
    w1 = jax.random.normal(ks[0], (C2, H1), jnp.float32) * np.sqrt(2.0 / C2)
    lim1 = 1.0 / np.sqrt(C2)
    b1 = jax.random.uniform(ks[1], (1, H1), jnp.float32, -lim1, lim1)
    # fc[2], fc[4]: PyTorch default uniform(-1/sqrt(fan_in), 1/sqrt(fan_in))
    lim2 = 1.0 / np.sqrt(H1)
    w2 = jax.random.uniform(ks[2], (H1, H2), jnp.float32, -lim2, lim2)
    b2 = jax.random.uniform(ks[3], (1, H2), jnp.float32, -lim2, lim2)
    lim3 = 1.0 / np.sqrt(H2)
    w3 = jax.random.uniform(ks[4], (H2, OUT), jnp.float32, -lim3, lim3)
    b3 = jax.random.uniform(ks[5], (1, OUT), jnp.float32, -lim3, lim3)
    # GroupNorm affine (PyTorch default 1/0; perturbed so the test is non-trivial)
    gamma_t = jnp.ones((1, C), jnp.float32) + 0.01 * jax.random.normal(ks[6], (1, C))
    beta_t = 0.01 * jax.random.normal(ks[7], (1, C))
    gamma_a = jnp.ones((1, C), jnp.float32) + 0.01 * jax.random.normal(ks[8], (1, C))
    beta_a = 0.01 * jax.random.normal(ks[9], (1, C))
    gamma_cat = jnp.concatenate([gamma_t, gamma_a], axis=1)    # [1, 2C]
    beta_cat = jnp.concatenate([beta_t, beta_a], axis=1)

    # --- deployment-time folds / casts used by the kernel ---
    # GroupNorm affine folded into fc[0]:  (y*g + b) @ W1 = y @ (g⊙W1) + b@W1
    w1g = (gamma_cat.reshape(C2, 1) * w1).astype(jnp.bfloat16)
    b1g = (b1 + beta_cat @ w1).astype(jnp.float32)
    w2b = w2.astype(jnp.bfloat16)
    w3p = jnp.zeros((H2, OUT_PAD), jnp.float32).at[:, :OUT].set(w3)
    b3p = jnp.zeros((1, OUT_PAD), jnp.float32).at[:, :OUT].set(b3)
    w3pb = w3p.astype(jnp.bfloat16)
    # Channel -> group one-hot covering BOTH modalities; exact 0/1 in bf16.
    mask = (jnp.arange(C2)[:, None] // CPG == jnp.arange(G2)[None, :])
    mask = mask.astype(jnp.bfloat16)

    return dict(
        w1=w1, b1=b1, w2=w2, b2=b2, w3=w3, b3=b3,
        gamma_t=gamma_t, beta_t=beta_t, gamma_a=gamma_a, beta_a=beta_a,
        w1g=w1g, b1g=b1g, w2b=w2b, w3pb=w3pb, b3p=b3p, mask=mask,
    )


def reference_matched(text_hidden, audio_hidden, p):
    """Same math as the kernel (uses the same folded / bf16-stored weights)."""
    def gn_normalize(x):
        xg = x.reshape(x.shape[0], G, CPG)
        m = xg.mean(-1, keepdims=True)
        v = ((xg - m) ** 2).mean(-1, keepdims=True)
        return ((xg - m) * jax.lax.rsqrt(v + EPS)).reshape(x.shape[0], C)

    t = gn_normalize(text_hidden.mean(axis=1))
    a = gn_normalize(audio_hidden.mean(axis=1))
    y = jnp.concatenate([t, a], axis=1)
    f32 = lambda w: w.astype(jnp.float32)
    h = jnp.maximum(y @ f32(p["w1g"]) + p["b1g"], 0.0)
    h = jnp.maximum(h @ f32(p["w2b"]) + p["b2"], 0.0)
    return (h @ f32(p["w3pb"]) + p["b3p"])[:, :OUT]


def reference_full_precision(text_hidden, audio_hidden, p):
    """Exact f32 PyTorch-module math (no weight quantization / folding)."""
    def gn(x, gamma, beta):
        xg = x.reshape(x.shape[0], G, CPG)
        m = xg.mean(-1, keepdims=True)
        v = ((xg - m) ** 2).mean(-1, keepdims=True)
        return ((xg - m) / jnp.sqrt(v + EPS)).reshape(x.shape[0], C) * gamma + beta

    t = gn(text_hidden.mean(axis=1), p["gamma_t"], p["beta_t"])
    a = gn(audio_hidden.mean(axis=1), p["gamma_a"], p["beta_a"])
    h = jnp.concatenate([t, a], axis=1)
    h = jnp.maximum(h @ p["w1"] + p["b1"], 0.0)
    h = jnp.maximum(h @ p["w2"] + p["b2"], 0.0)
    return h @ p["w3"] + p["b3"]


if __name__ == "__main__":
    key = jax.random.PRNGKey(0)
    k_t, k_a, k_p = jax.random.split(key, 3)

    # Stand-ins for BertModel / Wav2Vec2Model last_hidden_state outputs.
    B, S_TEXT, S_AUDIO = 2, 77, 249
    text_hidden = jax.random.normal(k_t, (B, S_TEXT, C), jnp.float32)
    audio_hidden = jax.random.normal(k_a, (B, S_AUDIO, C), jnp.float32)
    params = make_params(k_p)

    # Primary run: force a small seq tile so multi-tile streaming, clamped
    # index maps, and ragged-tail masking are all exercised.
    fwd_small_tile = jax.jit(lambda t, a, p: student_model(t, a, p, max_seq_tile=64))
    out = jax.block_until_ready(fwd_small_tile(text_hidden, audio_hidden, params))

    # Production tiling (VMEM-budget-derived tiles; single tile at these shapes).
    fwd_default = jax.jit(lambda t, a, p: student_model(t, a, p))
    out_default = jax.block_until_ready(fwd_default(text_hidden, audio_hidden, params))

    ref = reference_matched(text_hidden, audio_hidden, params)
    ref_fp = reference_full_precision(text_hidden, audio_hidden, params)

    np.testing.assert_allclose(np.asarray(out), np.asarray(ref),
                               rtol=2e-4, atol=2e-4)
    np.testing.assert_allclose(np.asarray(out_default), np.asarray(ref),
                               rtol=2e-4, atol=2e-4)
    # bf16 weight storage is the only deviation from exact f32 PyTorch math.
    np.testing.assert_allclose(np.asarray(out), np.asarray(ref_fp),
                               rtol=2e-2, atol=2e-2)
    assert out.shape == (B, OUT)
    print("KERNEL_OK")
</pallas_src>

<mosaic_0001>
module attributes {stable_mosaic.version = 11 : i64} {
  func.func @kernel(%arg0: i32, %arg1: memref<2x64x768xf32, #tpu.memory_space<vmem>>, %arg2: memref<2x64x768xf32, #tpu.memory_space<vmem>>, %arg3: memref<1536x64xbf16, #tpu.memory_space<vmem>>, %arg4: memref<1x1536xf32, #tpu.memory_space<vmem>>, %arg5: memref<1536x512xbf16, #tpu.memory_space<vmem>>, %arg6: memref<1x512xf32, #tpu.memory_space<vmem>>, %arg7: memref<512x256xbf16, #tpu.memory_space<vmem>>, %arg8: memref<1x256xf32, #tpu.memory_space<vmem>>, %arg9: memref<256x128xbf16, #tpu.memory_space<vmem>>, %arg10: memref<1x128xf32, #tpu.memory_space<vmem>>, %arg11: memref<2x128xf32, #tpu.memory_space<vmem>>, %arg12: memref<2x1536xf32, #tpu.memory_space<vmem>>) attributes {dimension_semantics = [#tpu.dimension_semantics<arbitrary>], iteration_bounds = array<i64: 6>, scalar_prefetch = 0 : i64, scratch_operands = 1 : i64, tpu.core_type = #tpu.core_type<tc>, window_params = [{transform_indices = @transform_0, window_bounds = array<i64: 2, 64, 768>}, {transform_indices = @transform_1, window_bounds = array<i64: 2, 64, 768>}, {pipeline_mode = #tpu.pipeline_mode<synchronous>, transform_indices = @transform_2, window_bounds = array<i64: 1536, 64>}, {pipeline_mode = #tpu.pipeline_mode<synchronous>, transform_indices = @transform_3, window_bounds = array<i64: 1, 1536>}, {pipeline_mode = #tpu.pipeline_mode<synchronous>, transform_indices = @transform_4, window_bounds = array<i64: 1536, 512>}, {pipeline_mode = #tpu.pipeline_mode<synchronous>, transform_indices = @transform_5, window_bounds = array<i64: 1, 512>}, {pipeline_mode = #tpu.pipeline_mode<synchronous>, transform_indices = @transform_6, window_bounds = array<i64: 512, 256>}, {pipeline_mode = #tpu.pipeline_mode<synchronous>, transform_indices = @transform_7, window_bounds = array<i64: 1, 256>}, {pipeline_mode = #tpu.pipeline_mode<synchronous>, transform_indices = @transform_8, window_bounds = array<i64: 256, 128>}, {pipeline_mode = #tpu.pipeline_mode<synchronous>, transform_indices = @transform_9, window_bounds = array<i64: 1, 128>}, {pipeline_mode = #tpu.pipeline_mode<synchronous>, transform_indices = @transform_10, window_bounds = array<i64: 2, 128>}]} {
    %c0_i32 = arith.constant 0 : i32
    %0 = arith.cmpi eq, %arg0, %c0_i32 : i32
    %1 = arith.extui %0 : i1 to i32
    %c0_i32_0 = arith.constant 0 : i32
    %2 = arith.cmpi ne, %1, %c0_i32_0 : i32
    scf.if %2 {
      %cst = arith.constant 0.000000e+00 : f32
      %12 = vector.broadcast %cst : f32 to vector<2x1536xf32>
      %c0 = arith.constant 0 : index
      %c0_5 = arith.constant 0 : index
      %13 = vector.load %arg12[%c0, %c0_5] : memref<2x1536xf32, #tpu.memory_space<vmem>>, vector<2x1536xf32>
      tpu.vector_store %arg12[%c0, %c0_5], %12 {strides = array<i32>} : memref<2x1536xf32, #tpu.memory_space<vmem>>, vector<2x1536xf32>,
    } else {
    }
    %c2_i32 = arith.constant 2 : i32
    %3 = arith.cmpi slt, %arg0, %c2_i32 : i32
    %4 = arith.extui %3 : i1 to i32
    %c0_i32_1 = arith.constant 0 : i32
    %5 = arith.cmpi ne, %4, %c0_i32_1 : i32
    scf.if %5 {
      %c0 = arith.constant 0 : index
      %c0_5 = arith.constant 0 : index
      %c0_6 = arith.constant 0 : index
      %12 = vector.load %arg1[%c0, %c0_5, %c0_6] : memref<2x64x768xf32, #tpu.memory_space<vmem>>, vector<2x64x768xf32>
      %c64_i32 = arith.constant 64 : i32
      %13 = arith.muli %arg0, %c64_i32 : i32
      %c77_i32 = arith.constant 77 : i32
      %14 = arith.subi %c77_i32, %13 : i32
      %15 = tpu.iota {dimensions = array<i32: 1>} : vector<1x64x1xi32>
      %16 = vector.broadcast %14 : i32 to vector<1x64x1xi32>
      %17 = arith.cmpi slt, %15, %16 : vector<1x64x1xi32>
      %cst = arith.constant 0.000000e+00 : f32
      %18 = vector.shape_cast %17 : vector<1x64x1xi1> to vector<1x64x1xi1>
      %19 = vector.broadcast %18 : vector<1x64x1xi1> to vector<2x64x768xi1>
      %20 = vector.broadcast %cst : f32 to vector<2x64x768xf32>
      %21 = arith.select %19, %12, %20 : vector<2x64x768xi1>, vector<2x64x768xf32>
      %c0_7 = arith.constant 0 : index
      %c0_8 = arith.constant 0 : index
      %22 = vector.load %arg12[%c0_7, %c0_8] : memref<2x1536xf32, #tpu.memory_space<vmem>>, vector<2x768xf32>
      %cst_9 = arith.constant dense<0.000000e+00> : vector<2x768xf32>
      %23 = vector.multi_reduction <add>, %21, %cst_9 [1] : vector<2x64x768xf32> to vector<2x768xf32>
      %24 = arith.addf %22, %23 : vector<2x768xf32>
      %c0_10 = arith.constant 0 : index
      %c0_11 = arith.constant 0 : index
      %25 = vector.load %arg12[%c0_10, %c0_11] : memref<2x1536xf32, #tpu.memory_space<vmem>>, vector<2x768xf32>
      tpu.vector_store %arg12[%c0_10, %c0_11], %24 {strides = array<i32>} : memref<2x1536xf32, #tpu.memory_space<vmem>>, vector<2x768xf32>,
    } else {
    }
    %c2_i32_2 = arith.constant 2 : i32
    %6 = arith.cmpi sge, %arg0, %c2_i32_2 : i32
    %7 = arith.extui %6 : i1 to i32
    %c0_i32_3 = arith.constant 0 : i32
    %8 = arith.cmpi ne, %7, %c0_i32_3 : i32
    scf.if %8 {
      %c2_i32_5 = arith.constant 2 : i32
      %12 = arith.subi %arg0, %c2_i32_5 : i32
      %c0 = arith.constant 0 : index
      %c0_6 = arith.constant 0 : index
      %c0_7 = arith.constant 0 : index
      %13 = vector.load %arg2[%c0, %c0_6, %c0_7] : memref<2x64x768xf32, #tpu.memory_space<vmem>>, vector<2x64x768xf32>
      %c64_i32 = arith.constant 64 : i32
      %14 = arith.muli %12, %c64_i32 : i32
      %c249_i32 = arith.constant 249 : i32
      %15 = arith.subi %c249_i32, %14 : i32
      %16 = tpu.iota {dimensions = array<i32: 1>} : vector<1x64x1xi32>
      %17 = vector.broadcast %15 : i32 to vector<1x64x1xi32>
      %18 = arith.cmpi slt, %16, %17 : vector<1x64x1xi32>
      %cst = arith.constant 0.000000e+00 : f32
      %19 = vector.shape_cast %18 : vector<1x64x1xi1> to vector<1x64x1xi1>
      %20 = vector.broadcast %19 : vector<1x64x1xi1> to vector<2x64x768xi1>
      %21 = vector.broadcast %cst : f32 to vector<2x64x768xf32>
      %22 = arith.select %20, %13, %21 : vector<2x64x768xi1>, vector<2x64x768xf32>
      %c0_8 = arith.constant 0 : index
      %c768 = arith.constant 768 : index
      %23 = vector.load %arg12[%c0_8, %c768] : memref<2x1536xf32, #tpu.memory_space<vmem>>, vector<2x768xf32>
      %cst_9 = arith.constant dense<0.000000e+00> : vector<2x768xf32>
      %24 = vector.multi_reduction <add>, %22, %cst_9 [1] : vector<2x64x768xf32> to vector<2x768xf32>
      %25 = arith.addf %23, %24 : vector<2x768xf32>
      %c0_10 = arith.constant 0 : index
      %c768_11 = arith.constant 768 : index
      %26 = vector.load %arg12[%c0_10, %c768_11] : memref<2x1536xf32, #tpu.memory_space<vmem>>, vector<2x768xf32>
      tpu.vector_store %arg12[%c0_10, %c768_11], %25 {strides = array<i32>} : memref<2x1536xf32, #tpu.memory_space<vmem>>, vector<2x768xf32>,
    } else {
    }
    %c5_i32 = arith.constant 5 : i32
    %9 = arith.cmpi eq, %arg0, %c5_i32 : i32
    %10 = arith.extui %9 : i1 to i32
    %c0_i32_4 = arith.constant 0 : i32
    %11 = arith.cmpi ne, %10, %c0_i32_4 : i32
    scf.if %11 {
      %c0 = arith.constant 0 : index
      %c0_5 = arith.constant 0 : index
      %12 = vector.load %arg12[%c0, %c0_5] : memref<2x1536xf32, #tpu.memory_space<vmem>>, vector<2x1536xf32>
      %c0_6 = arith.constant 0 : index
      %c0_7 = arith.constant 0 : index
      %13 = vector.load %arg4[%c0_6, %c0_7] : memref<1x1536xf32, #tpu.memory_space<vmem>>, vector<1x1536xf32>
      %14 = vector.broadcast %13 : vector<1x1536xf32> to vector<2x1536xf32>
      %15 = arith.mulf %12, %14 : vector<2x1536xf32>
      %c0_8 = arith.constant 0 : index
      %c0_9 = arith.constant 0 : index
      %16 = vector.load %arg3[%c0_8, %c0_9] : memref<1536x64xbf16, #tpu.memory_space<vmem>>, vector<1536x64xbf16>
      %17 = arith.extf %16 : vector<1536x64xbf16> to vector<1536x64xf32>
      %cst = arith.constant dense<0.000000e+00> : vector<2x64xf32>
      %18 = tpu.matmul %15, %17, %cst {dimension_numbers = #tpu.dot_dimension_numbers<[1], [0], [0], [1], [0, 0, 1, 1], [], []>} : vector<2x1536xf32>, vector<1536x64xf32>, vector<2x64xf32> -> vector<2x64xf32>
      %cst_10 = arith.constant 0.0416666679 : f32
      %19 = vector.broadcast %cst_10 : f32 to vector<2x64xf32>
      %20 = arith.mulf %18, %19 : vector<2x64xf32>
      %cst_11 = arith.constant dense<0.000000e+00> : vector<2x1536xf32>
      %21 = tpu.matmul %20, %17, %cst_11 {dimension_numbers = #tpu.dot_dimension_numbers<[1], [1], [0], [0], [0, 0, 1, 0], [], []>} : vector<2x64xf32>, vector<1536x64xf32>, vector<2x1536xf32> -> vector<2x1536xf32>
      %22 = arith.subf %15, %21 : vector<2x1536xf32>
      %23 = arith.mulf %22, %22 : vector<2x1536xf32>
      %cst_12 = arith.constant dense<0.000000e+00> : vector<2x64xf32>
      %24 = tpu.matmul %23, %17, %cst_12 {dimension_numbers = #tpu.dot_dimension_numbers<[1], [0], [0], [1], [0, 0, 1, 1], [], []>} : vector<2x1536xf32>, vector<1536x64xf32>, vector<2x64xf32> -> vector<2x64xf32>
      %cst_13 = arith.constant 0.0416666679 : f32
      %25 = vector.broadcast %cst_13 : f32 to vector<2x64xf32>
      %26 = arith.mulf %24, %25 : vector<2x64xf32>
      %cst_14 = arith.constant dense<0.000000e+00> : vector<2x1536xf32>
      %27 = tpu.matmul %26, %17, %cst_14 {dimension_numbers = #tpu.dot_dimension_numbers<[1], [1], [0], [0], [0, 0, 1, 0], [], []>} : vector<2x64xf32>, vector<1536x64xf32>, vector<2x1536xf32> -> vector<2x1536xf32>
      %cst_15 = arith.constant 9.99999974E-6 : f32
      %28 = vector.broadcast %cst_15 : f32 to vector<2x1536xf32>
      %29 = arith.addf %27, %28 : vector<2x1536xf32>
      %30 = math.rsqrt %29 : vector<2x1536xf32>
      %31 = arith.mulf %22, %30 : vector<2x1536xf32>
      %c0_16 = arith.constant 0 : index
      %c0_17 = arith.constant 0 : index
      %32 = vector.load %arg5[%c0_16, %c0_17] : memref<1536x512xbf16, #tpu.memory_space<vmem>>, vector<1536x512xbf16>
      %cst_18 = arith.constant dense<0.000000e+00> : vector<2x512xf32>
      %33 = tpu.matmul %31, %32, %cst_18 {dimension_numbers = #tpu.dot_dimension_numbers<[1], [0], [0], [1], [0, 0, 1, 1], [], []>} : vector<2x1536xf32>, vector<1536x512xbf16>, vector<2x512xf32> -> vector<2x512xf32>
      %c0_19 = arith.constant 0 : index
      %c0_20 = arith.constant 0 : index
      %34 = vector.load %arg6[%c0_19, %c0_20] : memref<1x512xf32, #tpu.memory_space<vmem>>, vector<1x512xf32>
      %35 = vector.broadcast %34 : vector<1x512xf32> to vector<2x512xf32>
      %36 = arith.addf %33, %35 : vector<2x512xf32>
      %cst_21 = arith.constant 0.000000e+00 : f32
      %37 = vector.broadcast %cst_21 : f32 to vector<2x512xf32>
      %38 = arith.maximumf %36, %37 : vector<2x512xf32>
      %c0_22 = arith.constant 0 : index
      %c0_23 = arith.constant 0 : index
      %39 = vector.load %arg7[%c0_22, %c0_23] : memref<512x256xbf16, #tpu.memory_space<vmem>>, vector<512x256xbf16>
      %cst_24 = arith.constant dense<0.000000e+00> : vector<2x256xf32>
      %40 = tpu.matmul %38, %39, %cst_24 {dimension_numbers = #tpu.dot_dimension_numbers<[1], [0], [0], [1], [0, 0, 1, 1], [], []>} : vector<2x512xf32>, vector<512x256xbf16>, vector<2x256xf32> -> vector<2x256xf32>
      %c0_25 = arith.constant 0 : index
      %c0_26 = arith.constant 0 : index
      %41 = vector.load %arg8[%c0_25, %c0_26] : memref<1x256xf32, #tpu.memory_space<vmem>>, vector<1x256xf32>
      %42 = vector.broadcast %41 : vector<1x256xf32> to vector<2x256xf32>
      %43 = arith.addf %40, %42 : vector<2x256xf32>
      %cst_27 = arith.constant 0.000000e+00 : f32
      %44 = vector.broadcast %cst_27 : f32 to vector<2x256xf32>
      %45 = arith.maximumf %43, %44 : vector<2x256xf32>
      %c0_28 = arith.constant 0 : index
      %c0_29 = arith.constant 0 : index
      %46 = vector.load %arg9[%c0_28, %c0_29] : memref<256x128xbf16, #tpu.memory_space<vmem>>, vector<256x128xbf16>
      %cst_30 = arith.constant dense<0.000000e+00> : vector<2x128xf32>
      %47 = tpu.matmul %45, %46, %cst_30 {dimension_numbers = #tpu.dot_dimension_numbers<[1], [0], [0], [1], [0, 0, 1, 1], [], []>} : vector<2x256xf32>, vector<256x128xbf16>, vector<2x128xf32> -> vector<2x128xf32>
      %c0_31 = arith.constant 0 : index
      %c0_32 = arith.constant 0 : index
      %48 = vector.load %arg10[%c0_31, %c0_32] : memref<1x128xf32, #tpu.memory_space<vmem>>, vector<1x128xf32>
      %49 = vector.broadcast %48 : vector<1x128xf32> to vector<2x128xf32>
      %50 = arith.addf %47, %49 : vector<2x128xf32>
      %c0_33 = arith.constant 0 : index
      %c0_34 = arith.constant 0 : index
      %51 = vector.load %arg11[%c0_33, %c0_34] : memref<2x128xf32, #tpu.memory_space<vmem>>, vector<2x128xf32>
      tpu.vector_store %arg11[%c0_33, %c0_34], %50 {strides = array<i32>} : memref<2x128xf32, #tpu.memory_space<vmem>>, vector<2x128xf32>,
    } else {
    }
    return
  }
  func.func @transform_0(%arg0: i32) -> (i32, i32, i32) {
    %c1_i32 = arith.constant 1 : i32
    %0 = arith.minsi %arg0, %c1_i32 : i32
    %c0_i32 = arith.constant 0 : i32
    %c0_i32_0 = arith.constant 0 : i32
    %c0_i32_1 = arith.constant 0 : i32
    return %c0_i32, %0, %c0_i32_0 : i32, i32, i32
  }
  func.func @transform_1(%arg0: i32) -> (i32, i32, i32) {
    %c2_i32 = arith.constant 2 : i32
    %0 = arith.subi %arg0, %c2_i32 : i32
    %c0_i32 = arith.constant 0 : i32
    %1 = arith.maxsi %0, %c0_i32 : i32
    %c3_i32 = arith.constant 3 : i32
    %2 = arith.minsi %1, %c3_i32 : i32
    %c0_i32_0 = arith.constant 0 : i32
    %c0_i32_1 = arith.constant 0 : i32
    %c0_i32_2 = arith.constant 0 : i32
    return %c0_i32_0, %2, %c0_i32_1 : i32, i32, i32
  }
  func.func @transform_2(%arg0: i32) -> (i32, i32) {
    %c0_i32 = arith.constant 0 : i32
    %c0_i32_0 = arith.constant 0 : i32
    %c0_i32_1 = arith.constant 0 : i32
    return %c0_i32, %c0_i32_0 : i32, i32
  }
  func.func @transform_3(%arg0: i32) -> (i32, i32) {
    %c0_i32 = arith.constant 0 : i32
    %c0_i32_0 = arith.constant 0 : i32
    %c0_i32_1 = arith.constant 0 : i32
    return %c0_i32, %c0_i32_0 : i32, i32
  }
  func.func @transform_4(%arg0: i32) -> (i32, i32) {
    %c0_i32 = arith.constant 0 : i32
    %c0_i32_0 = arith.constant 0 : i32
    %c0_i32_1 = arith.constant 0 : i32
    return %c0_i32, %c0_i32_0 : i32, i32
  }
  func.func @transform_5(%arg0: i32) -> (i32, i32) {
    %c0_i32 = arith.constant 0 : i32
    %c0_i32_0 = arith.constant 0 : i32
    %c0_i32_1 = arith.constant 0 : i32
    return %c0_i32, %c0_i32_0 : i32, i32
  }
  func.func @transform_6(%arg0: i32) -> (i32, i32) {
    %c0_i32 = arith.constant 0 : i32
    %c0_i32_0 = arith.constant 0 : i32
    %c0_i32_1 = arith.constant 0 : i32
    return %c0_i32, %c0_i32_0 : i32, i32
  }
  func.func @transform_7(%arg0: i32) -> (i32, i32) {
    %c0_i32 = arith.constant 0 : i32
    %c0_i32_0 = arith.constant 0 : i32
    %c0_i32_1 = arith.constant 0 : i32
    return %c0_i32, %c0_i32_0 : i32, i32
  }
  func.func @transform_8(%arg0: i32) -> (i32, i32) {
    %c0_i32 = arith.constant 0 : i32
    %c0_i32_0 = arith.constant 0 : i32
    %c0_i32_1 = arith.constant 0 : i32
    return %c0_i32, %c0_i32_0 : i32, i32
  }
  func.func @transform_9(%arg0: i32) -> (i32, i32) {
    %c0_i32 = arith.constant 0 : i32
    %c0_i32_0 = arith.constant 0 : i32
    %c0_i32_1 = arith.constant 0 : i32
    return %c0_i32, %c0_i32_0 : i32, i32
  }
  func.func @transform_10(%arg0: i32) -> (i32, i32) {
    %c0_i32 = arith.constant 0 : i32
    %c0_i32_0 = arith.constant 0 : i32
    %c0_i32_1 = arith.constant 0 : i32
    return %c0_i32, %c0_i32_0 : i32, i32
  }
}

</mosaic_0001>

<bundles_post_ra>
// kernel: _lambda_.1
= control target key start
LH: loop header
LB: loop body
LE: loop exit
PB: predicated region body
PF: predicated region fallthrough
CT: control target
= control target key end

     0   :  { %s17439_s0 = inlined_call_operand.vmem [shape: f32[2,77,768], index: 0, kind: input, shape index: {}]   ;;  %s17440_s1 = inlined_call_operand.vmem [shape: f32[2,249,768], index: 1, kind: input, shape index: {}]   ;;  %s17441_s2 = inlined_call_operand.vmem [shape: bf16[1536,64], index: 2, kind: input, shape index: {}]   ;;  %s17442_s3 = inlined_call_operand.vmem [shape: f32[1,1536], index: 3, kind: input, shape index: {}]   ;;  %s17443_s4 = inlined_call_operand.vmem [shape: bf16[1536,512], index: 4, kind: input, shape index: {}]   ;;  %s17444_s5 = inlined_call_operand.vmem [shape: f32[1,512], index: 5, kind: input, shape index: {}]   ;;  %s17445_s6 = inlined_call_operand.vmem [shape: bf16[512,256], index: 6, kind: input, shape index: {}]   ;;  %s17446_s7 = inlined_call_operand.vmem [shape: f32[1,256], index: 7, kind: input, shape index: {}]   ;;  %s17447_s8 = inlined_call_operand.vmem [shape: bf16[256,128], index: 8, kind: input, shape index: {}]   ;;  %s17448_s9 = inlined_call_operand.vmem [shape: f32[1,128], index: 9, kind: input, shape index: {}]   ;;  %s17449_s10 = inlined_call_operand.hbm [shape: f32[2,128], index: 10, kind: output, shape index: {}]  }
   0x1   :  { %17863 = sst [smem:[#allocation246_spill]] %s17439_s0 }
   0x2   :  { %17864 = sst [smem:[#allocation247_spill]] %s17449_s10 }
   0x3   :  { %15 = vsyncpa [#allocation6], 0  ;;  %s11756_s13 = smov 0   ;;  %s11758_s14 = smov 0  }
   0x4   :  { %s11760_s15 = smov 0   ;;  %s11762_s16 = smov 0  }
   0x5   :  { %s11764_s17 = smov 0  }
   0x6 LB: > { %17865 = sst [smem:[#allocation8_spill]] %s11658_s16  ;;  %s11782_s18 = sadd.s32 4294967295, %s11662_s17   ;;  %s11662_s17 = sphi %s11764_s17, %s18723_s17   ;;  %s11658_s16 = sphi %s11762_s16, %s18726_s16   ;;  %s11654_s15 = sphi %s11760_s15, %s18729_s15   ;;  %s11650_s14 = sphi %s11758_s14, %s18728_s14   ;;  %s11646_s13 = sphi %s11756_s13, %s18727_s13  }
   0x7   : > { %s11785_s19 = sadd.s32 1, %s11662_s17   ;;  %p25_p0 = scmp.lt.s32.totalorder %s11662_s17, 1 }
   0x8   : > { %17866 = sst [smem:[#allocation9_spill]] %s11785_s19  ;;  %p27_p1 = scmp.lt.s32.totalorder %s11785_s19, 1 }
   0x9   : > { %s32_s20 = sadd.s32 1, %s11658_s16  ;;  %p39_p2 = scmp.ne.s32.totalorder %s11658_s16, %s11654_s15 }
   0xa   : > { %s11793_s21 = scalar_select %p25_p0, %s11662_s17, 1 }
   0xb   : > { %s28_s22 = scalar_select %p27_p1, %s11785_s19, 1 }
   0xc   : > { %p40_p3 = scmp.eq.s32.totalorder %s11662_s17, 0  ;;  %s8487_s23 = sadd.s32 4294967294, %s11662_s17 }
   0xd   : > { %s29_s24 = ssub.s32 %s11793_s21, %s28_s22  ;;  %p56_p4 = scmp.gt.s32.totalorder %s8487_s23, 0 }
   0xe   : > { %p30_p5 = scmp.eq.s32.totalorder %s29_s24, 0  ;;  %p11801_p6 = por %p40_p3, %p39_p2 }
   0xf   : > { %s57_s26 = scalar_select %p56_p4, %s8487_s23, 0 }
  0x10   : > { %s11806_s27 = scalar_select %p30_p5, %s11658_s16, %s32_s20  }
  0x11   : > { %p8488_p7 = scmp.lt.s32.totalorder %s8487_s23, 3  ;;  %s8493_s28 = sadd.s32 4294967294, %s11785_s19 }
  0x12   : > { %17868 = sst [smem:[#allocation10_spill]] %s11806_s27  ;;  %p61_p8 = scmp.gt.s32.totalorder %s8493_s28, 0 }
  0x13   : > { %p8494_p9 = scmp.lt.s32.totalorder %s8493_s28, 3  ;;  %s18731_s26 = smov (!%p8488_p7, %s57_s26), 3 }
  0x14   : > { %s18733_s28 = smov (!%p61_p8, %s8493_s28), 0  ;;  %p75_p10 = scmp.ne.s32.totalorder %s11650_s14, %s11646_s13 }
  0x15   : > { %s18735_s28 = smov (!%p8494_p9, %s18733_s28), 3  ;;  %s68_s11 = sadd.s32 1, %s11650_s14 }
  0x16   : > { %p11815_p11 = por %p75_p10, %p40_p3  ;;  %s65_s30 = ssub.s32 %s18731_s26, %s18735_s28 }
  0x17   : > { %p66_p12 = scmp.eq.s32.totalorder %s65_s30, 0  ;;  %p8500_p13 = scmp.ge.s32.totalorder %s11662_s17, 6 }
  0x19   : > { %s11822_s12 = scalar_select %p66_p12, %s11650_s14, %s68_s11  }
  0x1a   : > { %314 = sbr.rel (%p8500_p13) target bundleno = 172 (0xac), region = 48 }
  0x1b   : > { %17870 = sst [smem:[#allocation11_spill]] %s11822_s12 }
  0x1f   : > { %317 = sbr.rel (!%p11801_p6) target bundleno = 119 (0x77), region = 52  ;;  %s319_s20 = sand.u32 (%p11801_p6), 1, %s11658_s16  }
  0x20   : > { %s8501_s22 = sshll.u32 (%p11801_p6), %s11793_s21, 3  ;;  %s10726_s23 = smul.u32 (%p11801_p6), 768, %s319_s20 }
  0x21   : > { %s325_s24 = ssub.s32 (%p11801_p6), 10, %s8501_s22  ;;  %s10727_s27 = smul.u32 (%p11801_p6), 384, %s11793_s21 }
  0x22   : > { %p326_p0 = scmp.lt.s32.totalorder (%p11801_p6), %s325_s24, 8  ;;  %s17871_s0 = sld [smem:[#allocation246_spill]] (%p11801_p6) }
  0x23   : > { %s11838_s25 = scalar_lea.vmem (%p11801_p6), [#allocation3], %s10726_s23  }
  0x24   : > { %s18737_s24 = smov (!%p326_p0, %s325_s24), 8 }
  0x25   : > { %s8503_s12 = smul.u32 1536, %s18737_s24 }
  0x27   : > { %p8507_p1 = scmp.eq.s32.totalorder %s8503_s12, 0 }
  0x28   : > { %s11835_s11 = scalar_lea.vmem %s17871_s0, %s10727_s27   ;;  %10848 = sdivrem.u32 (!%p8507_p1), %s18737_s24, 6 }
  0x29   : > { %336 = sbr.rel (%p8507_p1) target bundleno = 119 (0x77), region = 56 }
  0x31   : > { %s11841_s16 = spop.drf %10848 }
  0x32   : > { %p8508_p2 = scmp.le.s32.totalorder %s11841_s16, 0 }
  0x33   : > { %s17872_s21 = smov (!%p8508_p2), %s11838_s25  ;;  %s17873_s20 = smov (!%p8508_p2), %s11835_s11 }
  0x34   : > { %8440 = sbr.rel (%p8508_p2) target bundleno = 94 (0x5e), region = 165  ;;  %s11850_s27 = smov (!%p8508_p2), 0  }
  0x35   : > { %s11852_s22 = smov (!%p8508_p2), 0  }
  0x39 LB: >> { %v350_v0 = vld [vmem:[%s11670_s20] sm:$0xff]  ;;  %v352_v1 = vld [vmem:[%s11670_s20 + $0x30] sm:$0xff]  ;;  %s494_s12 = sadd.s32 1, %s11674_s27  ;;  %v362_v6 = vld [vmem:[%s11670_s20 + $0x8] sm:$0xff]  ;;  %s344_s22 = sadd.s32 1, %s11678_s22   ;;  %s11678_s22 = sphi %s11852_s22, %s344_s22   ;;  %s11674_s27 = sphi %s11850_s27, %s17876_s27   ;;  %s11670_s20 = sphi %s17873_s20, %s17875_s20   ;;  %s11666_s21 = sphi %s17872_s21, %s17874_s21  }
  0x3a   : >> { %v354_v2 = vld [vmem:[%s11670_s20 + $0x60] sm:$0xff]  ;;  %351 = vst [vmem:[%s11666_s21] sm:$0xff] %v350_v0  ;;  %353 = vst [vmem:[%s11666_s21 + $0x30] sm:$0xff] %v352_v1  ;;  %v356_v3 = vld [vmem:[%s11670_s20 + $0x90] sm:$0xff]  ;;  %p495_p3 = scmp.ge.s32.totalorder %s494_s12, %s11841_s16  ;;  %p343_p4 = scmp.ge.s32.totalorder %s344_s22, %s11841_s16 }
  0x3b   : >> { %355 = vst [vmem:[%s11666_s21 + $0x60] sm:$0xff] %v354_v2  ;;  %v358_v4 = vld [vmem:[%s11670_s20 + $0xc0] sm:$0xff]  ;;  %v360_v5 = vld [vmem:[%s11670_s20 + $0xf0] sm:$0xff]  ;;  %357 = vst [vmem:[%s11666_s21 + $0x90] sm:$0xff] %v356_v3 }
  0x3c   : >> { %359 = vst [vmem:[%s11666_s21 + $0xc0] sm:$0xff] %v358_v4  ;;  %361 = vst [vmem:[%s11666_s21 + $0xf0] sm:$0xff] %v360_v5  ;;  %v364_v7 = vld [vmem:[%s11670_s20 + $0x38] sm:$0xff]  ;;  %v366_v8 = vld [vmem:[%s11670_s20 + $0x68] sm:$0xff]  ;;  %s18739_s12 = smov (%p495_p3, %s494_s12), 0 }
  0x3d   : >> { %363 = vst [vmem:[%s11666_s21 + $0x8] sm:$0xff] %v362_v6  ;;  %365 = vst [vmem:[%s11666_s21 + $0x38] sm:$0xff] %v364_v7  ;;  %v368_v9 = vld [vmem:[%s11670_s20 + $0x98] sm:$0xff]  ;;  %v370_v10 = vld [vmem:[%s11670_s20 + $0xc8] sm:$0xff]  ;;  %s497_s23 = smul.u32 288, %s18739_s12  ;;  %s17876_s27 = smov %s18739_s12 }
  0x3e   : >> { %367 = vst [vmem:[%s11666_s21 + $0x68] sm:$0xff] %v366_v8  ;;  %v372_v11 = vld [vmem:[%s11670_s20 + $0xf8] sm:$0xff]  ;;  %369 = vst [vmem:[%s11666_s21 + $0x98] sm:$0xff] %v368_v9  ;;  %v374_v12 = vld [vmem:[%s11670_s20 + $0x10] sm:$0xff] }
  0x3f   : >> { %371 = vst [vmem:[%s11666_s21 + $0xc8] sm:$0xff] %v370_v10  ;;  %373 = vst [vmem:[%s11666_s21 + $0xf8] sm:$0xff] %v372_v11  ;;  %v376_v13 = vld [vmem:[%s11670_s20 + $0x40] sm:$0xff]  ;;  %v378_v14 = vld [vmem:[%s11670_s20 + $0x70] sm:$0xff]  ;;  %s11914_s28 = scalar_lea.vmem %s11835_s11, %s497_s23   ;;  %s11917_s30 = scalar_lea.vmem %s11838_s25, %s497_s23 [#allocation3]  }
  0x40   : >> { %375 = vst [vmem:[%s11666_s21 + $0x10] sm:$0xff] %v374_v12  ;;  %377 = vst [vmem:[%s11666_s21 + $0x40] sm:$0xff] %v376_v13  ;;  %v380_v15 = vld [vmem:[%s11670_s20 + $0xa0] sm:$0xff]  ;;  %v382_v16 = vld [vmem:[%s11670_s20 + $0xd0] sm:$0xff] }
  0x41   : >> { %379 = vst [vmem:[%s11666_s21 + $0x70] sm:$0xff] %v378_v14  ;;  %v384_v17 = vld [vmem:[%s11670_s20 + $0x100] sm:$0xff]  ;;  %381 = vst [vmem:[%s11666_s21 + $0xa0] sm:$0xff] %v380_v15  ;;  %v386_v18 = vld [vmem:[%s11670_s20 + $0x18] sm:$0xff] }
  0x42   : >> { %383 = vst [vmem:[%s11666_s21 + $0xd0] sm:$0xff] %v382_v16  ;;  %385 = vst [vmem:[%s11666_s21 + $0x100] sm:$0xff] %v384_v17  ;;  %v388_v19 = vld [vmem:[%s11670_s20 + $0x48] sm:$0xff]  ;;  %v390_v20 = vld [vmem:[%s11670_s20 + $0x78] sm:$0xff] }
  0x43   : >> { %387 = vst [vmem:[%s11666_s21 + $0x18] sm:$0xff] %v386_v18  ;;  %389 = vst [vmem:[%s11666_s21 + $0x48] sm:$0xff] %v388_v19  ;;  %v392_v21 = vld [vmem:[%s11670_s20 + $0xa8] sm:$0xff]  ;;  %v394_v22 = vld [vmem:[%s11670_s20 + $0xd8] sm:$0xff] }
  0x44   : >> { %391 = vst [vmem:[%s11666_s21 + $0x78] sm:$0xff] %v390_v20  ;;  %v396_v23 = vld [vmem:[%s11670_s20 + $0x108] sm:$0xff]  ;;  %393 = vst [vmem:[%s11666_s21 + $0xa8] sm:$0xff] %v392_v21  ;;  %v398_v24 = vld [vmem:[%s11670_s20 + $0x20] sm:$0xff] }
  0x45   : >> { %395 = vst [vmem:[%s11666_s21 + $0xd8] sm:$0xff] %v394_v22  ;;  %397 = vst [vmem:[%s11666_s21 + $0x108] sm:$0xff] %v396_v23  ;;  %v400_v25 = vld [vmem:[%s11670_s20 + $0x50] sm:$0xff]  ;;  %v402_v26 = vld [vmem:[%s11670_s20 + $0x80] sm:$0xff] }
  0x46   : >> { %399 = vst [vmem:[%s11666_s21 + $0x20] sm:$0xff] %v398_v24  ;;  %401 = vst [vmem:[%s11666_s21 + $0x50] sm:$0xff] %v400_v25  ;;  %v404_v27 = vld [vmem:[%s11670_s20 + $0xb0] sm:$0xff]  ;;  %v406_v28 = vld [vmem:[%s11670_s20 + $0xe0] sm:$0xff] }
  0x47   : >> { %403 = vst [vmem:[%s11666_s21 + $0x80] sm:$0xff] %v402_v26  ;;  %v408_v29 = vld [vmem:[%s11670_s20 + $0x110] sm:$0xff]  ;;  %405 = vst [vmem:[%s11666_s21 + $0xb0] sm:$0xff] %v404_v27  ;;  %v410_v30 = vld [vmem:[%s11670_s20 + $0x28] sm:$0xff] }
  0x48   : >> { %407 = vst [vmem:[%s11666_s21 + $0xe0] sm:$0xff] %v406_v28  ;;  %409 = vst [vmem:[%s11666_s21 + $0x110] sm:$0xff] %v408_v29  ;;  %v412_v31 = vld [vmem:[%s11670_s20 + $0x58] sm:$0xff]  ;;  %v414_v32 = vld [vmem:[%s11670_s20 + $0x88] sm:$0xff] }
  0x49   : >> { %411 = vst [vmem:[%s11666_s21 + $0x28] sm:$0xff] %v410_v30  ;;  %413 = vst [vmem:[%s11666_s21 + $0x58] sm:$0xff] %v412_v31  ;;  %v416_v33 = vld [vmem:[%s11670_s20 + $0xb8] sm:$0xff]  ;;  %v418_v34 = vld [vmem:[%s11670_s20 + $0xe8] sm:$0xff] }
  0x4a   : >> { %415 = vst [vmem:[%s11666_s21 + $0x88] sm:$0xff] %v414_v32  ;;  %v420_v35 = vld [vmem:[%s11670_s20 + $0x118] sm:$0xff]  ;;  %417 = vst [vmem:[%s11666_s21 + $0xb8] sm:$0xff] %v416_v33  ;;  %v422_v36 = vld [vmem:[%s11670_s20 + $0x1e0] sm:$0xff] }
  0x4b   : >> { %419 = vst [vmem:[%s11666_s21 + $0xe8] sm:$0xff] %v418_v34  ;;  %421 = vst [vmem:[%s11666_s21 + $0x118] sm:$0xff] %v420_v35  ;;  %v424_v37 = vld [vmem:[%s11670_s20 + $0x210] sm:$0xff]  ;;  %v426_v38 = vld [vmem:[%s11670_s20 + $0x240] sm:$0xff] }
  0x4c   : >> { %423 = vst [vmem:[%s11666_s21 + $0x180] sm:$0xff] %v422_v36  ;;  %425 = vst [vmem:[%s11666_s21 + $0x1b0] sm:$0xff] %v424_v37  ;;  %v428_v39 = vld [vmem:[%s11670_s20 + $0x270] sm:$0xff]  ;;  %v430_v40 = vld [vmem:[%s11670_s20 + $0x2a0] sm:$0xff] }
  0x4d   : >> { %427 = vst [vmem:[%s11666_s21 + $0x1e0] sm:$0xff] %v426_v38  ;;  %v432_v41 = vld [vmem:[%s11670_s20 + $0x2d0] sm:$0xff]  ;;  %429 = vst [vmem:[%s11666_s21 + $0x210] sm:$0xff] %v428_v39  ;;  %v434_v42 = vld [vmem:[%s11670_s20 + $0x1e8] sm:$0xff] }
  0x4e   : >> { %431 = vst [vmem:[%s11666_s21 + $0x240] sm:$0xff] %v430_v40  ;;  %433 = vst [vmem:[%s11666_s21 + $0x270] sm:$0xff] %v432_v41  ;;  %v436_v43 = vld [vmem:[%s11670_s20 + $0x218] sm:$0xff]  ;;  %v438_v44 = vld [vmem:[%s11670_s20 + $0x248] sm:$0xff] }
  0x4f   : >> { %435 = vst [vmem:[%s11666_s21 + $0x188] sm:$0xff] %v434_v42  ;;  %437 = vst [vmem:[%s11666_s21 + $0x1b8] sm:$0xff] %v436_v43  ;;  %v440_v45 = vld [vmem:[%s11670_s20 + $0x278] sm:$0xff]  ;;  %v442_v46 = vld [vmem:[%s11670_s20 + $0x2a8] sm:$0xff] }
  0x50   : >> { %439 = vst [vmem:[%s11666_s21 + $0x1e8] sm:$0xff] %v438_v44  ;;  %v444_v47 = vld [vmem:[%s11670_s20 + $0x2d8] sm:$0xff]  ;;  %441 = vst [vmem:[%s11666_s21 + $0x218] sm:$0xff] %v440_v45  ;;  %v446_v48 = vld [vmem:[%s11670_s20 + $0x1f0] sm:$0xff] }
  0x51   : >> { %443 = vst [vmem:[%s11666_s21 + $0x248] sm:$0xff] %v442_v46  ;;  %445 = vst [vmem:[%s11666_s21 + $0x278] sm:$0xff] %v444_v47  ;;  %v448_v49 = vld [vmem:[%s11670_s20 + $0x220] sm:$0xff]  ;;  %v450_v50 = vld [vmem:[%s11670_s20 + $0x250] sm:$0xff] }
  0x52   : >> { %447 = vst [vmem:[%s11666_s21 + $0x190] sm:$0xff] %v446_v48  ;;  %449 = vst [vmem:[%s11666_s21 + $0x1c0] sm:$0xff] %v448_v49  ;;  %v452_v51 = vld [vmem:[%s11670_s20 + $0x280] sm:$0xff]  ;;  %v454_v52 = vld [vmem:[%s11670_s20 + $0x2b0] sm:$0xff] }
  0x53   : >> { %451 = vst [vmem:[%s11666_s21 + $0x1f0] sm:$0xff] %v450_v50  ;;  %v456_v53 = vld [vmem:[%s11670_s20 + $0x2e0] sm:$0xff]  ;;  %453 = vst [vmem:[%s11666_s21 + $0x220] sm:$0xff] %v452_v51  ;;  %v458_v54 = vld [vmem:[%s11670_s20 + $0x1f8] sm:$0xff] }
  0x54   : >> { %455 = vst [vmem:[%s11666_s21 + $0x250] sm:$0xff] %v454_v52  ;;  %457 = vst [vmem:[%s11666_s21 + $0x280] sm:$0xff] %v456_v53  ;;  %v460_v55 = vld [vmem:[%s11670_s20 + $0x228] sm:$0xff]  ;;  %v462_v56 = vld [vmem:[%s11670_s20 + $0x258] sm:$0xff] }
  0x55   : >> { %459 = vst [vmem:[%s11666_s21 + $0x198] sm:$0xff] %v458_v54  ;;  %461 = vst [vmem:[%s11666_s21 + $0x1c8] sm:$0xff] %v460_v55  ;;  %v464_v57 = vld [vmem:[%s11670_s20 + $0x288] sm:$0xff]  ;;  %v466_v58 = vld [vmem:[%s11670_s20 + $0x2b8] sm:$0xff] }
  0x56   : >> { %463 = vst [vmem:[%s11666_s21 + $0x1f8] sm:$0xff] %v462_v56  ;;  %v468_v59 = vld [vmem:[%s11670_s20 + $0x2e8] sm:$0xff]  ;;  %465 = vst [vmem:[%s11666_s21 + $0x228] sm:$0xff] %v464_v57  ;;  %v470_v60 = vld [vmem:[%s11670_s20 + $0x200] sm:$0xff] }
  0x57   : >> { %467 = vst [vmem:[%s11666_s21 + $0x258] sm:$0xff] %v466_v58  ;;  %469 = vst [vmem:[%s11666_s21 + $0x288] sm:$0xff] %v468_v59  ;;  %v472_v61 = vld [vmem:[%s11670_s20 + $0x230] sm:$0xff]  ;;  %v474_v62 = vld [vmem:[%s11670_s20 + $0x260] sm:$0xff] }
  0x58   : >> { %471 = vst [vmem:[%s11666_s21 + $0x1a0] sm:$0xff] %v470_v60  ;;  %473 = vst [vmem:[%s11666_s21 + $0x1d0] sm:$0xff] %v472_v61  ;;  %v476_v63 = vld [vmem:[%s11670_s20 + $0x290] sm:$0xff]  ;;  %v478_v0 = vld [vmem:[%s11670_s20 + $0x2c0] sm:$0xff] }
  0x59   : >> { %475 = vst [vmem:[%s11666_s21 + $0x200] sm:$0xff] %v474_v62  ;;  %v480_v1 = vld [vmem:[%s11670_s20 + $0x2f0] sm:$0xff]  ;;  %477 = vst [vmem:[%s11666_s21 + $0x230] sm:$0xff] %v476_v63  ;;  %v482_v2 = vld [vmem:[%s11670_s20 + $0x208] sm:$0xff]  ;;  %346 = sbr.rel (!%p343_p4) target bundleno = 57 (0x39), region = 171 }
  0x5a   : >> { %479 = vst [vmem:[%s11666_s21 + $0x260] sm:$0xff] %v478_v0  ;;  %481 = vst [vmem:[%s11666_s21 + $0x290] sm:$0xff] %v480_v1  ;;  %v484_v3 = vld [vmem:[%s11670_s20 + $0x238] sm:$0xff]  ;;  %v486_v4 = vld [vmem:[%s11670_s20 + $0x268] sm:$0xff] }
  0x5b   : >> { %483 = vst [vmem:[%s11666_s21 + $0x1a8] sm:$0xff] %v482_v2  ;;  %485 = vst [vmem:[%s11666_s21 + $0x1d8] sm:$0xff] %v484_v3  ;;  %v488_v5 = vld [vmem:[%s11670_s20 + $0x298] sm:$0xff]  ;;  %v490_v6 = vld [vmem:[%s11670_s20 + $0x2c8] sm:$0xff] }
  0x5c   : >> { %487 = vst [vmem:[%s11666_s21 + $0x208] sm:$0xff] %v486_v4  ;;  %v492_v7 = vld [vmem:[%s11670_s20 + $0x2f8] sm:$0xff]  ;;  %489 = vst [vmem:[%s11666_s21 + $0x238] sm:$0xff] %v488_v5  ;;  %s17875_s20 = smov %s11914_s28 }
  0x5d   : >> { %491 = vst [vmem:[%s11666_s21 + $0x268] sm:$0xff] %v490_v6  ;;  %493 = vst [vmem:[%s11666_s21 + $0x298] sm:$0xff] %v492_v7  ;;  %s17874_s21 = smov %s11917_s30 }
  0x5e PF: > { %10850 = sdivrem.u32 %s18737_s24, 6 }
  0x5f   : > { %s8509_s23 = smul.u32 288, %s11841_s16 }
  0x61   : > { %s12034_s0 = scalar_lea.vmem %s11835_s11, %s8509_s23   ;;  %s12037_s19 = scalar_lea.vmem %s11838_s25, %s8509_s23 [#allocation3]  }
  0x67   : > { %s12039_s10 = spop.drf %10850 }
  0x68   : > { %p8511_p5 = scmp.le.s32.totalorder %s12039_s10, 0 }
  0x69   : > { %s17877_s22 = smov (!%p8511_p5), %s12037_s19  ;;  %s17878_s21 = smov (!%p8511_p5), %s12034_s0 }
  0x6a   : > { %8454 = sbr.rel (%p8511_p5) target bundleno = 119 (0x77), region = 176  ;;  %s12048_s20 = smov (!%p8511_p5), 0  }
  0x6b   : > { %s12050_s27 = smov (!%p8511_p5), 0  }
  0x6f LB: >> { %v517_v8 = vld [vmem:[%s11686_s21] sm:$0xff]  ;;  %v519_v9 = vld [vmem:[%s11686_s21 + $0x8] sm:$0xff]  ;;  %v521_v10 = vld [vmem:[%s11686_s21 + $0x10] sm:$0xff]  ;;  %s541_s16 = sadd.s32 1, %s11690_s20  ;;  %s511_s27 = sadd.s32 1, %s11694_s27   ;;  %s11694_s27 = sphi %s12050_s27, %s511_s27   ;;  %s11690_s20 = sphi %s12048_s20, %s17879_s20   ;;  %s11686_s21 = sphi %s17878_s21, %s546_s21   ;;  %s11682_s22 = sphi %s17877_s22, %s547_s22  }
  0x70   : >> { %518 = vst [vmem:[%s11682_s22] sm:$0xff] %v517_v8  ;;  %520 = vst [vmem:[%s11682_s22 + $0x8] sm:$0xff] %v519_v9  ;;  %v523_v11 = vld [vmem:[%s11686_s21 + $0x18] sm:$0xff]  ;;  %v525_v12 = vld [vmem:[%s11686_s21 + $0x20] sm:$0xff]  ;;  %p542_p6 = scmp.ge.s32.totalorder %s541_s16, %s12039_s10  ;;  %p510_p7 = scmp.ge.s32.totalorder %s511_s27, %s12039_s10 }
  0x71   : >> { %522 = vst [vmem:[%s11682_s22 + $0x10] sm:$0xff] %v521_v10  ;;  %v527_v13 = vld [vmem:[%s11686_s21 + $0x28] sm:$0xff]  ;;  %524 = vst [vmem:[%s11682_s22 + $0x18] sm:$0xff] %v523_v11  ;;  %v529_v14 = vld [vmem:[%s11686_s21 + $0x1e0] sm:$0xff] }
  0x72   : >> { %526 = vst [vmem:[%s11682_s22 + $0x20] sm:$0xff] %v525_v12  ;;  %528 = vst [vmem:[%s11682_s22 + $0x28] sm:$0xff] %v527_v13  ;;  %v531_v15 = vld [vmem:[%s11686_s21 + $0x1e8] sm:$0xff]  ;;  %v533_v16 = vld [vmem:[%s11686_s21 + $0x1f0] sm:$0xff]  ;;  %s18741_s16 = smov (%p542_p6, %s541_s16), 0  ;;  %513 = sbr.rel (!%p510_p7) target bundleno = 111 (0x6f), region = 182 }
  0x73   : >> { %530 = vst [vmem:[%s11682_s22 + $0x180] sm:$0xff] %v529_v14  ;;  %532 = vst [vmem:[%s11682_s22 + $0x188] sm:$0xff] %v531_v15  ;;  %v535_v17 = vld [vmem:[%s11686_s21 + $0x1f8] sm:$0xff]  ;;  %v537_v18 = vld [vmem:[%s11686_s21 + $0x200] sm:$0xff]  ;;  %s544_s24 = smul.u32 48, %s18741_s16  ;;  %s17879_s20 = smov %s18741_s16 }
  0x74   : >> { %534 = vst [vmem:[%s11682_s22 + $0x190] sm:$0xff] %v533_v16  ;;  %v539_v19 = vld [vmem:[%s11686_s21 + $0x208] sm:$0xff]  ;;  %536 = vst [vmem:[%s11682_s22 + $0x198] sm:$0xff] %v535_v17 }
  0x75   : >> { %538 = vst [vmem:[%s11682_s22 + $0x1a0] sm:$0xff] %v537_v18  ;;  %540 = vst [vmem:[%s11682_s22 + $0x1a8] sm:$0xff] %v539_v19  ;;  %s546_s21 = scalar_lea.vmem %s12034_s0, %s544_s24   ;;  %s547_s22 = scalar_lea.vmem %s12037_s19, %s544_s24 [#allocation3]  }
  0x77 PF: > { %553 = sbr.rel (!%p11815_p11) target bundleno = 172 (0xac), region = 82  ;;  %s555_s11 = sand.u32 (%p11815_p11), 1, %s11650_s14  }
  0x78   : > { %s10729_s25 = smul.u32 (%p11815_p11), 384, %s18731_s26 }
  0x79   : > { %s10728_s12 = smul.u32 (%p11815_p11), 768, %s555_s11 }
  0x7a   : > { %s12078_s23 = scalar_lea.vmem (%p11815_p11), %s17440_s1, %s10729_s25 }
  0x7b   : > { %v579_v20 = vld [vmem:[%s12078_s23] sm:$0xff] (%p11815_p11)  ;;  %v581_v21 = vld [vmem:[%s12078_s23 + $0x8] sm:$0xff] (%p11815_p11)  ;;  %v583_v22 = vld [vmem:[%s12078_s23 + $0x10] sm:$0xff] (%p11815_p11)  ;;  %s12083_s0 = scalar_lea.vmem (%p11815_p11), [#allocation4], %s10728_s12 }
  0x7c   : > { %580 = vst [vmem:[%s12083_s0] sm:$0xff] %v579_v20  ;;  %582 = vst [vmem:[%s12083_s0 + $0x8] sm:$0xff] %v581_v21  ;;  %v585_v23 = vld [vmem:[%s12078_s23 + $0x18] sm:$0xff]  ;;  %v587_v24 = vld [vmem:[%s12078_s23 + $0x20] sm:$0xff] }
  0x7d   : > { %584 = vst [vmem:[%s12083_s0 + $0x10] sm:$0xff] %v583_v22  ;;  %v589_v25 = vld [vmem:[%s12078_s23 + $0x28] sm:$0xff]  ;;  %586 = vst [vmem:[%s12083_s0 + $0x18] sm:$0xff] %v585_v23  ;;  %v591_v26 = vld [vmem:[%s12078_s23 + $0x30] sm:$0xff] }
  0x7e   : > { %588 = vst [vmem:[%s12083_s0 + $0x20] sm:$0xff] %v587_v24  ;;  %590 = vst [vmem:[%s12083_s0 + $0x28] sm:$0xff] %v589_v25  ;;  %v593_v27 = vld [vmem:[%s12078_s23 + $0x38] sm:$0xff]  ;;  %v595_v28 = vld [vmem:[%s12078_s23 + $0x40] sm:$0xff] }
  0x7f   : > { %592 = vst [vmem:[%s12083_s0 + $0x30] sm:$0xff] %v591_v26  ;;  %594 = vst [vmem:[%s12083_s0 + $0x38] sm:$0xff] %v593_v27  ;;  %v597_v29 = vld [vmem:[%s12078_s23 + $0x48] sm:$0xff]  ;;  %v599_v30 = vld [vmem:[%s12078_s23 + $0x50] sm:$0xff] }
  0x80   : > { %596 = vst [vmem:[%s12083_s0 + $0x40] sm:$0xff] %v595_v28  ;;  %v601_v31 = vld [vmem:[%s12078_s23 + $0x58] sm:$0xff]  ;;  %598 = vst [vmem:[%s12083_s0 + $0x48] sm:$0xff] %v597_v29  ;;  %v603_v32 = vld [vmem:[%s12078_s23 + $0x60] sm:$0xff] }
  0x81   : > { %600 = vst [vmem:[%s12083_s0 + $0x50] sm:$0xff] %v599_v30  ;;  %602 = vst [vmem:[%s12083_s0 + $0x58] sm:$0xff] %v601_v31  ;;  %v605_v33 = vld [vmem:[%s12078_s23 + $0x68] sm:$0xff]  ;;  %v607_v34 = vld [vmem:[%s12078_s23 + $0x70] sm:$0xff] }
  0x82   : > { %604 = vst [vmem:[%s12083_s0 + $0x60] sm:$0xff] %v603_v32  ;;  %606 = vst [vmem:[%s12083_s0 + $0x68] sm:$0xff] %v605_v33  ;;  %v609_v35 = vld [vmem:[%s12078_s23 + $0x78] sm:$0xff]  ;;  %v611_v36 = vld [vmem:[%s12078_s23 + $0x80] sm:$0xff] }
  0x83   : > { %608 = vst [vmem:[%s12083_s0 + $0x70] sm:$0xff] %v607_v34  ;;  %v613_v37 = vld [vmem:[%s12078_s23 + $0x88] sm:$0xff]  ;;  %610 = vst [vmem:[%s12083_s0 + $0x78] sm:$0xff] %v609_v35  ;;  %v615_v38 = vld [vmem:[%s12078_s23 + $0x90] sm:$0xff] }
  0x84   : > { %612 = vst [vmem:[%s12083_s0 + $0x80] sm:$0xff] %v611_v36  ;;  %614 = vst [vmem:[%s12083_s0 + $0x88] sm:$0xff] %v613_v37  ;;  %v617_v39 = vld [vmem:[%s12078_s23 + $0x98] sm:$0xff]  ;;  %v619_v40 = vld [vmem:[%s12078_s23 + $0xa0] sm:$0xff] }
  0x85   : > { %616 = vst [vmem:[%s12083_s0 + $0x90] sm:$0xff] %v615_v38  ;;  %618 = vst [vmem:[%s12083_s0 + $0x98] sm:$0xff] %v617_v39  ;;  %v621_v41 = vld [vmem:[%s12078_s23 + $0xa8] sm:$0xff]  ;;  %v623_v42 = vld [vmem:[%s12078_s23 + $0xb0] sm:$0xff] }
  0x86   : > { %620 = vst [vmem:[%s12083_s0 + $0xa0] sm:$0xff] %v619_v40  ;;  %v625_v43 = vld [vmem:[%s12078_s23 + $0xb8] sm:$0xff]  ;;  %622 = vst [vmem:[%s12083_s0 + $0xa8] sm:$0xff] %v621_v41  ;;  %v627_v44 = vld [vmem:[%s12078_s23 + $0xc0] sm:$0xff] }
  0x87   : > { %624 = vst [vmem:[%s12083_s0 + $0xb0] sm:$0xff] %v623_v42  ;;  %626 = vst [vmem:[%s12083_s0 + $0xb8] sm:$0xff] %v625_v43  ;;  %v629_v45 = vld [vmem:[%s12078_s23 + $0xc8] sm:$0xff]  ;;  %v631_v46 = vld [vmem:[%s12078_s23 + $0xd0] sm:$0xff] }
  0x88   : > { %628 = vst [vmem:[%s12083_s0 + $0xc0] sm:$0xff] %v627_v44  ;;  %630 = vst [vmem:[%s12083_s0 + $0xc8] sm:$0xff] %v629_v45  ;;  %v633_v47 = vld [vmem:[%s12078_s23 + $0xd8] sm:$0xff]  ;;  %v635_v48 = vld [vmem:[%s12078_s23 + $0xe0] sm:$0xff] }
  0x89   : > { %632 = vst [vmem:[%s12083_s0 + $0xd0] sm:$0xff] %v631_v46  ;;  %v637_v49 = vld [vmem:[%s12078_s23 + $0xe8] sm:$0xff]  ;;  %634 = vst [vmem:[%s12083_s0 + $0xd8] sm:$0xff] %v633_v47  ;;  %v639_v50 = vld [vmem:[%s12078_s23 + $0xf0] sm:$0xff] }
  0x8a   : > { %636 = vst [vmem:[%s12083_s0 + $0xe0] sm:$0xff] %v635_v48  ;;  %638 = vst [vmem:[%s12083_s0 + $0xe8] sm:$0xff] %v637_v49  ;;  %v641_v51 = vld [vmem:[%s12078_s23 + $0xf8] sm:$0xff]  ;;  %v643_v52 = vld [vmem:[%s12078_s23 + $0x100] sm:$0xff] }
  0x8b   : > { %640 = vst [vmem:[%s12083_s0 + $0xf0] sm:$0xff] %v639_v50  ;;  %642 = vst [vmem:[%s12083_s0 + $0xf8] sm:$0xff] %v641_v51  ;;  %v645_v53 = vld [vmem:[%s12078_s23 + $0x108] sm:$0xff]  ;;  %v647_v54 = vld [vmem:[%s12078_s23 + $0x110] sm:$0xff] }
  0x8c   : > { %644 = vst [vmem:[%s12083_s0 + $0x100] sm:$0xff] %v643_v52  ;;  %v649_v55 = vld [vmem:[%s12078_s23 + $0x118] sm:$0xff]  ;;  %646 = vst [vmem:[%s12083_s0 + $0x108] sm:$0xff] %v645_v53  ;;  %v651_v56 = vld [vmem:[%s12078_s23 + $0x120] sm:$0xff] }
  0x8d   : > { %648 = vst [vmem:[%s12083_s0 + $0x110] sm:$0xff] %v647_v54  ;;  %650 = vst [vmem:[%s12083_s0 + $0x118] sm:$0xff] %v649_v55  ;;  %v653_v57 = vld [vmem:[%s12078_s23 + $0x128] sm:$0xff]  ;;  %v655_v58 = vld [vmem:[%s12078_s23 + $0x130] sm:$0xff] }
  0x8e   : > { %652 = vst [vmem:[%s12083_s0 + $0x120] sm:$0xff] %v651_v56  ;;  %654 = vst [vmem:[%s12083_s0 + $0x128] sm:$0xff] %v653_v57  ;;  %v657_v59 = vld [vmem:[%s12078_s23 + $0x138] sm:$0xff]  ;;  %v659_v60 = vld [vmem:[%s12078_s23 + $0x140] sm:$0xff] }
  0x8f   : > { %656 = vst [vmem:[%s12083_s0 + $0x130] sm:$0xff] %v655_v58  ;;  %v661_v61 = vld [vmem:[%s12078_s23 + $0x148] sm:$0xff]  ;;  %658 = vst [vmem:[%s12083_s0 + $0x138] sm:$0xff] %v657_v59  ;;  %v663_v62 = vld [vmem:[%s12078_s23 + $0x150] sm:$0xff] }
  0x90   : > { %660 = vst [vmem:[%s12083_s0 + $0x140] sm:$0xff] %v659_v60  ;;  %662 = vst [vmem:[%s12083_s0 + $0x148] sm:$0xff] %v661_v61  ;;  %v665_v63 = vld [vmem:[%s12078_s23 + $0x158] sm:$0xff]  ;;  %v667_v0 = vld [vmem:[%s12078_s23 + $0x160] sm:$0xff] }
  0x91   : > { %664 = vst [vmem:[%s12083_s0 + $0x150] sm:$0xff] %v663_v62  ;;  %666 = vst [vmem:[%s12083_s0 + $0x158] sm:$0xff] %v665_v63  ;;  %v669_v1 = vld [vmem:[%s12078_s23 + $0x168] sm:$0xff]  ;;  %v671_v2 = vld [vmem:[%s12078_s23 + $0x170] sm:$0xff] }
  0x92   : > { %668 = vst [vmem:[%s12083_s0 + $0x160] sm:$0xff] %v667_v0  ;;  %v673_v3 = vld [vmem:[%s12078_s23 + $0x178] sm:$0xff]  ;;  %670 = vst [vmem:[%s12083_s0 + $0x168] sm:$0xff] %v669_v1  ;;  %v675_v4 = vld [vmem:[%s12078_s23 + $0x600] sm:$0xff] }
  0x93   : > { %672 = vst [vmem:[%s12083_s0 + $0x170] sm:$0xff] %v671_v2  ;;  %674 = vst [vmem:[%s12083_s0 + $0x178] sm:$0xff] %v673_v3  ;;  %v677_v5 = vld [vmem:[%s12078_s23 + $0x608] sm:$0xff]  ;;  %v679_v6 = vld [vmem:[%s12078_s23 + $0x610] sm:$0xff] }
  0x94   : > { %676 = vst [vmem:[%s12083_s0 + $0x180] sm:$0xff] %v675_v4  ;;  %678 = vst [vmem:[%s12083_s0 + $0x188] sm:$0xff] %v677_v5  ;;  %v681_v7 = vld [vmem:[%s12078_s23 + $0x618] sm:$0xff]  ;;  %v683_v8 = vld [vmem:[%s12078_s23 + $0x620] sm:$0xff] }
  0x95   : > { %680 = vst [vmem:[%s12083_s0 + $0x190] sm:$0xff] %v679_v6  ;;  %v685_v9 = vld [vmem:[%s12078_s23 + $0x628] sm:$0xff]  ;;  %682 = vst [vmem:[%s12083_s0 + $0x198] sm:$0xff] %v681_v7  ;;  %v687_v10 = vld [vmem:[%s12078_s23 + $0x630] sm:$0xff] }
  0x96   : > { %684 = vst [vmem:[%s12083_s0 + $0x1a0] sm:$0xff] %v683_v8  ;;  %686 = vst [vmem:[%s12083_s0 + $0x1a8] sm:$0xff] %v685_v9  ;;  %v689_v11 = vld [vmem:[%s12078_s23 + $0x638] sm:$0xff]  ;;  %v691_v12 = vld [vmem:[%s12078_s23 + $0x640] sm:$0xff] }
  0x97   : > { %688 = vst [vmem:[%s12083_s0 + $0x1b0] sm:$0xff] %v687_v10  ;;  %690 = vst [vmem:[%s12083_s0 + $0x1b8] sm:$0xff] %v689_v11  ;;  %v693_v13 = vld [vmem:[%s12078_s23 + $0x648] sm:$0xff]  ;;  %v695_v14 = vld [vmem:[%s12078_s23 + $0x650] sm:$0xff] }
  0x98   : > { %692 = vst [vmem:[%s12083_s0 + $0x1c0] sm:$0xff] %v691_v12  ;;  %v697_v15 = vld [vmem:[%s12078_s23 + $0x658] sm:$0xff]  ;;  %694 = vst [vmem:[%s12083_s0 + $0x1c8] sm:$0xff] %v693_v13  ;;  %v699_v16 = vld [vmem:[%s12078_s23 + $0x660] sm:$0xff] }
  0x99   : > { %696 = vst [vmem:[%s12083_s0 + $0x1d0] sm:$0xff] %v695_v14  ;;  %698 = vst [vmem:[%s12083_s0 + $0x1d8] sm:$0xff] %v697_v15  ;;  %v701_v17 = vld [vmem:[%s12078_s23 + $0x668] sm:$0xff]  ;;  %v703_v18 = vld [vmem:[%s12078_s23 + $0x670] sm:$0xff] }
  0x9a   : > { %700 = vst [vmem:[%s12083_s0 + $0x1e0] sm:$0xff] %v699_v16  ;;  %702 = vst [vmem:[%s12083_s0 + $0x1e8] sm:$0xff] %v701_v17  ;;  %v705_v19 = vld [vmem:[%s12078_s23 + $0x678] sm:$0xff]  ;;  %v707_v20 = vld [vmem:[%s12078_s23 + $0x680] sm:$0xff] }
  0x9b   : > { %704 = vst [vmem:[%s12083_s0 + $0x1f0] sm:$0xff] %v703_v18  ;;  %v709_v21 = vld [vmem:[%s12078_s23 + $0x688] sm:$0xff]  ;;  %706 = vst [vmem:[%s12083_s0 + $0x1f8] sm:$0xff] %v705_v19  ;;  %v711_v22 = vld [vmem:[%s12078_s23 + $0x690] sm:$0xff] }
  0x9c   : > { %708 = vst [vmem:[%s12083_s0 + $0x200] sm:$0xff] %v707_v20  ;;  %710 = vst [vmem:[%s12083_s0 + $0x208] sm:$0xff] %v709_v21  ;;  %v713_v23 = vld [vmem:[%s12078_s23 + $0x698] sm:$0xff]  ;;  %v715_v24 = vld [vmem:[%s12078_s23 + $0x6a0] sm:$0xff] }
  0x9d   : > { %712 = vst [vmem:[%s12083_s0 + $0x210] sm:$0xff] %v711_v22  ;;  %714 = vst [vmem:[%s12083_s0 + $0x218] sm:$0xff] %v713_v23  ;;  %v717_v25 = vld [vmem:[%s12078_s23 + $0x6a8] sm:$0xff]  ;;  %v719_v26 = vld [vmem:[%s12078_s23 + $0x6b0] sm:$0xff] }
  0x9e   : > { %716 = vst [vmem:[%s12083_s0 + $0x220] sm:$0xff] %v715_v24  ;;  %v721_v27 = vld [vmem:[%s12078_s23 + $0x6b8] sm:$0xff]  ;;  %718 = vst [vmem:[%s12083_s0 + $0x228] sm:$0xff] %v717_v25  ;;  %v723_v28 = vld [vmem:[%s12078_s23 + $0x6c0] sm:$0xff] }
  0x9f   : > { %720 = vst [vmem:[%s12083_s0 + $0x230] sm:$0xff] %v719_v26  ;;  %722 = vst [vmem:[%s12083_s0 + $0x238] sm:$0xff] %v721_v27  ;;  %v725_v29 = vld [vmem:[%s12078_s23 + $0x6c8] sm:$0xff]  ;;  %v727_v30 = vld [vmem:[%s12078_s23 + $0x6d0] sm:$0xff] }
  0xa0   : > { %724 = vst [vmem:[%s12083_s0 + $0x240] sm:$0xff] %v723_v28  ;;  %726 = vst [vmem:[%s12083_s0 + $0x248] sm:$0xff] %v725_v29  ;;  %v729_v31 = vld [vmem:[%s12078_s23 + $0x6d8] sm:$0xff]  ;;  %v731_v32 = vld [vmem:[%s12078_s23 + $0x6e0] sm:$0xff] }
  0xa1   : > { %728 = vst [vmem:[%s12083_s0 + $0x250] sm:$0xff] %v727_v30  ;;  %v733_v33 = vld [vmem:[%s12078_s23 + $0x6e8] sm:$0xff]  ;;  %730 = vst [vmem:[%s12083_s0 + $0x258] sm:$0xff] %v729_v31  ;;  %v735_v34 = vld [vmem:[%s12078_s23 + $0x6f0] sm:$0xff] }
  0xa2   : > { %732 = vst [vmem:[%s12083_s0 + $0x260] sm:$0xff] %v731_v32  ;;  %734 = vst [vmem:[%s12083_s0 + $0x268] sm:$0xff] %v733_v33  ;;  %v737_v35 = vld [vmem:[%s12078_s23 + $0x6f8] sm:$0xff]  ;;  %v739_v36 = vld [vmem:[%s12078_s23 + $0x700] sm:$0xff] }
  0xa3   : > { %736 = vst [vmem:[%s12083_s0 + $0x270] sm:$0xff] %v735_v34  ;;  %738 = vst [vmem:[%s12083_s0 + $0x278] sm:$0xff] %v737_v35  ;;  %v741_v37 = vld [vmem:[%s12078_s23 + $0x708] sm:$0xff]  ;;  %v743_v38 = vld [vmem:[%s12078_s23 + $0x710] sm:$0xff] }
  0xa4   : > { %740 = vst [vmem:[%s12083_s0 + $0x280] sm:$0xff] %v739_v36  ;;  %v745_v39 = vld [vmem:[%s12078_s23 + $0x718] sm:$0xff]  ;;  %742 = vst [vmem:[%s12083_s0 + $0x288] sm:$0xff] %v741_v37  ;;  %v747_v40 = vld [vmem:[%s12078_s23 + $0x720] sm:$0xff] }
  0xa5   : > { %744 = vst [vmem:[%s12083_s0 + $0x290] sm:$0xff] %v743_v38  ;;  %746 = vst [vmem:[%s12083_s0 + $0x298] sm:$0xff] %v745_v39  ;;  %v749_v41 = vld [vmem:[%s12078_s23 + $0x728] sm:$0xff]  ;;  %v751_v42 = vld [vmem:[%s12078_s23 + $0x730] sm:$0xff] }
  0xa6   : > { %748 = vst [vmem:[%s12083_s0 + $0x2a0] sm:$0xff] %v747_v40  ;;  %750 = vst [vmem:[%s12083_s0 + $0x2a8] sm:$0xff] %v749_v41  ;;  %v753_v43 = vld [vmem:[%s12078_s23 + $0x738] sm:$0xff]  ;;  %v755_v44 = vld [vmem:[%s12078_s23 + $0x740] sm:$0xff] }
  0xa7   : > { %752 = vst [vmem:[%s12083_s0 + $0x2b0] sm:$0xff] %v751_v42  ;;  %v757_v45 = vld [vmem:[%s12078_s23 + $0x748] sm:$0xff]  ;;  %754 = vst [vmem:[%s12083_s0 + $0x2b8] sm:$0xff] %v753_v43  ;;  %v759_v46 = vld [vmem:[%s12078_s23 + $0x750] sm:$0xff] }
  0xa8   : > { %756 = vst [vmem:[%s12083_s0 + $0x2c0] sm:$0xff] %v755_v44  ;;  %758 = vst [vmem:[%s12083_s0 + $0x2c8] sm:$0xff] %v757_v45  ;;  %v761_v47 = vld [vmem:[%s12078_s23 + $0x758] sm:$0xff]  ;;  %v763_v48 = vld [vmem:[%s12078_s23 + $0x760] sm:$0xff] }
  0xa9   : > { %760 = vst [vmem:[%s12083_s0 + $0x2d0] sm:$0xff] %v759_v46  ;;  %762 = vst [vmem:[%s12083_s0 + $0x2d8] sm:$0xff] %v761_v47  ;;  %v765_v49 = vld [vmem:[%s12078_s23 + $0x768] sm:$0xff]  ;;  %v767_v50 = vld [vmem:[%s12078_s23 + $0x770] sm:$0xff] }
  0xaa   : > { %764 = vst [vmem:[%s12083_s0 + $0x2e0] sm:$0xff] %v763_v48  ;;  %v769_v51 = vld [vmem:[%s12078_s23 + $0x778] sm:$0xff]  ;;  %766 = vst [vmem:[%s12083_s0 + $0x2e8] sm:$0xff] %v765_v49 }
  0xab   : > { %768 = vst [vmem:[%s12083_s0 + $0x2f0] sm:$0xff] %v767_v50  ;;  %770 = vst [vmem:[%s12083_s0 + $0x2f8] sm:$0xff] %v769_v51 }
  0xac PF: > { %p8521_p8 = scmp.ge.s32.totalorder %s11662_s17, 1  ;;  %p775_p9 = scmp.lt.s32.totalorder %s11662_s17, 7 }
  0xae   : > { %p776_p10 = pnand %p8521_p8, %p775_p9 }
  0xaf   : > { %s782_s10 = sand.u32 (!%p776_p10), 1, %s11654_s15   ;;  %s789_s19 = sand.u32 (!%p776_p10), 1, %s11646_s13  }
  0xb0   : > { %779 = sbr.rel (%p776_p10) target bundleno = 2426 (0x97a), region = 105  ;;  %p8522_p11 = scmp.ne.s32.totalorder (!%p776_p10), %s11782_s18, 0 }
  0xb1   : > { %s10730_s26 = smul.u32 (!%p776_p10), 768, %s782_s10 }
  0xb2   : > { %s10731_s29 = smul.u32 (!%p776_p10), 768, %s789_s19 }
  0xb3   : > { %s12278_s22 = scalar_lea.vmem (!%p776_p10), [#allocation3], %s10730_s26 }
  0xb4   : > { %s12280_s21 = scalar_lea.vmem (!%p776_p10), [#allocation4], %s10731_s29 }
  0xb5   : > { %843 = sbr.rel (%p8522_p11) target bundleno = 189 (0xbd), region = 117 }
  0xba   : > { %v11696_v52 = vmov 0.0  }
  0xbb   : > { %844 = vst [vmem:[#allocation2] sm:$0xff] %v11696_v52  ;;  %845 = vst [vmem:[#allocation2 + $0x8] sm:$0xff] %v11696_v52 }
  0xbc   : > { %846 = vst [vmem:[#allocation2 + $0x10] sm:$0xff] %v11696_v52 }
  0xbd PF: > { %p8523_p12 = scmp.ge.s32.totalorder %s11782_s18, 2 }
  0xbf   : > { %850 = sbr.rel (%p8523_p12) target bundleno = 294 (0x126), region = 121 }
  0xc4   : > { %s8524_s13 = sshll.u32 %s11782_s18, 6  ;;  %v949_v53 = vlaneseq  ;;  %v851_v56 = vld [vmem:[%s12278_s22] sm:$0xff]  ;;  %v852_v58 = vld [vmem:[%s12278_s22 + $0x8] sm:$0xff]  ;;  %v857_v59 = vld [vmem:[%s12278_s22 + $0x30] sm:$0xff]  ;;  %v11697_v0 = vmov 1983009808  }
  0xc5   : > { %s948_s15 = ssub.s32 77, %s8524_s13  ;;  %v858_v62 = vld [vmem:[%s12278_s22 + $0x38] sm:$0xff]  ;;  %v12300_v1 = vunpack.c.l.s4 %v11697_v0  ;;  %v863_v2 = vld [vmem:[%s12278_s22 + $0x60] sm:$0xff]  ;;  %v12312_v7 = vld [vmem:[%s12278_s22 + $0x10] sm:$0xff]  ;;  %vm1304_vm8 = vcmask 1041409   ;;  %vm1306_vm9 = vcmask 1043459  }
  0xc6   : > { %v12285_v54 = vshrl.u32 %v949_v53, 7  ;;  %v958_v55 = vstv %s948_s15  ;;  %v864_v8 = vld [vmem:[%s12278_s22 + $0x68] sm:$0xff]  ;;  %v12320_v12 = vld [vmem:[%s12278_s22 + $0x18] sm:$0xff]  ;;  %v12323_v13 = vld [vmem:[%s12278_s22 + $0x20] sm:$0xff]  ;;  %vm1308_vm10 = vcmask 1045509   ;;  %vm1310_vm11 = vcmask 1047559  }
  0xc7   : > { %17883 = vst [vmem:[#allocation13_spill] sm:$0xff] %v12300_v1  ;;  %v869_v14 = vld [vmem:[%s12278_s22 + $0x90] sm:$0xff]  ;;  %v12334_v19 = vld [vmem:[%s12278_s22 + $0x28] sm:$0xff]  ;;  %v12337_v20 = vld [vmem:[%s12278_s22 + $0x40] sm:$0xff] }
  0xc8   : > { %17880 = vst [vmem:[#allocation12_spill] sm:$0xff] %v12285_v54  ;;  %v951_v57 = vadd.s32 8, %v12285_v54  ;;  %v952_v60 = vadd.s32 16, %v12285_v54  ;;  %vm12293_vm0 = vcmp.lt.s32.totalorder %v12285_v54, %v958_v55  ;;  %v953_v3 = vadd.s32 24, %v12285_v54  ;;  %v870_v21 = vld [vmem:[%s12278_s22 + $0x98] sm:$0xff]  ;;  %v12344_v25 = vld [vmem:[%s12278_s22 + $0x48] sm:$0xff] }
  0xc9   : > { %v983_v63 = vsel %vm12293_vm0, %v851_v56, 0.0  ;;  %v954_v4 = vadd.s32 32, %v12285_v54  ;;  %v984_v6 = vsel %vm12293_vm0, %v852_v58, 0.0  ;;  %v955_v9 = vadd.s32 40, %v12285_v54  ;;  %v12347_v26 = vld [vmem:[%s12278_s22 + $0x50] sm:$0xff]  ;;  %v875_v27 = vld [vmem:[%s12278_s22 + $0xc0] sm:$0xff] }
  0xca   : > { %vm12305_vm1 = vcmp.lt.s32.totalorder %v951_v57, %v958_v55  ;;  %v956_v10 = vadd.s32 48, %v12285_v54  ;;  %v957_v15 = vadd.s32 56, %v12285_v54  ;;  %vm12327_vm2 = vcmp.lt.s32.totalorder %v952_v60, %v958_v55  ;;  %v12361_v32 = vld [vmem:[%s12278_s22 + $0x58] sm:$0xff]  ;;  %v12364_v33 = vld [vmem:[%s12278_s22 + $0x70] sm:$0xff]  ;;  %v876_v34 = vld [vmem:[%s12278_s22 + $0xc8] sm:$0xff] }
  0xcb   : > { %v989_v11 = vsel %vm12305_vm1, %v857_v59, 0.0  ;;  %v990_v17 = vsel %vm12305_vm1, %v858_v62, 0.0  ;;  %v995_v22 = vsel %vm12327_vm2, %v863_v2, 0.0  ;;  %vm12350_vm3 = vcmp.lt.s32.totalorder %v953_v3, %v958_v55  ;;  %v12378_v39 = vld [vmem:[%s12278_s22 + $0x78] sm:$0xff]  ;;  %v12381_v40 = vld [vmem:[%s12278_s22 + $0x80] sm:$0xff]  ;;  %v12384_v41 = vld [vmem:[%s12278_s22 + $0x88] sm:$0xff] }
  0xcc   : > { %v1081_v18 = vadd.f32 %v989_v11, %v983_v63  ;;  %v1094_v23 = vadd.f32 %v990_v17, %v984_v6  ;;  %vm12354_vm4 = vcmp.lt.s32.totalorder %v954_v4, %v958_v55  ;;  %v996_v30 = vsel %vm12327_vm2, %v864_v8, 0.0  ;;  %v881_v42 = vld [vmem:[%s12278_s22 + $0xf0] sm:$0xff]  ;;  %v12397_v47 = vld [vmem:[%s12278_s22 + $0xa0] sm:$0xff]  ;;  %v12400_v48 = vld [vmem:[%s12278_s22 + $0xa8] sm:$0xff] }
  0xcd   : > { %vm12367_vm5 = vcmp.lt.s32.totalorder %v955_v9, %v958_v55  ;;  %vm12371_vm6 = vcmp.lt.s32.totalorder %v956_v10, %v958_v55  ;;  %v1001_v37 = vsel %vm12350_vm3, %v869_v14, 0.0  ;;  %vm12387_vm7 = vcmp.lt.s32.totalorder %v957_v15, %v958_v55  ;;  %v12403_v49 = vld [vmem:[%s12278_s22 + $0xb0] sm:$0xff]  ;;  %v882_v50 = vld [vmem:[%s12278_s22 + $0xf8] sm:$0xff]  ;;  %v887_v59 = vld [vmem:[%s12278_s22 + $0x120] sm:$0xff] }
  0xce   : > { %v1082_v31 = vadd.f32 %v1081_v18, %v995_v22  ;;  %v1095_v38 = vadd.f32 %v1094_v23, %v996_v30  ;;  %v985_v44 = vsel %vm12293_vm0, %v12312_v7, 0.0  ;;  %v1002_v45 = vsel %vm12350_vm3, %v870_v21, 0.0  ;;  %v12415_v56 = vld [vmem:[%s12278_s22 + $0xb8] sm:$0xff]  ;;  %v12418_v57 = vld [vmem:[%s12278_s22 + $0xd0] sm:$0xff]  ;;  %v12433_v2 = vld [vmem:[%s12278_s22 + $0xe0] sm:$0xff] }
  0xcf   : > { %v986_v51 = vsel %vm12293_vm0, %v12320_v12, 0.0  ;;  %v1007_v53 = vsel %vm12354_vm4, %v875_v27, 0.0  ;;  %v12421_v58 = vld [vmem:[%s12278_s22 + $0xd8] sm:$0xff]  ;;  %v991_v62 = vsel %vm12305_vm1, %v12337_v20, 0.0  ;;  %v1008_v63 = vsel %vm12354_vm4, %v876_v34, 0.0  ;;  %v12436_v3 = vld [vmem:[%s12278_s22 + $0xe8] sm:$0xff] }
  0xd0   : > { %v1083_v46 = vadd.f32 %v1082_v31, %v1001_v37  ;;  %v1096_v55 = vadd.f32 %v1095_v38, %v1002_v45  ;;  %v12439_v4 = vld [vmem:[%s12278_s22 + $0x100] sm:$0xff]  ;;  %v992_v6 = vsel %vm12305_vm1, %v12344_v25, 0.0  ;;  %v1013_v9 = vsel %vm12367_vm5, %v881_v42, 0.0  ;;  %v12450_v11 = vld [vmem:[%s12278_s22 + $0x108] sm:$0xff]  ;;  %v12453_v14 = vld [vmem:[%s12278_s22 + $0x110] sm:$0xff] }
  0xd1   : > { %v12456_v15 = vld [vmem:[%s12278_s22 + $0x118] sm:$0xff]  ;;  %v888_v17 = vld [vmem:[%s12278_s22 + $0x128] sm:$0xff]  ;;  %v997_v20 = vsel %vm12327_vm2, %v12364_v33, 0.0  ;;  %v1014_v21 = vsel %vm12367_vm5, %v882_v50, 0.0  ;;  %v12468_v23 = vld [vmem:[%s12278_s22 + $0x130] sm:$0xff]  ;;  %v998_v27 = vsel %vm12327_vm2, %v12378_v39, 0.0 }
  0xd2   : > { %v1084_v0 = vadd.f32 %v1083_v46, %v1007_v53  ;;  %v1097_v10 = vadd.f32 %v1096_v55, %v1008_v63  ;;  %17898 = vst [vmem:[#allocation14_spill] sm:$0xff] %v12456_v15  ;;  %v12471_v25 = vld [vmem:[%s12278_s22 + $0x138] sm:$0xff]  ;;  %v1019_v33 = vsel %vm12371_vm6, %v887_v59, 0.0  ;;  %v12485_v34 = vld [vmem:[%s12278_s22 + $0x140] sm:$0xff]  ;;  %v12488_v37 = vld [vmem:[%s12278_s22 + $0x148] sm:$0xff] }
  0xd3   : > { %17899 = vst [vmem:[#allocation15_spill] sm:$0xff] %v12485_v34  ;;  %17900 = vst [vmem:[#allocation16_spill] sm:$0xff] %v12488_v37  ;;  %v893_v38 = vld [vmem:[%s12278_s22 + $0x150] sm:$0xff]  ;;  %v12492_v39 = vld [vmem:[%s12278_s22 + $0x158] sm:$0xff] }
  0xd4   : > { %v1085_v22 = vadd.f32 %v1084_v0, %v1013_v9  ;;  %v1098_v50 = vadd.f32 %v1097_v10, %v1014_v21  ;;  %v12504_v53 = vld [vmem:[%s12278_s22 + $0x160] sm:$0xff]  ;;  %v12507_v55 = vld [vmem:[%s12278_s22 + $0x168] sm:$0xff]  ;;  %v1020_v9 = vsel %vm12371_vm6, %v888_v17, 0.0  ;;  %v12521_v10 = vld [vmem:[%s12278_s22 + $0x170] sm:$0xff]  ;;  %v1026_v7 = vsel %vm12387_vm7, %v12492_v39, 0.0 }
  0xd5   : > { %17901 = vst [vmem:[#allocation17_spill] sm:$0xff] %v12521_v10  ;;  %v12524_v21 = vld [vmem:[%s12278_s22 + $0x178] sm:$0xff]  ;;  %v12527_v24 = vld [vmem:[%s12278_s22 + $0x180] sm:$0xff]  ;;  %v12539_v30 = vld [vmem:[%s12278_s22 + $0x188] sm:$0xff] }
  0xd6   : > { %17902 = vst [vmem:[#allocation18_spill] sm:$0xff] %v12524_v21  ;;  %v1086_v31 = vadd.f32 %v1085_v22, %v1019_v33  ;;  %v12542_v18 = vld [vmem:[%s12278_s22 + $0x190] sm:$0xff]  ;;  %v12545_v60 = vld [vmem:[%s12278_s22 + $0x198] sm:$0xff]  ;;  %v1025_v33 = vsel %vm12387_vm7, %v893_v38, 0.0  ;;  %v12559_v8 = vld [vmem:[%s12278_s22 + $0x1a0] sm:$0xff]  ;;  %v1099_v17 = vadd.f32 %v1098_v50, %v1020_v9  ;;  %v1107_v38 = vadd.f32 %v991_v62, %v985_v44 }
  0xd7   : > { %17903 = vst [vmem:[#allocation19_spill] sm:$0xff] %v12542_v18  ;;  %17904 = vst [vmem:[#allocation20_spill] sm:$0xff] %v12545_v60  ;;  %v12562_v52 = vld [vmem:[%s12278_s22 + $0x1a8] sm:$0xff]  ;;  %v12565_v59 = vld [vmem:[%s12278_s22 + $0x1b0] sm:$0xff]  ;;  %v1120_v44 = vadd.f32 %v992_v6, %v986_v51 }
  0xd8   : > { %17905 = vst [vmem:[#allocation21_spill] sm:$0xff] %v12559_v8  ;;  %17906 = vst [vmem:[#allocation22_spill] sm:$0xff] %v12562_v52  ;;  %v12578_v0 = vld [vmem:[%s12278_s22 + $0x1b8] sm:$0xff]  ;;  %v12581_v63 = vld [vmem:[%s12278_s22 + $0x1c0] sm:$0xff]  ;;  %v12617_v51 = vadd.f32 %v1086_v31, %v1025_v33  ;;  %v1108_v6 = vadd.f32 %v1107_v38, %v997_v20  ;;  %v17913_v31 = vsel %vm12350_vm3, %v12397_v47, 0.0  ;;  %v17914_v52 = vsel %vm12350_vm3, %v12400_v48, 0.0 }
  0xd9   : > { %v12584_v45 = vld [vmem:[%s12278_s22 + $0x1c8] sm:$0xff]  ;;  %v12600_v62 = vld [vmem:[%s12278_s22 + $0x1d0] sm:$0xff]  ;;  %v12603_v9 = vld [vmem:[%s12278_s22 + $0x1d8] sm:$0xff]  ;;  %v1121_v33 = vadd.f32 %v1120_v44, %v998_v27  ;;  %v12661_v44 = vadd.f32 %v1099_v17, %v1026_v7  ;;  %v1037_v27 = vsel %vm12305_vm1, %v12565_v59, 0.0  ;;  %v1038_v17 = vsel %vm12305_vm1, %v12578_v0, 0.0 }
  0xda   : > { %17907 = vst [vmem:[#allocation23_spill] sm:$0xff] %v12600_v62  ;;  %17908 = vst [vmem:[#allocation24_spill] sm:$0xff] %v12603_v9  ;;  %v12606_v22 = vld [vmem:[%s12278_s22 + $0x1e0] sm:$0xff]  ;;  %v12609_v46 = vld [vmem:[%s12278_s22 + $0x1e8] sm:$0xff]  ;;  %v1109_v0 = vadd.f32 %v1108_v6, %v17913_v31  ;;  %v17918_v62 = vsel %vm12354_vm4, %v12421_v58, 0.0  ;;  %v17919_v58 = vsel %vm12367_vm5, %v12439_v4, 0.0 }
  0xdb   : > { %v12620_v50 = vld [vmem:[%s12278_s22 + $0x1f0] sm:$0xff]  ;;  %v12623_v42 = vld [vmem:[%s12278_s22 + $0x1f8] sm:$0xff]  ;;  %v12626_v1 = vld [vmem:[%s12278_s22 + $0x200] sm:$0xff]  ;;  %v1122_v8 = vadd.f32 %v1121_v33, %v17914_v52  ;;  %v1043_v6 = vsel %vm12327_vm2, %v12606_v22, 0.0  ;;  %v1044_v48 = vsel %vm12327_vm2, %v12609_v46, 0.0  ;;  %v17917_v22 = vsel %vm12354_vm4, %v12418_v57, 0.0 }
  0xdc   : > { %17909 = vst [vmem:[#allocation25_spill] sm:$0xff] %v12626_v1  ;;  %v12629_v54 = vld [vmem:[%s12278_s22 + $0x208] sm:$0xff]  ;;  %v12641_v38 = vld [vmem:[%s12278_s22 + $0x210] sm:$0xff]  ;;  %v12644_v12 = vld [vmem:[%s12278_s22 + $0x218] sm:$0xff]  ;;  %v1110_v46 = vadd.f32 %v1109_v0, %v17917_v22 }
  0xdd   : > { %17910 = vst [vmem:[#allocation26_spill] sm:$0xff] %v12629_v54  ;;  %v12647_v37 = vld [vmem:[%s12278_s22 + $0x220] sm:$0xff]  ;;  %v12650_v34 = vld [vmem:[%s12278_s22 + $0x228] sm:$0xff]  ;;  %v12664_v20 = vld [vmem:[%s12278_s22 + $0x230] sm:$0xff]  ;;  %v1049_v33 = vsel %vm12350_vm3, %v12641_v38, 0.0  ;;  %v1050_v47 = vsel %vm12350_vm3, %v12644_v12, 0.0 }
  0xde   : > { %17911 = vst [vmem:[#allocation27_spill] sm:$0xff] %v12647_v37  ;;  %17912 = vst [vmem:[#allocation28_spill] sm:$0xff] %v12650_v34  ;;  %v12667_v21 = vld [vmem:[%s12278_s22 + $0x238] sm:$0xff]  ;;  %v12682_v7 = vld [vmem:[%s12278_s22 + $0x240] sm:$0xff]  ;;  %v1123_v34 = vadd.f32 %v1122_v8, %v17918_v62  ;;  %v1111_v62 = vadd.f32 %v1110_v46, %v17919_v58  ;;  %v17923_v46 = vsel %vm12293_vm0, %v12334_v19, 0.0  ;;  %v17976_v16 = vsel %vm12350_vm3, %v12664_v20, 0.0 }
  0xdf   : > { %v12685_v60 = vld [vmem:[%s12278_s22 + $0x248] sm:$0xff]  ;;  %v12688_v10 = vld [vmem:[%s12278_s22 + $0x250] sm:$0xff]  ;;  %v12705_v18 = vld [vmem:[%s12278_s22 + $0x258] sm:$0xff]  ;;  %v1055_v38 = vsel %vm12354_vm4, %v12682_v7, 0.0  ;;  %v17920_v7 = vsel %vm12367_vm5, %v12450_v11, 0.0  ;;  %v17924_v11 = vsel %vm12305_vm1, %v12361_v32, 0.0 }
  0xe0   : > { %v12708_v15 = vld [vmem:[%s12278_s22 + $0x260] sm:$0xff]  ;;  %v12723_v52 = vld [vmem:[%s12278_s22 + $0x268] sm:$0xff]  ;;  %v12726_v31 = vld [vmem:[%s12278_s22 + $0x270] sm:$0xff]  ;;  %v1056_v12 = vsel %vm12354_vm4, %v12685_v60, 0.0  ;;  %v17927_v32 = vsel %vm12371_vm6, %v12468_v23, 0.0  ;;  %v17930_v23 = vsel %vm12327_vm2, %v12384_v41, 0.0 }
  0xe1   : > { %v12741_v39 = vld [vmem:[%s12278_s22 + $0x278] sm:$0xff]  ;;  %v12744_v59 = vld [vmem:[%s12278_s22 + $0x280] sm:$0xff]  ;;  %v12759_v54 = vld [vmem:[%s12278_s22 + $0x288] sm:$0xff]  ;;  %v1061_v60 = vsel %vm12367_vm5, %v12726_v31, 0.0  ;;  %v17921_v31 = vsel %vm12293_vm0, %v12323_v13, 0.0  ;;  %v17925_v13 = vsel %vm12293_vm0, %v12527_v24, 0.0 }
  0xe2   : > { %v12762_v1 = vld [vmem:[%s12278_s22 + $0x290] sm:$0xff]  ;;  %v12765_v9 = vld [vmem:[%s12278_s22 + $0x298] sm:$0xff]  ;;  %v12782_v37 = vld [vmem:[%s12278_s22 + $0x2a0] sm:$0xff]  ;;  %v1062_v0 = vsel %vm12367_vm5, %v12741_v39, 0.0  ;;  %v17928_v24 = vsel %vm12371_vm6, %v12471_v25, 0.0  ;;  %v17933_v41 = vsel %vm12350_vm3, %v12403_v49, 0.0 }
  0xe3   : > { %17915 = vst [vmem:[#allocation29_spill] sm:$0xff] %v12762_v1  ;;  %17916 = vst [vmem:[#allocation30_spill] sm:$0xff] %v12765_v9  ;;  %v12797_v8 = vld [vmem:[%s12278_s22 + $0x2a8] sm:$0xff]  ;;  %v12812_v22 = vld [vmem:[%s12278_s22 + $0x2b0] sm:$0xff]  ;;  %v1067_v57 = vsel %vm12371_vm6, %v12782_v37, 0.0  ;;  %v1124_v1 = vadd.f32 %v1123_v34, %v17920_v7  ;;  %v17922_v9 = vsel %vm12305_vm1, %v12347_v26, 0.0  ;;  %v1146_v34 = vadd.f32 %v17924_v11, %v17923_v46 }
  0xe4   : > { %v12827_v39 = vld [vmem:[%s12278_s22 + $0x2b8] sm:$0xff]  ;;  %v1133_v37 = vadd.f32 %v17922_v9, %v17921_v31  ;;  %v1068_v4 = vsel %vm12371_vm6, %v12797_v8, 0.0  ;;  %v1159_v26 = vadd.f32 %v1037_v27, %v17925_v13  ;;  %v17926_v9 = vsel %vm12293_vm0, %v12539_v30, 0.0  ;;  %v12868_v8 = vld [vmem:[%s12278_s22 + $0x2c0] sm:$0xff]  ;;  %v12886_v31 = vld [vmem:[%s12278_s22 + $0x2c8] sm:$0xff] }
  0xe5   : > { %v1172_v58 = vadd.f32 %v1038_v17, %v17926_v9  ;;  %v1069_v19 = vsel %vm12371_vm6, %v12812_v22, 0.0  ;;  %v1112_v7 = vadd.f32 %v1111_v62, %v17927_v32  ;;  %v1125_v27 = vadd.f32 %v1124_v1, %v17928_v24  ;;  %v941_v1 = vld [vmem:[%s12278_s22 + $0x2d0] sm:$0xff]  ;;  %v12918_v24 = vld [vmem:[%s12278_s22 + $0x2e0] sm:$0xff] }
  0xe6   : > { %v17929_v30 = vsel %vm12327_vm2, %v12381_v40, 0.0  ;;  %v1070_v46 = vsel %vm12371_vm6, %v12827_v39, 0.0  ;;  %v1147_v62 = vadd.f32 %v1146_v34, %v17930_v23  ;;  %v1160_v11 = vadd.f32 %v1159_v26, %v1043_v6  ;;  %v12929_v23 = vld [vmem:[%s12278_s22 + $0x2e8] sm:$0xff] }
  0xe7   : > { %v1134_v17 = vadd.f32 %v1133_v37, %v17929_v30  ;;  %v1173_v25 = vadd.f32 %v1172_v58, %v1044_v48  ;;  %v1088_v13 = vrot.slane %v12617_v51, 4  ;;  %v17931_v40 = vsel %vm12387_vm7, %v12504_v53, 0.0  ;;  %v942_v48 = vld [vmem:[%s12278_s22 + $0x2d8] sm:$0xff]  ;;  %v17972_v5 = vld [vmem:[#allocation25_spill] sm:$0xff] }
  0xe8   : > { %v1113_v37 = vadd.f32 %v1112_v7, %v17931_v40  ;;  %v17932_v9 = vsel %vm12387_vm7, %v12507_v55, 0.0  ;;  %v1071_v34 = vsel %vm12371_vm6, %v12868_v8, 0.0  ;;  %v17934_v53 = vsel %vm12350_vm3, %v12415_v56, 0.0 }
  0xe9   : > { %v1126_v32 = vadd.f32 %v1125_v27, %v17932_v9  ;;  %v1135_v6 = vadd.f32 %v1134_v17, %v17933_v41  ;;  %v1148_v26 = vadd.f32 %v1147_v62, %v17934_v53  ;;  %v1161_v58 = vadd.f32 %v1160_v11, %v1049_v33  ;;  %v17938_v41 = vld [vmem:[#allocation14_spill] sm:$0xff] }
  0xea   : > { %v1174_v7 = vadd.f32 %v1173_v25, %v1050_v47  ;;  %v1072_v55 = vsel %vm12371_vm6, %v12886_v31, 0.0  ;;  %v1101_v49 = vrot.slane %v12661_v44, 4  ;;  %v1114_v27 = vrot.slane %v1113_v37, 4  ;;  %v17985_v31 = vld [vmem:[#allocation13_spill] sm:$0xff] }
  0xeb   : > { %v17935_v30 = vsel %vm12354_vm4, %v12433_v2, 0.0  ;;  %v1073_v56 = vsel %vm12387_vm7, %v941_v1, 0.0  ;;  %v17936_v47 = vsel %vm12354_vm4, %v12436_v3, 0.0  ;;  %v1162_v62 = vadd.f32 %v1161_v58, %v1055_v38 }
  0xec   : > { %v1136_v17 = vadd.f32 %v1135_v6, %v17935_v30  ;;  %v1149_v33 = vadd.f32 %v1148_v26, %v17936_v47  ;;  %v1175_v11 = vadd.f32 %v1174_v7, %v1056_v12  ;;  %v1074_v25 = vsel %vm12387_vm7, %v942_v48, 0.0  ;;  %v12960_v7 = vld [vmem:[%s12278_s22 + $0x2f0] sm:$0xff] }
  0xed   : > { %v1089_v2 = vadd.f32 %v1088_v13, %v12617_v51  ;;  %v1127_v40 = vrot.slane %v1126_v32, 4  ;;  %v17937_v9 = vsel %vm12367_vm5, %v12453_v14, 0.0  ;;  %v1075_v3 = vsel %vm12387_vm7, %v12918_v24, 0.0  ;;  %v17940_v14 = vld [vmem:[#allocation15_spill] sm:$0xff] }
  0xee   : > { %v1137_v1 = vadd.f32 %v1136_v17, %v17937_v9  ;;  %v17939_v38 = vsel %vm12367_vm5, %v17938_v41, 0.0  ;;  %v1163_v6 = vadd.f32 %v1162_v62, %v1061_v60  ;;  %v1176_v53 = vadd.f32 %v1175_v11, %v1062_v0  ;;  %v12963_v24 = vld [vmem:[%s12278_s22 + $0x2f8] sm:$0xff]  ;;  %v17942_v60 = vld [vmem:[#allocation16_spill] sm:$0xff]  ;;  %v17947_v62 = vld [vmem:[#allocation17_spill] sm:$0xff] }
  0xef   : > { %v1150_v12 = vadd.f32 %v1149_v33, %v17939_v38  ;;  %v1076_v51 = vsel %vm12387_vm7, %v12929_v23, 0.0  ;;  %v1102_v13 = vadd.f32 %v1101_v49, %v12661_v44  ;;  %v1115_v48 = vadd.f32 %v1114_v27, %v1113_v37  ;;  %v17944_v44 = vld [vmem:[#allocation19_spill] sm:$0xff] }
  0xf0   : > { %v17941_v26 = vsel %vm12371_vm6, %v17940_v14, 0.0  ;;  %v17943_v0 = vsel %vm12371_vm6, %v17942_v60, 0.0  ;;  %v1164_v17 = vadd.f32 %v1163_v6, %v1067_v57  ;;  %v1177_v47 = vadd.f32 %v1176_v53, %v1068_v4  ;;  %v17949_v57 = vld [vmem:[#allocation20_spill] sm:$0xff] }
  0xf1   : > { %v1138_v58 = vadd.f32 %v1137_v1, %v17941_v26  ;;  %v1151_v30 = vadd.f32 %v1150_v12, %v17943_v0  ;;  %v17945_v37 = vsel %vm12293_vm0, %v17944_v44, 0.0  ;;  %v17946_v49 = vsel %vm12305_vm1, %v12581_v63, 0.0  ;;  %v17952_v63 = vld [vmem:[#allocation18_spill] sm:$0xff] }
  0xf2   : > { %v1185_v27 = vadd.f32 %v17946_v49, %v17945_v37  ;;  %v1090_v23 = vrot.slane %v1089_v2, 2  ;;  %v1128_v33 = vadd.f32 %v1127_v40, %v1126_v32  ;;  %v17948_v11 = vsel %vm12387_vm7, %v17947_v62, 0.0  ;;  %v17958_v49 = vld [vmem:[#allocation28_spill] sm:$0xff] }
  0xf3   : > { %v1139_v9 = vadd.f32 %v1138_v58, %v17948_v11  ;;  %v17950_v4 = vsel %vm12293_vm0, %v17949_v57, 0.0  ;;  %v17951_v1 = vsel %vm12305_vm1, %v12584_v45, 0.0  ;;  %v17953_v38 = vsel %vm12387_vm7, %v17952_v63, 0.0  ;;  %v17962_v63 = vld [vmem:[#allocation21_spill] sm:$0xff] }
  0xf4   : > { %v1198_v41 = vadd.f32 %v17951_v1, %v17950_v4  ;;  %v1152_v12 = vadd.f32 %v1151_v30, %v17953_v38  ;;  %v1165_v32 = vadd.f32 %v1164_v17, %v1073_v56  ;;  %v1178_v40 = vadd.f32 %v1177_v47, %v1074_v25 }
  0xf5   : > { %v17954_v6 = vsel %vm12327_vm2, %v12620_v50, 0.0  ;;  %v1077_v14 = vsel %vm12387_vm7, %v12960_v7, 0.0  ;;  %v1078_v45 = vsel %vm12387_vm7, %v12963_v24, 0.0  ;;  %v1103_v26 = vrot.slane %v1102_v13, 2  ;;  %v17956_v50 = vld [vmem:[#allocation27_spill] sm:$0xff] }
  0xf6   : > { %v1186_v53 = vadd.f32 %v1185_v27, %v17954_v6  ;;  %v17955_v58 = vsel %vm12327_vm2, %v12623_v42, 0.0  ;;  %v1116_v25 = vrot.slane %v1115_v48, 2  ;;  %v1166_v60 = vrot.slane %v1165_v32, 4  ;;  %v17964_v6 = vld [vmem:[#allocation23_spill] sm:$0xff] }
  0xf7   : > { %v1199_v56 = vadd.f32 %v1198_v41, %v17955_v58  ;;  %v1179_v0 = vrot.slane %v1178_v40, 4  ;;  %v17957_v30 = vsel %vm12350_vm3, %v17956_v50, 0.0  ;;  %v1091_v47 = vadd.f32 %v1090_v23, %v1089_v2 }
  0xf8   : > { %v1187_v17 = vadd.f32 %v1186_v53, %v17957_v30  ;;  %v1129_v44 = vrot.slane %v1128_v33, 2  ;;  %v1140_v37 = vrot.slane %v1139_v9, 4  ;;  %v17959_v27 = vsel %vm12350_vm3, %v17958_v49, 0.0  ;;  %v17966_v53 = vld [vmem:[#allocation22_spill] sm:$0xff] }
  0xf9   : > { %v1200_v62 = vadd.f32 %v1199_v56, %v17959_v27  ;;  %v1153_v11 = vrot.slane %v1152_v12, 4  ;;  %v1167_v57 = vadd.f32 %v1166_v60, %v1165_v32  ;;  %v1180_v42 = vadd.f32 %v1179_v0, %v1178_v40 }
  0xfa   : > { %v17960_v4 = vsel %vm12354_vm4, %v12688_v10, 0.0  ;;  %v1104_v41 = vadd.f32 %v1103_v26, %v1102_v13  ;;  %v17961_v2 = vsel %vm12354_vm4, %v12705_v18, 0.0  ;;  %v17963_v38 = vsel %vm12293_vm0, %v17962_v63, 0.0  ;;  %v17968_v13 = vld [vmem:[#allocation24_spill] sm:$0xff] }
  0xfb   : > { %v1188_v1 = vadd.f32 %v1187_v17, %v17960_v4  ;;  %v1201_v23 = vadd.f32 %v1200_v62, %v17961_v2  ;;  %v17965_v32 = vsel %vm12305_vm1, %v17964_v6, 0.0  ;;  %v17967_v10 = vsel %vm12293_vm0, %v17966_v53, 0.0 }
  0xfc   : > { %v1211_v40 = vadd.f32 %v17965_v32, %v17963_v38  ;;  %v17969_v26 = vsel %vm12305_vm1, %v17968_v13, 0.0  ;;  %v1117_v18 = vadd.f32 %v1116_v25, %v1115_v48  ;;  %v1168_v56 = vrot.slane %v1167_v57, 2  ;;  %v17974_v48 = vld [vmem:[#allocation26_spill] sm:$0xff] }
  0xfd   : > { %v1224_v58 = vadd.f32 %v17969_v26, %v17967_v10  ;;  %v1181_v60 = vrot.slane %v1180_v42, 2  ;;  %v17970_v0 = vsel %vm12367_vm5, %v12744_v59, 0.0  ;;  %v1141_v30 = vadd.f32 %v1140_v37, %v1139_v9 }
  0xfe   : > { %v1189_v50 = vadd.f32 %v1188_v1, %v17970_v0  ;;  %v17971_v61 = vsel %vm12367_vm5, %v12759_v54, 0.0  ;;  %v17973_v49 = vsel %vm12327_vm2, %v17972_v5, 0.0  ;;  %v17975_v25 = vsel %vm12327_vm2, %v17974_v48, 0.0 }
  0xff   : > { %v1202_v17 = vadd.f32 %v1201_v23, %v17971_v61  ;;  %v1212_v27 = vadd.f32 %v1211_v40, %v17973_v49  ;;  %v1225_v62 = vadd.f32 %v1224_v58, %v17975_v25  ;;  %v1130_v4 = vadd.f32 %v1129_v44, %v1128_v33 }
 0x100   : > { %v1154_v2 = vadd.f32 %v1153_v11, %v1152_v12  ;;  %v1169_v59 = vadd.f32 %v1168_v56, %v1167_v57  ;;  %v1190_v9 = vadd.f32 %v1189_v50, %v1069_v19  ;;  %v1182_v54 = vadd.f32 %v1181_v60, %v1180_v42 }
 0x101   : > { %v1203_v37 = vadd.f32 %v1202_v17, %v1070_v46  ;;  %v1213_v1 = vadd.f32 %v1212_v27, %v17976_v16  ;;  %v17977_v33 = vsel %vm12350_vm3, %v12667_v21, 0.0  ;;  %v1092_v44 = vrot.slane %v1091_v47, 1 }
 0x102   : > { %v1226_v12 = vadd.f32 %v1225_v62, %v17977_v33  ;;  %v1105_v11 = vrot.slane %v1104_v41, 1  ;;  %v1118_v22 = vrot.slane %v1117_v18, 1  ;;  %v1191_v19 = vadd.f32 %v1190_v9, %v1075_v3  ;;  %v17980_v3 = vld [vmem:[#allocation29_spill] sm:$0xff] }
 0x103   : > { %v1142_v57 = vrot.slane %v1141_v30, 2  ;;  %v1204_v42 = vadd.f32 %v1203_v37, %v1076_v51  ;;  %v17978_v39 = vsel %vm12354_vm4, %v12708_v15, 0.0  ;;  %v17979_v20 = vsel %vm12354_vm4, %v12723_v52, 0.0  ;;  %v17982_v15 = vld [vmem:[#allocation30_spill] sm:$0xff] }
 0x104   : > { %v1214_v46 = vadd.f32 %v1213_v1, %v17978_v39  ;;  %v1227_v23 = vadd.f32 %v1226_v12, %v17979_v20  ;;  %v1131_v28 = vrot.slane %v1130_v4, 1  ;;  %v1155_v63 = vrot.slane %v1154_v2, 2 }
 0x105   : > { %v1170_v21 = vrot.slane %v1169_v59, 1  ;;  %v1192_v38 = vrot.slane %v1191_v19, 4  ;;  %v1183_v6 = vrot.slane %v1182_v54, 1  ;;  %v1205_v32 = vrot.slane %v1204_v42, 4 }
 0x106   : > { %v17981_v51 = vsel %vm12367_vm5, %v17980_v3, 0.0  ;;  %v17983_v53 = vsel %vm12367_vm5, %v17982_v15, 0.0  ;;  %v1093_v29 = vadd.f32 %v1092_v44, %v1091_v47  ;;  %v1106_v13 = vadd.f32 %v1105_v11, %v1104_v41  ;;  %v1079_v3 = vld [vmem:[#allocation2] sm:$0xff] }
 0x107   : > { %v1215_v40 = vadd.f32 %v1214_v46, %v17981_v51  ;;  %v1228_v10 = vadd.f32 %v1227_v23, %v17983_v53  ;;  %v1119_v52 = vadd.f32 %v1118_v22, %v1117_v18  ;;  %v1193_v26 = vadd.f32 %v1192_v38, %v1191_v19 }
 0x108   : > { %v1143_v58 = vadd.f32 %v1142_v57, %v1141_v30  ;;  %v1206_v56 = vadd.f32 %v1205_v32, %v1204_v42  ;;  %v1132_v35 = vadd.f32 %v1131_v28, %v1130_v4  ;;  %v1156_v50 = vadd.f32 %v1155_v63, %v1154_v2 }
 0x109   : > { %v1216_v60 = vadd.f32 %v1215_v40, %v1071_v34  ;;  %v1229_v0 = vadd.f32 %v1228_v10, %v1072_v55  ;;  %v1171_v61 = vadd.f32 %v1170_v21, %v1169_v59  ;;  %v1194_v17 = vrot.slane %v1193_v26, 2  ;;  %v17984_v34 = vld [vmem:[#allocation12_spill] sm:$0xff] }
 0x10a   : > { %v1184_v47 = vadd.f32 %v1183_v6, %v1182_v54  ;;  %v1207_v41 = vrot.slane %v1206_v56, 2  ;;  %v17986_v55 = vunpack.c.0.s8 %v17985_v31  ;;  %v1144_v5 = vrot.slane %v1143_v58, 1 }
 0x10b   : > { %v1217_v18 = vadd.f32 %v1216_v60, %v1077_v14  ;;  %v1230_v8 = vadd.f32 %v1229_v0, %v1078_v45  ;;  %v1195_v36 = vadd.f32 %v1194_v17, %v1193_v26  ;;  %v1157_v25 = vrot.slane %v1156_v50, 1 }
 0x10c   : > { %v1256_v30 = vsub.s32 %v17986_v55, %v17984_v34  ;;  %v1208_v49 = vadd.f32 %v1207_v41, %v1206_v56  ;;  %v1249_v4 = vcombine.low %v1093_v29, %v1106_v13  ;;  %v1250_v2 = vcombine.low %v1119_v52, %v1132_v35  ;;  %v1080_v13 = vld [vmem:[#allocation2 + $0x8] sm:$0xf] }
 0x10d   : > { %v1218_v27 = vrot.slane %v1217_v18, 4  ;;  %v1231_v48 = vrot.slane %v1230_v8, 4  ;;  %v1196_v62 = vrot.slane %v1195_v36, 1  ;;  %v1274_v43 = vcombine.low %v1171_v61, %v1184_v47 }
 0x10e   : > { %v1209_v7 = vrot.slane %v1208_v49, 1  ;;  %v1145_v37 = vadd.f32 %v1144_v5, %v1143_v58  ;;  %v1158_v16 = vadd.f32 %v1157_v25, %v1156_v50  ;;  %v1257_v1 = vrot.slane %v1249_v4, %v1256_v30 }
 0x10f   : > { %v1219_v14 = vadd.f32 %v1218_v27, %v1217_v18  ;;  %v1232_v59 = vadd.f32 %v1231_v48, %v1230_v8  ;;  %v1197_v9 = vadd.f32 %v1196_v62, %v1195_v36  ;;  %v1264_v33 = vrot.slane %v1250_v2, %v1256_v30 }
 0x110   : > { %v1210_v24 = vadd.f32 %v1209_v7, %v1208_v49  ;;  %v1282_v22 = vrot.slane %v1274_v43, %v1256_v30  ;;  %v1266_v39 = vcombine.low %v1145_v37, %v1158_v16 }
 0x111   : > { %v1220_v45 = vrot.slane %v1219_v14, 2  ;;  %v1233_v54 = vrot.slane %v1232_v59, 2  ;;  %v1265_v23 = vcombine.low %v1257_v1, %v1264_v33 }
 0x112   : > { %v1275_v11 = vcombine.low %v1197_v9, %v1210_v24  ;;  %v1273_v38 = vrot.slane %v1266_v39, %v1256_v30 }
 0x113   : > { %v1221_v12 = vadd.f32 %v1220_v45, %v1219_v14  ;;  %v1234_v44 = vadd.f32 %v1233_v54, %v1232_v59 }
 0x114   : > { %v1289_v42 = vrot.slane %v1275_v11, %v1256_v30 }
 0x115   : > { %v1222_v19 = vrot.slane %v1221_v12, 1  ;;  %v1235_v57 = vrot.slane %v1234_v44, 1 }
 0x116   : > { %v1290_v28 = vcombine.low %v1282_v22, %v1289_v42 }
 0x117   : > { %v1223_v46 = vadd.f32 %v1222_v19, %v1221_v12  ;;  %v1236_v20 = vadd.f32 %v1235_v57, %v1234_v44 }
 0x118   : > { %v1303_v21 = vrot.slane %v1290_v28, 7 }
 0x119   : > { %v1291_v63 = vcombine.low %v1223_v46, %v1236_v20 }
 0x11a   : > { %v1305_v32 = vsel %vm1304_vm8, %v1303_v21, %v1265_v23 }
 0x11b   : > { %v1298_v6 = vrot.slane %v1291_v63, %v1256_v30  ;;  %v1307_v51 = vsel %vm1306_vm9, %v1303_v21, %v1305_v32 }
 0x11c   : > { %v1309_v40 = vsel %vm1308_vm10, %v1303_v21, %v1307_v51 }
 0x11d   : > { %v1314_v15 = vrot.slane %v1298_v6, 7  ;;  %v1311_v53 = vsel %vm1310_vm11, %v1303_v21, %v1309_v40 }
 0x11e   : > { %v1321_v29 = vadd.f32 %v1311_v53, %v1079_v3 }
 0x11f   : > { %v1315_v10 = vsel %vm1304_vm8, %v1314_v15, %v1273_v38 }
 0x120   : > { %v1316_v52 = vsel %vm1306_vm9, %v1314_v15, %v1315_v10  ;;  %1323 = vst [vmem:[#allocation2] sm:$0xff] %v1321_v29 }
 0x121   : > { %v1317_v26 = vsel %vm1308_vm10, %v1314_v15, %v1316_v52 }
 0x122   : > { %v1318_v58 = vsel %vm1310_vm11, %v1314_v15, %v1317_v26 }
 0x123   : > { %v1322_v56 = vadd.f32 %v1318_v58, %v1080_v13 }
 0x125   : > { %1324 = vst [vmem:[#allocation2 + $0x8] sm:$0xf] %v1322_v56 }
 0x126 PF: > { %p8525_p13 = scmp.lt.s32.totalorder %s11782_s18, 2 }
 0x128   : > { %1328 = sbr.rel (%p8525_p13) target bundleno = 399 (0x18f), region = 125 }
 0x12d   : > { %s8526_s17 = sadd.s32 4294967294, %s11782_s18  ;;  %v1428_v60 = vlaneseq  ;;  %v1330_v50 = vld [vmem:[%s12280_s21] sm:$0xff]  ;;  %v1331_v17 = vld [vmem:[%s12280_s21 + $0x8] sm:$0xff]  ;;  %v1336_v47 = vld [vmem:[%s12280_s21 + $0x30] sm:$0xff]  ;;  %v11698_v34 = vmov 1983009808  }
 0x12e   : > { %s8527_s20 = sshll.u32 %s8526_s17, 6  ;;  %v1337_v8 = vld [vmem:[%s12280_s21 + $0x38] sm:$0xff]  ;;  %v13123_v31 = vunpack.c.l.s4 %v11698_v34  ;;  %v1342_v55 = vld [vmem:[%s12280_s21 + $0x60] sm:$0xff]  ;;  %v13135_v48 = vld [vmem:[%s12280_s21 + $0x10] sm:$0xff]  ;;  %vm1783_vm4 = vcmask 1041409   ;;  %vm1785_vm5 = vcmask 1043459  }
 0x12f   : > { %s1427_s27 = ssub.s32 249, %s8527_s20  ;;  %v13108_v0 = vshrl.u32 %v1428_v60, 7  ;;  %v1343_v25 = vld [vmem:[%s12280_s21 + $0x68] sm:$0xff]  ;;  %v13143_v7 = vld [vmem:[%s12280_s21 + $0x18] sm:$0xff]  ;;  %v13146_v14 = vld [vmem:[%s12280_s21 + $0x20] sm:$0xff]  ;;  %vm1787_vm6 = vcmask 1045509  }
 0x130   : > { %v1437_v35 = vstv %s1427_s27  ;;  %17990 = vst [vmem:[#allocation32_spill] sm:$0xff] %v13123_v31  ;;  %v1348_v59 = vld [vmem:[%s12280_s21 + $0x90] sm:$0xff]  ;;  %v13157_v54 = vld [vmem:[%s12280_s21 + $0x28] sm:$0xff]  ;;  %v13160_v37 = vld [vmem:[%s12280_s21 + $0x40] sm:$0xff]  ;;  %vm1789_vm7 = vcmask 1047559  }
 0x131   : > { %17987 = vst [vmem:[#allocation31_spill] sm:$0xff] %v13108_v0  ;;  %v1430_v61 = vadd.s32 8, %v13108_v0  ;;  %v1431_v41 = vadd.s32 16, %v13108_v0  ;;  %vm13116_vm12 = vcmp.lt.s32.totalorder %v13108_v0, %v1437_v35  ;;  %v1432_v30 = vadd.s32 24, %v13108_v0  ;;  %v1349_v16 = vld [vmem:[%s12280_s21 + $0x98] sm:$0xff]  ;;  %v13167_v44 = vld [vmem:[%s12280_s21 + $0x48] sm:$0xff] }
 0x132   : > { %v1462_v36 = vsel %vm13116_vm12, %v1330_v50, 0.0  ;;  %v1433_v5 = vadd.s32 32, %v13108_v0  ;;  %v1463_v27 = vsel %vm13116_vm12, %v1331_v17, 0.0  ;;  %v1434_v62 = vadd.s32 40, %v13108_v0  ;;  %v13170_v11 = vld [vmem:[%s12280_s21 + $0x50] sm:$0xff]  ;;  %v1354_v22 = vld [vmem:[%s12280_s21 + $0xc0] sm:$0xff] }
 0x133   : > { %vm13128_vm13 = vcmp.lt.s32.totalorder %v1430_v61, %v1437_v35  ;;  %v1435_v4 = vadd.s32 48, %v13108_v0  ;;  %v1436_v43 = vadd.s32 56, %v13108_v0  ;;  %vm13150_vm14 = vcmp.lt.s32.totalorder %v1431_v41, %v1437_v35  ;;  %v13184_v46 = vld [vmem:[%s12280_s21 + $0x58] sm:$0xff]  ;;  %v13187_v20 = vld [vmem:[%s12280_s21 + $0x70] sm:$0xff]  ;;  %v1355_v23 = vld [vmem:[%s12280_s21 + $0xc8] sm:$0xff] }
 0x134   : > { %v1468_v2 = vsel %vm13128_vm13, %v1336_v47, 0.0  ;;  %v1469_v24 = vsel %vm13128_vm13, %v1337_v8, 0.0  ;;  %v1474_v1 = vsel %vm13150_vm14, %v1342_v55, 0.0  ;;  %vm13173_vm15 = vcmp.lt.s32.totalorder %v1432_v30, %v1437_v35  ;;  %v13201_v6 = vld [vmem:[%s12280_s21 + $0x78] sm:$0xff]  ;;  %v13204_v32 = vld [vmem:[%s12280_s21 + $0x80] sm:$0xff]  ;;  %v13207_v3 = vld [vmem:[%s12280_s21 + $0x88] sm:$0xff] }
 0x135   : > { %v1560_v45 = vadd.f32 %v1468_v2, %v1462_v36  ;;  %v1573_v33 = vadd.f32 %v1469_v24, %v1463_v27  ;;  %vm13177_vm0 = vcmp.lt.s32.totalorder %v1433_v5, %v1437_v35  ;;  %v1475_v42 = vsel %vm13150_vm14, %v1343_v25, 0.0  ;;  %v1360_v51 = vld [vmem:[%s12280_s21 + $0xf0] sm:$0xff]  ;;  %v13220_v29 = vld [vmem:[%s12280_s21 + $0xa0] sm:$0xff]  ;;  %v13223_v13 = vld [vmem:[%s12280_s21 + $0xa8] sm:$0xff] }
 0x136   : > { %vm13190_vm1 = vcmp.lt.s32.totalorder %v1434_v62, %v1437_v35  ;;  %vm13194_vm2 = vcmp.lt.s32.totalorder %v1435_v4, %v1437_v35  ;;  %v1480_v21 = vsel %vm13173_vm15, %v1348_v59, 0.0  ;;  %vm13210_vm3 = vcmp.lt.s32.totalorder %v1436_v43, %v1437_v35  ;;  %v13226_v52 = vld [vmem:[%s12280_s21 + $0xb0] sm:$0xff]  ;;  %v1361_v26 = vld [vmem:[%s12280_s21 + $0xf8] sm:$0xff]  ;;  %v1366_v47 = vld [vmem:[%s12280_s21 + $0x120] sm:$0xff] }
 0x137   : > { %v1561_v39 = vadd.f32 %v1560_v45, %v1474_v1  ;;  %v1574_v38 = vadd.f32 %v1573_v33, %v1475_v42  ;;  %v1464_v15 = vsel %vm13116_vm12, %v13135_v48, 0.0  ;;  %v1481_v53 = vsel %vm13173_vm15, %v1349_v16, 0.0  ;;  %v13238_v50 = vld [vmem:[%s12280_s21 + $0xb8] sm:$0xff]  ;;  %v13241_v61 = vld [vmem:[%s12280_s21 + $0xd0] sm:$0xff]  ;;  %v13256_v55 = vld [vmem:[%s12280_s21 + $0xe0] sm:$0xff] }
 0x138   : > { %v1465_v58 = vsel %vm13116_vm12, %v13143_v7, 0.0  ;;  %v1486_v60 = vsel %vm13177_vm0, %v1354_v22, 0.0  ;;  %v13244_v17 = vld [vmem:[%s12280_s21 + $0xd8] sm:$0xff]  ;;  %v1470_v8 = vsel %vm13128_vm13, %v13160_v37, 0.0  ;;  %v1487_v36 = vsel %vm13177_vm0, %v1355_v23, 0.0  ;;  %v13259_v30 = vld [vmem:[%s12280_s21 + $0xe8] sm:$0xff] }
 0x139   : > { %v1562_v10 = vadd.f32 %v1561_v39, %v1480_v21  ;;  %v1575_v35 = vadd.f32 %v1574_v38, %v1481_v53  ;;  %v13262_v5 = vld [vmem:[%s12280_s21 + $0x100] sm:$0xff]  ;;  %v1471_v27 = vsel %vm13128_vm13, %v13167_v44, 0.0  ;;  %v1492_v62 = vsel %vm13190_vm1, %v1360_v51, 0.0  ;;  %v13273_v2 = vld [vmem:[%s12280_s21 + $0x108] sm:$0xff]  ;;  %v13276_v59 = vld [vmem:[%s12280_s21 + $0x110] sm:$0xff] }
 0x13a   : > { %v13279_v43 = vld [vmem:[%s12280_s21 + $0x118] sm:$0xff]  ;;  %v1367_v24 = vld [vmem:[%s12280_s21 + $0x128] sm:$0xff]  ;;  %v1476_v37 = vsel %vm13150_vm14, %v13187_v20, 0.0  ;;  %v1493_v16 = vsel %vm13190_vm1, %v1361_v26, 0.0  ;;  %v13291_v33 = vld [vmem:[%s12280_s21 + $0x130] sm:$0xff]  ;;  %v1477_v22 = vsel %vm13150_vm14, %v13201_v6, 0.0 }
 0x13b   : > { %v1563_v34 = vadd.f32 %v1562_v10, %v1486_v60  ;;  %v1576_v4 = vadd.f32 %v1575_v35, %v1487_v36  ;;  %18005 = vst [vmem:[#allocation33_spill] sm:$0xff] %v13279_v43  ;;  %v13294_v44 = vld [vmem:[%s12280_s21 + $0x138] sm:$0xff]  ;;  %v1498_v20 = vsel %vm13194_vm2, %v1366_v47, 0.0  ;;  %v13308_v23 = vld [vmem:[%s12280_s21 + $0x140] sm:$0xff]  ;;  %v13311_v21 = vld [vmem:[%s12280_s21 + $0x148] sm:$0xff] }
 0x13c   : > { %18006 = vst [vmem:[#allocation34_spill] sm:$0xff] %v13308_v23  ;;  %18007 = vst [vmem:[#allocation35_spill] sm:$0xff] %v13311_v21  ;;  %v1372_v38 = vld [vmem:[%s12280_s21 + $0x150] sm:$0xff]  ;;  %v13315_v6 = vld [vmem:[%s12280_s21 + $0x158] sm:$0xff] }
 0x13d   : > { %v1564_v1 = vadd.f32 %v1563_v34, %v1492_v62  ;;  %v1577_v26 = vadd.f32 %v1576_v4, %v1493_v16  ;;  %v13327_v60 = vld [vmem:[%s12280_s21 + $0x160] sm:$0xff]  ;;  %v13330_v35 = vld [vmem:[%s12280_s21 + $0x168] sm:$0xff]  ;;  %v1499_v62 = vsel %vm13194_vm2, %v1367_v24, 0.0  ;;  %v13344_v4 = vld [vmem:[%s12280_s21 + $0x170] sm:$0xff]  ;;  %v1505_v48 = vsel %vm13210_vm3, %v13315_v6, 0.0 }
 0x13e   : > { %18008 = vst [vmem:[#allocation36_spill] sm:$0xff] %v13344_v4  ;;  %v13347_v16 = vld [vmem:[%s12280_s21 + $0x178] sm:$0xff]  ;;  %v13350_v12 = vld [vmem:[%s12280_s21 + $0x180] sm:$0xff]  ;;  %v13362_v42 = vld [vmem:[%s12280_s21 + $0x188] sm:$0xff] }
 0x13f   : > { %18009 = vst [vmem:[#allocation37_spill] sm:$0xff] %v13347_v16  ;;  %v1565_v39 = vadd.f32 %v1564_v1, %v1498_v20  ;;  %v13365_v45 = vld [vmem:[%s12280_s21 + $0x190] sm:$0xff]  ;;  %v13368_v41 = vld [vmem:[%s12280_s21 + $0x198] sm:$0xff]  ;;  %v1504_v20 = vsel %vm13210_vm3, %v1372_v38, 0.0  ;;  %v13382_v25 = vld [vmem:[%s12280_s21 + $0x1a0] sm:$0xff]  ;;  %v1578_v24 = vadd.f32 %v1577_v26, %v1499_v62  ;;  %v1586_v38 = vadd.f32 %v1470_v8, %v1464_v15 }
 0x140   : > { %18010 = vst [vmem:[#allocation38_spill] sm:$0xff] %v13365_v45  ;;  %18011 = vst [vmem:[#allocation39_spill] sm:$0xff] %v13368_v41  ;;  %v13385_v56 = vld [vmem:[%s12280_s21 + $0x1a8] sm:$0xff]  ;;  %v13388_v47 = vld [vmem:[%s12280_s21 + $0x1b0] sm:$0xff]  ;;  %v1599_v15 = vadd.f32 %v1471_v27, %v1465_v58 }
 0x141   : > { %18012 = vst [vmem:[#allocation40_spill] sm:$0xff] %v13382_v25  ;;  %18013 = vst [vmem:[#allocation41_spill] sm:$0xff] %v13385_v56  ;;  %v13401_v34 = vld [vmem:[%s12280_s21 + $0x1b8] sm:$0xff]  ;;  %v13404_v36 = vld [vmem:[%s12280_s21 + $0x1c0] sm:$0xff]  ;;  %v13440_v58 = vadd.f32 %v1565_v39, %v1504_v20  ;;  %v1587_v27 = vadd.f32 %v1586_v38, %v1476_v37  ;;  %v18020_v39 = vsel %vm13173_vm15, %v13220_v29, 0.0  ;;  %v18021_v56 = vsel %vm13173_vm15, %v13223_v13, 0.0 }
 0x142   : > { %v13407_v53 = vld [vmem:[%s12280_s21 + $0x1c8] sm:$0xff]  ;;  %v13423_v8 = vld [vmem:[%s12280_s21 + $0x1d0] sm:$0xff]  ;;  %v13426_v62 = vld [vmem:[%s12280_s21 + $0x1d8] sm:$0xff]  ;;  %v1600_v20 = vadd.f32 %v1599_v15, %v1477_v22  ;;  %v13484_v15 = vadd.f32 %v1578_v24, %v1505_v48  ;;  %v1516_v22 = vsel %vm13128_vm13, %v13388_v47, 0.0  ;;  %v1517_v24 = vsel %vm13128_vm13, %v13401_v34, 0.0 }
 0x143   : > { %18014 = vst [vmem:[#allocation42_spill] sm:$0xff] %v13423_v8  ;;  %18015 = vst [vmem:[#allocation43_spill] sm:$0xff] %v13426_v62  ;;  %v13429_v1 = vld [vmem:[%s12280_s21 + $0x1e0] sm:$0xff]  ;;  %v13432_v10 = vld [vmem:[%s12280_s21 + $0x1e8] sm:$0xff]  ;;  %v1588_v34 = vadd.f32 %v1587_v27, %v18020_v39  ;;  %v18025_v8 = vsel %vm13177_vm0, %v13244_v17, 0.0  ;;  %v18026_v17 = vsel %vm13190_vm1, %v13262_v5, 0.0 }
 0x144   : > { %v13443_v26 = vld [vmem:[%s12280_s21 + $0x1f0] sm:$0xff]  ;;  %v13446_v51 = vld [vmem:[%s12280_s21 + $0x1f8] sm:$0xff]  ;;  %v13449_v31 = vld [vmem:[%s12280_s21 + $0x200] sm:$0xff]  ;;  %v1601_v25 = vadd.f32 %v1600_v20, %v18021_v56  ;;  %v1522_v27 = vsel %vm13150_vm14, %v13429_v1, 0.0  ;;  %v1523_v13 = vsel %vm13150_vm14, %v13432_v10, 0.0  ;;  %v18024_v1 = vsel %vm13177_vm0, %v13241_v61, 0.0 }
 0x145   : > { %18016 = vst [vmem:[#allocation44_spill] sm:$0xff] %v13449_v31  ;;  %v13452_v0 = vld [vmem:[%s12280_s21 + $0x208] sm:$0xff]  ;;  %v13464_v38 = vld [vmem:[%s12280_s21 + $0x210] sm:$0xff]  ;;  %v13467_v7 = vld [vmem:[%s12280_s21 + $0x218] sm:$0xff]  ;;  %v1589_v10 = vadd.f32 %v1588_v34, %v18024_v1 }
 0x146   : > { %18017 = vst [vmem:[#allocation45_spill] sm:$0xff] %v13452_v0  ;;  %v13470_v21 = vld [vmem:[%s12280_s21 + $0x220] sm:$0xff]  ;;  %v13473_v23 = vld [vmem:[%s12280_s21 + $0x228] sm:$0xff]  ;;  %v13487_v37 = vld [vmem:[%s12280_s21 + $0x230] sm:$0xff]  ;;  %v1528_v20 = vsel %vm13173_vm15, %v13464_v38, 0.0  ;;  %v1529_v29 = vsel %vm13173_vm15, %v13467_v7, 0.0 }
 0x147   : > { %18018 = vst [vmem:[#allocation46_spill] sm:$0xff] %v13470_v21  ;;  %18019 = vst [vmem:[#allocation47_spill] sm:$0xff] %v13473_v23  ;;  %v13490_v16 = vld [vmem:[%s12280_s21 + $0x238] sm:$0xff]  ;;  %v13505_v48 = vld [vmem:[%s12280_s21 + $0x240] sm:$0xff]  ;;  %v1602_v23 = vadd.f32 %v1601_v25, %v18025_v8  ;;  %v1590_v8 = vadd.f32 %v1589_v10, %v18026_v17  ;;  %v18030_v10 = vsel %vm13116_vm12, %v13157_v54, 0.0  ;;  %v18083_v9 = vsel %vm13173_vm15, %v13487_v37, 0.0 }
 0x148   : > { %v13508_v41 = vld [vmem:[%s12280_s21 + $0x248] sm:$0xff]  ;;  %v13511_v4 = vld [vmem:[%s12280_s21 + $0x250] sm:$0xff]  ;;  %v13528_v45 = vld [vmem:[%s12280_s21 + $0x258] sm:$0xff]  ;;  %v1534_v38 = vsel %vm13177_vm0, %v13505_v48, 0.0  ;;  %v18027_v48 = vsel %vm13190_vm1, %v13273_v2, 0.0  ;;  %v18031_v2 = vsel %vm13128_vm13, %v13184_v46, 0.0 }
 0x149   : > { %v13531_v43 = vld [vmem:[%s12280_s21 + $0x260] sm:$0xff]  ;;  %v13546_v56 = vld [vmem:[%s12280_s21 + $0x268] sm:$0xff]  ;;  %v13549_v39 = vld [vmem:[%s12280_s21 + $0x270] sm:$0xff]  ;;  %v1535_v7 = vsel %vm13177_vm0, %v13508_v41, 0.0  ;;  %v18034_v46 = vsel %vm13194_vm2, %v13291_v33, 0.0  ;;  %v18037_v33 = vsel %vm13150_vm14, %v13207_v3, 0.0 }
 0x14a   : > { %v13564_v6 = vld [vmem:[%s12280_s21 + $0x278] sm:$0xff]  ;;  %v13567_v47 = vld [vmem:[%s12280_s21 + $0x280] sm:$0xff]  ;;  %v13582_v0 = vld [vmem:[%s12280_s21 + $0x288] sm:$0xff]  ;;  %v1540_v41 = vsel %vm13190_vm1, %v13549_v39, 0.0  ;;  %v18028_v39 = vsel %vm13116_vm12, %v13146_v14, 0.0  ;;  %v18032_v14 = vsel %vm13116_vm12, %v13350_v12, 0.0 }
 0x14b   : > { %v13585_v31 = vld [vmem:[%s12280_s21 + $0x290] sm:$0xff]  ;;  %v13588_v62 = vld [vmem:[%s12280_s21 + $0x298] sm:$0xff]  ;;  %v13605_v21 = vld [vmem:[%s12280_s21 + $0x2a0] sm:$0xff]  ;;  %v1541_v34 = vsel %vm13190_vm1, %v13564_v6, 0.0  ;;  %v18035_v12 = vsel %vm13194_vm2, %v13294_v44, 0.0  ;;  %v18040_v3 = vsel %vm13173_vm15, %v13226_v52, 0.0 }
 0x14c   : > { %18022 = vst [vmem:[#allocation48_spill] sm:$0xff] %v13585_v31  ;;  %18023 = vst [vmem:[#allocation49_spill] sm:$0xff] %v13588_v62  ;;  %v13620_v25 = vld [vmem:[%s12280_s21 + $0x2a8] sm:$0xff]  ;;  %v13635_v1 = vld [vmem:[%s12280_s21 + $0x2b0] sm:$0xff]  ;;  %v1546_v61 = vsel %vm13194_vm2, %v13605_v21, 0.0  ;;  %v1603_v31 = vadd.f32 %v1602_v23, %v18027_v48  ;;  %v18029_v62 = vsel %vm13128_vm13, %v13170_v11, 0.0  ;;  %v1625_v23 = vadd.f32 %v18031_v2, %v18030_v10 }
 0x14d   : > { %v13650_v6 = vld [vmem:[%s12280_s21 + $0x2b8] sm:$0xff]  ;;  %v1612_v21 = vadd.f32 %v18029_v62, %v18028_v39  ;;  %v1547_v5 = vsel %vm13194_vm2, %v13620_v25, 0.0  ;;  %v1638_v11 = vadd.f32 %v1516_v22, %v18032_v14  ;;  %v18033_v62 = vsel %vm13116_vm12, %v13362_v42, 0.0  ;;  %v13691_v25 = vld [vmem:[%s12280_s21 + $0x2c0] sm:$0xff]  ;;  %v13709_v39 = vld [vmem:[%s12280_s21 + $0x2c8] sm:$0xff] }
 0x14e   : > { %v1651_v17 = vadd.f32 %v1517_v24, %v18033_v62  ;;  %v1548_v54 = vsel %vm13194_vm2, %v13635_v1, 0.0  ;;  %v1591_v48 = vadd.f32 %v1590_v8, %v18034_v46  ;;  %v1604_v22 = vadd.f32 %v1603_v31, %v18035_v12  ;;  %v1420_v31 = vld [vmem:[%s12280_s21 + $0x2d0] sm:$0xff]  ;;  %v13741_v12 = vld [vmem:[%s12280_s21 + $0x2e0] sm:$0xff] }
 0x14f   : > { %v18036_v42 = vsel %vm13150_vm14, %v13204_v32, 0.0  ;;  %v1549_v10 = vsel %vm13194_vm2, %v13650_v6, 0.0  ;;  %v1626_v8 = vadd.f32 %v1625_v23, %v18037_v33  ;;  %v1639_v2 = vadd.f32 %v1638_v11, %v1522_v27  ;;  %v13752_v33 = vld [vmem:[%s12280_s21 + $0x2e8] sm:$0xff] }
 0x150   : > { %v1613_v24 = vadd.f32 %v1612_v21, %v18036_v42  ;;  %v1652_v44 = vadd.f32 %v1651_v17, %v1523_v13  ;;  %v1567_v14 = vrot.slane %v13440_v58, 4  ;;  %v18038_v32 = vsel %vm13210_vm3, %v13327_v60, 0.0  ;;  %v1421_v13 = vld [vmem:[%s12280_s21 + $0x2d8] sm:$0xff]  ;;  %v18079_v49 = vld [vmem:[#allocation44_spill] sm:$0xff] }
 0x151   : > { %v1592_v21 = vadd.f32 %v1591_v48, %v18038_v32  ;;  %v18039_v62 = vsel %vm13210_vm3, %v13330_v35, 0.0  ;;  %v1550_v23 = vsel %vm13194_vm2, %v13691_v25, 0.0  ;;  %v18041_v60 = vsel %vm13173_vm15, %v13238_v50, 0.0 }
 0x152   : > { %v1605_v46 = vadd.f32 %v1604_v22, %v18039_v62  ;;  %v1614_v27 = vadd.f32 %v1613_v24, %v18040_v3  ;;  %v1627_v11 = vadd.f32 %v1626_v8, %v18041_v60  ;;  %v1640_v17 = vadd.f32 %v1639_v2, %v1528_v20  ;;  %v18045_v3 = vld [vmem:[#allocation33_spill] sm:$0xff] }
 0x153   : > { %v1653_v48 = vadd.f32 %v1652_v44, %v1529_v29  ;;  %v1551_v35 = vsel %vm13194_vm2, %v13709_v39, 0.0  ;;  %v1580_v52 = vrot.slane %v13484_v15, 4  ;;  %v1593_v22 = vrot.slane %v1592_v21, 4  ;;  %v18092_v39 = vld [vmem:[#allocation32_spill] sm:$0xff] }
 0x154   : > { %v18042_v42 = vsel %vm13177_vm0, %v13256_v55, 0.0  ;;  %v1552_v50 = vsel %vm13210_vm3, %v1420_v31, 0.0  ;;  %v18043_v29 = vsel %vm13177_vm0, %v13259_v30, 0.0  ;;  %v1641_v8 = vadd.f32 %v1640_v17, %v1534_v38 }
 0x155   : > { %v1615_v24 = vadd.f32 %v1614_v27, %v18042_v42  ;;  %v1628_v20 = vadd.f32 %v1627_v11, %v18043_v29  ;;  %v1654_v2 = vadd.f32 %v1653_v48, %v1535_v7  ;;  %v1553_v44 = vsel %vm13210_vm3, %v1421_v13, 0.0  ;;  %v13783_v48 = vld [vmem:[%s12280_s21 + $0x2f0] sm:$0xff] }
 0x156   : > { %v1568_v55 = vadd.f32 %v1567_v14, %v13440_v58  ;;  %v1606_v32 = vrot.slane %v1605_v46, 4  ;;  %v18044_v62 = vsel %vm13190_vm1, %v13276_v59, 0.0  ;;  %v1554_v30 = vsel %vm13210_vm3, %v13741_v12, 0.0  ;;  %v18047_v59 = vld [vmem:[#allocation34_spill] sm:$0xff] }
 0x157   : > { %v1616_v31 = vadd.f32 %v1615_v24, %v18044_v62  ;;  %v18046_v38 = vsel %vm13190_vm1, %v18045_v3, 0.0  ;;  %v1642_v27 = vadd.f32 %v1641_v8, %v1540_v41  ;;  %v1655_v60 = vadd.f32 %v1654_v2, %v1541_v34  ;;  %v13786_v12 = vld [vmem:[%s12280_s21 + $0x2f8] sm:$0xff]  ;;  %v18049_v41 = vld [vmem:[#allocation35_spill] sm:$0xff]  ;;  %v18054_v8 = vld [vmem:[#allocation36_spill] sm:$0xff] }
 0x158   : > { %v1629_v7 = vadd.f32 %v1628_v20, %v18046_v38  ;;  %v1555_v58 = vsel %vm13210_vm3, %v13752_v33, 0.0  ;;  %v1581_v14 = vadd.f32 %v1580_v52, %v13484_v15  ;;  %v1594_v13 = vadd.f32 %v1593_v22, %v1592_v21  ;;  %v18051_v15 = vld [vmem:[#allocation38_spill] sm:$0xff] }
 0x159   : > { %v18048_v11 = vsel %vm13194_vm2, %v18047_v59, 0.0  ;;  %v18050_v34 = vsel %vm13194_vm2, %v18049_v41, 0.0  ;;  %v1643_v24 = vadd.f32 %v1642_v27, %v1546_v61  ;;  %v1656_v29 = vadd.f32 %v1655_v60, %v1547_v5  ;;  %v18056_v61 = vld [vmem:[#allocation39_spill] sm:$0xff] }
 0x15a   : > { %v1617_v17 = vadd.f32 %v1616_v31, %v18048_v11  ;;  %v1630_v42 = vadd.f32 %v1629_v7, %v18050_v34  ;;  %v18052_v21 = vsel %vm13116_vm12, %v18051_v15, 0.0  ;;  %v18053_v52 = vsel %vm13128_vm13, %v13404_v36, 0.0  ;;  %v18059_v36 = vld [vmem:[#allocation37_spill] sm:$0xff] }
 0x15b   : > { %v1664_v22 = vadd.f32 %v18053_v52, %v18052_v21  ;;  %v1569_v33 = vrot.slane %v1568_v55, 2  ;;  %v1607_v20 = vadd.f32 %v1606_v32, %v1605_v46  ;;  %v18055_v2 = vsel %vm13210_vm3, %v18054_v8, 0.0  ;;  %v18065_v52 = vld [vmem:[#allocation47_spill] sm:$0xff] }
 0x15c   : > { %v1618_v62 = vadd.f32 %v1617_v17, %v18055_v2  ;;  %v18057_v5 = vsel %vm13116_vm12, %v18056_v61, 0.0  ;;  %v18058_v31 = vsel %vm13128_vm13, %v13407_v53, 0.0  ;;  %v18060_v38 = vsel %vm13210_vm3, %v18059_v36, 0.0  ;;  %v18069_v36 = vld [vmem:[#allocation40_spill] sm:$0xff] }
 0x15d   : > { %v1677_v3 = vadd.f32 %v18058_v31, %v18057_v5  ;;  %v1631_v7 = vadd.f32 %v1630_v42, %v18060_v38  ;;  %v1644_v46 = vadd.f32 %v1643_v24, %v1552_v50  ;;  %v1657_v32 = vadd.f32 %v1656_v29, %v1553_v44 }
 0x15e   : > { %v18061_v27 = vsel %vm13150_vm14, %v13443_v26, 0.0  ;;  %v1556_v59 = vsel %vm13210_vm3, %v13783_v48, 0.0  ;;  %v1557_v53 = vsel %vm13210_vm3, %v13786_v12, 0.0  ;;  %v1582_v11 = vrot.slane %v1581_v14, 2  ;;  %v18063_v26 = vld [vmem:[#allocation46_spill] sm:$0xff] }
 0x15f   : > { %v1665_v60 = vadd.f32 %v1664_v22, %v18061_v27  ;;  %v18062_v17 = vsel %vm13150_vm14, %v13446_v51, 0.0  ;;  %v1595_v44 = vrot.slane %v1594_v13, 2  ;;  %v1645_v41 = vrot.slane %v1644_v46, 4  ;;  %v18071_v27 = vld [vmem:[#allocation42_spill] sm:$0xff] }
 0x160   : > { %v1678_v50 = vadd.f32 %v1677_v3, %v18062_v17  ;;  %v1658_v34 = vrot.slane %v1657_v32, 4  ;;  %v18064_v42 = vsel %vm13173_vm15, %v18063_v26, 0.0  ;;  %v1570_v29 = vadd.f32 %v1569_v33, %v1568_v55 }
 0x161   : > { %v1666_v24 = vadd.f32 %v1665_v60, %v18064_v42  ;;  %v1608_v15 = vrot.slane %v1607_v20, 2  ;;  %v1619_v21 = vrot.slane %v1618_v62, 4  ;;  %v18066_v22 = vsel %vm13173_vm15, %v18065_v52, 0.0  ;;  %v18073_v60 = vld [vmem:[#allocation41_spill] sm:$0xff] }
 0x162   : > { %v1679_v8 = vadd.f32 %v1678_v50, %v18066_v22  ;;  %v1632_v2 = vrot.slane %v1631_v7, 4  ;;  %v1646_v61 = vadd.f32 %v1645_v41, %v1644_v46  ;;  %v1659_v51 = vadd.f32 %v1658_v34, %v1657_v32 }
 0x163   : > { %v18067_v5 = vsel %vm13177_vm0, %v13511_v4, 0.0  ;;  %v1583_v3 = vadd.f32 %v1582_v11, %v1581_v14  ;;  %v18068_v55 = vsel %vm13177_vm0, %v13528_v45, 0.0  ;;  %v18070_v38 = vsel %vm13116_vm12, %v18069_v36, 0.0  ;;  %v18075_v14 = vld [vmem:[#allocation43_spill] sm:$0xff] }
 0x164   : > { %v1667_v31 = vadd.f32 %v1666_v24, %v18067_v5  ;;  %v1680_v33 = vadd.f32 %v1679_v8, %v18068_v55  ;;  %v18072_v46 = vsel %vm13128_vm13, %v18071_v27, 0.0  ;;  %v18074_v4 = vsel %vm13116_vm12, %v18073_v60, 0.0 }
 0x165   : > { %v1690_v32 = vadd.f32 %v18072_v46, %v18070_v38  ;;  %v18076_v11 = vsel %vm13128_vm13, %v18075_v14, 0.0  ;;  %v1596_v45 = vadd.f32 %v1595_v44, %v1594_v13  ;;  %v1647_v50 = vrot.slane %v1646_v61, 2  ;;  %v18081_v13 = vld [vmem:[#allocation45_spill] sm:$0xff] }
 0x166   : > { %v1703_v17 = vadd.f32 %v18076_v11, %v18074_v4  ;;  %v1660_v41 = vrot.slane %v1659_v51, 2  ;;  %v18077_v34 = vsel %vm13190_vm1, %v13567_v47, 0.0  ;;  %v1620_v42 = vadd.f32 %v1619_v21, %v1618_v62 }
 0x167   : > { %v1668_v26 = vadd.f32 %v1667_v31, %v18077_v34  ;;  %v18078_v18 = vsel %vm13190_vm1, %v13582_v0, 0.0  ;;  %v18080_v52 = vsel %vm13150_vm14, %v18079_v49, 0.0  ;;  %v18082_v44 = vsel %vm13150_vm14, %v18081_v13, 0.0 }
 0x168   : > { %v1681_v24 = vadd.f32 %v1680_v33, %v18078_v18  ;;  %v1691_v22 = vadd.f32 %v1690_v32, %v18080_v52  ;;  %v1704_v8 = vadd.f32 %v1703_v17, %v18082_v44  ;;  %v1609_v5 = vadd.f32 %v1608_v15, %v1607_v20 }
 0x169   : > { %v1633_v55 = vadd.f32 %v1632_v2, %v1631_v7  ;;  %v1648_v47 = vadd.f32 %v1647_v50, %v1646_v61  ;;  %v1669_v62 = vadd.f32 %v1668_v26, %v1548_v54  ;;  %v1661_v0 = vadd.f32 %v1660_v41, %v1659_v51 }
 0x16a   : > { %v1682_v21 = vadd.f32 %v1681_v24, %v1549_v10  ;;  %v1692_v31 = vadd.f32 %v1691_v22, %v18083_v9  ;;  %v18084_v20 = vsel %vm13173_vm15, %v13490_v16, 0.0  ;;  %v1571_v15 = vrot.slane %v1570_v29, 1 }
 0x16b   : > { %v1705_v7 = vadd.f32 %v1704_v8, %v18084_v20  ;;  %v1584_v2 = vrot.slane %v1583_v3, 1  ;;  %v1597_v1 = vrot.slane %v1596_v45, 1  ;;  %v1670_v54 = vadd.f32 %v1669_v62, %v1554_v30  ;;  %v18087_v30 = vld [vmem:[#allocation48_spill] sm:$0xff] }
 0x16c   : > { %v1621_v61 = vrot.slane %v1620_v42, 2  ;;  %v1683_v51 = vadd.f32 %v1682_v21, %v1555_v58  ;;  %v18085_v6 = vsel %vm13177_vm0, %v13531_v43, 0.0  ;;  %v18086_v37 = vsel %vm13177_vm0, %v13546_v56, 0.0  ;;  %v18089_v43 = vld [vmem:[#allocation49_spill] sm:$0xff] }
 0x16d   : > { %v1693_v10 = vadd.f32 %v1692_v31, %v18085_v6  ;;  %v1706_v33 = vadd.f32 %v1705_v7, %v18086_v37  ;;  %v1610_v19 = vrot.slane %v1609_v5, 1  ;;  %v1634_v36 = vrot.slane %v1633_v55, 2 }
 0x16e   : > { %v1649_v16 = vrot.slane %v1648_v47, 1  ;;  %v1671_v38 = vrot.slane %v1670_v54, 4  ;;  %v1662_v27 = vrot.slane %v1661_v0, 1  ;;  %v1684_v46 = vrot.slane %v1683_v51, 4 }
 0x16f   : > { %v18088_v58 = vsel %vm13190_vm1, %v18087_v30, 0.0  ;;  %v18090_v60 = vsel %vm13190_vm1, %v18089_v43, 0.0  ;;  %v1572_v57 = vadd.f32 %v1571_v15, %v1570_v29  ;;  %v1585_v14 = vadd.f32 %v1584_v2, %v1583_v3  ;;  %v1558_v30 = vld [vmem:[#allocation2 + $0xc] sm:$0xff] }
 0x170   : > { %v1694_v32 = vadd.f32 %v1693_v10, %v18088_v58  ;;  %v1707_v4 = vadd.f32 %v1706_v33, %v18090_v60  ;;  %v1598_v56 = vadd.f32 %v1597_v1, %v1596_v45  ;;  %v1672_v11 = vadd.f32 %v1671_v38, %v1670_v54 }
 0x171   : > { %v1622_v17 = vadd.f32 %v1621_v61, %v1620_v42  ;;  %v1685_v50 = vadd.f32 %v1684_v46, %v1683_v51  ;;  %v1611_v28 = vadd.f32 %v1610_v19, %v1609_v5  ;;  %v1635_v26 = vadd.f32 %v1634_v36, %v1633_v55 }
 0x172   : > { %v1695_v41 = vadd.f32 %v1694_v32, %v1550_v23  ;;  %v1708_v34 = vadd.f32 %v1707_v4, %v1551_v35  ;;  %v1650_v18 = vadd.f32 %v1649_v16, %v1648_v47  ;;  %v1673_v24 = vrot.slane %v1672_v11, 2  ;;  %v18091_v23 = vld [vmem:[#allocation31_spill] sm:$0xff] }
 0x173   : > { %v1663_v29 = vadd.f32 %v1662_v27, %v1661_v0  ;;  %v1686_v3 = vrot.slane %v1685_v50, 2  ;;  %v18093_v35 = vunpack.c.0.s8 %v18092_v39  ;;  %v1623_v49 = vrot.slane %v1622_v17, 1 }
 0x174   : > { %v1696_v45 = vadd.f32 %v1695_v41, %v1556_v59  ;;  %v1709_v25 = vadd.f32 %v1708_v34, %v1557_v53  ;;  %v1674_v63 = vadd.f32 %v1673_v24, %v1672_v11  ;;  %v1636_v44 = vrot.slane %v1635_v26, 1 }
 0x175   : > { %v1735_v42 = vsub.s32 %v18093_v35, %v18091_v23  ;;  %v1687_v52 = vadd.f32 %v1686_v3, %v1685_v50  ;;  %v1728_v5 = vcombine.low %v1572_v57, %v1585_v14  ;;  %v1729_v55 = vcombine.low %v1598_v56, %v1611_v28  ;;  %v1559_v14 = vld [vmem:[#allocation2 + $0x14] sm:$0xf] }
 0x176   : > { %v1697_v22 = vrot.slane %v1696_v45, 4  ;;  %v1710_v13 = vrot.slane %v1709_v25, 4  ;;  %v1675_v8 = vrot.slane %v1674_v63, 1  ;;  %v1753_v40 = vcombine.low %v1650_v18, %v1663_v29 }
 0x177   : > { %v1688_v48 = vrot.slane %v1687_v52, 1  ;;  %v1624_v21 = vadd.f32 %v1623_v49, %v1622_v17  ;;  %v1637_v9 = vadd.f32 %v1636_v44, %v1635_v26  ;;  %v1736_v31 = vrot.slane %v1728_v5, %v1735_v42 }
 0x178   : > { %v1698_v59 = vadd.f32 %v1697_v22, %v1696_v45  ;;  %v1711_v47 = vadd.f32 %v1710_v13, %v1709_v25  ;;  %v1676_v62 = vadd.f32 %v1675_v8, %v1674_v63  ;;  %v1743_v20 = vrot.slane %v1729_v55, %v1735_v42 }
 0x179   : > { %v1689_v12 = vadd.f32 %v1688_v48, %v1687_v52  ;;  %v1761_v1 = vrot.slane %v1753_v40, %v1735_v42  ;;  %v1745_v6 = vcombine.low %v1624_v21, %v1637_v9 }
 0x17a   : > { %v1699_v53 = vrot.slane %v1698_v59, 2  ;;  %v1712_v0 = vrot.slane %v1711_v47, 2  ;;  %v1744_v33 = vcombine.low %v1736_v31, %v1743_v20 }
 0x17b   : > { %v1754_v2 = vcombine.low %v1676_v62, %v1689_v12  ;;  %v1752_v38 = vrot.slane %v1745_v6, %v1735_v42 }
 0x17c   : > { %v1700_v7 = vadd.f32 %v1699_v53, %v1698_v59  ;;  %v1713_v15 = vadd.f32 %v1712_v0, %v1711_v47 }
 0x17d   : > { %v1768_v51 = vrot.slane %v1754_v2, %v1735_v42 }
 0x17e   : > { %v1701_v54 = vrot.slane %v1700_v7, 1  ;;  %v1714_v61 = vrot.slane %v1713_v15, 1 }
 0x17f   : > { %v1769_v19 = vcombine.low %v1761_v1, %v1768_v51 }
 0x180   : > { %v1702_v10 = vadd.f32 %v1701_v54, %v1700_v7  ;;  %v1715_v37 = vadd.f32 %v1714_v61, %v1713_v15 }
 0x181   : > { %v1782_v16 = vrot.slane %v1769_v19, 7 }
 0x182   : > { %v1770_v36 = vcombine.low %v1702_v10, %v1715_v37 }
 0x183   : > { %v1784_v46 = vsel %vm1783_vm4, %v1782_v16, %v1744_v33 }
 0x184   : > { %v1777_v27 = vrot.slane %v1770_v36, %v1735_v42  ;;  %v1786_v58 = vsel %vm1785_vm5, %v1782_v16, %v1784_v46 }
 0x185   : > { %v1788_v32 = vsel %vm1787_vm6, %v1782_v16, %v1786_v58 }
 0x186   : > { %v1793_v43 = vrot.slane %v1777_v27, 7  ;;  %v1790_v60 = vsel %vm1789_vm7, %v1782_v16, %v1788_v32 }
 0x187   : > { %v1800_v57 = vadd.f32 %v1790_v60, %v1558_v30 }
 0x188   : > { %v1794_v4 = vsel %vm1783_vm4, %v1793_v43, %v1752_v38 }
 0x189   : > { %v1795_v56 = vsel %vm1785_vm5, %v1793_v43, %v1794_v4  ;;  %1802 = vst [vmem:[#allocation2 + $0xc] sm:$0xff] %v1800_v57 }
 0x18a   : > { %v1796_v11 = vsel %vm1787_vm6, %v1793_v43, %v1795_v56 }
 0x18b   : > { %v1797_v17 = vsel %vm1789_vm7, %v1793_v43, %v1796_v11 }
 0x18c   : > { %v1801_v50 = vadd.f32 %v1797_v17, %v1559_v14 }
 0x18e   : > { %1803 = vst [vmem:[#allocation2 + $0x14] sm:$0xf] %v1801_v50 }
 0x18f PF: > { %p8528_p0 = scmp.ne.s32.totalorder %s11782_s18, 5 }
 0x191   : > { %1807 = sbr.rel (%p8528_p0) target bundleno = 2405 (0x965), region = 129 }
 0x196   : > { %v9798_v41 = vld [vmem:[%s17441_s2 + $0x78] sm:$0xff]   ;;  %v9797_v45 = vld [vmem:[%s17441_s2 + $0x70] sm:$0xff]   ;;  %v9796_v8 = vld [vmem:[%s17441_s2 + $0x68] sm:$0xff]   ;;  %v1815_v19 = vlaneseq  ;;  %vm2791_vm8 = vcmask 523264  }
 0x197   : > { %v9814_v34 = vld [vmem:[%s17441_s2 + $0xf8] sm:$0xff]   ;;  %v13939_v26 = vunpack.c.h.bf16 %v9798_v41  ;;  %v13948_v3 = vunpack.c.l.bf16 %v9798_v41  ;;  %v9813_v25 = vld [vmem:[%s17441_s2 + $0xf0] sm:$0xff]   ;;  %v13972_v52 = vunpack.c.h.bf16 %v9797_v45  ;;  %v9812_v5 = vld [vmem:[%s17441_s2 + $0xe8] sm:$0xff]   ;;  %v13990_v55 = vunpack.c.l.bf16 %v9797_v45 }
 0x198   : > { %v9790_v28 = vld [vmem:[%s17441_s2 + $0x38] sm:$0xff]   ;;  %v13941_v18 = vunpack.c.h.bf16 %v9814_v34  ;;  %v13958_v23 = vunpack.c.l.bf16 %v9814_v34  ;;  %v9789_v42 = vld [vmem:[%s17441_s2 + $0x30] sm:$0xff]   ;;  %v13974_v22 = vunpack.c.h.bf16 %v9813_v25  ;;  %v13992_v48 = vunpack.c.l.bf16 %v9813_v25  ;;  %v9788_v59 = vld [vmem:[%s17441_s2 + $0x28] sm:$0xff]  }
 0x199   : > { %v13943_v24 = vunpack.c.h.bf16 %v9790_v28  ;;  %v9806_v29 = vld [vmem:[%s17441_s2 + $0xb8] sm:$0xff]   ;;  %18096 = vst [vmem:[#allocation52_spill] sm:$0xff] %v13948_v3  ;;  %v13960_v39 = vunpack.c.l.bf16 %v9790_v28  ;;  %v9805_v49 = vld [vmem:[%s17441_s2 + $0xb0] sm:$0xff]   ;;  %9879 = vmatprep.subr.mxu0 %v13939_v26  ;;  %18101 = vst [vmem:[#allocation57_spill] sm:$0xff] %v13972_v52  ;;  %v13978_v13 = vunpack.c.h.bf16 %v9789_v42  ;;  %v14002_v40 = vunpack.c.l.bf16 %v9789_v42 }
 0x19a   : > { %18094 = vst [vmem:[#allocation50_spill] sm:$0xff] %v13941_v18  ;;  %v13956_v63 = vunpack.c.h.bf16 %v9806_v29  ;;  %18098 = vst [vmem:[#allocation54_spill] sm:$0xff] %v13958_v23  ;;  %v13962_v35 = vunpack.c.l.bf16 %v9806_v29  ;;  %9914 = vmatprep.subr.mxu1 %v13941_v18  ;;  %v13980_v44 = vunpack.c.h.bf16 %v9805_v49  ;;  %v9804_v47 = vld [vmem:[%s17441_s2 + $0xa8] sm:$0xff]   ;;  %v14004_v62 = vunpack.c.l.bf16 %v9805_v49  ;;  %v9795_v9 = vld [vmem:[%s17441_s2 + $0x60] sm:$0xff]  }
 0x19b   : > { %18095 = vst [vmem:[#allocation51_spill] sm:$0xff] %v13943_v24  ;;  %18099 = vst [vmem:[#allocation55_spill] sm:$0xff] %v13960_v39  ;;  %9880 = vmatpush3.msra.mxu0 %v13943_v24  ;;  %v14008_v12 = vunpack.c.h.bf16 %v9796_v8  ;;  %v14010_v53 = vunpack.c.h.bf16 %v9812_v5  ;;  %v14014_v0 = vunpack.c.h.bf16 %v9788_v59  ;;  %v14016_v21 = vunpack.c.h.bf16 %v9804_v47  ;;  %v9811_v31 = vld [vmem:[%s17441_s2 + $0xe0] sm:$0xff]   ;;  %v9794_v37 = vld [vmem:[%s17441_s2 + $0x58] sm:$0xff]  }
 0x19c   : > { %18097 = vst [vmem:[#allocation53_spill] sm:$0xff] %v13956_v63  ;;  %18100 = vst [vmem:[#allocation56_spill] sm:$0xff] %v13962_v35  ;;  %9915 = vmatpush3.msra.mxu1 %v13956_v63  ;;  %9881 = vmatprep.subr.mxu0 %v13948_v3  ;;  %v14026_v20 = vunpack.c.l.bf16 %v9796_v8  ;;  %v14028_v7 = vunpack.c.l.bf16 %v9812_v5  ;;  %v9787_v15 = vld [vmem:[%s17441_s2 + $0x20] sm:$0xff]   ;;  %v14038_v1 = vunpack.c.l.bf16 %v9788_v59  ;;  %v14040_v54 = vunpack.c.l.bf16 %v9804_v47  ;;  %v9810_v33 = vld [vmem:[%s17441_s2 + $0xd8] sm:$0xff]  }
 0x19d   : > { %18102 = vst [vmem:[#allocation58_spill] sm:$0xff] %v13974_v22  ;;  %18103 = vst [vmem:[#allocation59_spill] sm:$0xff] %v13978_v13  ;;  %9916 = vmatprep.subr.mxu1 %v13958_v23  ;;  %9882 = vmatpush3.msra.mxu0 %v13960_v39  ;;  %v9803_v2 = vld [vmem:[%s17441_s2 + $0xa0] sm:$0xff]   ;;  %v14044_v61 = vunpack.c.h.bf16 %v9795_v9  ;;  %v14046_v51 = vunpack.c.h.bf16 %v9811_v31  ;;  %v14050_v6 = vunpack.c.h.bf16 %v9787_v15  ;;  %v14062_v36 = vunpack.c.l.bf16 %v9795_v9  ;;  %v9786_v38 = vld [vmem:[%s17441_s2 + $0x18] sm:$0xff]  }
 0x19e   : > { %18104 = vst [vmem:[#allocation60_spill] sm:$0xff] %v13980_v44  ;;  %18105 = vst [vmem:[#allocation61_spill] sm:$0xff] %v13990_v55  ;;  %9917 = vmatpush3.msra.mxu1 %v13962_v35  ;;  %9883 = vmatprep.subr.mxu0 %v13972_v52  ;;  %v14052_v10 = vunpack.c.h.bf16 %v9803_v2  ;;  %v14064_v16 = vunpack.c.l.bf16 %v9811_v31  ;;  %v9802_v27 = vld [vmem:[%s17441_s2 + $0x98] sm:$0xff]   ;;  %v14074_v46 = vunpack.c.l.bf16 %v9787_v15  ;;  %v14076_v30 = vunpack.c.l.bf16 %v9803_v2  ;;  %v9793_v57 = vld [vmem:[%s17441_s2 + $0x50] sm:$0xff]  }
 0x19f   : > { %18106 = vst [vmem:[#allocation62_spill] sm:$0xff] %v13992_v48  ;;  %18107 = vst [vmem:[#allocation63_spill] sm:$0xff] %v14002_v40  ;;  %9918 = vmatprep.subr.mxu1 %v13974_v22  ;;  %9884 = vmatpush3.msra.mxu0 %v13978_v13  ;;  %v14080_v58 = vunpack.c.h.bf16 %v9794_v37  ;;  %v14082_v32 = vunpack.c.h.bf16 %v9810_v33  ;;  %v14086_v43 = vunpack.c.h.bf16 %v9786_v38  ;;  %v14088_v60 = vunpack.c.h.bf16 %v9802_v27  ;;  %v9809_v14 = vld [vmem:[%s17441_s2 + $0xd0] sm:$0xff]   ;;  %v14117_v28 = vld [vmem:[%s17442_s3] sm:$0xff] }
 0x1a0   : > { %18108 = vst [vmem:[#allocation64_spill] sm:$0xff] %v14004_v62  ;;  %18109 = vst [vmem:[#allocation65_spill] sm:$0xff] %v14008_v12  ;;  %9919 = vmatpush3.msra.mxu1 %v13980_v44  ;;  %9885 = vmatprep.subr.mxu0 %v13990_v55  ;;  %v14090_v4 = vunpack.c.l.bf16 %v9794_v37  ;;  %v9785_v56 = vld [vmem:[%s17441_s2 + $0x10] sm:$0xff]   ;;  %v14101_v11 = vshrl.u32 %v1815_v19, 7  ;;  %v14105_v17 = vunpack.c.l.bf16 %v9810_v33  ;;  %v14107_v50 = vunpack.c.l.bf16 %v9786_v38  ;;  %v9792_v15 = vld [vmem:[%s17441_s2 + $0x48] sm:$0xff]  }
 0x1a1   : > { %18110 = vst [vmem:[#allocation66_spill] sm:$0xff] %v14010_v53  ;;  %18111 = vst [vmem:[#allocation67_spill] sm:$0xff] %v14014_v0  ;;  %9920 = vmatprep.subr.mxu1 %v13992_v48  ;;  %9886 = vmatpush3.msra.mxu0 %v14002_v40  ;;  %v14109_v41 = vunpack.c.l.bf16 %v9802_v27  ;;  %v9801_v34 = vld [vmem:[%s17441_s2 + $0x90] sm:$0xff]   ;;  %v11699_v29 = vmov 1983009808   ;;  %v14135_v5 = vunpack.c.h.bf16 %v9793_v57  ;;  %v14137_v59 = vunpack.c.h.bf16 %v9809_v14  ;;  %v9808_v2 = vld [vmem:[%s17441_s2 + $0xc8] sm:$0xff]  }
 0x1a2   : > { %18112 = vst [vmem:[#allocation68_spill] sm:$0xff] %v14016_v21  ;;  %18113 = vst [vmem:[#allocation69_spill] sm:$0xff] %v14026_v20  ;;  %9921 = vmatpush3.msra.mxu1 %v14004_v62  ;;  %9887 = vmatprep.subr.mxu0 %v14008_v12  ;;  %v1866_v45 = vunpack.c.l.s4 %v11699_v29  ;;  %v14122_v25 = vsub.s32 0, %v14101_v11  ;;  %v14125_v42 = vsub.s32 1, %v14101_v11  ;;  %v14128_v49 = vsub.s32 2, %v14101_v11  ;;  %v9784_v29 = vld [vmem:[%s17441_s2 + $0x8] sm:$0xff]  }
 0x1a3   : > { %18114 = vst [vmem:[#allocation70_spill] sm:$0xff] %v14028_v7  ;;  %18115 = vst [vmem:[#allocation71_spill] sm:$0xff] %v14038_v1  ;;  %9922 = vmatprep.subr.mxu1 %v14010_v53  ;;  %9888 = vmatpush3.msra.mxu0 %v14014_v0  ;;  %v14131_v8 = vsub.s32 3, %v14101_v11  ;;  %v14139_v47 = vunpack.c.h.bf16 %v9785_v56  ;;  %v14143_v31 = vunpack.c.h.bf16 %v9801_v34  ;;  %v14159_v38 = vunpack.c.l.bf16 %v9793_v57 }
 0x1a4   : > { %18116 = vst [vmem:[#allocation72_spill] sm:$0xff] %v14040_v54  ;;  %18117 = vst [vmem:[#allocation73_spill] sm:$0xff] %v14044_v61  ;;  %9923 = vmatpush3.msra.mxu1 %v14016_v21  ;;  %9889 = vmatprep.subr.mxu0 %v14026_v20  ;;  %v1867_v9 = vunpack.c.0.s8 %v1866_v45  ;;  %v1818_v37 = vrot.slane %v14117_v28, %v14122_v25  ;;  %v1822_v33 = vrot.slane %v14117_v28, %v14125_v42  ;;  %v9800_v45 = vld [vmem:[%s17441_s2 + $0x88] sm:$0xff]  }
 0x1a5   : > { %18118 = vst [vmem:[#allocation74_spill] sm:$0xff] %v14046_v51  ;;  %18119 = vst [vmem:[#allocation75_spill] sm:$0xff] %v14050_v6  ;;  %9924 = vmatprep.subr.mxu1 %v14028_v7  ;;  %9890 = vmatpush3.msra.mxu0 %v14038_v1  ;;  %v1826_v19 = vrot.slane %v14117_v28, %v14128_v49  ;;  %v14161_v27 = vunpack.c.l.bf16 %v9809_v14  ;;  %v14176_v57 = vunpack.c.l.bf16 %v9785_v56  ;;  %v14178_v14 = vunpack.c.l.bf16 %v9801_v34  ;;  %v9791_v34 = vld [vmem:[%s17441_s2 + $0x40] sm:$0xff]  }
 0x1a6   : > { %18120 = vst [vmem:[#allocation76_spill] sm:$0xff] %v14052_v10  ;;  %18121 = vst [vmem:[#allocation77_spill] sm:$0xff] %v14062_v36  ;;  %9925 = vmatpush3.msra.mxu1 %v14040_v54  ;;  %9891 = vmatprep.subr.mxu0 %v14044_v61  ;;  %v14190_v56 = vunpack.c.h.bf16 %v9800_v45 }
 0x1a7   : > { %18122 = vst [vmem:[#allocation78_spill] sm:$0xff] %v14064_v16  ;;  %18123 = vst [vmem:[#allocation79_spill] sm:$0xff] %v14074_v46  ;;  %9926 = vmatprep.subr.mxu1 %v14046_v51  ;;  %9892 = vmatpush3.msra.mxu0 %v14050_v6 }
 0x1a8   : > { %18124 = vst [vmem:[#allocation80_spill] sm:$0xff] %v14076_v30  ;;  %18125 = vst [vmem:[#allocation81_spill] sm:$0xff] %v14080_v58  ;;  %9927 = vmatpush3.msra.mxu1 %v14052_v10  ;;  %9893 = vmatprep.subr.mxu0 %v14062_v36 }
 0x1a9   : > { %18126 = vst [vmem:[#allocation82_spill] sm:$0xff] %v14082_v32  ;;  %18127 = vst [vmem:[#allocation83_spill] sm:$0xff] %v14086_v43  ;;  %9928 = vmatprep.subr.mxu1 %v14064_v16  ;;  %9894 = vmatpush3.msra.mxu0 %v14074_v46 }
 0x1aa   : > { %18128 = vst [vmem:[#allocation84_spill] sm:$0xff] %v14088_v60  ;;  %18129 = vst [vmem:[#allocation85_spill] sm:$0xff] %v14090_v4  ;;  %9929 = vmatpush3.msra.mxu1 %v14076_v30  ;;  %9895 = vmatprep.subr.mxu0 %v14080_v58 }
 0x1ab   : > { %18130 = vst [vmem:[#allocation86_spill] sm:$0xff] %v14105_v17  ;;  %18131 = vst [vmem:[#allocation87_spill] sm:$0xff] %v14107_v50  ;;  %9930 = vmatprep.subr.mxu1 %v14082_v32  ;;  %9896 = vmatpush3.msra.mxu0 %v14086_v43  ;;  %v14172_v43 = vsub.s32 %v1867_v9, %v14101_v11  ;;  %v14184_v32 = vunpack.c.h.bf16 %v9808_v2  ;;  %v14188_v9 = vunpack.c.h.bf16 %v9784_v29 }
 0x1ac   : > { %18132 = vst [vmem:[#allocation88_spill] sm:$0xff] %v14109_v41  ;;  %18133 = vst [vmem:[#allocation89_spill] sm:$0xff] %v14122_v25  ;;  %9931 = vmatpush3.msra.mxu1 %v14088_v60  ;;  %9897 = vmatprep.subr.mxu0 %v14090_v4  ;;  %v1830_v60 = vrot.slane %v14117_v28, %v14131_v8  ;;  %v14182_v4 = vunpack.c.h.bf16 %v9792_v15 }
 0x1ad   : > { %18134 = vst [vmem:[#allocation90_spill] sm:$0xff] %v14125_v42  ;;  %18135 = vst [vmem:[#allocation91_spill] sm:$0xff] %v14128_v49  ;;  %9932 = vmatprep.subr.mxu1 %v14105_v17  ;;  %9898 = vmatpush3.msra.mxu0 %v14107_v50  ;;  %v1863_v17 = vcombine.low %v1818_v37, %v1822_v33  ;;  %v9807_v37 = vld [vmem:[%s17441_s2 + $0xc0] sm:$0xff]  }
 0x1ae   : > { %18136 = vst [vmem:[#allocation92_spill] sm:$0xff] %v14131_v8  ;;  %18137 = vst [vmem:[#allocation93_spill] sm:$0xff] %v14135_v5  ;;  %9933 = vmatpush3.msra.mxu1 %v14109_v41  ;;  %9899 = vmatprep.subr.mxu0 %v14135_v5  ;;  %v1864_v58 = vcombine.low %v1826_v19, %v1830_v60  ;;  %v14201_v60 = vunpack.c.l.bf16 %v9792_v15  ;;  %v14203_v19 = vunpack.c.l.bf16 %v9808_v2  ;;  %v14216_v15 = vunpack.c.l.bf16 %v9800_v45  ;;  %v1808_v2 = vld [vmem:[#allocation2] sm:$0xff]  ;;  %v9830_v45 = vld [vmem:[%s17441_s2 + $0x178] sm:$0xff]  }
 0x1af   : > { %18138 = vst [vmem:[#allocation94_spill] sm:$0xff] %v14137_v59  ;;  %18139 = vst [vmem:[#allocation95_spill] sm:$0xff] %v14139_v47  ;;  %9934 = vmatprep.subr.mxu1 %v14137_v59  ;;  %9900 = vmatpush3.msra.mxu0 %v14139_v47  ;;  %v1871_v33 = vrot.slane %v1863_v17, %v14172_v43  ;;  %v9799_v47 = vld [vmem:[%s17441_s2 + $0x80] sm:$0xff]   ;;  %v14214_v17 = vunpack.c.l.bf16 %v9784_v29 }
 0x1b0   : > { %18140 = vst [vmem:[#allocation96_spill] sm:$0xff] %v14143_v31  ;;  %18141 = vst [vmem:[#allocation97_spill] sm:$0xff] %v14159_v38  ;;  %9935 = vmatpush3.msra.mxu1 %v14143_v31  ;;  %9901 = vmatprep.subr.mxu0 %v14159_v38  ;;  %v9401_v31 = vld [vmem:[%s17441_s2] sm:$0xff]   ;;  %v1878_v59 = vrot.slane %v1864_v58, %v14172_v43  ;;  %v14222_v38 = vunpack.c.h.bf16 %v9807_v37  ;;  %v14228_v29 = vunpack.c.h.bf16 %v9799_v47 }
 0x1b1   : > { %18142 = vst [vmem:[#allocation98_spill] sm:$0xff] %v14161_v27  ;;  %18143 = vst [vmem:[#allocation99_spill] sm:$0xff] %v14172_v43  ;;  %9936 = vmatprep.subr.mxu1 %v14161_v27  ;;  %9902 = vmatpush3.msra.mxu0 %v14176_v57  ;;  %v14220_v27 = vunpack.c.h.bf16 %v9791_v34  ;;  %v14226_v58 = vunpack.c.h.bf16 %v9401_v31 }
 0x1b2   : > { %18144 = vst [vmem:[#allocation100_spill] sm:$0xff] %v14176_v57  ;;  %18145 = vst [vmem:[#allocation101_spill] sm:$0xff] %v14178_v14  ;;  %9937 = vmatpush3.msra.mxu1 %v14178_v14  ;;  %9903 = vmatprep.subr.mxu0 %v14182_v4  ;;  %v1879_v5 = vcombine.low %v1871_v33, %v1878_v59  ;;  %v9846_v33 = vld [vmem:[%s17441_s2 + $0x1f8] sm:$0xff]   ;;  %v1845_v14 = vsub.s32 7, %v14101_v11 }
 0x1b3   : > { %18146 = vst [vmem:[#allocation102_spill] sm:$0xff] %v14182_v4  ;;  %18147 = vst [vmem:[#allocation103_spill] sm:$0xff] %v14184_v32  ;;  %9938 = vmatprep.subr.mxu1 %v14184_v32  ;;  %9904 = vmatpush3.msra.mxu0 %v14188_v9  ;;  %v14235_v32 = vunpack.c.l.bf16 %v9791_v34  ;;  %v14237_v4 = vunpack.c.l.bf16 %v9807_v37  ;;  %v9822_v34 = vld [vmem:[%s17441_s2 + $0x138] sm:$0xff]  }
 0x1b4   : > { %18148 = vst [vmem:[#allocation104_spill] sm:$0xff] %v14188_v9  ;;  %18149 = vst [vmem:[#allocation105_spill] sm:$0xff] %v14190_v56  ;;  %9939 = vmatpush3.msra.mxu1 %v14190_v56  ;;  %9905 = vmatprep.subr.mxu0 %v14201_v60  ;;  %v14239_v59 = vmul.f32 %v1879_v5, %v1808_v2  ;;  %v14246_v56 = vunpack.c.l.bf16 %v9401_v31  ;;  %v14248_v9 = vunpack.c.l.bf16 %v9799_v47  ;;  %v14259_v2 = vunpack.c.h.bf16 %v9830_v45  ;;  %v9838_v31 = vld [vmem:[%s17441_s2 + $0x1b8] sm:$0xff]  }
 0x1b5   : > { %18150 = vst [vmem:[#allocation106_spill] sm:$0xff] %v14201_v60  ;;  %18151 = vst [vmem:[#allocation107_spill] sm:$0xff] %v14203_v19  ;;  %9940 = vmatprep.subr.mxu1 %v14203_v19  ;;  %9906 = vmatpush3.msra.mxu0 %v14214_v17  ;;  %v14263_v47 = vunpack.c.h.bf16 %v9846_v33  ;;  %v14292_v19 = vunpack.c.l.bf16 %v9822_v34  ;;  %v1846_v50 = vrot.slane %v14117_v28, %v1845_v14  ;;  %v9826_v14 = vld [vmem:[%s17441_s2 + $0x158] sm:$0xff]  }
 0x1b6   : > { %18152 = vst [vmem:[#allocation108_spill] sm:$0xff] %v14214_v17  ;;  %18153 = vst [vmem:[#allocation109_spill] sm:$0xff] %v14216_v15  ;;  %9941 = vmatpush3.msra.mxu1 %v14216_v15  ;;  %9907 = vmatprep.subr.mxu0 %v14220_v27  ;;  %v2314_v5 = vrot.slane %v14239_v59, %v14172_v43  ;;  %v2307_v37 = vcombine.high %v14239_v59, %v14239_v59  ;;  %v9821_v15 = vld [vmem:[%s17441_s2 + $0x130] sm:$0xff]   ;;  %v14290_v17 = vunpack.c.h.bf16 %v9838_v31 }
 0x1b7   : > { %18154 = vst [vmem:[#allocation110_spill] sm:$0xff] %v14220_v27  ;;  %18155 = vst [vmem:[#allocation111_spill] sm:$0xff] %v14222_v38  ;;  %9942 = vmatprep.subr.mxu1 %v14222_v38  ;;  %9908 = vmatpush3.msra.mxu0 %v14226_v58 }
 0x1b8   : > { %18156 = vst [vmem:[#allocation112_spill] sm:$0xff] %v14226_v58  ;;  %18157 = vst [vmem:[#allocation113_spill] sm:$0xff] %v14228_v29  ;;  %9943 = vmatpush3.msra.mxu1 %v14228_v29  ;;  %9909 = vmatprep.subr.mxu0 %v14235_v32  ;;  %v2322_v38 = vcombine.high %v2314_v5, %v2314_v5  ;;  %v2321_v27 = vrot.slane %v2307_v37, %v14172_v43  ;;  %v9829_v58 = vld [vmem:[%s17441_s2 + $0x170] sm:$0xff]  }
 0x1b9   : > { %18158 = vst [vmem:[#allocation114_spill] sm:$0xff] %v14235_v32  ;;  %18159 = vst [vmem:[#allocation115_spill] sm:$0xff] %v14237_v4  ;;  %9944 = vmatprep.subr.mxu1 %v14237_v4  ;;  %v9845_v29 = vld [vmem:[%s17441_s2 + $0x1f0] sm:$0xff]   ;;  %9910 = vmatpush3.msra.mxu0 %v14246_v56  ;;  %v14284_v4 = vunpack.c.l.bf16 %v9830_v45  ;;  %v14298_v45 = vunpack.c.l.bf16 %v9846_v33 }
 0x1ba   : > { %18160 = vst [vmem:[#allocation116_spill] sm:$0xff] %v14239_v59  ;;  %18161 = vst [vmem:[#allocation117_spill] sm:$0xff] %v14246_v56  ;;  %v14271_v59 = vunpack.c.h.bf16 %v9822_v34  ;;  %9945 = vmatpush3.msra.mxu1 %v14248_v9  ;;  %v9837_v37 = vld [vmem:[%s17441_s2 + $0x1b0] sm:$0xff]   ;;  %2434 = vmatprep.mubr.f32.mxu0 %v2322_v38  ;;  %v2323_v32 = vcombine.high %v2321_v27, %v2321_v27  ;;  %v9828_v56 = vld [vmem:[%s17441_s2 + $0x168] sm:$0xff]   ;;  %v14306_v34 = vunpack.c.l.bf16 %v9838_v31  ;;  %v14314_v33 = vunpack.c.h.bf16 %v9845_v29 }
 0x1bb   : > { %18162 = vst [vmem:[#allocation118_spill] sm:$0xff] %v14248_v9  ;;  %18163 = vst [vmem:[#allocation119_spill] sm:$0xff] %v14259_v2  ;;  %9949 = vmatprep.subr.mxu0 %v14259_v2  ;;  %2435 = vmatmul.mubr.f32.vlgmr.msra.gmra.mxu0 %v2314_v5  ;;  %v14300_v9 = vunpack.c.h.bf16 %v9829_v58  ;;  %v9820_v38 = vld [vmem:[%s17441_s2 + $0x128] sm:$0xff]   ;;  %v14308_v2 = vunpack.c.h.bf16 %v9821_v15  ;;  %v1833_v31 = vsub.s32 4, %v14101_v11  ;;  %v14325_v60 = vunpack.c.h.bf16 %v9837_v37 }
 0x1bc   : > { %18164 = vst [vmem:[#allocation120_spill] sm:$0xff] %v14263_v47  ;;  %18165 = vst [vmem:[#allocation121_spill] sm:$0xff] %v14271_v59  ;;  %9984 = vmatprep.subr.mxu1 %v14263_v47  ;;  %2504 = vmatprep.mubr.f32.mxu1 %v2323_v32  ;;  %v9844_v5 = vld [vmem:[%s17441_s2 + $0x1e8] sm:$0xff]   ;;  %v14316_v47 = vunpack.c.l.bf16 %v9829_v58  ;;  %v9827_v58 = vld [vmem:[%s17441_s2 + $0x160] sm:$0xff]   ;;  %v14336_v57 = vunpack.c.l.bf16 %v9845_v29 }
 0x1bd   : > { %18166 = vst [vmem:[#allocation122_spill] sm:$0xff] %v14284_v4  ;;  %18167 = vst [vmem:[#allocation123_spill] sm:$0xff] %v14290_v17  ;;  %9950 = vmatpush3.msra.mxu0 %v14271_v59  ;;  %2505 = vmatmul.mubr.f32.vlgmr.msra.gmra.mxu1 %v2321_v27  ;;  %v9836_v32 = vld [vmem:[%s17441_s2 + $0x1a8] sm:$0xff]   ;;  %v1837_v59 = vsub.s32 5, %v14101_v11  ;;  %v14327_v27 = vunpack.c.l.bf16 %v9821_v15  ;;  %v9819_v15 = vld [vmem:[%s17441_s2 + $0x120] sm:$0xff]  }
 0x1be   : > { %18168 = vst [vmem:[#allocation124_spill] sm:$0xff] %v14292_v19  ;;  %18169 = vst [vmem:[#allocation125_spill] sm:$0xff] %v14298_v45  ;;  %9951 = vmatprep.subr.mxu0 %v14284_v4  ;;  %9985 = vmatpush3.msra.mxu1 %v14290_v17  ;;  %v1841_v4 = vsub.s32 6, %v14101_v11  ;;  %v14338_v17 = vunpack.c.h.bf16 %v9828_v56  ;;  %v14347_v11 = vunpack.c.l.bf16 %v9837_v37  ;;  %v9843_v29 = vld [vmem:[%s17441_s2 + $0x1e0] sm:$0xff]  }
 0x1bf   : > { %18170 = vst [vmem:[#allocation126_spill] sm:$0xff] %v14300_v9  ;;  %18171 = vst [vmem:[#allocation127_spill] sm:$0xff] %v14308_v2  ;;  %9952 = vmatpush3.msra.mxu0 %v14292_v19  ;;  %9986 = vmatprep.subr.mxu1 %v14298_v45  ;;  %v1834_v19 = vrot.slane %v14117_v28, %v1833_v31  ;;  %v1838_v41 = vrot.slane %v14117_v28, %v1837_v59  ;;  %v14349_v45 = vunpack.c.h.bf16 %v9820_v38  ;;  %v9835_v37 = vld [vmem:[%s17441_s2 + $0x1a0] sm:$0xff]  }
 0x1c0   : > { %18172 = vst [vmem:[#allocation128_spill] sm:$0xff] %v14316_v47  ;;  %18173 = vst [vmem:[#allocation129_spill] sm:$0xff] %v14327_v27  ;;  %9953 = vmatprep.subr.mxu0 %v14300_v9  ;;  %9987 = vmatpush3.msra.mxu1 %v14306_v34  ;;  %v1842_v9 = vrot.slane %v14117_v28, %v1841_v4  ;;  %v14358_v59 = vunpack.c.h.bf16 %v9844_v5  ;;  %v14360_v31 = vunpack.c.l.bf16 %v9828_v56  ;;  %v14367_v4 = vunpack.c.h.bf16 %v9836_v32 }
 0x1c1   : > { %18174 = vst [vmem:[#allocation130_spill] sm:$0xff] %v14336_v57  ;;  %18175 = vst [vmem:[#allocation131_spill] sm:$0xff] %v14338_v17  ;;  %9954 = vmatpush3.msra.mxu0 %v14308_v2  ;;  %9988 = vmatprep.subr.mxu1 %v14314_v33  ;;  %v1880_v2 = vcombine.low %v1834_v19, %v1838_v41  ;;  %v14369_v28 = vunpack.c.l.bf16 %v9820_v38  ;;  %v14376_v56 = vunpack.c.l.bf16 %v9844_v5  ;;  %v14378_v41 = vunpack.c.h.bf16 %v9827_v58  ;;  %v9818_v19 = vld [vmem:[%s17441_s2 + $0x118] sm:$0xff]  }
 0x1c2   : > { %18176 = vst [vmem:[#allocation132_spill] sm:$0xff] %v14347_v11  ;;  %18177 = vst [vmem:[#allocation133_spill] sm:$0xff] %v14349_v45  ;;  %9955 = vmatprep.subr.mxu0 %v14316_v47  ;;  %9989 = vmatpush3.msra.mxu1 %v14325_v60  ;;  %v1881_v47 = vcombine.low %v1842_v9, %v1846_v50  ;;  %v14385_v38 = vunpack.c.l.bf16 %v9836_v32  ;;  %v9842_v50 = vld [vmem:[%s17441_s2 + $0x1d8] sm:$0xff]   ;;  %v14394_v9 = vunpack.c.h.bf16 %v9843_v29  ;;  %v14396_v5 = vunpack.c.l.bf16 %v9827_v58  ;;  %v9825_v58 = vld [vmem:[%s17441_s2 + $0x150] sm:$0xff]  }
 0x1c3   : > { %18178 = vst [vmem:[#allocation134_spill] sm:$0xff] %v14358_v59  ;;  %18179 = vst [vmem:[#allocation135_spill] sm:$0xff] %v14360_v31  ;;  %9956 = vmatpush3.msra.mxu0 %v14327_v27  ;;  %9990 = vmatprep.subr.mxu1 %v14336_v57  ;;  %v14387_v27 = vunpack.c.h.bf16 %v9819_v15  ;;  %v1888_v32 = vrot.slane %v1880_v2, %v14172_v43  ;;  %v14416_v2 = vunpack.c.h.bf16 %v9826_v14  ;;  %v14443_v57 = vunpack.c.l.bf16 %v9818_v19 }
 0x1c4   : > { %18180 = vst [vmem:[#allocation136_spill] sm:$0xff] %v14367_v4  ;;  %18181 = vst [vmem:[#allocation137_spill] sm:$0xff] %v14369_v28  ;;  %9957 = vmatprep.subr.mxu0 %v14338_v17  ;;  %9991 = vmatpush3.msra.mxu1 %v14347_v11  ;;  %v1895_v17 = vrot.slane %v1881_v47, %v14172_v43  ;;  %v14405_v11 = vunpack.c.h.bf16 %v9835_v37  ;;  %v9817_v47 = vld [vmem:[%s17441_s2 + $0x110] sm:$0xff]  }
 0x1c5   : > { %18182 = vst [vmem:[#allocation138_spill] sm:$0xff] %v14376_v56  ;;  %18183 = vst [vmem:[#allocation139_spill] sm:$0xff] %v14378_v41  ;;  %9958 = vmatpush3.msra.mxu0 %v14349_v45  ;;  %9992 = vmatprep.subr.mxu1 %v14358_v59  ;;  %v9834_v45 = vld [vmem:[%s17441_s2 + $0x198] sm:$0xff]   ;;  %v14407_v59 = vunpack.c.l.bf16 %v9819_v15  ;;  %v14423_v15 = vunpack.c.l.bf16 %v9835_v37  ;;  %v9833_v37 = vld [vmem:[%s17441_s2 + $0x190] sm:$0xff]  }
 0x1c6   : > { %18184 = vst [vmem:[#allocation140_spill] sm:$0xff] %v14385_v38  ;;  %18185 = vst [vmem:[#allocation141_spill] sm:$0xff] %v14387_v27  ;;  %9959 = vmatprep.subr.mxu0 %v14360_v31  ;;  %9993 = vmatpush3.msra.mxu1 %v14367_v4  ;;  %v14414_v31 = vunpack.c.l.bf16 %v9843_v29  ;;  %v1809_v29 = vld [vmem:[#allocation2 + $0x8] sm:$0xff]  ;;  %v14434_v4 = vunpack.c.l.bf16 %v9826_v14  ;;  %v14450_v14 = vunpack.c.l.bf16 %v9842_v50 }
 0x1c7   : > { %18186 = vst [vmem:[#allocation142_spill] sm:$0xff] %v14394_v9  ;;  %18187 = vst [vmem:[#allocation143_spill] sm:$0xff] %v14396_v5  ;;  %9960 = vmatpush3.msra.mxu0 %v14369_v28  ;;  %9994 = vmatprep.subr.mxu1 %v14376_v56  ;;  %v14425_v28 = vunpack.c.h.bf16 %v9818_v19  ;;  %v14432_v56 = vunpack.c.h.bf16 %v9842_v50  ;;  %v14459_v19 = vunpack.c.l.bf16 %v9834_v45 }
 0x1c8   : > { %18188 = vst [vmem:[#allocation144_spill] sm:$0xff] %v14405_v11  ;;  %18189 = vst [vmem:[#allocation145_spill] sm:$0xff] %v14407_v59  ;;  %9961 = vmatprep.subr.mxu0 %v14378_v41  ;;  %9995 = vmatpush3.msra.mxu1 %v14385_v38  ;;  %v9841_v41 = vld [vmem:[%s17441_s2 + $0x1d0] sm:$0xff]   ;;  %v14441_v38 = vunpack.c.h.bf16 %v9834_v45 }
 0x1c9   : > { %18190 = vst [vmem:[#allocation146_spill] sm:$0xff] %v14414_v31  ;;  %18191 = vst [vmem:[#allocation147_spill] sm:$0xff] %v14416_v2  ;;  %9962 = vmatpush3.msra.mxu0 %v14387_v27  ;;  %9996 = vmatprep.subr.mxu1 %v14394_v9  ;;  %v1896_v27 = vcombine.low %v1888_v32, %v1895_v17  ;;  %v14452_v9 = vunpack.c.h.bf16 %v9825_v58  ;;  %v9816_v17 = vld [vmem:[%s17441_s2 + $0x108] sm:$0xff]   ;;  %v14461_v32 = vunpack.c.h.bf16 %v9817_v47  ;;  %v14468_v50 = vunpack.c.h.bf16 %v9841_v41 }
 0x1ca   : > { %18192 = vst [vmem:[#allocation148_spill] sm:$0xff] %v14423_v15  ;;  %18193 = vst [vmem:[#allocation149_spill] sm:$0xff] %v14425_v28  ;;  %9963 = vmatprep.subr.mxu0 %v14396_v5  ;;  %9997 = vmatpush3.msra.mxu1 %v14405_v11  ;;  %v9824_v5 = vld [vmem:[%s17441_s2 + $0x148] sm:$0xff]  }
 0x1cb   : > { %18194 = vst [vmem:[#allocation150_spill] sm:$0xff] %v14432_v56  ;;  %18195 = vst [vmem:[#allocation151_spill] sm:$0xff] %v14434_v4  ;;  %9964 = vmatpush3.msra.mxu0 %v14407_v59  ;;  %9998 = vmatprep.subr.mxu1 %v14414_v31  ;;  %v14470_v59 = vunpack.c.l.bf16 %v9825_v58  ;;  %v14475_v45 = vmul.f32 %v1896_v27, %v1809_v29  ;;  %v14481_v31 = vunpack.c.l.bf16 %v9817_v47  ;;  %v14488_v58 = vunpack.c.l.bf16 %v9841_v41  ;;  %v9815_v29 = vld [vmem:[%s17441_s2 + $0x100] sm:$0xff]  }
 0x1cc   : > { %18196 = vst [vmem:[#allocation152_spill] sm:$0xff] %v14441_v38  ;;  %18197 = vst [vmem:[#allocation153_spill] sm:$0xff] %v14443_v57  ;;  %9965 = vmatprep.subr.mxu0 %v14416_v2  ;;  %9999 = vmatpush3.msra.mxu1 %v14423_v15  ;;  %v9840_v2 = vld [vmem:[%s17441_s2 + $0x1c8] sm:$0xff]   ;;  %v14479_v15 = vunpack.c.h.bf16 %v9833_v37  ;;  %v14490_v27 = vunpack.c.h.bf16 %v9824_v5  ;;  %v14497_v47 = vunpack.c.l.bf16 %v9833_v37 }
 0x1cd   : > { %18198 = vst [vmem:[#allocation154_spill] sm:$0xff] %v14450_v14  ;;  %18199 = vst [vmem:[#allocation155_spill] sm:$0xff] %v14452_v9  ;;  %9966 = vmatpush3.msra.mxu0 %v14425_v28  ;;  %10000 = vmatprep.subr.mxu1 %v14432_v56  ;;  %v9832_v28 = vld [vmem:[%s17441_s2 + $0x188] sm:$0xff]   ;;  %v14506_v41 = vunpack.c.h.bf16 %v9840_v2  ;;  %v2324_v37 = vcombine.high %v14475_v45, %v14475_v45 }
 0x1ce   : > { %18200 = vst [vmem:[#allocation156_spill] sm:$0xff] %v14459_v19  ;;  %18201 = vst [vmem:[#allocation157_spill] sm:$0xff] %v14461_v32  ;;  %9967 = vmatprep.subr.mxu0 %v14434_v4  ;;  %10001 = vmatpush3.msra.mxu1 %v14441_v38  ;;  %v9823_v4 = vld [vmem:[%s17441_s2 + $0x140] sm:$0xff]   ;;  %v2331_v38 = vrot.slane %v14475_v45, %v14172_v43 }
 0x1cf   : > { %18202 = vst [vmem:[#allocation158_spill] sm:$0xff] %v14468_v50  ;;  %18203 = vst [vmem:[#allocation159_spill] sm:$0xff] %v14470_v59  ;;  %9968 = vmatpush3.msra.mxu0 %v14443_v57  ;;  %10002 = vmatprep.subr.mxu1 %v14450_v14  ;;  %v14499_v57 = vunpack.c.h.bf16 %v9816_v17  ;;  %v14508_v14 = vunpack.c.l.bf16 %v9824_v5  ;;  %v14523_v5 = vunpack.c.l.bf16 %v9840_v2 }
 0x1d0   : > { %18204 = vst [vmem:[#allocation160_spill] sm:$0xff] %v14475_v45  ;;  %18205 = vst [vmem:[#allocation161_spill] sm:$0xff] %v14479_v15  ;;  %9969 = vmatprep.subr.mxu0 %v14452_v9  ;;  %10003 = vmatpush3.msra.mxu1 %v14459_v19  ;;  %v9839_v9 = vld [vmem:[%s17441_s2 + $0x1c0] sm:$0xff]   ;;  %v14517_v19 = vunpack.c.h.bf16 %v9832_v28  ;;  %v2338_v45 = vrot.slane %v2324_v37, %v14172_v43 }
 0x1d1   : > { %18206 = vst [vmem:[#allocation162_spill] sm:$0xff] %v14481_v31  ;;  %18207 = vst [vmem:[#allocation163_spill] sm:$0xff] %v14488_v58  ;;  %9970 = vmatpush3.msra.mxu0 %v14461_v32  ;;  %10004 = vmatprep.subr.mxu1 %v14468_v50  ;;  %v9831_v32 = vld [vmem:[%s17441_s2 + $0x180] sm:$0xff]   ;;  %v14519_v50 = vunpack.c.l.bf16 %v9816_v17  ;;  %v9862_v17 = vld [vmem:[%s17441_s2 + $0x278] sm:$0xff]   ;;  %v14540_v2 = vunpack.c.h.bf16 %v9839_v9  ;;  %v14562_v37 = vunpack.c.l.bf16 %v9839_v9 }
 0x1d2   : > { %18208 = vst [vmem:[#allocation164_spill] sm:$0xff] %v14490_v27  ;;  %18209 = vst [vmem:[#allocation165_spill] sm:$0xff] %v14497_v47  ;;  %9971 = vmatprep.subr.mxu0 %v14470_v59  ;;  %10005 = vmatpush3.msra.mxu1 %v14479_v15  ;;  %v14525_v59 = vunpack.c.h.bf16 %v9823_v4  ;;  %v14533_v15 = vunpack.c.h.bf16 %v9815_v29  ;;  %v2340_v9 = vcombine.high %v2338_v45, %v2338_v45 }
 0x1d3   : > { %18210 = vst [vmem:[#allocation166_spill] sm:$0xff] %v14499_v57  ;;  %18211 = vst [vmem:[#allocation167_spill] sm:$0xff] %v14506_v41  ;;  %9972 = vmatpush3.msra.mxu0 %v14481_v31  ;;  %10006 = vmatprep.subr.mxu1 %v14488_v58  ;;  %v14531_v31 = vunpack.c.l.bf16 %v9832_v28  ;;  %v9878_v28 = vld [vmem:[%s17441_s2 + $0x2f8] sm:$0xff]  }
 0x1d4   : > { %18212 = vst [vmem:[#allocation168_spill] sm:$0xff] %v14508_v14  ;;  %18213 = vst [vmem:[#allocation169_spill] sm:$0xff] %v14517_v19  ;;  %9973 = vmatprep.subr.mxu0 %v14490_v27  ;;  %10007 = vmatpush3.msra.mxu1 %v14497_v47  ;;  %v14542_v27 = vunpack.c.l.bf16 %v9823_v4  ;;  %v14552_v47 = vunpack.c.l.bf16 %v9815_v29  ;;  %v9870_v4 = vld [vmem:[%s17441_s2 + $0x2b8] sm:$0xff]   ;;  %v14566_v29 = vunpack.c.l.bf16 %v9831_v32 }
 0x1d5   : > { %18214 = vst [vmem:[#allocation170_spill] sm:$0xff] %v14519_v50  ;;  %18215 = vst [vmem:[#allocation171_spill] sm:$0xff] %v14523_v5  ;;  %9974 = vmatpush3.msra.mxu0 %v14499_v57  ;;  %10008 = vmatprep.subr.mxu1 %v14506_v41  ;;  %v14550_v57 = vunpack.c.h.bf16 %v9831_v32  ;;  %v1812_v41 = vld [vmem:[%s17442_s3 + $0x8] sm:$0xf]  ;;  %v9877_v32 = vld [vmem:[%s17441_s2 + $0x2f0] sm:$0xff]   ;;  %v14604_v56 = vunpack.c.l.bf16 %v9870_v4 }
 0x1d6   : > { %18216 = vst [vmem:[#allocation172_spill] sm:$0xff] %v14525_v59  ;;  %18217 = vst [vmem:[#allocation173_spill] sm:$0xff] %v14531_v31  ;;  %9975 = vmatprep.subr.mxu0 %v14508_v14  ;;  %10009 = vmatpush3.msra.mxu1 %v14517_v19  ;;  %v9854_v14 = vld [vmem:[%s17441_s2 + $0x238] sm:$0xff]   ;;  %v2339_v19 = vcombine.high %v2331_v38, %v2331_v38  ;;  %v14637_v11 = vunpack.c.l.bf16 %v9877_v32 }
 0x1d7   : > { %18218 = vst [vmem:[#allocation174_spill] sm:$0xff] %v14533_v15  ;;  %18219 = vst [vmem:[#allocation175_spill] sm:$0xff] %v14540_v2  ;;  %9976 = vmatpush3.msra.mxu0 %v14519_v50  ;;  %10010 = vmatprep.subr.mxu1 %v14523_v5  ;;  %v9861_v50 = vld [vmem:[%s17441_s2 + $0x270] sm:$0xff]   ;;  %v14594_v5 = vunpack.c.h.bf16 %v9870_v4  ;;  %v14602_v58 = vunpack.c.l.bf16 %v9854_v14  ;;  %v9868_v4 = vld [vmem:[%s17441_s2 + $0x2a8] sm:$0xff]  }
 0x1d8   : > { %18220 = vst [vmem:[#allocation176_spill] sm:$0xff] %v14542_v27  ;;  %18221 = vst [vmem:[#allocation177_spill] sm:$0xff] %v14550_v57  ;;  %9977 = vmatprep.subr.mxu0 %v14525_v59  ;;  %10011 = vmatpush3.msra.mxu1 %v14531_v31  ;;  %v14576_v59 = vunpack.c.h.bf16 %v9862_v17  ;;  %v9853_v31 = vld [vmem:[%s17441_s2 + $0x230] sm:$0xff]  }
 0x1d9   : > { %18222 = vst [vmem:[#allocation178_spill] sm:$0xff] %v14552_v47  ;;  %18223 = vst [vmem:[#allocation179_spill] sm:$0xff] %v14562_v37  ;;  %9978 = vmatpush3.msra.mxu0 %v14533_v15  ;;  %10012 = vmatprep.subr.mxu1 %v14540_v2  ;;  %v14583_v15 = vunpack.c.h.bf16 %v9878_v28  ;;  %v14592_v2 = vunpack.c.h.bf16 %v9854_v14  ;;  %v9852_v14 = vld [vmem:[%s17441_s2 + $0x228] sm:$0xff]  }
 0x1da   : > { %18224 = vst [vmem:[#allocation180_spill] sm:$0xff] %v14566_v29  ;;  %9979 = vmatprep.subr.mxu0 %v14542_v27  ;;  %18225 = vst [vmem:[#allocation181_spill] sm:$0xff] %v14576_v59  ;;  %10013 = vmatpush3.msra.mxu1 %v14550_v57  ;;  %v9869_v27 = vld [vmem:[%s17441_s2 + $0x2b0] sm:$0xff]   ;;  %v14599_v57 = vunpack.c.l.bf16 %v9878_v28  ;;  %v14616_v28 = vunpack.c.h.bf16 %v9877_v32 }
 0x1db   : > { %9980 = vmatpush3.msra.mxu0 %v14552_v47  ;;  %18226 = vst [vmem:[#allocation182_spill] sm:$0xff] %v14583_v15  ;;  %10014 = vmatprep.subr.mxu1 %v14562_v37  ;;  %18227 = vst [vmem:[#allocation183_spill] sm:$0xff] %v14592_v2  ;;  %v14597_v47 = vunpack.c.l.bf16 %v9862_v17  ;;  %v14606_v37 = vunpack.c.h.bf16 %v9861_v50  ;;  %v1850_v17 = vrot.slane %v1812_v41, %v14122_v25  ;;  %v14631_v25 = vunpack.c.h.bf16 %v9869_v27 }
 0x1dc   : > { %2574 = vmatprep.mubr.f32.mxu0 %v2339_v19  ;;  %18228 = vst [vmem:[#allocation184_spill] sm:$0xff] %v14594_v5  ;;  %10015 = vmatpush3.msra.mxu1 %v14566_v29  ;;  %18230 = vst [vmem:[#allocation186_spill] sm:$0xff] %v14599_v57  ;;  %v9860_v19 = vld [vmem:[%s17441_s2 + $0x268] sm:$0xff]   ;;  %v1862_v29 = vrot.slane %v1812_v41, %v14131_v8  ;;  %v14643_v8 = vunpack.c.l.bf16 %v9869_v27  ;;  %v9867_v27 = vld [vmem:[%s17441_s2 + $0x2a0] sm:$0xff]  }
 0x1dd   : > { %2575 = vmatmul.mubr.f32.vlgmr.msra.gmra.mxu0 %v2331_v38  ;;  %18229 = vst [vmem:[#allocation185_spill] sm:$0xff] %v14597_v47  ;;  %2644 = vmatprep.mubr.f32.mxu1 %v2340_v9  ;;  %18231 = vst [vmem:[#allocation187_spill] sm:$0xff] %v14602_v58  ;;  %v9876_v38 = vld [vmem:[%s17441_s2 + $0x2e8] sm:$0xff]   ;;  %v1854_v9 = vrot.slane %v1812_v41, %v14125_v42  ;;  %v9875_v42 = vld [vmem:[%s17441_s2 + $0x2e0] sm:$0xff]  }
 0x1de   : > { %10019 = vmatprep.subr.mxu0 %v14576_v59  ;;  %18232 = vst [vmem:[#allocation188_spill] sm:$0xff] %v14604_v56  ;;  %18233 = vst [vmem:[#allocation189_spill] sm:$0xff] %v14606_v37  ;;  %10054 = vmatprep.subr.mxu1 %v14583_v15  ;;  %v1858_v59 = vrot.slane %v1812_v41, %v14128_v49  ;;  %v14635_v15 = vunpack.c.l.bf16 %v9861_v50  ;;  %v14641_v41 = vunpack.c.l.bf16 %v9853_v31  ;;  %v9859_v49 = vld [vmem:[%s17441_s2 + $0x260] sm:$0xff]   ;;  %v14653_v50 = vunpack.c.h.bf16 %v9860_v19 }
 0x1df   : > { %2645 = vmatmul.mubr.f32.vlgmr.msra.gmra.mxu1 %v2338_v45  ;;  %18234 = vst [vmem:[#allocation190_spill] sm:$0xff] %v14616_v28  ;;  %10020 = vmatpush3.msra.mxu0 %v14592_v2  ;;  %v14629_v45 = vunpack.c.h.bf16 %v9853_v31  ;;  %18236 = vst [vmem:[#allocation192_spill] sm:$0xff] %v14631_v25  ;;  %v14655_v32 = vunpack.c.h.bf16 %v9876_v38  ;;  %v9851_v31 = vld [vmem:[%s17441_s2 + $0x220] sm:$0xff]  }
 0x1e0   : > { %10055 = vmatpush3.msra.mxu1 %v14594_v5  ;;  %10021 = vmatprep.subr.mxu0 %v14597_v47  ;;  %18237 = vst [vmem:[#allocation193_spill] sm:$0xff] %v14635_v15  ;;  %18238 = vst [vmem:[#allocation194_spill] sm:$0xff] %v14637_v11  ;;  %v14673_v47 = vunpack.c.l.bf16 %v9876_v38  ;;  %v14691_v38 = vunpack.c.h.bf16 %v9875_v42 }
 0x1e1   : > { %18235 = vst [vmem:[#allocation191_spill] sm:$0xff] %v14629_v45  ;;  %10056 = vmatprep.subr.mxu1 %v14599_v57  ;;  %10022 = vmatpush3.msra.mxu0 %v14602_v58  ;;  %18239 = vst [vmem:[#allocation195_spill] sm:$0xff] %v14641_v41  ;;  %v1898_v58 = vcombine.low %v1858_v59, %v1862_v29  ;;  %v14671_v57 = vunpack.c.l.bf16 %v9860_v19  ;;  %v14677_v59 = vunpack.c.l.bf16 %v9852_v14  ;;  %v14679_v29 = vunpack.c.l.bf16 %v9868_v4 }
 0x1e2   : > { %10057 = vmatpush3.msra.mxu1 %v14604_v56  ;;  %18240 = vst [vmem:[#allocation196_spill] sm:$0xff] %v14643_v8  ;;  %10023 = vmatprep.subr.mxu0 %v14606_v37  ;;  %18241 = vst [vmem:[#allocation197_spill] sm:$0xff] %v14653_v50  ;;  %v1897_v56 = vcombine.low %v1850_v17, %v1854_v9  ;;  %v14665_v37 = vunpack.c.h.bf16 %v9852_v14  ;;  %v9858_v17 = vld [vmem:[%s17441_s2 + $0x258] sm:$0xff]   ;;  %v14689_v19 = vunpack.c.h.bf16 %v9859_v49 }
 0x1e3   : > { %10058 = vmatprep.subr.mxu1 %v14616_v28  ;;  %18242 = vst [vmem:[#allocation198_spill] sm:$0xff] %v14655_v32  ;;  %10024 = vmatpush3.msra.mxu0 %v14629_v45  ;;  %v14667_v28 = vunpack.c.h.bf16 %v9868_v4  ;;  %18245 = vst [vmem:[#allocation201_spill] sm:$0xff] %v14671_v57  ;;  %v9874_v9 = vld [vmem:[%s17441_s2 + $0x2d8] sm:$0xff]  }
 0x1e4   : > { %10059 = vmatpush3.msra.mxu1 %v14631_v25  ;;  %18243 = vst [vmem:[#allocation199_spill] sm:$0xff] %v14665_v37  ;;  %10025 = vmatprep.subr.mxu0 %v14635_v15  ;;  %18246 = vst [vmem:[#allocation202_spill] sm:$0xff] %v14673_v47  ;;  %v9850_v14 = vld [vmem:[%s17441_s2 + $0x218] sm:$0xff]   ;;  %v14711_v15 = vunpack.c.l.bf16 %v9875_v42  ;;  %v14727_v42 = vunpack.c.h.bf16 %v9858_v17 }
 0x1e5   : > { %18244 = vst [vmem:[#allocation200_spill] sm:$0xff] %v14667_v28  ;;  %10060 = vmatprep.subr.mxu1 %v14637_v11  ;;  %10026 = vmatpush3.msra.mxu0 %v14641_v41  ;;  %18247 = vst [vmem:[#allocation203_spill] sm:$0xff] %v14677_v59  ;;  %v9866_v4 = vld [vmem:[%s17441_s2 + $0x298] sm:$0xff]   ;;  %v1912_v41 = vrot.slane %v1898_v58, %v14172_v43  ;;  %v14709_v11 = vunpack.c.l.bf16 %v9859_v49  ;;  %v14717_v58 = vunpack.c.l.bf16 %v9867_v27  ;;  %v1810_v49 = vld [vmem:[#allocation2 + $0x10] sm:$0xff] }
 0x1e6   : > { %10061 = vmatpush3.msra.mxu1 %v14643_v8  ;;  %18248 = vst [vmem:[#allocation204_spill] sm:$0xff] %v14679_v29  ;;  %10027 = vmatprep.subr.mxu0 %v14653_v50  ;;  %18249 = vst [vmem:[#allocation205_spill] sm:$0xff] %v14689_v19  ;;  %v1905_v8 = vrot.slane %v1897_v56, %v14172_v43  ;;  %v14705_v50 = vunpack.c.h.bf16 %v9867_v27  ;;  %v14715_v56 = vunpack.c.l.bf16 %v9851_v31  ;;  %v9865_v27 = vld [vmem:[%s17441_s2 + $0x290] sm:$0xff]  }
 0x1e7   : > { %10062 = vmatprep.subr.mxu1 %v14655_v32  ;;  %18250 = vst [vmem:[#allocation206_spill] sm:$0xff] %v14691_v38  ;;  %10028 = vmatpush3.msra.mxu0 %v14665_v37  ;;  %v14703_v32 = vunpack.c.h.bf16 %v9851_v31  ;;  %18253 = vst [vmem:[#allocation209_spill] sm:$0xff] %v14709_v11  ;;  %v9849_v31 = vld [vmem:[%s17441_s2 + $0x210] sm:$0xff]   ;;  %v14747_v37 = vunpack.c.l.bf16 %v9874_v9 }
 0x1e8   : > { %10063 = vmatpush3.msra.mxu1 %v14667_v28  ;;  %18252 = vst [vmem:[#allocation208_spill] sm:$0xff] %v14705_v50  ;;  %10029 = vmatprep.subr.mxu0 %v14671_v57  ;;  %18254 = vst [vmem:[#allocation210_spill] sm:$0xff] %v14711_v15  ;;  %v9857_v28 = vld [vmem:[%s17441_s2 + $0x250] sm:$0xff]   ;;  %v14745_v57 = vunpack.c.l.bf16 %v9858_v17 }
 0x1e9   : > { %18251 = vst [vmem:[#allocation207_spill] sm:$0xff] %v14703_v32  ;;  %10064 = vmatprep.subr.mxu1 %v14673_v47  ;;  %10030 = vmatpush3.msra.mxu0 %v14677_v59  ;;  %18255 = vst [vmem:[#allocation211_spill] sm:$0xff] %v14715_v56  ;;  %v9873_v47 = vld [vmem:[%s17441_s2 + $0x2d0] sm:$0xff]   ;;  %v1913_v59 = vcombine.low %v1905_v8, %v1912_v41  ;;  %v14751_v8 = vunpack.c.l.bf16 %v9850_v14  ;;  %v14753_v41 = vunpack.c.l.bf16 %v9866_v4  ;;  %v14763_v17 = vunpack.c.h.bf16 %v9857_v28 }
 0x1ea   : > { %10065 = vmatpush3.msra.mxu1 %v14679_v29  ;;  %18256 = vst [vmem:[#allocation212_spill] sm:$0xff] %v14717_v58  ;;  %10031 = vmatprep.subr.mxu0 %v14689_v19  ;;  %18257 = vst [vmem:[#allocation213_spill] sm:$0xff] %v14727_v42  ;;  %v14729_v29 = vunpack.c.h.bf16 %v9874_v9  ;;  %v14739_v19 = vunpack.c.h.bf16 %v9850_v14  ;;  %v14765_v9 = vunpack.c.h.bf16 %v9873_v47  ;;  %v9848_v14 = vld [vmem:[%s17441_s2 + $0x208] sm:$0xff]  }
 0x1eb   : > { %10066 = vmatprep.subr.mxu1 %v14691_v38  ;;  %10032 = vmatpush3.msra.mxu0 %v14703_v32  ;;  %v14741_v38 = vunpack.c.h.bf16 %v9866_v4  ;;  %18261 = vst [vmem:[#allocation217_spill] sm:$0xff] %v14745_v57  ;;  %18262 = vst [vmem:[#allocation218_spill] sm:$0xff] %v14747_v37  ;;  %v9864_v4 = vld [vmem:[%s17441_s2 + $0x288] sm:$0xff]  }
 0x1ec   : > { %18258 = vst [vmem:[#allocation214_spill] sm:$0xff] %v14729_v29  ;;  %10067 = vmatpush3.msra.mxu1 %v14705_v50  ;;  %18259 = vst [vmem:[#allocation215_spill] sm:$0xff] %v14739_v19  ;;  %10033 = vmatprep.subr.mxu0 %v14709_v11  ;;  %v9856_v50 = vld [vmem:[%s17441_s2 + $0x248] sm:$0xff]   ;;  %v14785_v11 = vunpack.c.l.bf16 %v9873_v47 }
 0x1ed   : > { %18260 = vst [vmem:[#allocation216_spill] sm:$0xff] %v14741_v38  ;;  %10068 = vmatprep.subr.mxu1 %v14711_v15  ;;  %10034 = vmatpush3.msra.mxu0 %v14715_v56  ;;  %18263 = vst [vmem:[#allocation219_spill] sm:$0xff] %v14751_v8  ;;  %v9872_v15 = vld [vmem:[%s17441_s2 + $0x2c8] sm:$0xff]   ;;  %v14783_v56 = vunpack.c.l.bf16 %v9857_v28  ;;  %v14801_v47 = vunpack.c.h.bf16 %v9856_v50 }
 0x1ee   : > { %10069 = vmatpush3.msra.mxu1 %v14717_v58  ;;  %18264 = vst [vmem:[#allocation220_spill] sm:$0xff] %v14753_v41  ;;  %10035 = vmatprep.subr.mxu0 %v14727_v42  ;;  %18265 = vst [vmem:[#allocation221_spill] sm:$0xff] %v14763_v17  ;;  %v14773_v58 = vmul.f32 %v1913_v59, %v1810_v49  ;;  %v14777_v42 = vunpack.c.h.bf16 %v9849_v31  ;;  %v14789_v59 = vunpack.c.l.bf16 %v9849_v31  ;;  %v14791_v49 = vunpack.c.l.bf16 %v9865_v27  ;;  %v9847_v31 = vld [vmem:[%s17441_s2 + $0x200] sm:$0xff]  }
 0x1ef   : > { %10070 = vmatprep.subr.mxu1 %v14729_v29  ;;  %18266 = vst [vmem:[#allocation222_spill] sm:$0xff] %v14765_v9  ;;  %10036 = vmatpush3.msra.mxu0 %v14739_v19  ;;  %v14779_v29 = vunpack.c.h.bf16 %v9865_v27  ;;  %18270 = vst [vmem:[#allocation226_spill] sm:$0xff] %v14783_v56  ;;  %v14803_v28 = vunpack.c.h.bf16 %v9872_v15  ;;  %v9863_v27 = vld [vmem:[%s17441_s2 + $0x280] sm:$0xff]   ;;  %v14827_v19 = vunpack.c.l.bf16 %v9848_v14 }
 0x1f0   : > { %18267 = vst [vmem:[#allocation223_spill] sm:$0xff] %v14773_v58  ;;  %10071 = vmatpush3.msra.mxu1 %v14741_v38  ;;  %18268 = vst [vmem:[#allocation224_spill] sm:$0xff] %v14777_v42  ;;  %10037 = vmatprep.subr.mxu0 %v14745_v57  ;;  %v9855_v38 = vld [vmem:[%s17441_s2 + $0x240] sm:$0xff]   ;;  %v14823_v57 = vunpack.c.l.bf16 %v9872_v15 }
 0x1f1   : > { %18269 = vst [vmem:[#allocation225_spill] sm:$0xff] %v14779_v29  ;;  %10072 = vmatprep.subr.mxu1 %v14747_v37  ;;  %18271 = vst [vmem:[#allocation227_spill] sm:$0xff] %v14785_v11  ;;  %10038 = vmatpush3.msra.mxu0 %v14751_v8  ;;  %v9871_v37 = vld [vmem:[%s17441_s2 + $0x2c0] sm:$0xff]   ;;  %v14821_v8 = vunpack.c.l.bf16 %v9856_v50 }
 0x1f2   : > { %10073 = vmatpush3.msra.mxu1 %v14753_v41  ;;  %18272 = vst [vmem:[#allocation228_spill] sm:$0xff] %v14789_v59  ;;  %18273 = vst [vmem:[#allocation229_spill] sm:$0xff] %v14791_v49  ;;  %10039 = vmatprep.subr.mxu0 %v14763_v17  ;;  %v2341_v41 = vcombine.high %v14773_v58, %v14773_v58  ;;  %v14817_v17 = vunpack.c.h.bf16 %v9864_v4  ;;  %v14837_v50 = vunpack.c.h.bf16 %v9871_v37 }
 0x1f3   : > { %10074 = vmatprep.subr.mxu1 %v14765_v9  ;;  %18274 = vst [vmem:[#allocation230_spill] sm:$0xff] %v14801_v47  ;;  %18275 = vst [vmem:[#allocation231_spill] sm:$0xff] %v14803_v28  ;;  %10040 = vmatpush3.msra.mxu0 %v14777_v42  ;;  %v14815_v9 = vunpack.c.h.bf16 %v9848_v14  ;;  %v14829_v42 = vunpack.c.l.bf16 %v9864_v4  ;;  %v14842_v14 = vunpack.c.h.bf16 %v9847_v31  ;;  %v14844_v4 = vunpack.c.h.bf16 %v9863_v27 }
 0x1f4   : > { %10075 = vmatpush3.msra.mxu1 %v14779_v29  ;;  %18277 = vst [vmem:[#allocation233_spill] sm:$0xff] %v14817_v17  ;;  %10041 = vmatprep.subr.mxu0 %v14783_v56  ;;  %18278 = vst [vmem:[#allocation234_spill] sm:$0xff] %v14821_v8  ;;  %v2348_v29 = vrot.slane %v14773_v58, %v14172_v43  ;;  %v2355_v15 = vrot.slane %v2341_v41, %v14172_v43  ;;  %v14848_v58 = vunpack.c.l.bf16 %v9855_v38 }
 0x1f5   : > { %18276 = vst [vmem:[#allocation232_spill] sm:$0xff] %v14815_v9  ;;  %10076 = vmatprep.subr.mxu1 %v14785_v11  ;;  %18279 = vst [vmem:[#allocation235_spill] sm:$0xff] %v14823_v57  ;;  %10042 = vmatpush3.msra.mxu0 %v14789_v59  ;;  %v14835_v11 = vunpack.c.h.bf16 %v9855_v38  ;;  %v14854_v41 = vunpack.c.l.bf16 %v9847_v31  ;;  %v18293_v38 = vld [vmem:[#allocation84_spill] sm:$0xff]  ;;  %v18295_v31 = vld [vmem:[#allocation86_spill] sm:$0xff] }
 0x1f6   : > { %10077 = vmatpush3.msra.mxu1 %v14791_v49  ;;  %18280 = vst [vmem:[#allocation236_spill] sm:$0xff] %v14827_v19  ;;  %18281 = vst [vmem:[#allocation237_spill] sm:$0xff] %v14829_v42  ;;  %10043 = vmatprep.subr.mxu0 %v14801_v47  ;;  %v2356_v43 = vcombine.high %v2348_v29, %v2348_v29 }
 0x1f7   : > { %10078 = vmatprep.subr.mxu1 %v14803_v28  ;;  %18282 = vst [vmem:[#allocation238_spill] sm:$0xff] %v14835_v11  ;;  %18283 = vst [vmem:[#allocation239_spill] sm:$0xff] %v14837_v50  ;;  %10044 = vmatpush3.msra.mxu0 %v14815_v9  ;;  %v14850_v28 = vunpack.c.l.bf16 %v9871_v37  ;;  %v18291_v37 = vld [vmem:[#allocation82_spill] sm:$0xff] }
 0x1f8   : > { %10079 = vmatpush3.msra.mxu1 %v14817_v17  ;;  %18284 = vst [vmem:[#allocation240_spill] sm:$0xff] %v14842_v14  ;;  %18285 = vst [vmem:[#allocation241_spill] sm:$0xff] %v14844_v4  ;;  %10045 = vmatprep.subr.mxu0 %v14821_v8  ;;  %v14858_v17 = vunpack.c.l.bf16 %v9863_v27  ;;  %v2357_v8 = vcombine.high %v2355_v15, %v2355_v15  ;;  %v18296_v27 = vld [vmem:[#allocation87_spill] sm:$0xff] }
 0x1f9   : > { %10080 = vmatprep.subr.mxu1 %v14823_v57  ;;  %18286 = vst [vmem:[#allocation242_spill] sm:$0xff] %v14848_v58  ;;  %18287 = vst [vmem:[#allocation243_spill] sm:$0xff] %v14850_v28  ;;  %10046 = vmatpush3.msra.mxu0 %v14827_v19 }
 0x1fa   : > { %10081 = vmatpush3.msra.mxu1 %v14829_v42  ;;  %18288 = vst [vmem:[#allocation244_spill] sm:$0xff] %v14854_v41  ;;  %10047 = vmatprep.subr.mxu0 %v14835_v11  ;;  %18289 = vst [vmem:[#allocation245_spill] sm:$0xff] %v14858_v17 }
 0x1fb   : > { %10082 = vmatprep.subr.mxu1 %v14837_v50  ;;  %10048 = vmatpush3.msra.mxu0 %v14842_v14 }
 0x1fc   : > { %10083 = vmatpush3.msra.mxu1 %v14844_v4  ;;  %10049 = vmatprep.subr.mxu0 %v14848_v58 }
 0x1fd   : > { %10084 = vmatprep.subr.mxu1 %v14850_v28  ;;  %10050 = vmatpush3.msra.mxu0 %v14854_v41 }
 0x1fe   : > { %2714 = vmatprep.mubr.f32.mxu0 %v2356_v43  ;;  %10085 = vmatpush3.msra.mxu1 %v14858_v17  ;;  %v18290_v43 = vld [vmem:[#allocation81_spill] sm:$0xff] }
 0x1ff   : > { %2784 = vmatprep.mubr.f32.mxu1 %v2357_v8  ;;  %2715 = vmatmul.mubr.f32.vlgmr.msra.gmra.mxu0 %v2348_v29  ;;  %v18292_v29 = vld [vmem:[#allocation83_spill] sm:$0xff]  ;;  %v18294_v8 = vld [vmem:[#allocation85_spill] sm:$0xff] }
 0x200   : > { %2785 = vmatmul.mubr.f32.vlgmr.msra.gmra.mxu1 %v2355_v15  ;;  %10089 = vmatprep.subr.msk.mxu0 %vm2791_vm8, %v13939_v26  ;;  %v18297_v15 = vld [vmem:[#allocation88_spill] sm:$0xff] }
 0x201   : > { %10123 = vmatprep.subr.msk.mxu1 %vm2791_vm8, %v13941_v18  ;;  %10090 = vmatpush3.xpose.msk.msra.mxu0 %vm2791_vm8, %v13943_v24 }
 0x202   : > { %10124 = vmatpush3.xpose.msk.msra.mxu1 %vm2791_vm8, %v13956_v63  ;;  %10091 = vmatprep.subr.msk.mxu0 %vm2791_vm8, %v13948_v3 }
 0x203   : > { %10125 = vmatprep.subr.msk.mxu1 %vm2791_vm8, %v13958_v23 }
 0x205   : > { %10092 = vmatpush3.xpose.msk.msra.mxu0 %vm2791_vm8, %v13960_v39 }
 0x206   : > { %10126 = vmatpush3.xpose.msk.msra.mxu1 %vm2791_vm8, %v13962_v35  ;;  %10093 = vmatprep.subr.msk.mxu0 %vm2791_vm8, %v13972_v52 }
 0x207   : > { %10127 = vmatprep.subr.msk.mxu1 %vm2791_vm8, %v13974_v22 }
 0x209   : > { %10094 = vmatpush3.xpose.msk.msra.mxu0 %vm2791_vm8, %v13978_v13 }
 0x20a   : > { %10128 = vmatpush3.xpose.msk.msra.mxu1 %vm2791_vm8, %v13980_v44  ;;  %10095 = vmatprep.subr.msk.mxu0 %vm2791_vm8, %v13990_v55 }
 0x20b   : > { %10129 = vmatprep.subr.msk.mxu1 %vm2791_vm8, %v13992_v48 }
 0x20d   : > { %10096 = vmatpush3.xpose.msk.msra.mxu0 %vm2791_vm8, %v14002_v40 }
 0x20e   : > { %10130 = vmatpush3.xpose.msk.msra.mxu1 %vm2791_vm8, %v14004_v62  ;;  %10097 = vmatprep.subr.msk.mxu0 %vm2791_vm8, %v14008_v12 }
 0x20f   : > { %10131 = vmatprep.subr.msk.mxu1 %vm2791_vm8, %v14010_v53 }
 0x211   : > { %10098 = vmatpush3.xpose.msk.msra.mxu0 %vm2791_vm8, %v14014_v0 }
 0x212   : > { %10132 = vmatpush3.xpose.msk.msra.mxu1 %vm2791_vm8, %v14016_v21  ;;  %10099 = vmatprep.subr.msk.mxu0 %vm2791_vm8, %v14026_v20 }
 0x213   : > { %10133 = vmatprep.subr.msk.mxu1 %vm2791_vm8, %v14028_v7 }
 0x215   : > { %10100 = vmatpush3.xpose.msk.msra.mxu0 %vm2791_vm8, %v14038_v1 }
 0x216   : > { %10134 = vmatpush3.xpose.msk.msra.mxu1 %vm2791_vm8, %v14040_v54  ;;  %10101 = vmatprep.subr.msk.mxu0 %vm2791_vm8, %v14044_v61 }
 0x217   : > { %10135 = vmatprep.subr.msk.mxu1 %vm2791_vm8, %v14046_v51 }
 0x219   : > { %10102 = vmatpush3.xpose.msk.msra.mxu0 %vm2791_vm8, %v14050_v6 }
 0x21a   : > { %10136 = vmatpush3.xpose.msk.msra.mxu1 %vm2791_vm8, %v14052_v10  ;;  %10103 = vmatprep.subr.msk.mxu0 %vm2791_vm8, %v14062_v36 }
 0x21b   : > { %10137 = vmatprep.subr.msk.mxu1 %vm2791_vm8, %v14064_v16 }
 0x21d   : > { %10104 = vmatpush3.xpose.msk.msra.mxu0 %vm2791_vm8, %v14074_v46 }
 0x21e   : > { %10138 = vmatpush3.xpose.msk.msra.mxu1 %vm2791_vm8, %v14076_v30  ;;  %10105 = vmatprep.subr.msk.mxu0 %vm2791_vm8, %v18290_v43  ;;  %v18298_v30 = vld [vmem:[#allocation93_spill] sm:$0xff] }
 0x21f   : > { %10139 = vmatprep.subr.msk.mxu1 %vm2791_vm8, %v18291_v37  ;;  %v18299_v37 = vld [vmem:[#allocation94_spill] sm:$0xff] }
 0x221   : > { %10106 = vmatpush3.xpose.msk.msra.mxu0 %vm2791_vm8, %v18292_v29  ;;  %v18300_v29 = vld [vmem:[#allocation95_spill] sm:$0xff] }
 0x222   : > { %10140 = vmatpush3.xpose.msk.msra.mxu1 %vm2791_vm8, %v18293_v38  ;;  %10107 = vmatprep.subr.msk.mxu0 %vm2791_vm8, %v18294_v8  ;;  %v18301_v38 = vld [vmem:[#allocation96_spill] sm:$0xff]  ;;  %v18302_v8 = vld [vmem:[#allocation97_spill] sm:$0xff] }
 0x223   : > { %10141 = vmatprep.subr.msk.mxu1 %vm2791_vm8, %v18295_v31  ;;  %v18303_v31 = vld [vmem:[#allocation98_spill] sm:$0xff] }
 0x225   : > { %10108 = vmatpush3.xpose.msk.msra.mxu0 %vm2791_vm8, %v18296_v27  ;;  %v18304_v27 = vld [vmem:[#allocation100_spill] sm:$0xff] }
 0x226   : > { %10142 = vmatpush3.xpose.msk.msra.mxu1 %vm2791_vm8, %v18297_v15  ;;  %10109 = vmatprep.subr.msk.mxu0 %vm2791_vm8, %v18298_v30  ;;  %v18305_v15 = vld [vmem:[#allocation101_spill] sm:$0xff]  ;;  %v18306_v30 = vld [vmem:[#allocation102_spill] sm:$0xff] }
 0x227   : > { %10143 = vmatprep.subr.msk.mxu1 %vm2791_vm8, %v18299_v37  ;;  %v18307_v37 = vld [vmem:[#allocation103_spill] sm:$0xff] }
 0x229   : > { %10110 = vmatpush3.xpose.msk.msra.mxu0 %vm2791_vm8, %v18300_v29  ;;  %v18308_v29 = vld [vmem:[#allocation104_spill] sm:$0xff] }
 0x22a   : > { %10144 = vmatpush3.xpose.msk.msra.mxu1 %vm2791_vm8, %v18301_v38  ;;  %10111 = vmatprep.subr.msk.mxu0 %vm2791_vm8, %v18302_v8  ;;  %v18309_v38 = vld [vmem:[#allocation105_spill] sm:$0xff]  ;;  %v18310_v8 = vld [vmem:[#allocation106_spill] sm:$0xff] }
 0x22b   : > { %10145 = vmatprep.subr.msk.mxu1 %vm2791_vm8, %v18303_v31  ;;  %v18311_v31 = vld [vmem:[#allocation107_spill] sm:$0xff] }
 0x22d   : > { %10112 = vmatpush3.xpose.msk.msra.mxu0 %vm2791_vm8, %v18304_v27  ;;  %v18312_v27 = vld [vmem:[#allocation108_spill] sm:$0xff] }
 0x22e   : > { %10146 = vmatpush3.xpose.msk.msra.mxu1 %vm2791_vm8, %v18305_v15  ;;  %10113 = vmatprep.subr.msk.mxu0 %vm2791_vm8, %v18306_v30  ;;  %v18313_v15 = vld [vmem:[#allocation109_spill] sm:$0xff]  ;;  %v18314_v30 = vld [vmem:[#allocation110_spill] sm:$0xff] }
 0x22f   : > { %10147 = vmatprep.subr.msk.mxu1 %vm2791_vm8, %v18307_v37  ;;  %v18315_v37 = vld [vmem:[#allocation111_spill] sm:$0xff] }
 0x231   : > { %10114 = vmatpush3.xpose.msk.msra.mxu0 %vm2791_vm8, %v18308_v29  ;;  %v18316_v29 = vld [vmem:[#allocation112_spill] sm:$0xff] }
 0x232   : > { %10148 = vmatpush3.xpose.msk.msra.mxu1 %vm2791_vm8, %v18309_v38  ;;  %10115 = vmatprep.subr.msk.mxu0 %vm2791_vm8, %v18310_v8  ;;  %v18317_v38 = vld [vmem:[#allocation113_spill] sm:$0xff]  ;;  %v18318_v8 = vld [vmem:[#allocation114_spill] sm:$0xff] }
 0x233   : > { %10149 = vmatprep.subr.msk.mxu1 %vm2791_vm8, %v18311_v31  ;;  %v18319_v31 = vld [vmem:[#allocation115_spill] sm:$0xff] }
 0x235   : > { %10116 = vmatpush3.xpose.msk.msra.mxu0 %vm2791_vm8, %v18312_v27  ;;  %v18320_v27 = vld [vmem:[#allocation117_spill] sm:$0xff] }
 0x236   : > { %10150 = vmatpush3.xpose.msk.msra.mxu1 %vm2791_vm8, %v18313_v15  ;;  %10117 = vmatprep.subr.msk.mxu0 %vm2791_vm8, %v18314_v30  ;;  %v18321_v15 = vld [vmem:[#allocation118_spill] sm:$0xff]  ;;  %v18322_v30 = vld [vmem:[#allocation119_spill] sm:$0xff] }
 0x237   : > { %10151 = vmatprep.subr.msk.mxu1 %vm2791_vm8, %v18315_v37  ;;  %v18323_v37 = vld [vmem:[#allocation120_spill] sm:$0xff] }
 0x239   : > { %10118 = vmatpush3.xpose.msk.msra.mxu0 %vm2791_vm8, %v18316_v29 }
 0x23a   : > { %10152 = vmatpush3.xpose.msk.msra.mxu1 %vm2791_vm8, %v18317_v38  ;;  %10119 = vmatprep.subr.msk.mxu0 %vm2791_vm8, %v18318_v8 }
 0x23b   : > { %10153 = vmatprep.subr.msk.mxu1 %vm2791_vm8, %v18319_v31 }
 0x23d   : > { %10120 = vmatpush3.xpose.msk.msra.mxu0 %vm2791_vm8, %v18320_v27 }
 0x23e   : > { %10154 = vmatpush3.xpose.msk.msra.mxu1 %vm2791_vm8, %v18321_v15  ;;  %10157 = vmatprep.subr.msk.mxu0 %vm2791_vm8, %v18322_v30 }
 0x23f   : > { %10191 = vmatprep.subr.msk.mxu1 %vm2791_vm8, %v18323_v37 }
 0x27b   : > { %v9911_v29 = vpop.f32.mrf.mxu0 }
 0x27d   : > { %v9946_v38 = vpop.f32.mrf.mxu1  ;;  %v9912_v43 = vpop.f32.mrf.mxu0 }
 0x27e   : > { %v9913_v31 = vadd.f32 %v9912_v43, %v9911_v29  ;;  %v18339_v43 = vld [vmem:[#allocation135_spill] sm:$0xff]  ;;  %v18341_v29 = vld [vmem:[#allocation137_spill] sm:$0xff] }
 0x27f   : > { %v9947_v8 = vpop.f32.mrf.mxu1 }
 0x280   : > { %v9948_v36 = vadd.f32 %v9947_v8, %v9946_v38  ;;  %v18342_v38 = vld [vmem:[#allocation140_spill] sm:$0xff]  ;;  %v18343_v8 = vld [vmem:[#allocation139_spill] sm:$0xff] }
 0x282   : > { %v2507_v6 = vadd.f32 %v9948_v36, %v9913_v31  ;;  %v18335_v36 = vld [vmem:[#allocation131_spill] sm:$0xff]  ;;  %v18344_v31 = vld [vmem:[#allocation142_spill] sm:$0xff] }
 0x29d   : > { %v9981_v16 = vpop.f32.mrf.mxu0 }
 0x29f   : > { %v10016_v46 = vpop.f32.mrf.mxu1  ;;  %v9982_v10 = vpop.f32.mrf.mxu0 }
 0x2a0   : > { %v9983_v51 = vadd.f32 %v9982_v10, %v9981_v16  ;;  %v18334_v10 = vld [vmem:[#allocation132_spill] sm:$0xff]  ;;  %v18336_v16 = vld [vmem:[#allocation134_spill] sm:$0xff] }
 0x2a1   : > { %v10017_v27 = vpop.f32.mrf.mxu1 }
 0x2a2   : > { %v2577_v54 = vadd.f32 %v9983_v51, %v2507_v6  ;;  %v10018_v15 = vadd.f32 %v10017_v27, %v10016_v46  ;;  %v18324_v51 = vld [vmem:[#allocation121_spill] sm:$0xff] }
 0x2a3   : > { %v18333_v6 = vld [vmem:[#allocation129_spill] sm:$0xff] }
 0x2a4   : > { %v2647_v21 = vadd.f32 %v10018_v15, %v2577_v54  ;;  %v18331_v54 = vld [vmem:[#allocation128_spill] sm:$0xff]  ;;  %v18337_v46 = vld [vmem:[#allocation133_spill] sm:$0xff] }
 0x2a5   : > { %v18345_v27 = vld [vmem:[#allocation141_spill] sm:$0xff]  ;;  %v18346_v15 = vld [vmem:[#allocation144_spill] sm:$0xff] }
 0x2bf   : > { %v10051_v61 = vpop.f32.mrf.mxu0 }
 0x2c0   : > { %v10086_v7 = vpop.f32.mrf.mxu1 }
 0x2c1   : > { %v10052_v30 = vpop.f32.mrf.mxu0 }
 0x2c2   : > { %v10087_v1 = vpop.f32.mrf.mxu1  ;;  %v10053_v37 = vadd.f32 %v10052_v30, %v10051_v61  ;;  %v18332_v61 = vld [vmem:[#allocation130_spill] sm:$0xff]  ;;  %v18338_v30 = vld [vmem:[#allocation136_spill] sm:$0xff] }
 0x2c3   : > { %v10088_v53 = vadd.f32 %v10087_v1, %v10086_v7  ;;  %v18329_v7 = vld [vmem:[#allocation126_spill] sm:$0xff]  ;;  %v18330_v1 = vld [vmem:[#allocation127_spill] sm:$0xff] }
 0x2c4   : > { %v2717_v20 = vadd.f32 %v10053_v37, %v2647_v21  ;;  %v18325_v21 = vld [vmem:[#allocation123_spill] sm:$0xff]  ;;  %v18340_v37 = vld [vmem:[#allocation138_spill] sm:$0xff] }
 0x2c6   : > { %v2787_v0 = vadd.f32 %v10088_v53, %v2717_v20  ;;  %v18326_v53 = vld [vmem:[#allocation122_spill] sm:$0xff]  ;;  %v18328_v20 = vld [vmem:[#allocation124_spill] sm:$0xff] }
 0x2c8   : > { %v14998_v62 = vmul.f32 0.041666668, %v2787_v0  ;;  %v18327_v0 = vld [vmem:[#allocation125_spill] sm:$0xff] }
 0x2ca   : > { %10121 = vmatprep.mubr.msk.f32.mxu0 %vm2791_vm8, %v14998_v62  ;;  %10155 = vmatprep.mubr.msk.f32.mxu1 %vm2791_vm8, %v14998_v62 }
 0x2cb   : > { %10122 = vmatmul.mubr.msk.f32.vlgmr.msra.gmra.mxu0 %vm2791_vm8, %v14998_v62  ;;  %10156 = vmatmul.mubr.msk.f32.vlgmr.msra.gmra.mxu1 %vm2791_vm8, %v14998_v62 }
 0x2cc   : > { %10158 = vmatpush3.xpose.msk.msra.mxu0 %vm2791_vm8, %v18324_v51  ;;  %10192 = vmatpush3.xpose.msk.msra.mxu1 %vm2791_vm8, %v18325_v21 }
 0x2cd   : > { %10189 = vmatprep.mubr.msk.f32.mxu0 %vm2791_vm8, %v14998_v62  ;;  %10223 = vmatprep.mubr.msk.f32.mxu1 %vm2791_vm8, %v14998_v62 }
 0x2ce   : > { %10159 = vmatprep.subr.msk.mxu0 %vm2791_vm8, %v18326_v53  ;;  %10193 = vmatprep.subr.msk.mxu1 %vm2791_vm8, %v18327_v0 }
 0x2d0   : > { %10160 = vmatpush3.xpose.msk.msra.mxu0 %vm2791_vm8, %v18328_v20  ;;  %10194 = vmatpush3.xpose.msk.msra.mxu1 %vm2791_vm8, %v14306_v34 }
 0x2d1   : > { %10161 = vmatprep.subr.msk.mxu0 %vm2791_vm8, %v18329_v7  ;;  %10195 = vmatprep.subr.msk.mxu1 %vm2791_vm8, %v14314_v33 }
 0x2d4   : > { %10162 = vmatpush3.xpose.msk.msra.mxu0 %vm2791_vm8, %v18330_v1  ;;  %10196 = vmatpush3.xpose.msk.msra.mxu1 %vm2791_vm8, %v14325_v60 }
 0x2d5   : > { %10163 = vmatprep.subr.msk.mxu0 %vm2791_vm8, %v18331_v54  ;;  %10197 = vmatprep.subr.msk.mxu1 %vm2791_vm8, %v18332_v61 }
 0x2d8   : > { %10164 = vmatpush3.xpose.msk.msra.mxu0 %vm2791_vm8, %v18333_v6  ;;  %10198 = vmatpush3.xpose.msk.msra.mxu1 %vm2791_vm8, %v18334_v10 }
 0x2d9   : > { %10165 = vmatprep.subr.msk.mxu0 %vm2791_vm8, %v18335_v36  ;;  %10199 = vmatprep.subr.msk.mxu1 %vm2791_vm8, %v18336_v16 }
 0x2dc   : > { %10166 = vmatpush3.xpose.msk.msra.mxu0 %vm2791_vm8, %v18337_v46  ;;  %10200 = vmatpush3.xpose.msk.msra.mxu1 %vm2791_vm8, %v18338_v30  ;;  %v18347_v30 = vld [vmem:[#allocation143_spill] sm:$0xff] }
 0x2dd   : > { %10167 = vmatprep.subr.msk.mxu0 %vm2791_vm8, %v18339_v43  ;;  %10201 = vmatprep.subr.msk.mxu1 %vm2791_vm8, %v18340_v37  ;;  %v18348_v37 = vld [vmem:[#allocation146_spill] sm:$0xff] }
 0x2e0   : > { %10168 = vmatpush3.xpose.msk.msra.mxu0 %vm2791_vm8, %v18341_v29  ;;  %10202 = vmatpush3.xpose.msk.msra.mxu1 %vm2791_vm8, %v18342_v38  ;;  %v18349_v29 = vld [vmem:[#allocation145_spill] sm:$0xff]  ;;  %v18350_v38 = vld [vmem:[#allocation148_spill] sm:$0xff] }
 0x2e1   : > { %10169 = vmatprep.subr.msk.mxu0 %vm2791_vm8, %v18343_v8  ;;  %10203 = vmatprep.subr.msk.mxu1 %vm2791_vm8, %v18344_v31  ;;  %v18351_v8 = vld [vmem:[#allocation147_spill] sm:$0xff]  ;;  %v18352_v31 = vld [vmem:[#allocation150_spill] sm:$0xff] }
 0x2e4   : > { %10170 = vmatpush3.xpose.msk.msra.mxu0 %vm2791_vm8, %v18345_v27  ;;  %10204 = vmatpush3.xpose.msk.msra.mxu1 %vm2791_vm8, %v18346_v15  ;;  %v18353_v27 = vld [vmem:[#allocation149_spill] sm:$0xff]  ;;  %v18354_v15 = vld [vmem:[#allocation152_spill] sm:$0xff] }
 0x2e5   : > { %10171 = vmatprep.subr.msk.mxu0 %vm2791_vm8, %v18347_v30  ;;  %10205 = vmatprep.subr.msk.mxu1 %vm2791_vm8, %v18348_v37  ;;  %v18355_v30 = vld [vmem:[#allocation151_spill] sm:$0xff]  ;;  %v18356_v37 = vld [vmem:[#allocation154_spill] sm:$0xff] }
 0x2e8   : > { %10172 = vmatpush3.xpose.msk.msra.mxu0 %vm2791_vm8, %v18349_v29  ;;  %10206 = vmatpush3.xpose.msk.msra.mxu1 %vm2791_vm8, %v18350_v38  ;;  %v18357_v29 = vld [vmem:[#allocation153_spill] sm:$0xff]  ;;  %v18358_v38 = vld [vmem:[#allocation156_spill] sm:$0xff] }
 0x2e9   : > { %10173 = vmatprep.subr.msk.mxu0 %vm2791_vm8, %v18351_v8  ;;  %10207 = vmatprep.subr.msk.mxu1 %vm2791_vm8, %v18352_v31  ;;  %v18359_v8 = vld [vmem:[#allocation155_spill] sm:$0xff]  ;;  %v18360_v31 = vld [vmem:[#allocation158_spill] sm:$0xff] }
 0x2ec   : > { %10174 = vmatpush3.xpose.msk.msra.mxu0 %vm2791_vm8, %v18353_v27  ;;  %10208 = vmatpush3.xpose.msk.msra.mxu1 %vm2791_vm8, %v18354_v15  ;;  %v18361_v27 = vld [vmem:[#allocation157_spill] sm:$0xff] }
 0x2ed   : > { %10175 = vmatprep.subr.msk.mxu0 %vm2791_vm8, %v18355_v30  ;;  %10209 = vmatprep.subr.msk.mxu1 %vm2791_vm8, %v18356_v37  ;;  %v18362_v15 = vld [vmem:[#allocation161_spill] sm:$0xff]  ;;  %v18363_v30 = vld [vmem:[#allocation159_spill] sm:$0xff] }
 0x2ee   : > { %v18364_v37 = vld [vmem:[#allocation163_spill] sm:$0xff] }
 0x2f0   : > { %10176 = vmatpush3.xpose.msk.msra.mxu0 %vm2791_vm8, %v18357_v29  ;;  %10210 = vmatpush3.xpose.msk.msra.mxu1 %vm2791_vm8, %v18358_v38  ;;  %v18365_v29 = vld [vmem:[#allocation162_spill] sm:$0xff]  ;;  %v18366_v38 = vld [vmem:[#allocation165_spill] sm:$0xff] }
 0x2f1   : > { %10177 = vmatprep.subr.msk.mxu0 %vm2791_vm8, %v18359_v8  ;;  %10211 = vmatprep.subr.msk.mxu1 %vm2791_vm8, %v18360_v31  ;;  %v18367_v8 = vld [vmem:[#allocation164_spill] sm:$0xff]  ;;  %v18368_v31 = vld [vmem:[#allocation167_spill] sm:$0xff] }
 0x2f4   : > { %10178 = vmatpush3.xpose.msk.msra.mxu0 %vm2791_vm8, %v18361_v27  ;;  %10212 = vmatpush3.xpose.msk.msra.mxu1 %vm2791_vm8, %v18362_v15  ;;  %v18369_v27 = vld [vmem:[#allocation166_spill] sm:$0xff]  ;;  %v18370_v15 = vld [vmem:[#allocation169_spill] sm:$0xff] }
 0x2f5   : > { %10179 = vmatprep.subr.msk.mxu0 %vm2791_vm8, %v18363_v30  ;;  %10213 = vmatprep.subr.msk.mxu1 %vm2791_vm8, %v18364_v37  ;;  %v18371_v30 = vld [vmem:[#allocation168_spill] sm:$0xff]  ;;  %v18372_v37 = vld [vmem:[#allocation171_spill] sm:$0xff] }
 0x2f8   : > { %10180 = vmatpush3.xpose.msk.msra.mxu0 %vm2791_vm8, %v18365_v29  ;;  %10214 = vmatpush3.xpose.msk.msra.mxu1 %vm2791_vm8, %v18366_v38  ;;  %v18373_v29 = vld [vmem:[#allocation170_spill] sm:$0xff]  ;;  %v18374_v38 = vld [vmem:[#allocation173_spill] sm:$0xff] }
 0x2f9   : > { %10181 = vmatprep.subr.msk.mxu0 %vm2791_vm8, %v18367_v8  ;;  %10215 = vmatprep.subr.msk.mxu1 %vm2791_vm8, %v18368_v31  ;;  %v18375_v8 = vld [vmem:[#allocation172_spill] sm:$0xff]  ;;  %v18376_v31 = vld [vmem:[#allocation175_spill] sm:$0xff] }
 0x2fc   : > { %10182 = vmatpush3.xpose.msk.msra.mxu0 %vm2791_vm8, %v18369_v27  ;;  %10216 = vmatpush3.xpose.msk.msra.mxu1 %vm2791_vm8, %v18370_v15  ;;  %v18377_v27 = vld [vmem:[#allocation174_spill] sm:$0xff]  ;;  %v18378_v15 = vld [vmem:[#allocation177_spill] sm:$0xff] }
 0x2fd   : > { %10183 = vmatprep.subr.msk.mxu0 %vm2791_vm8, %v18371_v30  ;;  %10217 = vmatprep.subr.msk.mxu1 %vm2791_vm8, %v18372_v37  ;;  %v18379_v30 = vld [vmem:[#allocation176_spill] sm:$0xff]  ;;  %v18380_v37 = vld [vmem:[#allocation179_spill] sm:$0xff] }
 0x300   : > { %10184 = vmatpush3.xpose.msk.msra.mxu0 %vm2791_vm8, %v18373_v29  ;;  %10218 = vmatpush3.xpose.msk.msra.mxu1 %vm2791_vm8, %v18374_v38  ;;  %v18381_v29 = vld [vmem:[#allocation178_spill] sm:$0xff]  ;;  %v18382_v38 = vld [vmem:[#allocation180_spill] sm:$0xff] }
 0x301   : > { %10185 = vmatprep.subr.msk.mxu0 %vm2791_vm8, %v18375_v8  ;;  %10219 = vmatprep.subr.msk.mxu1 %vm2791_vm8, %v18376_v31  ;;  %v18383_v8 = vld [vmem:[#allocation181_spill] sm:$0xff]  ;;  %v18384_v31 = vld [vmem:[#allocation182_spill] sm:$0xff] }
 0x304   : > { %10186 = vmatpush3.xpose.msk.msra.mxu0 %vm2791_vm8, %v18377_v27  ;;  %10220 = vmatpush3.xpose.msk.msra.mxu1 %vm2791_vm8, %v18378_v15  ;;  %v18390_v15 = vld [vmem:[#allocation190_spill] sm:$0xff] }
 0x305   : > { %10187 = vmatprep.subr.msk.mxu0 %vm2791_vm8, %v18379_v30  ;;  %10221 = vmatprep.subr.msk.mxu1 %vm2791_vm8, %v18380_v37  ;;  %v18388_v37 = vld [vmem:[#allocation188_spill] sm:$0xff] }
 0x308   : > { %10188 = vmatpush3.xpose.msk.msra.mxu0 %vm2791_vm8, %v18381_v29  ;;  %10222 = vmatpush3.xpose.msk.msra.mxu1 %vm2791_vm8, %v18382_v38  ;;  %v18385_v38 = vld [vmem:[#allocation185_spill] sm:$0xff] }
 0x309   : > { %10225 = vmatprep.subr.msk.mxu0 %vm2791_vm8, %v18383_v8  ;;  %10259 = vmatprep.subr.msk.mxu1 %vm2791_vm8, %v18384_v31  ;;  %v18386_v31 = vld [vmem:[#allocation186_spill] sm:$0xff]  ;;  %v18387_v8 = vld [vmem:[#allocation187_spill] sm:$0xff] }
 0x30b   : > { %10190 = vmatmul.mubr.msk.f32.vlgmr.msra.gmra.mxu0 %vm2791_vm8, %v14998_v62  ;;  %10224 = vmatmul.mubr.msk.f32.vlgmr.msra.gmra.mxu1 %vm2791_vm8, %v14998_v62 }
 0x30c   : > { %10226 = vmatpush3.xpose.msk.msra.mxu0 %vm2791_vm8, %v14592_v2  ;;  %10257 = vmatprep.mubr.msk.f32.mxu0 %vm2791_vm8, %v14998_v62  ;;  %v18389_v2 = vld [vmem:[#allocation189_spill] sm:$0xff] }
 0x30d   : > { %10260 = vmatpush3.xpose.msk.msra.mxu1 %vm2791_vm8, %v14594_v5  ;;  %10291 = vmatprep.mubr.msk.f32.mxu1 %vm2791_vm8, %v14998_v62  ;;  %v18391_v5 = vld [vmem:[#allocation193_spill] sm:$0xff] }
 0x30e   : > { %10227 = vmatprep.subr.msk.mxu0 %vm2791_vm8, %v18385_v38  ;;  %10261 = vmatprep.subr.msk.mxu1 %vm2791_vm8, %v18386_v31  ;;  %v18392_v31 = vld [vmem:[#allocation194_spill] sm:$0xff] }
 0x310   : > { %10228 = vmatpush3.xpose.msk.msra.mxu0 %vm2791_vm8, %v18387_v8  ;;  %v18393_v8 = vld [vmem:[#allocation195_spill] sm:$0xff] }
 0x311   : > { %10262 = vmatpush3.xpose.msk.msra.mxu1 %vm2791_vm8, %v18388_v37  ;;  %10229 = vmatprep.subr.msk.mxu0 %vm2791_vm8, %v18389_v2  ;;  %v18394_v37 = vld [vmem:[#allocation196_spill] sm:$0xff]  ;;  %v18395_v2 = vld [vmem:[#allocation197_spill] sm:$0xff] }
 0x312   : > { %10263 = vmatprep.subr.msk.mxu1 %vm2791_vm8, %v18390_v15  ;;  %v18396_v15 = vld [vmem:[#allocation198_spill] sm:$0xff] }
 0x314   : > { %10230 = vmatpush3.xpose.msk.msra.mxu0 %vm2791_vm8, %v14629_v45  ;;  %v18397_v45 = vld [vmem:[#allocation199_spill] sm:$0xff] }
 0x315   : > { %10264 = vmatpush3.xpose.msk.msra.mxu1 %vm2791_vm8, %v14631_v25  ;;  %10231 = vmatprep.subr.msk.mxu0 %vm2791_vm8, %v18391_v5  ;;  %v18398_v25 = vld [vmem:[#allocation200_spill] sm:$0xff]  ;;  %v18399_v5 = vld [vmem:[#allocation201_spill] sm:$0xff] }
 0x316   : > { %10265 = vmatprep.subr.msk.mxu1 %vm2791_vm8, %v18392_v31  ;;  %v18400_v31 = vld [vmem:[#allocation202_spill] sm:$0xff] }
 0x318   : > { %10232 = vmatpush3.xpose.msk.msra.mxu0 %vm2791_vm8, %v18393_v8  ;;  %v18401_v8 = vld [vmem:[#allocation203_spill] sm:$0xff] }
 0x319   : > { %10266 = vmatpush3.xpose.msk.msra.mxu1 %vm2791_vm8, %v18394_v37  ;;  %10233 = vmatprep.subr.msk.mxu0 %vm2791_vm8, %v18395_v2  ;;  %v18402_v37 = vld [vmem:[#allocation204_spill] sm:$0xff]  ;;  %v18403_v2 = vld [vmem:[#allocation205_spill] sm:$0xff] }
 0x31a   : > { %10267 = vmatprep.subr.msk.mxu1 %vm2791_vm8, %v18396_v15  ;;  %v18404_v15 = vld [vmem:[#allocation206_spill] sm:$0xff] }
 0x31c   : > { %10234 = vmatpush3.xpose.msk.msra.mxu0 %vm2791_vm8, %v18397_v45 }
 0x31d   : > { %10268 = vmatpush3.xpose.msk.msra.mxu1 %vm2791_vm8, %v18398_v25  ;;  %10235 = vmatprep.subr.msk.mxu0 %vm2791_vm8, %v18399_v5  ;;  %v18405_v25 = vld [vmem:[#allocation208_spill] sm:$0xff]  ;;  %v18406_v5 = vld [vmem:[#allocation209_spill] sm:$0xff] }
 0x31e   : > { %10269 = vmatprep.subr.msk.mxu1 %vm2791_vm8, %v18400_v31  ;;  %v18407_v31 = vld [vmem:[#allocation210_spill] sm:$0xff] }
 0x320   : > { %10236 = vmatpush3.xpose.msk.msra.mxu0 %vm2791_vm8, %v18401_v8  ;;  %v18408_v8 = vld [vmem:[#allocation211_spill] sm:$0xff] }
 0x321   : > { %10270 = vmatpush3.xpose.msk.msra.mxu1 %vm2791_vm8, %v18402_v37  ;;  %10237 = vmatprep.subr.msk.mxu0 %vm2791_vm8, %v18403_v2  ;;  %v18409_v37 = vld [vmem:[#allocation212_spill] sm:$0xff]  ;;  %v18410_v2 = vld [vmem:[#allocation213_spill] sm:$0xff] }
 0x322   : > { %10271 = vmatprep.subr.msk.mxu1 %vm2791_vm8, %v18404_v15  ;;  %v18411_v15 = vld [vmem:[#allocation214_spill] sm:$0xff] }
 0x324   : > { %10238 = vmatpush3.xpose.msk.msra.mxu0 %vm2791_vm8, %v14703_v32  ;;  %v18412_v32 = vld [vmem:[#allocation215_spill] sm:$0xff] }
 0x325   : > { %10272 = vmatpush3.xpose.msk.msra.mxu1 %vm2791_vm8, %v18405_v25  ;;  %10239 = vmatprep.subr.msk.mxu0 %vm2791_vm8, %v18406_v5  ;;  %v18413_v25 = vld [vmem:[#allocation216_spill] sm:$0xff]  ;;  %v18414_v5 = vld [vmem:[#allocation217_spill] sm:$0xff] }
 0x326   : > { %10273 = vmatprep.subr.msk.mxu1 %vm2791_vm8, %v18407_v31  ;;  %v18415_v31 = vld [vmem:[#allocation218_spill] sm:$0xff] }
 0x328   : > { %10240 = vmatpush3.xpose.msk.msra.mxu0 %vm2791_vm8, %v18408_v8  ;;  %v18416_v8 = vld [vmem:[#allocation219_spill] sm:$0xff] }
 0x329   : > { %10274 = vmatpush3.xpose.msk.msra.mxu1 %vm2791_vm8, %v18409_v37  ;;  %10241 = vmatprep.subr.msk.mxu0 %vm2791_vm8, %v18410_v2  ;;  %v18417_v37 = vld [vmem:[#allocation220_spill] sm:$0xff]  ;;  %v18418_v2 = vld [vmem:[#allocation221_spill] sm:$0xff] }
 0x32a   : > { %10275 = vmatprep.subr.msk.mxu1 %vm2791_vm8, %v18411_v15  ;;  %v18419_v15 = vld [vmem:[#allocation222_spill] sm:$0xff] }
 0x32c   : > { %10242 = vmatpush3.xpose.msk.msra.mxu0 %vm2791_vm8, %v18412_v32  ;;  %v18420_v32 = vld [vmem:[#allocation224_spill] sm:$0xff] }
 0x32d   : > { %10276 = vmatpush3.xpose.msk.msra.mxu1 %vm2791_vm8, %v18413_v25  ;;  %10243 = vmatprep.subr.msk.mxu0 %vm2791_vm8, %v18414_v5  ;;  %v18421_v25 = vld [vmem:[#allocation225_spill] sm:$0xff] }
 0x32e   : > { %10277 = vmatprep.subr.msk.mxu1 %vm2791_vm8, %v18415_v31  ;;  %v18422_v31 = vld [vmem:[#allocation227_spill] sm:$0xff] }
 0x330   : > { %10244 = vmatpush3.xpose.msk.msra.mxu0 %vm2791_vm8, %v18416_v8 }
 0x331   : > { %10278 = vmatpush3.xpose.msk.msra.mxu1 %vm2791_vm8, %v18417_v37  ;;  %10245 = vmatprep.subr.msk.mxu0 %vm2791_vm8, %v18418_v2 }
 0x332   : > { %10279 = vmatprep.subr.msk.mxu1 %vm2791_vm8, %v18419_v15  ;;  %v18423_v15 = vld [vmem:[#allocation231_spill] sm:$0xff] }
 0x334   : > { %10246 = vmatpush3.xpose.msk.msra.mxu0 %vm2791_vm8, %v18420_v32 }
 0x335   : > { %10280 = vmatpush3.xpose.msk.msra.mxu1 %vm2791_vm8, %v18421_v25  ;;  %10247 = vmatprep.subr.msk.mxu0 %vm2791_vm8, %v14783_v56  ;;  %v18424_v25 = vld [vmem:[#allocation233_spill] sm:$0xff]  ;;  %v18425_v56 = vld [vmem:[#allocation234_spill] sm:$0xff] }
 0x336   : > { %10281 = vmatprep.subr.msk.mxu1 %vm2791_vm8, %v18422_v31 }
 0x338   : > { %10248 = vmatpush3.xpose.msk.msra.mxu0 %vm2791_vm8, %v14789_v59 }
 0x339   : > { %10282 = vmatpush3.xpose.msk.msra.mxu1 %vm2791_vm8, %v14791_v49  ;;  %10249 = vmatprep.subr.msk.mxu0 %vm2791_vm8, %v14801_v47 }
 0x33a   : > { %10283 = vmatprep.subr.msk.mxu1 %vm2791_vm8, %v18423_v15 }
 0x33c   : > { %10250 = vmatpush3.xpose.msk.msra.mxu0 %vm2791_vm8, %v14815_v9 }
 0x33d   : > { %10284 = vmatpush3.xpose.msk.msra.mxu1 %vm2791_vm8, %v18424_v25  ;;  %10251 = vmatprep.subr.msk.mxu0 %vm2791_vm8, %v18425_v56 }
 0x33e   : > { %10285 = vmatprep.subr.msk.mxu1 %vm2791_vm8, %v14823_v57 }
 0x340   : > { %10252 = vmatpush3.xpose.msk.msra.mxu0 %vm2791_vm8, %v14827_v19 }
 0x341   : > { %10286 = vmatpush3.xpose.msk.msra.mxu1 %vm2791_vm8, %v14829_v42  ;;  %10253 = vmatprep.subr.msk.mxu0 %vm2791_vm8, %v14835_v11 }
 0x342   : > { %10287 = vmatprep.subr.msk.mxu1 %vm2791_vm8, %v14837_v50 }
 0x344   : > { %10254 = vmatpush3.xpose.msk.msra.mxu0 %vm2791_vm8, %v14842_v14 }
 0x345   : > { %10288 = vmatpush3.xpose.msk.msra.mxu1 %vm2791_vm8, %v14844_v4  ;;  %10255 = vmatprep.subr.msk.mxu0 %vm2791_vm8, %v14848_v58 }
 0x346   : > { %10289 = vmatprep.subr.msk.mxu1 %vm2791_vm8, %v14850_v28 }
 0x348   : > { %10256 = vmatpush3.xpose.msk.msra.mxu0 %vm2791_vm8, %v14854_v41 }
 0x349   : > { %10290 = vmatpush3.xpose.msk.msra.mxu1 %vm2791_vm8, %v14858_v17  ;;  %10293 = vmatprep.subr.mxu0 %v13939_v26 }
 0x34a   : > { %10328 = vmatprep.subr.mxu1 %v13941_v18 }
 0x34b   : > { %10258 = vmatmul.mubr.msk.f32.vlgmr.msra.gmra.mxu0 %vm2791_vm8, %v14998_v62 }
 0x34c   : > { %10292 = vmatmul.mubr.msk.f32.vlgmr.msra.gmra.mxu1 %vm2791_vm8, %v14998_v62  ;;  %10294 = vmatpush3.msra.mxu0 %v13943_v24  ;;  %v18426_v62 = vld [vmem:[#allocation64_spill] sm:$0xff] }
 0x34d   : > { %10295 = vmatprep.subr.mxu0 %v13948_v3  ;;  %10329 = vmatpush3.msra.mxu1 %v13956_v63  ;;  %v18476_v3 = vld [vmem:[#allocation99_spill] sm:$0xff] }
 0x34e   : > { %10296 = vmatpush3.msra.mxu0 %v13960_v39  ;;  %10330 = vmatprep.subr.mxu1 %v13958_v23  ;;  %v18427_v39 = vld [vmem:[#allocation67_spill] sm:$0xff] }
 0x34f   : > { %10297 = vmatprep.subr.mxu0 %v13972_v52  ;;  %10331 = vmatpush3.msra.mxu1 %v13962_v35  ;;  %v18428_v52 = vld [vmem:[#allocation66_spill] sm:$0xff]  ;;  %v18429_v35 = vld [vmem:[#allocation69_spill] sm:$0xff] }
 0x350   : > { %10298 = vmatpush3.msra.mxu0 %v13978_v13  ;;  %10332 = vmatprep.subr.mxu1 %v13974_v22  ;;  %v18430_v13 = vld [vmem:[#allocation68_spill] sm:$0xff]  ;;  %v18431_v22 = vld [vmem:[#allocation71_spill] sm:$0xff] }
 0x351   : > { %10299 = vmatprep.subr.mxu0 %v13990_v55  ;;  %10333 = vmatpush3.msra.mxu1 %v13980_v44  ;;  %v18432_v55 = vld [vmem:[#allocation70_spill] sm:$0xff]  ;;  %v18433_v44 = vld [vmem:[#allocation73_spill] sm:$0xff] }
 0x352   : > { %10300 = vmatpush3.msra.mxu0 %v14002_v40  ;;  %10334 = vmatprep.subr.mxu1 %v13992_v48  ;;  %v18434_v40 = vld [vmem:[#allocation72_spill] sm:$0xff]  ;;  %v18435_v48 = vld [vmem:[#allocation75_spill] sm:$0xff] }
 0x353   : > { %10301 = vmatprep.subr.mxu0 %v14008_v12  ;;  %10335 = vmatpush3.msra.mxu1 %v18426_v62  ;;  %v18436_v12 = vld [vmem:[#allocation74_spill] sm:$0xff]  ;;  %v18437_v62 = vld [vmem:[#allocation77_spill] sm:$0xff] }
 0x354   : > { %10302 = vmatpush3.msra.mxu0 %v18427_v39  ;;  %10336 = vmatprep.subr.mxu1 %v18428_v52  ;;  %v18438_v39 = vld [vmem:[#allocation76_spill] sm:$0xff]  ;;  %v18439_v52 = vld [vmem:[#allocation79_spill] sm:$0xff] }
 0x355   : > { %10303 = vmatprep.subr.mxu0 %v18429_v35  ;;  %10337 = vmatpush3.msra.mxu1 %v18430_v13  ;;  %v18440_v35 = vld [vmem:[#allocation78_spill] sm:$0xff]  ;;  %v18441_v13 = vld [vmem:[#allocation81_spill] sm:$0xff] }
 0x356   : > { %10304 = vmatpush3.msra.mxu0 %v18431_v22  ;;  %10338 = vmatprep.subr.mxu1 %v18432_v55  ;;  %v18442_v22 = vld [vmem:[#allocation80_spill] sm:$0xff]  ;;  %v18443_v55 = vld [vmem:[#allocation83_spill] sm:$0xff] }
 0x357   : > { %10305 = vmatprep.subr.mxu0 %v18433_v44  ;;  %10339 = vmatpush3.msra.mxu1 %v18434_v40  ;;  %v18444_v44 = vld [vmem:[#allocation82_spill] sm:$0xff]  ;;  %v18445_v40 = vld [vmem:[#allocation85_spill] sm:$0xff] }
 0x358   : > { %10306 = vmatpush3.msra.mxu0 %v18435_v48  ;;  %10340 = vmatprep.subr.mxu1 %v18436_v12  ;;  %v18446_v48 = vld [vmem:[#allocation84_spill] sm:$0xff]  ;;  %v18447_v12 = vld [vmem:[#allocation87_spill] sm:$0xff] }
 0x359   : > { %10307 = vmatprep.subr.mxu0 %v18437_v62  ;;  %10341 = vmatpush3.msra.mxu1 %v18438_v39  ;;  %v18448_v62 = vld [vmem:[#allocation86_spill] sm:$0xff]  ;;  %v18449_v39 = vld [vmem:[#allocation93_spill] sm:$0xff] }
 0x35a   : > { %10308 = vmatpush3.msra.mxu0 %v18439_v52  ;;  %10342 = vmatprep.subr.mxu1 %v18440_v35  ;;  %v18450_v52 = vld [vmem:[#allocation88_spill] sm:$0xff]  ;;  %v18451_v35 = vld [vmem:[#allocation95_spill] sm:$0xff] }
 0x35b   : > { %10309 = vmatprep.subr.mxu0 %v18441_v13  ;;  %10343 = vmatpush3.msra.mxu1 %v18442_v22  ;;  %v18452_v13 = vld [vmem:[#allocation94_spill] sm:$0xff]  ;;  %v18453_v22 = vld [vmem:[#allocation97_spill] sm:$0xff] }
 0x35c   : > { %10310 = vmatpush3.msra.mxu0 %v18443_v55  ;;  %10344 = vmatprep.subr.mxu1 %v18444_v44  ;;  %v18454_v55 = vld [vmem:[#allocation96_spill] sm:$0xff] }
 0x35d   : > { %10311 = vmatprep.subr.mxu0 %v18445_v40  ;;  %10345 = vmatpush3.msra.mxu1 %v18446_v48  ;;  %v18455_v44 = vld [vmem:[#allocation100_spill] sm:$0xff]  ;;  %v18456_v40 = vld [vmem:[#allocation98_spill] sm:$0xff] }
 0x35e   : > { %10312 = vmatpush3.msra.mxu0 %v18447_v12  ;;  %10346 = vmatprep.subr.mxu1 %v18448_v62  ;;  %v18457_v48 = vld [vmem:[#allocation102_spill] sm:$0xff]  ;;  %v18458_v12 = vld [vmem:[#allocation101_spill] sm:$0xff]  ;;  %v18459_v62 = vld [vmem:[#allocation104_spill] sm:$0xff] }
 0x35f   : > { %10313 = vmatprep.subr.mxu0 %v18449_v39  ;;  %10347 = vmatpush3.msra.mxu1 %v18450_v52  ;;  %v18460_v39 = vld [vmem:[#allocation103_spill] sm:$0xff]  ;;  %v18461_v52 = vld [vmem:[#allocation106_spill] sm:$0xff] }
 0x360   : > { %10314 = vmatpush3.msra.mxu0 %v18451_v35  ;;  %10348 = vmatprep.subr.mxu1 %v18452_v13  ;;  %v18462_v35 = vld [vmem:[#allocation105_spill] sm:$0xff]  ;;  %v18463_v13 = vld [vmem:[#allocation108_spill] sm:$0xff] }
 0x361   : > { %10315 = vmatprep.subr.mxu0 %v18453_v22  ;;  %10349 = vmatpush3.msra.mxu1 %v18454_v55  ;;  %v18464_v22 = vld [vmem:[#allocation107_spill] sm:$0xff]  ;;  %v18465_v55 = vld [vmem:[#allocation110_spill] sm:$0xff] }
 0x362   : > { %10316 = vmatpush3.msra.mxu0 %v18455_v44  ;;  %10350 = vmatprep.subr.mxu1 %v18456_v40  ;;  %v18466_v44 = vld [vmem:[#allocation109_spill] sm:$0xff]  ;;  %v18467_v40 = vld [vmem:[#allocation112_spill] sm:$0xff] }
 0x363   : > { %10317 = vmatprep.subr.mxu0 %v18457_v48  ;;  %10351 = vmatpush3.msra.mxu1 %v18458_v12  ;;  %v18468_v48 = vld [vmem:[#allocation111_spill] sm:$0xff]  ;;  %v18469_v12 = vld [vmem:[#allocation114_spill] sm:$0xff] }
 0x364   : > { %10318 = vmatpush3.msra.mxu0 %v18459_v62  ;;  %10352 = vmatprep.subr.mxu1 %v18460_v39  ;;  %v18470_v62 = vld [vmem:[#allocation113_spill] sm:$0xff] }
 0x365   : > { %10319 = vmatprep.subr.mxu0 %v18461_v52  ;;  %10353 = vmatpush3.msra.mxu1 %v18462_v35  ;;  %v18471_v39 = vld [vmem:[#allocation117_spill] sm:$0xff]  ;;  %v18472_v52 = vld [vmem:[#allocation115_spill] sm:$0xff]  ;;  %v18473_v35 = vld [vmem:[#allocation118_spill] sm:$0xff] }
 0x366   : > { %10320 = vmatpush3.msra.mxu0 %v18463_v13  ;;  %10354 = vmatprep.subr.mxu1 %v18464_v22  ;;  %v18474_v13 = vld [vmem:[#allocation119_spill] sm:$0xff]  ;;  %v18475_v22 = vld [vmem:[#allocation120_spill] sm:$0xff] }
 0x367   : > { %10321 = vmatprep.subr.mxu0 %v18465_v55  ;;  %10355 = vmatpush3.msra.mxu1 %v18466_v44 }
 0x368   : > { %10322 = vmatpush3.msra.mxu0 %v18467_v40  ;;  %10356 = vmatprep.subr.mxu1 %v18468_v48 }
 0x369   : > { %10323 = vmatprep.subr.mxu0 %v18469_v12  ;;  %10357 = vmatpush3.msra.mxu1 %v18470_v62 }
 0x36a   : > { %10324 = vmatpush3.msra.mxu0 %v18471_v39  ;;  %10358 = vmatprep.subr.mxu1 %v18472_v52  ;;  %v18477_v39 = vld [vmem:[#allocation116_spill] sm:$0xff] }
 0x36b   : > { %10359 = vmatpush3.msra.mxu1 %v18473_v35  ;;  %10363 = vmatprep.subr.mxu0 %v18474_v13 }
 0x36c   : > { %10398 = vmatprep.subr.mxu1 %v18475_v22 }
 0x38b   : > { %v3437_v55 = vpop.f32.mrf.mxu0  ;;  %v3508_v44 = vpop.f32.mrf.mxu1 }
 0x38d   : > { %v3439_v23 = vpop.f32.mrf.mxu0  ;;  %v3510_v40 = vpop.f32.mrf.mxu1 }
 0x38e   : > { %v3809_v63 = vcombine.low %v3437_v55, %v3439_v23  ;;  %v3810_v48 = vcombine.low %v3508_v44, %v3510_v40  ;;  %v18486_v44 = vld [vmem:[#allocation142_spill] sm:$0xff]  ;;  %v18487_v55 = vld [vmem:[#allocation145_spill] sm:$0xff]  ;;  %v18489_v40 = vld [vmem:[#allocation147_spill] sm:$0xff] }
 0x390   : > { %v3817_v12 = vrot.slane %v3809_v63, %v18476_v3  ;;  %v3824_v62 = vrot.slane %v3810_v48, %v18476_v3  ;;  %v18480_v63 = vld [vmem:[#allocation136_spill] sm:$0xff] }
 0x391   : > { %v18488_v48 = vld [vmem:[#allocation144_spill] sm:$0xff] }
 0x392   : > { %v3825_v24 = vcombine.low %v3817_v12, %v3824_v62  ;;  %v18490_v12 = vld [vmem:[#allocation146_spill] sm:$0xff]  ;;  %v18492_v62 = vld [vmem:[#allocation148_spill] sm:$0xff] }
 0x394   : > { %v15345_v18 = vsub.f32 %v18477_v39, %v3825_v24  ;;  %v18479_v24 = vld [vmem:[#allocation137_spill] sm:$0xff]  ;;  %v18481_v39 = vld [vmem:[#allocation139_spill] sm:$0xff] }
 0x396   : > { %18478 = vst [vmem:[#allocation121_spill] sm:$0xff] %v15345_v18  ;;  %v3866_v35 = vmul.f32 %v15345_v18, %v15345_v18  ;;  %v18494_v18 = vld [vmem:[#allocation150_spill] sm:$0xff] }
 0x398   : > { %v3879_v13 = vrot.slane %v3866_v35, %v18476_v3  ;;  %v3872_v22 = vcombine.high %v3866_v35, %v3866_v35  ;;  %v18482_v35 = vld [vmem:[#allocation138_spill] sm:$0xff] }
 0x39a   : > { %v3887_v52 = vcombine.high %v3879_v13, %v3879_v13  ;;  %v3886_v17 = vrot.slane %v3872_v22, %v18476_v3  ;;  %v18484_v22 = vld [vmem:[#allocation140_spill] sm:$0xff] }
 0x39c   : > { %3999 = vmatprep.mubr.f32.mxu0 %v3887_v52  ;;  %v3888_v23 = vcombine.high %v3886_v17, %v3886_v17  ;;  %v18483_v52 = vld [vmem:[#allocation141_spill] sm:$0xff] }
 0x39d   : > { %4000 = vmatmul.mubr.f32.vlgmr.msra.gmra.mxu0 %v3879_v13  ;;  %v18485_v13 = vld [vmem:[#allocation143_spill] sm:$0xff] }
 0x39e   : > { %4069 = vmatprep.mubr.f32.mxu1 %v3888_v23  ;;  %10364 = vmatpush3.msra.mxu0 %v18324_v51  ;;  %v18493_v23 = vld [vmem:[#allocation151_spill] sm:$0xff] }
 0x39f   : > { %4070 = vmatmul.mubr.f32.vlgmr.msra.gmra.mxu1 %v3886_v17  ;;  %10365 = vmatprep.subr.mxu0 %v18326_v53  ;;  %v18491_v17 = vld [vmem:[#allocation149_spill] sm:$0xff] }
 0x3a0   : > { %10366 = vmatpush3.msra.mxu0 %v18328_v20  ;;  %10399 = vmatpush3.msra.mxu1 %v18325_v21 }
 0x3a1   : > { %10367 = vmatprep.subr.mxu0 %v18329_v7  ;;  %10400 = vmatprep.subr.mxu1 %v18327_v0 }
 0x3a2   : > { %10368 = vmatpush3.msra.mxu0 %v18330_v1  ;;  %10401 = vmatpush3.msra.mxu1 %v14306_v34 }
 0x3a3   : > { %10369 = vmatprep.subr.mxu0 %v18331_v54  ;;  %10402 = vmatprep.subr.mxu1 %v14314_v33 }
 0x3a4   : > { %10370 = vmatpush3.msra.mxu0 %v18333_v6  ;;  %10403 = vmatpush3.msra.mxu1 %v14325_v60 }
 0x3a5   : > { %10371 = vmatprep.subr.mxu0 %v18335_v36  ;;  %10404 = vmatprep.subr.mxu1 %v18332_v61 }
 0x3a6   : > { %10372 = vmatpush3.msra.mxu0 %v18337_v46  ;;  %10405 = vmatpush3.msra.mxu1 %v18334_v10 }
 0x3a7   : > { %10373 = vmatprep.subr.mxu0 %v18339_v43  ;;  %10406 = vmatprep.subr.mxu1 %v18336_v16 }
 0x3a8   : > { %10374 = vmatpush3.msra.mxu0 %v18479_v24  ;;  %10407 = vmatpush3.msra.mxu1 %v18480_v63 }
 0x3a9   : > { %10375 = vmatprep.subr.mxu0 %v18481_v39  ;;  %10408 = vmatprep.subr.mxu1 %v18482_v35 }
 0x3aa   : > { %10376 = vmatpush3.msra.mxu0 %v18483_v52  ;;  %10409 = vmatpush3.msra.mxu1 %v18484_v22  ;;  %v18495_v52 = vld [vmem:[#allocation153_spill] sm:$0xff] }
 0x3ab   : > { %10377 = vmatprep.subr.mxu0 %v18485_v13  ;;  %10410 = vmatprep.subr.mxu1 %v18486_v44  ;;  %v18496_v13 = vld [vmem:[#allocation152_spill] sm:$0xff]  ;;  %v18497_v44 = vld [vmem:[#allocation155_spill] sm:$0xff] }
 0x3ac   : > { %10378 = vmatpush3.msra.mxu0 %v18487_v55  ;;  %10411 = vmatpush3.msra.mxu1 %v18488_v48  ;;  %v18498_v55 = vld [vmem:[#allocation154_spill] sm:$0xff]  ;;  %v18499_v48 = vld [vmem:[#allocation157_spill] sm:$0xff] }
 0x3ad   : > { %10379 = vmatprep.subr.mxu0 %v18489_v40  ;;  %10412 = vmatprep.subr.mxu1 %v18490_v12  ;;  %v18500_v40 = vld [vmem:[#allocation156_spill] sm:$0xff]  ;;  %v18501_v12 = vld [vmem:[#allocation159_spill] sm:$0xff] }
 0x3ae   : > { %10380 = vmatpush3.msra.mxu0 %v18491_v17  ;;  %10413 = vmatpush3.msra.mxu1 %v18492_v62  ;;  %v18502_v17 = vld [vmem:[#allocation158_spill] sm:$0xff] }
 0x3af   : > { %10381 = vmatprep.subr.mxu0 %v18493_v23  ;;  %10414 = vmatprep.subr.mxu1 %v18494_v18  ;;  %v18503_v62 = vld [vmem:[#allocation162_spill] sm:$0xff]  ;;  %v18504_v23 = vld [vmem:[#allocation161_spill] sm:$0xff]  ;;  %v18505_v18 = vld [vmem:[#allocation164_spill] sm:$0xff] }
 0x3b0   : > { %10382 = vmatpush3.msra.mxu0 %v18495_v52  ;;  %10415 = vmatpush3.msra.mxu1 %v18496_v13  ;;  %v18506_v52 = vld [vmem:[#allocation163_spill] sm:$0xff]  ;;  %v18507_v13 = vld [vmem:[#allocation166_spill] sm:$0xff] }
 0x3b1   : > { %10383 = vmatprep.subr.mxu0 %v18497_v44  ;;  %10416 = vmatprep.subr.mxu1 %v18498_v55  ;;  %v18508_v44 = vld [vmem:[#allocation165_spill] sm:$0xff]  ;;  %v18509_v55 = vld [vmem:[#allocation168_spill] sm:$0xff] }
 0x3b2   : > { %10384 = vmatpush3.msra.mxu0 %v18499_v48  ;;  %10417 = vmatpush3.msra.mxu1 %v18500_v40  ;;  %v18510_v48 = vld [vmem:[#allocation167_spill] sm:$0xff]  ;;  %v18511_v40 = vld [vmem:[#allocation170_spill] sm:$0xff] }
 0x3b3   : > { %10385 = vmatprep.subr.mxu0 %v18501_v12  ;;  %10418 = vmatprep.subr.mxu1 %v18502_v17  ;;  %v18512_v12 = vld [vmem:[#allocation169_spill] sm:$0xff]  ;;  %v18513_v17 = vld [vmem:[#allocation172_spill] sm:$0xff] }
 0x3b4   : > { %10386 = vmatpush3.msra.mxu0 %v18503_v62  ;;  %10419 = vmatpush3.msra.mxu1 %v18504_v23  ;;  %v18514_v62 = vld [vmem:[#allocation171_spill] sm:$0xff] }
 0x3b5   : > { %10387 = vmatprep.subr.mxu0 %v18505_v18  ;;  %10420 = vmatprep.subr.mxu1 %v18506_v52  ;;  %v18515_v18 = vld [vmem:[#allocation173_spill] sm:$0xff] }
 0x3b6   : > { %10388 = vmatpush3.msra.mxu0 %v18507_v13  ;;  %10421 = vmatpush3.msra.mxu1 %v18508_v44  ;;  %v18516_v13 = vld [vmem:[#allocation175_spill] sm:$0xff] }
 0x3b7   : > { %10389 = vmatprep.subr.mxu0 %v18509_v55  ;;  %10422 = vmatprep.subr.mxu1 %v18510_v48  ;;  %v18517_v55 = vld [vmem:[#allocation177_spill] sm:$0xff]  ;;  %v18518_v48 = vld [vmem:[#allocation179_spill] sm:$0xff] }
 0x3b8   : > { %10390 = vmatpush3.msra.mxu0 %v18511_v40  ;;  %10423 = vmatpush3.msra.mxu1 %v18512_v12  ;;  %v18519_v40 = vld [vmem:[#allocation181_spill] sm:$0xff]  ;;  %v18520_v12 = vld [vmem:[#allocation180_spill] sm:$0xff] }
 0x3b9   : > { %10391 = vmatprep.subr.mxu0 %v18513_v17  ;;  %10424 = vmatprep.subr.mxu1 %v18514_v62  ;;  %v18521_v17 = vld [vmem:[#allocation182_spill] sm:$0xff] }
 0x3ba   : > { %10392 = vmatpush3.msra.mxu0 %v18377_v27  ;;  %10425 = vmatpush3.msra.mxu1 %v18515_v18 }
 0x3bb   : > { %10393 = vmatprep.subr.mxu0 %v18379_v30  ;;  %10426 = vmatprep.subr.mxu1 %v18516_v13 }
 0x3bc   : > { %10394 = vmatpush3.msra.mxu0 %v18381_v29  ;;  %10427 = vmatpush3.msra.mxu1 %v18517_v55  ;;  %v18522_v55 = vld [vmem:[#allocation160_spill] sm:$0xff] }
 0x3bd   : > { %10428 = vmatprep.subr.mxu1 %v18518_v48  ;;  %10433 = vmatprep.subr.mxu0 %v18519_v40 }
 0x3be   : > { %10429 = vmatpush3.msra.mxu1 %v18520_v12 }
 0x3bf   : > { %10468 = vmatprep.subr.mxu1 %v18521_v17 }
 0x3cb   : > { %v3579_v62 = vpop.f32.mrf.mxu0  ;;  %v3650_v27 = vpop.f32.mrf.mxu1 }
 0x3cd   : > { %v3581_v44 = vpop.f32.mrf.mxu0  ;;  %v3652_v18 = vpop.f32.mrf.mxu1 }
 0x3ce   : > { %v3826_v52 = vcombine.low %v3579_v62, %v3581_v44  ;;  %v3827_v30 = vcombine.low %v3650_v27, %v3652_v18  ;;  %v18524_v18 = vld [vmem:[#allocation183_spill] sm:$0xff]  ;;  %v18527_v27 = vld [vmem:[#allocation189_spill] sm:$0xff]  ;;  %v18536_v62 = vld [vmem:[#allocation194_spill] sm:$0xff] }
 0x3d0   : > { %v3834_v13 = vrot.slane %v3826_v52, %v18476_v3  ;;  %v3841_v29 = vrot.slane %v3827_v30, %v18476_v3  ;;  %v18525_v30 = vld [vmem:[#allocation187_spill] sm:$0xff]  ;;  %v18528_v52 = vld [vmem:[#allocation186_spill] sm:$0xff] }
 0x3d2   : > { %v3842_v23 = vcombine.low %v3834_v13, %v3841_v29  ;;  %v18526_v29 = vld [vmem:[#allocation184_spill] sm:$0xff]  ;;  %v18529_v13 = vld [vmem:[#allocation191_spill] sm:$0xff] }
 0x3d4   : > { %v15418_v39 = vsub.f32 %v18522_v55, %v3842_v23  ;;  %v18530_v55 = vld [vmem:[#allocation188_spill] sm:$0xff] }
 0x3d5   : > { %v18537_v23 = vld [vmem:[#allocation196_spill] sm:$0xff] }
 0x3d6   : > { %18523 = vst [vmem:[#allocation123_spill] sm:$0xff] %v15418_v39  ;;  %v3867_v40 = vmul.f32 %v15418_v39, %v15418_v39  ;;  %v18539_v39 = vld [vmem:[#allocation198_spill] sm:$0xff] }
 0x3d8   : > { %v3896_v12 = vrot.slane %v3867_v40, %v18476_v3  ;;  %v3889_v17 = vcombine.high %v3867_v40, %v3867_v40  ;;  %v18532_v40 = vld [vmem:[#allocation190_spill] sm:$0xff] }
 0x3da   : > { %v3904_v48 = vcombine.high %v3896_v12, %v3896_v12  ;;  %v3903_v22 = vrot.slane %v3889_v17, %v18476_v3  ;;  %v18535_v17 = vld [vmem:[#allocation197_spill] sm:$0xff] }
 0x3dc   : > { %4139 = vmatprep.mubr.f32.mxu0 %v3904_v48  ;;  %v3905_v44 = vcombine.high %v3903_v22, %v3903_v22  ;;  %v18531_v48 = vld [vmem:[#allocation193_spill] sm:$0xff] }
 0x3dd   : > { %4140 = vmatmul.mubr.f32.vlgmr.msra.gmra.mxu0 %v3896_v12  ;;  %v18533_v12 = vld [vmem:[#allocation195_spill] sm:$0xff] }
 0x3de   : > { %4209 = vmatprep.mubr.f32.mxu1 %v3905_v44  ;;  %10434 = vmatpush3.msra.mxu0 %v18524_v18  ;;  %v18538_v44 = vld [vmem:[#allocation201_spill] sm:$0xff] }
 0x3df   : > { %4210 = vmatmul.mubr.f32.vlgmr.msra.gmra.mxu1 %v3903_v22  ;;  %10435 = vmatprep.subr.mxu0 %v18385_v38  ;;  %v18534_v22 = vld [vmem:[#allocation192_spill] sm:$0xff] }
 0x3e0   : > { %10436 = vmatpush3.msra.mxu0 %v18525_v30  ;;  %10469 = vmatpush3.msra.mxu1 %v18526_v29 }
 0x3e1   : > { %10437 = vmatprep.subr.mxu0 %v18527_v27  ;;  %10470 = vmatprep.subr.mxu1 %v18528_v52 }
 0x3e2   : > { %10438 = vmatpush3.msra.mxu0 %v18529_v13  ;;  %10471 = vmatpush3.msra.mxu1 %v18530_v55  ;;  %v18540_v13 = vld [vmem:[#allocation203_spill] sm:$0xff] }
 0x3e3   : > { %10439 = vmatprep.subr.mxu0 %v18531_v48  ;;  %10472 = vmatprep.subr.mxu1 %v18532_v40  ;;  %v18541_v48 = vld [vmem:[#allocation200_spill] sm:$0xff]  ;;  %v18542_v40 = vld [vmem:[#allocation205_spill] sm:$0xff] }
 0x3e4   : > { %10440 = vmatpush3.msra.mxu0 %v18533_v12  ;;  %10473 = vmatpush3.msra.mxu1 %v18534_v22  ;;  %v18543_v12 = vld [vmem:[#allocation202_spill] sm:$0xff]  ;;  %v18544_v22 = vld [vmem:[#allocation207_spill] sm:$0xff] }
 0x3e5   : > { %10441 = vmatprep.subr.mxu0 %v18535_v17  ;;  %10474 = vmatprep.subr.mxu1 %v18536_v62  ;;  %v18545_v17 = vld [vmem:[#allocation204_spill] sm:$0xff]  ;;  %v18546_v62 = vld [vmem:[#allocation209_spill] sm:$0xff] }
 0x3e6   : > { %10442 = vmatpush3.msra.mxu0 %v18397_v45  ;;  %10475 = vmatpush3.msra.mxu1 %v18537_v23  ;;  %v18547_v45 = vld [vmem:[#allocation206_spill] sm:$0xff]  ;;  %v18548_v23 = vld [vmem:[#allocation211_spill] sm:$0xff] }
 0x3e7   : > { %10443 = vmatprep.subr.mxu0 %v18538_v44  ;;  %10476 = vmatprep.subr.mxu1 %v18539_v39  ;;  %v18549_v44 = vld [vmem:[#allocation208_spill] sm:$0xff]  ;;  %v18550_v39 = vld [vmem:[#allocation213_spill] sm:$0xff] }
 0x3e8   : > { %10444 = vmatpush3.msra.mxu0 %v18540_v13  ;;  %10477 = vmatpush3.msra.mxu1 %v18541_v48  ;;  %v18551_v13 = vld [vmem:[#allocation210_spill] sm:$0xff]  ;;  %v18552_v48 = vld [vmem:[#allocation215_spill] sm:$0xff] }
 0x3e9   : > { %10445 = vmatprep.subr.mxu0 %v18542_v40  ;;  %10478 = vmatprep.subr.mxu1 %v18543_v12  ;;  %v18553_v40 = vld [vmem:[#allocation212_spill] sm:$0xff] }
 0x3ea   : > { %10446 = vmatpush3.msra.mxu0 %v18544_v22  ;;  %10479 = vmatpush3.msra.mxu1 %v18545_v17  ;;  %v18554_v22 = vld [vmem:[#allocation214_spill] sm:$0xff] }
 0x3eb   : > { %10447 = vmatprep.subr.mxu0 %v18546_v62  ;;  %10480 = vmatprep.subr.mxu1 %v18547_v45  ;;  %v18555_v62 = vld [vmem:[#allocation216_spill] sm:$0xff] }
 0x3ec   : > { %10448 = vmatpush3.msra.mxu0 %v18548_v23  ;;  %10481 = vmatpush3.msra.mxu1 %v18549_v44  ;;  %v18556_v23 = vld [vmem:[#allocation218_spill] sm:$0xff] }
 0x3ed   : > { %10449 = vmatprep.subr.mxu0 %v18550_v39  ;;  %10482 = vmatprep.subr.mxu1 %v18551_v13  ;;  %v18557_v39 = vld [vmem:[#allocation226_spill] sm:$0xff] }
 0x3ee   : > { %10450 = vmatpush3.msra.mxu0 %v18552_v48  ;;  %10483 = vmatpush3.msra.mxu1 %v18553_v40  ;;  %v18558_v48 = vld [vmem:[#allocation222_spill] sm:$0xff] }
 0x3ef   : > { %10451 = vmatprep.subr.mxu0 %v18414_v5  ;;  %10484 = vmatprep.subr.mxu1 %v18554_v22  ;;  %v18559_v5 = vld [vmem:[#allocation225_spill] sm:$0xff] }
 0x3f0   : > { %10452 = vmatpush3.msra.mxu0 %v18416_v8  ;;  %10485 = vmatpush3.msra.mxu1 %v18555_v62 }
 0x3f1   : > { %10453 = vmatprep.subr.mxu0 %v18418_v2  ;;  %10486 = vmatprep.subr.mxu1 %v18556_v23 }
 0x3f2   : > { %10454 = vmatpush3.msra.mxu0 %v18420_v32  ;;  %10487 = vmatpush3.msra.mxu1 %v18417_v37 }
 0x3f3   : > { %10455 = vmatprep.subr.mxu0 %v18557_v39  ;;  %10488 = vmatprep.subr.mxu1 %v18558_v48 }
 0x3f4   : > { %10456 = vmatpush3.msra.mxu0 %v14789_v59  ;;  %10489 = vmatpush3.msra.mxu1 %v18559_v5 }
 0x3f5   : > { %10457 = vmatprep.subr.mxu0 %v14801_v47  ;;  %10490 = vmatprep.subr.mxu1 %v18422_v31 }
 0x3f6   : > { %10458 = vmatpush3.msra.mxu0 %v14815_v9  ;;  %10491 = vmatpush3.msra.mxu1 %v14791_v49 }
 0x3f7   : > { %10459 = vmatprep.subr.mxu0 %v18425_v56  ;;  %10492 = vmatprep.subr.mxu1 %v18423_v15 }
 0x3f8   : > { %10460 = vmatpush3.msra.mxu0 %v14827_v19  ;;  %10493 = vmatpush3.msra.mxu1 %v18424_v25  ;;  %v18561_v19 = vld [vmem:[#allocation50_spill] sm:$0xff] }
 0x3f9   : > { %10461 = vmatprep.subr.mxu0 %v14835_v11  ;;  %10494 = vmatprep.subr.mxu1 %v14823_v57  ;;  %v18560_v11 = vld [vmem:[#allocation245_spill] sm:$0xff] }
 0x3fa   : > { %10462 = vmatpush3.msra.mxu0 %v14842_v14  ;;  %10495 = vmatpush3.msra.mxu1 %v14829_v42 }
 0x3fb   : > { %10463 = vmatprep.subr.mxu0 %v14848_v58  ;;  %10496 = vmatprep.subr.mxu1 %v14837_v50 }
 0x3fc   : > { %10464 = vmatpush3.msra.mxu0 %v14854_v41  ;;  %10497 = vmatpush3.msra.mxu1 %v14844_v4 }
 0x3fd   : > { %10498 = vmatprep.subr.mxu1 %v14850_v28  ;;  %10503 = vmatprep.subr.msk.mxu0 %vm2791_vm8, %v13939_v26  ;;  %v18562_v28 = vld [vmem:[#allocation223_spill] sm:$0xff] }
 0x3fe   : > { %10499 = vmatpush3.msra.mxu1 %v18560_v11 }
 0x3ff   : > { %10537 = vmatprep.subr.msk.mxu1 %vm2791_vm8, %v18561_v19 }
 0x40b   : > { %v3721_v14 = vpop.f32.mrf.mxu0 }
 0x40c   : > { %v3792_v42 = vpop.f32.mrf.mxu1 }
 0x40d   : > { %v3723_v57 = vpop.f32.mrf.mxu0 }
 0x40e   : > { %v3843_v58 = vcombine.low %v3721_v14, %v3723_v57  ;;  %v3794_v56 = vpop.f32.mrf.mxu1  ;;  %v18571_v14 = vld [vmem:[#allocation58_spill] sm:$0xff] }
 0x40f   : > { %v3844_v50 = vcombine.low %v3792_v42, %v3794_v56  ;;  %v18564_v56 = vld [vmem:[#allocation51_spill] sm:$0xff]  ;;  %v18567_v42 = vld [vmem:[#allocation54_spill] sm:$0xff] }
 0x410   : > { %v3851_v41 = vrot.slane %v3843_v58, %v18476_v3  ;;  %v18565_v58 = vld [vmem:[#allocation52_spill] sm:$0xff] }
 0x411   : > { %v3858_v4 = vrot.slane %v3844_v50, %v18476_v3  ;;  %v18569_v50 = vld [vmem:[#allocation57_spill] sm:$0xff] }
 0x413   : > { %v3859_v25 = vcombine.low %v3851_v41, %v3858_v4  ;;  %v18573_v4 = vld [vmem:[#allocation61_spill] sm:$0xff]  ;;  %v18574_v41 = vld [vmem:[#allocation60_spill] sm:$0xff] }
 0x415   : > { %v15493_v9 = vsub.f32 %v18562_v28, %v3859_v25  ;;  %v18566_v25 = vld [vmem:[#allocation53_spill] sm:$0xff]  ;;  %v18568_v28 = vld [vmem:[#allocation55_spill] sm:$0xff] }
 0x417   : > { %18563 = vst [vmem:[#allocation122_spill] sm:$0xff] %v15493_v9  ;;  %v3868_v26 = vmul.f32 %v15493_v9, %v15493_v9 }
 0x419   : > { %v3913_v11 = vrot.slane %v3868_v26, %v18476_v3  ;;  %v3906_v19 = vcombine.high %v3868_v26, %v3868_v26  ;;  %v18576_v26 = vld [vmem:[#allocation63_spill] sm:$0xff] }
 0x41b   : > { %v3921_v15 = vcombine.high %v3913_v11, %v3913_v11  ;;  %v3920_v47 = vrot.slane %v3906_v19, %v18476_v3  ;;  %v18577_v19 = vld [vmem:[#allocation65_spill] sm:$0xff] }
 0x41d   : > { %4279 = vmatprep.mubr.f32.mxu0 %v3921_v15  ;;  %v3922_v57 = vcombine.high %v3920_v47, %v3920_v47  ;;  %v18575_v15 = vld [vmem:[#allocation62_spill] sm:$0xff] }
 0x41e   : > { %4280 = vmatmul.mubr.f32.vlgmr.msra.gmra.mxu0 %v3913_v11  ;;  %v18570_v11 = vld [vmem:[#allocation56_spill] sm:$0xff] }
 0x41f   : > { %4349 = vmatprep.mubr.f32.mxu1 %v3922_v57  ;;  %10504 = vmatpush3.xpose.msk.msra.mxu0 %vm2791_vm8, %v18564_v56  ;;  %v18578_v57 = vld [vmem:[#allocation64_spill] sm:$0xff]  ;;  %v18579_v56 = vld [vmem:[#allocation66_spill] sm:$0xff] }
 0x420   : > { %4350 = vmatmul.mubr.f32.vlgmr.msra.gmra.mxu1 %v3920_v47  ;;  %10505 = vmatprep.subr.msk.mxu0 %vm2791_vm8, %v18565_v58  ;;  %v18572_v47 = vld [vmem:[#allocation59_spill] sm:$0xff] }
 0x421   : > { %10538 = vmatpush3.xpose.msk.msra.mxu1 %vm2791_vm8, %v18566_v25  ;;  %v18580_v58 = vld [vmem:[#allocation67_spill] sm:$0xff]  ;;  %v18581_v25 = vld [vmem:[#allocation69_spill] sm:$0xff] }
 0x422   : > { %10539 = vmatprep.subr.msk.mxu1 %vm2791_vm8, %v18567_v42  ;;  %v18582_v42 = vld [vmem:[#allocation68_spill] sm:$0xff] }
 0x423   : > { %10506 = vmatpush3.xpose.msk.msra.mxu0 %vm2791_vm8, %v18568_v28  ;;  %v18583_v28 = vld [vmem:[#allocation70_spill] sm:$0xff] }
 0x424   : > { %10507 = vmatprep.subr.msk.mxu0 %vm2791_vm8, %v18569_v50  ;;  %v18584_v50 = vld [vmem:[#allocation71_spill] sm:$0xff] }
 0x425   : > { %10540 = vmatpush3.xpose.msk.msra.mxu1 %vm2791_vm8, %v18570_v11  ;;  %v18585_v11 = vld [vmem:[#allocation73_spill] sm:$0xff] }
 0x426   : > { %10541 = vmatprep.subr.msk.mxu1 %vm2791_vm8, %v18571_v14  ;;  %v18586_v14 = vld [vmem:[#allocation72_spill] sm:$0xff] }
 0x427   : > { %10508 = vmatpush3.xpose.msk.msra.mxu0 %vm2791_vm8, %v18572_v47  ;;  %v18587_v47 = vld [vmem:[#allocation74_spill] sm:$0xff] }
 0x428   : > { %10509 = vmatprep.subr.msk.mxu0 %vm2791_vm8, %v18573_v4  ;;  %v18588_v4 = vld [vmem:[#allocation75_spill] sm:$0xff] }
 0x429   : > { %10542 = vmatpush3.xpose.msk.msra.mxu1 %vm2791_vm8, %v18574_v41  ;;  %v18589_v41 = vld [vmem:[#allocation77_spill] sm:$0xff] }
 0x42a   : > { %10543 = vmatprep.subr.msk.mxu1 %vm2791_vm8, %v18575_v15  ;;  %v18590_v15 = vld [vmem:[#allocation76_spill] sm:$0xff] }
 0x42b   : > { %10510 = vmatpush3.xpose.msk.msra.mxu0 %vm2791_vm8, %v18576_v26  ;;  %v18591_v26 = vld [vmem:[#allocation78_spill] sm:$0xff] }
 0x42c   : > { %10511 = vmatprep.subr.msk.mxu0 %vm2791_vm8, %v18577_v19  ;;  %v18592_v19 = vld [vmem:[#allocation79_spill] sm:$0xff] }
 0x42d   : > { %10544 = vmatpush3.xpose.msk.msra.mxu1 %vm2791_vm8, %v18578_v57  ;;  %v18593_v57 = vld [vmem:[#allocation81_spill] sm:$0xff] }
 0x42e   : > { %10545 = vmatprep.subr.msk.mxu1 %vm2791_vm8, %v18579_v56  ;;  %v18594_v56 = vld [vmem:[#allocation80_spill] sm:$0xff] }
 0x42f   : > { %10512 = vmatpush3.xpose.msk.msra.mxu0 %vm2791_vm8, %v18580_v58  ;;  %v18595_v58 = vld [vmem:[#allocation82_spill] sm:$0xff] }
 0x430   : > { %10513 = vmatprep.subr.msk.mxu0 %vm2791_vm8, %v18581_v25  ;;  %v18596_v25 = vld [vmem:[#allocation83_spill] sm:$0xff] }
 0x431   : > { %10546 = vmatpush3.xpose.msk.msra.mxu1 %vm2791_vm8, %v18582_v42  ;;  %v18597_v42 = vld [vmem:[#allocation85_spill] sm:$0xff] }
 0x432   : > { %10547 = vmatprep.subr.msk.mxu1 %vm2791_vm8, %v18583_v28  ;;  %v18598_v28 = vld [vmem:[#allocation84_spill] sm:$0xff] }
 0x433   : > { %10514 = vmatpush3.xpose.msk.msra.mxu0 %vm2791_vm8, %v18584_v50  ;;  %v18599_v50 = vld [vmem:[#allocation86_spill] sm:$0xff] }
 0x434   : > { %10515 = vmatprep.subr.msk.mxu0 %vm2791_vm8, %v18585_v11  ;;  %v18600_v11 = vld [vmem:[#allocation87_spill] sm:$0xff] }
 0x435   : > { %10548 = vmatpush3.xpose.msk.msra.mxu1 %vm2791_vm8, %v18586_v14  ;;  %v18601_v14 = vld [vmem:[#allocation93_spill] sm:$0xff] }
 0x436   : > { %10549 = vmatprep.subr.msk.mxu1 %vm2791_vm8, %v18587_v47  ;;  %v18602_v47 = vld [vmem:[#allocation88_spill] sm:$0xff] }
 0x437   : > { %10516 = vmatpush3.xpose.msk.msra.mxu0 %vm2791_vm8, %v18588_v4  ;;  %v18603_v4 = vld [vmem:[#allocation94_spill] sm:$0xff] }
 0x438   : > { %10517 = vmatprep.subr.msk.mxu0 %vm2791_vm8, %v18589_v41  ;;  %v18604_v41 = vld [vmem:[#allocation95_spill] sm:$0xff] }
 0x439   : > { %10550 = vmatpush3.xpose.msk.msra.mxu1 %vm2791_vm8, %v18590_v15  ;;  %v18605_v15 = vld [vmem:[#allocation97_spill] sm:$0xff] }
 0x43a   : > { %10551 = vmatprep.subr.msk.mxu1 %vm2791_vm8, %v18591_v26  ;;  %v18606_v26 = vld [vmem:[#allocation96_spill] sm:$0xff] }
 0x43b   : > { %10518 = vmatpush3.xpose.msk.msra.mxu0 %vm2791_vm8, %v18592_v19  ;;  %v18607_v19 = vld [vmem:[#allocation98_spill] sm:$0xff] }
 0x43c   : > { %10519 = vmatprep.subr.msk.mxu0 %vm2791_vm8, %v18593_v57  ;;  %v18608_v57 = vld [vmem:[#allocation100_spill] sm:$0xff] }
 0x43d   : > { %10552 = vmatpush3.xpose.msk.msra.mxu1 %vm2791_vm8, %v18594_v56  ;;  %v18609_v56 = vld [vmem:[#allocation102_spill] sm:$0xff] }
 0x43e   : > { %10553 = vmatprep.subr.msk.mxu1 %vm2791_vm8, %v18595_v58  ;;  %v18610_v58 = vld [vmem:[#allocation101_spill] sm:$0xff] }
 0x43f   : > { %10520 = vmatpush3.xpose.msk.msra.mxu0 %vm2791_vm8, %v18596_v25  ;;  %v18611_v25 = vld [vmem:[#allocation103_spill] sm:$0xff] }
 0x440   : > { %10521 = vmatprep.subr.msk.mxu0 %vm2791_vm8, %v18597_v42  ;;  %v18612_v42 = vld [vmem:[#allocation104_spill] sm:$0xff] }
 0x441   : > { %10554 = vmatpush3.xpose.msk.msra.mxu1 %vm2791_vm8, %v18598_v28  ;;  %v18613_v28 = vld [vmem:[#allocation106_spill] sm:$0xff] }
 0x442   : > { %10555 = vmatprep.subr.msk.mxu1 %vm2791_vm8, %v18599_v50  ;;  %v18614_v50 = vld [vmem:[#allocation105_spill] sm:$0xff] }
 0x443   : > { %10522 = vmatpush3.xpose.msk.msra.mxu0 %vm2791_vm8, %v18600_v11  ;;  %v18615_v11 = vld [vmem:[#allocation107_spill] sm:$0xff] }
 0x444   : > { %10523 = vmatprep.subr.msk.mxu0 %vm2791_vm8, %v18601_v14  ;;  %v18616_v14 = vld [vmem:[#allocation108_spill] sm:$0xff] }
 0x445   : > { %10556 = vmatpush3.xpose.msk.msra.mxu1 %vm2791_vm8, %v18602_v47  ;;  %v18617_v47 = vld [vmem:[#allocation110_spill] sm:$0xff] }
 0x446   : > { %10557 = vmatprep.subr.msk.mxu1 %vm2791_vm8, %v18603_v4  ;;  %v18618_v4 = vld [vmem:[#allocation109_spill] sm:$0xff] }
 0x447   : > { %10524 = vmatpush3.xpose.msk.msra.mxu0 %vm2791_vm8, %v18604_v41  ;;  %v18619_v41 = vld [vmem:[#allocation111_spill] sm:$0xff] }
 0x448   : > { %10525 = vmatprep.subr.msk.mxu0 %vm2791_vm8, %v18605_v15  ;;  %v18620_v15 = vld [vmem:[#allocation112_spill] sm:$0xff] }
 0x449   : > { %10558 = vmatpush3.xpose.msk.msra.mxu1 %vm2791_vm8, %v18606_v26  ;;  %v18621_v26 = vld [vmem:[#allocation114_spill] sm:$0xff] }
 0x44a   : > { %10559 = vmatprep.subr.msk.mxu1 %vm2791_vm8, %v18607_v19  ;;  %v18622_v19 = vld [vmem:[#allocation113_spill] sm:$0xff] }
 0x44b   : > { %10526 = vmatpush3.xpose.msk.msra.mxu0 %vm2791_vm8, %v18608_v57  ;;  %v18623_v57 = vld [vmem:[#allocation115_spill] sm:$0xff] }
 0x44c   : > { %10527 = vmatprep.subr.msk.mxu0 %vm2791_vm8, %v18609_v56  ;;  %v18624_v56 = vld [vmem:[#allocation117_spill] sm:$0xff] }
 0x44d   : > { %10560 = vmatpush3.xpose.msk.msra.mxu1 %vm2791_vm8, %v18610_v58  ;;  %v18625_v58 = vld [vmem:[#allocation119_spill] sm:$0xff] }
 0x44e   : > { %10561 = vmatprep.subr.msk.mxu1 %vm2791_vm8, %v18611_v25  ;;  %v18626_v25 = vld [vmem:[#allocation118_spill] sm:$0xff] }
 0x44f   : > { %10528 = vmatpush3.xpose.msk.msra.mxu0 %vm2791_vm8, %v18612_v42  ;;  %v18627_v42 = vld [vmem:[#allocation120_spill] sm:$0xff] }
 0x450   : > { %10529 = vmatprep.subr.msk.mxu0 %vm2791_vm8, %v18613_v28 }
 0x451   : > { %10562 = vmatpush3.xpose.msk.msra.mxu1 %vm2791_vm8, %v18614_v50 }
 0x452   : > { %10563 = vmatprep.subr.msk.mxu1 %vm2791_vm8, %v18615_v11 }
 0x453   : > { %10530 = vmatpush3.xpose.msk.msra.mxu0 %vm2791_vm8, %v18616_v14 }
 0x454   : > { %10531 = vmatprep.subr.msk.mxu0 %vm2791_vm8, %v18617_v47 }
 0x455   : > { %10564 = vmatpush3.xpose.msk.msra.mxu1 %vm2791_vm8, %v18618_v4 }
 0x456   : > { %10565 = vmatprep.subr.msk.mxu1 %vm2791_vm8, %v18619_v41 }
 0x457   : > { %10532 = vmatpush3.xpose.msk.msra.mxu0 %vm2791_vm8, %v18620_v15 }
 0x458   : > { %10533 = vmatprep.subr.msk.mxu0 %vm2791_vm8, %v18621_v26 }
 0x459   : > { %10566 = vmatpush3.xpose.msk.msra.mxu1 %vm2791_vm8, %v18622_v19 }
 0x45a   : > { %10567 = vmatprep.subr.msk.mxu1 %vm2791_vm8, %v18623_v57 }
 0x45b   : > { %10534 = vmatpush3.xpose.msk.msra.mxu0 %vm2791_vm8, %v18624_v56 }
 0x45c   : > { %10571 = vmatprep.subr.msk.mxu0 %vm2791_vm8, %v18625_v58 }
 0x45d   : > { %10568 = vmatpush3.xpose.msk.msra.mxu1 %vm2791_vm8, %v18626_v25  ;;  %v10325_v28 = vpop.f32.mrf.mxu0 }
 0x45e   : > { %10605 = vmatprep.subr.msk.mxu1 %vm2791_vm8, %v18627_v42 }
 0x45f   : > { %v10326_v50 = vpop.f32.mrf.mxu0  ;;  %v10360_v11 = vpop.f32.mrf.mxu1 }
 0x460   : > { %v10327_v26 = vadd.f32 %v10326_v50, %v10325_v28  ;;  %v18657_v28 = vld [vmem:[#allocation168_spill] sm:$0xff]  ;;  %v18658_v50 = vld [vmem:[#allocation171_spill] sm:$0xff] }
 0x461   : > { %v10361_v47 = vpop.f32.mrf.mxu1 }
 0x462   : > { %v10362_v15 = vadd.f32 %v10361_v47, %v10360_v11  ;;  %v18659_v11 = vld [vmem:[#allocation170_spill] sm:$0xff]  ;;  %v18661_v47 = vld [vmem:[#allocation172_spill] sm:$0xff] }
 0x464   : > { %v4072_v56 = vadd.f32 %v10362_v15, %v10327_v26  ;;  %v18664_v15 = vld [vmem:[#allocation177_spill] sm:$0xff]  ;;  %v18665_v26 = vld [vmem:[#allocation176_spill] sm:$0xff] }
 0x49d   : > { %v10395_v14 = vpop.f32.mrf.mxu0 }
 0x49f   : > { %v10396_v4 = vpop.f32.mrf.mxu0  ;;  %v10430_v41 = vpop.f32.mrf.mxu1 }
 0x4a0   : > { %v10397_v19 = vadd.f32 %v10396_v4, %v10395_v14  ;;  %v18660_v14 = vld [vmem:[#allocation173_spill] sm:$0xff]  ;;  %v18662_v4 = vld [vmem:[#allocation175_spill] sm:$0xff] }
 0x4a1   : > { %v10431_v57 = vpop.f32.mrf.mxu1 }
 0x4a2   : > { %v4142_v9 = vadd.f32 %v10397_v19, %v4072_v56  ;;  %v10432_v58 = vadd.f32 %v10431_v57, %v10430_v41  ;;  %v18663_v41 = vld [vmem:[#allocation174_spill] sm:$0xff]  ;;  %v18666_v19 = vld [vmem:[#allocation179_spill] sm:$0xff]  ;;  %v18668_v56 = vld [vmem:[#allocation180_spill] sm:$0xff] }
 0x4a3   : > { %v18667_v57 = vld [vmem:[#allocation178_spill] sm:$0xff] }
 0x4a4   : > { %v4212_v59 = vadd.f32 %v10432_v58, %v4142_v9  ;;  %v18634_v9 = vld [vmem:[#allocation146_spill] sm:$0xff]  ;;  %v18669_v58 = vld [vmem:[#allocation181_spill] sm:$0xff] }
 0x4de   : > { %v10465_v3 = vpop.f32.mrf.mxu0 }
 0x4e0   : > { %v10466_v49 = vpop.f32.mrf.mxu0  ;;  %v10500_v25 = vpop.f32.mrf.mxu1 }
 0x4e1   : > { %v10467_v31 = vadd.f32 %v10466_v49, %v10465_v3  ;;  %v18628_v3 = vld [vmem:[#allocation140_spill] sm:$0xff] }
 0x4e2   : > { %v10501_v42 = vpop.f32.mrf.mxu1  ;;  %v18636_v49 = vld [vmem:[#allocation148_spill] sm:$0xff] }
 0x4e3   : > { %v4282_v39 = vadd.f32 %v10467_v31, %v4212_v59  ;;  %v10502_v5 = vadd.f32 %v10501_v42, %v10500_v25  ;;  %v18635_v59 = vld [vmem:[#allocation145_spill] sm:$0xff]  ;;  %v18670_v25 = vld [vmem:[#allocation182_spill] sm:$0xff]  ;;  %v18673_v42 = vld [vmem:[#allocation192_spill] sm:$0xff] }
 0x4e4   : > { %v18652_v31 = vld [vmem:[#allocation165_spill] sm:$0xff] }
 0x4e5   : > { %v4352_v32 = vadd.f32 %v10502_v5, %v4282_v39  ;;  %v18632_v5 = vld [vmem:[#allocation144_spill] sm:$0xff]  ;;  %v18655_v39 = vld [vmem:[#allocation166_spill] sm:$0xff] }
 0x4e7   : > { %v15627_v48 = vmul.f32 0.041666668, %v4352_v32  ;;  %v18633_v32 = vld [vmem:[#allocation143_spill] sm:$0xff] }
 0x4e9   : > { %10535 = vmatprep.mubr.msk.f32.mxu0 %vm2791_vm8, %v15627_v48  ;;  %10569 = vmatprep.mubr.msk.f32.mxu1 %vm2791_vm8, %v15627_v48 }
 0x4ea   : > { %10536 = vmatmul.mubr.msk.f32.vlgmr.msra.gmra.mxu0 %vm2791_vm8, %v15627_v48  ;;  %10570 = vmatmul.mubr.msk.f32.vlgmr.msra.gmra.mxu1 %vm2791_vm8, %v15627_v48 }
 0x4eb   : > { %10572 = vmatpush3.xpose.msk.msra.mxu0 %vm2791_vm8, %v18324_v51  ;;  %10606 = vmatpush3.xpose.msk.msra.mxu1 %vm2791_vm8, %v18325_v21  ;;  %v18637_v51 = vld [vmem:[#allocation147_spill] sm:$0xff]  ;;  %v18638_v21 = vld [vmem:[#allocation150_spill] sm:$0xff] }
 0x4ec   : > { %10603 = vmatprep.mubr.msk.f32.mxu0 %vm2791_vm8, %v15627_v48  ;;  %10637 = vmatprep.mubr.msk.f32.mxu1 %vm2791_vm8, %v15627_v48 }
 0x4ed   : > { %10573 = vmatprep.subr.msk.mxu0 %vm2791_vm8, %v18326_v53  ;;  %10607 = vmatprep.subr.msk.mxu1 %vm2791_vm8, %v18327_v0  ;;  %v18639_v53 = vld [vmem:[#allocation149_spill] sm:$0xff]  ;;  %v18640_v0 = vld [vmem:[#allocation152_spill] sm:$0xff] }
 0x4ef   : > { %10574 = vmatpush3.xpose.msk.msra.mxu0 %vm2791_vm8, %v18328_v20  ;;  %10608 = vmatpush3.xpose.msk.msra.mxu1 %vm2791_vm8, %v14306_v34  ;;  %v18630_v34 = vld [vmem:[#allocation142_spill] sm:$0xff]  ;;  %v18641_v20 = vld [vmem:[#allocation151_spill] sm:$0xff] }
 0x4f0   : > { %10575 = vmatprep.subr.msk.mxu0 %vm2791_vm8, %v18329_v7  ;;  %10609 = vmatprep.subr.msk.mxu1 %vm2791_vm8, %v14314_v33  ;;  %v18631_v33 = vld [vmem:[#allocation141_spill] sm:$0xff]  ;;  %v18642_v7 = vld [vmem:[#allocation154_spill] sm:$0xff] }
 0x4f3   : > { %10576 = vmatpush3.xpose.msk.msra.mxu0 %vm2791_vm8, %v18330_v1  ;;  %10610 = vmatpush3.xpose.msk.msra.mxu1 %vm2791_vm8, %v14325_v60  ;;  %v18629_v60 = vld [vmem:[#allocation139_spill] sm:$0xff]  ;;  %v18643_v1 = vld [vmem:[#allocation153_spill] sm:$0xff] }
 0x4f4   : > { %10577 = vmatprep.subr.msk.mxu0 %vm2791_vm8, %v18331_v54  ;;  %10611 = vmatprep.subr.msk.mxu1 %vm2791_vm8, %v18332_v61  ;;  %v18644_v54 = vld [vmem:[#allocation156_spill] sm:$0xff]  ;;  %v18645_v61 = vld [vmem:[#allocation155_spill] sm:$0xff] }
 0x4f7   : > { %10578 = vmatpush3.xpose.msk.msra.mxu0 %vm2791_vm8, %v18333_v6  ;;  %10612 = vmatpush3.xpose.msk.msra.mxu1 %vm2791_vm8, %v18334_v10  ;;  %v18646_v6 = vld [vmem:[#allocation158_spill] sm:$0xff]  ;;  %v18647_v10 = vld [vmem:[#allocation157_spill] sm:$0xff] }
 0x4f8   : > { %10579 = vmatprep.subr.msk.mxu0 %vm2791_vm8, %v18335_v36  ;;  %10613 = vmatprep.subr.msk.mxu1 %vm2791_vm8, %v18336_v16  ;;  %v18648_v36 = vld [vmem:[#allocation161_spill] sm:$0xff]  ;;  %v18649_v16 = vld [vmem:[#allocation159_spill] sm:$0xff] }
 0x4fb   : > { %10580 = vmatpush3.xpose.msk.msra.mxu0 %vm2791_vm8, %v18337_v46  ;;  %10614 = vmatpush3.xpose.msk.msra.mxu1 %vm2791_vm8, %v18480_v63  ;;  %v18650_v46 = vld [vmem:[#allocation163_spill] sm:$0xff] }
 0x4fc   : > { %10581 = vmatprep.subr.msk.mxu0 %vm2791_vm8, %v18339_v43  ;;  %10615 = vmatprep.subr.msk.mxu1 %vm2791_vm8, %v18482_v35  ;;  %v18651_v43 = vld [vmem:[#allocation162_spill] sm:$0xff]  ;;  %v18654_v63 = vld [vmem:[#allocation167_spill] sm:$0xff]  ;;  %v18656_v35 = vld [vmem:[#allocation169_spill] sm:$0xff] }
 0x4ff   : > { %10582 = vmatpush3.xpose.msk.msra.mxu0 %vm2791_vm8, %v18479_v24  ;;  %10616 = vmatpush3.xpose.msk.msra.mxu1 %vm2791_vm8, %v18628_v3  ;;  %v18653_v24 = vld [vmem:[#allocation164_spill] sm:$0xff]  ;;  %v18679_v3 = vld [vmem:[#allocation198_spill] sm:$0xff] }
 0x500   : > { %10583 = vmatprep.subr.msk.mxu0 %vm2791_vm8, %v18629_v60  ;;  %10617 = vmatprep.subr.msk.mxu1 %vm2791_vm8, %v18630_v34  ;;  %v18680_v60 = vld [vmem:[#allocation199_spill] sm:$0xff]  ;;  %v18681_v34 = vld [vmem:[#allocation200_spill] sm:$0xff] }
 0x503   : > { %10584 = vmatpush3.xpose.msk.msra.mxu0 %vm2791_vm8, %v18631_v33  ;;  %10618 = vmatpush3.xpose.msk.msra.mxu1 %vm2791_vm8, %v18632_v5  ;;  %v18682_v33 = vld [vmem:[#allocation201_spill] sm:$0xff]  ;;  %v18683_v5 = vld [vmem:[#allocation203_spill] sm:$0xff] }
 0x504   : > { %10585 = vmatprep.subr.msk.mxu0 %vm2791_vm8, %v18633_v32  ;;  %10619 = vmatprep.subr.msk.mxu1 %vm2791_vm8, %v18634_v9  ;;  %v18684_v32 = vld [vmem:[#allocation205_spill] sm:$0xff]  ;;  %v18685_v9 = vld [vmem:[#allocation207_spill] sm:$0xff] }
 0x507   : > { %10586 = vmatpush3.xpose.msk.msra.mxu0 %vm2791_vm8, %v18635_v59  ;;  %10620 = vmatpush3.xpose.msk.msra.mxu1 %vm2791_vm8, %v18636_v49  ;;  %v18686_v59 = vld [vmem:[#allocation209_spill] sm:$0xff]  ;;  %v18699_v49 = vld [vmem:[#allocation231_spill] sm:$0xff] }
 0x508   : > { %10587 = vmatprep.subr.msk.mxu0 %vm2791_vm8, %v18637_v51  ;;  %10621 = vmatprep.subr.msk.mxu1 %vm2791_vm8, %v18638_v21  ;;  %v18700_v51 = vld [vmem:[#allocation232_spill] sm:$0xff]  ;;  %v18701_v21 = vld [vmem:[#allocation233_spill] sm:$0xff] }
 0x50b   : > { %10588 = vmatpush3.xpose.msk.msra.mxu0 %vm2791_vm8, %v18639_v53  ;;  %10622 = vmatpush3.xpose.msk.msra.mxu1 %vm2791_vm8, %v18640_v0  ;;  %v18702_v53 = vld [vmem:[#allocation234_spill] sm:$0xff]  ;;  %v18703_v0 = vld [vmem:[#allocation235_spill] sm:$0xff] }
 0x50c   : > { %10589 = vmatprep.subr.msk.mxu0 %vm2791_vm8, %v18641_v20  ;;  %10623 = vmatprep.subr.msk.mxu1 %vm2791_vm8, %v18642_v7  ;;  %v18704_v20 = vld [vmem:[#allocation236_spill] sm:$0xff]  ;;  %v18705_v7 = vld [vmem:[#allocation237_spill] sm:$0xff] }
 0x50f   : > { %10590 = vmatpush3.xpose.msk.msra.mxu0 %vm2791_vm8, %v18643_v1  ;;  %10624 = vmatpush3.xpose.msk.msra.mxu1 %vm2791_vm8, %v18644_v54  ;;  %v18706_v1 = vld [vmem:[#allocation238_spill] sm:$0xff]  ;;  %v18707_v54 = vld [vmem:[#allocation239_spill] sm:$0xff] }
 0x510   : > { %10591 = vmatprep.subr.msk.mxu0 %vm2791_vm8, %v18645_v61  ;;  %10625 = vmatprep.subr.msk.mxu1 %vm2791_vm8, %v18646_v6  ;;  %v18708_v61 = vld [vmem:[#allocation240_spill] sm:$0xff]  ;;  %v18709_v6 = vld [vmem:[#allocation241_spill] sm:$0xff] }
 0x513   : > { %10592 = vmatpush3.xpose.msk.msra.mxu0 %vm2791_vm8, %v18647_v10  ;;  %10626 = vmatpush3.xpose.msk.msra.mxu1 %vm2791_vm8, %v18648_v36  ;;  %v18710_v10 = vld [vmem:[#allocation242_spill] sm:$0xff]  ;;  %v10854_v36 = vld [vmem:[%s17443_s4 + $0xe4] ss:$16 sps:$4 sm:$0xff]  }
 0x514   : > { %10593 = vmatprep.subr.msk.mxu0 %vm2791_vm8, %v18649_v16  ;;  %10627 = vmatprep.subr.msk.mxu1 %vm2791_vm8, %v18650_v46  ;;  %v18711_v16 = vld [vmem:[#allocation243_spill] sm:$0xff] }
 0x515   : > { %v10857_v46 = vld [vmem:[%s17443_s4 + $0x2e4] ss:$16 sps:$4 sm:$0xff]  }
 0x517   : > { %10594 = vmatpush3.xpose.msk.msra.mxu0 %vm2791_vm8, %v18651_v43  ;;  %10628 = vmatpush3.xpose.msk.msra.mxu1 %vm2791_vm8, %v18652_v31  ;;  %v18712_v43 = vld [vmem:[#allocation244_spill] sm:$0xff] }
 0x518   : > { %10595 = vmatprep.subr.msk.mxu0 %vm2791_vm8, %v18653_v24  ;;  %10629 = vmatprep.subr.msk.mxu1 %vm2791_vm8, %v18654_v63  ;;  %v10852_v31 = vld [vmem:[%s17443_s4 + $0xe0] ss:$16 sps:$4 sm:$0xff]  }
 0x519   : > { %v18713_v24 = vld [vmem:[#allocation245_spill] sm:$0xff] }
 0x51a   : > { %v10855_v63 = vld [vmem:[%s17443_s4 + $0x2e0] ss:$16 sps:$4 sm:$0xff]  }
 0x51b   : > { %10596 = vmatpush3.xpose.msk.msra.mxu0 %vm2791_vm8, %v18655_v39  ;;  %10630 = vmatpush3.xpose.msk.msra.mxu1 %vm2791_vm8, %v18656_v35  ;;  %v10860_v39 = vld [vmem:[%s17443_s4 + $0xc4] ss:$16 sps:$4 sm:$0xff]  }
 0x51c   : > { %10597 = vmatprep.subr.msk.mxu0 %vm2791_vm8, %v18657_v28  ;;  %10631 = vmatprep.subr.msk.mxu1 %vm2791_vm8, %v18658_v50  ;;  %v10863_v35 = vld [vmem:[%s17443_s4 + $0x2c4] ss:$16 sps:$4 sm:$0xff]   ;;  %v10858_v28 = vld [vmem:[%s17443_s4 + $0xc0] ss:$16 sps:$4 sm:$0xff]  }
 0x51d   : > { %v10861_v50 = vld [vmem:[%s17443_s4 + $0x2c0] ss:$16 sps:$4 sm:$0xff]  }
 0x51f   : > { %10598 = vmatpush3.xpose.msk.msra.mxu0 %vm2791_vm8, %v18659_v11  ;;  %10632 = vmatpush3.xpose.msk.msra.mxu1 %vm2791_vm8, %v18660_v14  ;;  %v10866_v11 = vld [vmem:[%s17443_s4 + $0xa4] ss:$16 sps:$4 sm:$0xff]   ;;  %v10864_v14 = vld [vmem:[%s17443_s4 + $0xa0] ss:$16 sps:$4 sm:$0xff]  }
 0x520   : > { %10599 = vmatprep.subr.msk.mxu0 %vm2791_vm8, %v18661_v47  ;;  %10633 = vmatprep.subr.msk.mxu1 %vm2791_vm8, %v18662_v4  ;;  %v10867_v47 = vld [vmem:[%s17443_s4 + $0x2a0] ss:$16 sps:$4 sm:$0xff]   ;;  %v10872_v4 = vld [vmem:[%s17443_s4 + $0x84] ss:$16 sps:$4 sm:$0xff]  }
 0x523   : > { %10600 = vmatpush3.xpose.msk.msra.mxu0 %vm2791_vm8, %v18663_v41  ;;  %10634 = vmatpush3.xpose.msk.msra.mxu1 %vm2791_vm8, %v18664_v15  ;;  %v10875_v41 = vld [vmem:[%s17443_s4 + $0x284] ss:$16 sps:$4 sm:$0xff]   ;;  %v10870_v15 = vld [vmem:[%s17443_s4 + $0x80] ss:$16 sps:$4 sm:$0xff]  }
 0x524   : > { %10601 = vmatprep.subr.msk.mxu0 %vm2791_vm8, %v18665_v26  ;;  %10635 = vmatprep.subr.msk.mxu1 %vm2791_vm8, %v18666_v19  ;;  %v10873_v26 = vld [vmem:[%s17443_s4 + $0x280] ss:$16 sps:$4 sm:$0xff]   ;;  %v10878_v19 = vld [vmem:[%s17443_s4 + $0x64] ss:$16 sps:$4 sm:$0xff]  }
 0x527   : > { %10602 = vmatpush3.xpose.msk.msra.mxu0 %vm2791_vm8, %v18667_v57  ;;  %10636 = vmatpush3.xpose.msk.msra.mxu1 %vm2791_vm8, %v18668_v56  ;;  %v10881_v57 = vld [vmem:[%s17443_s4 + $0x264] ss:$16 sps:$4 sm:$0xff]   ;;  %v10876_v56 = vld [vmem:[%s17443_s4 + $0x60] ss:$16 sps:$4 sm:$0xff]  }
 0x528   : > { %10639 = vmatprep.subr.msk.mxu0 %vm2791_vm8, %v18669_v58  ;;  %10673 = vmatprep.subr.msk.mxu1 %vm2791_vm8, %v18670_v25  ;;  %v10879_v58 = vld [vmem:[%s17443_s4 + $0x260] ss:$16 sps:$4 sm:$0xff]   ;;  %v10884_v25 = vld [vmem:[%s17443_s4 + $0x44] ss:$16 sps:$4 sm:$0xff]  }
 0x52a   : > { %10604 = vmatmul.mubr.msk.f32.vlgmr.msra.gmra.mxu0 %vm2791_vm8, %v15627_v48  ;;  %10638 = vmatmul.mubr.msk.f32.vlgmr.msra.gmra.mxu1 %vm2791_vm8, %v15627_v48 }
 0x52b   : > { %10640 = vmatpush3.xpose.msk.msra.mxu0 %vm2791_vm8, %v18524_v18  ;;  %10671 = vmatprep.mubr.msk.f32.mxu0 %vm2791_vm8, %v15627_v48  ;;  %v18671_v18 = vld [vmem:[#allocation190_spill] sm:$0xff] }
 0x52c   : > { %10674 = vmatpush3.xpose.msk.msra.mxu1 %vm2791_vm8, %v18526_v29  ;;  %10705 = vmatprep.mubr.msk.f32.mxu1 %vm2791_vm8, %v15627_v48  ;;  %v18672_v29 = vld [vmem:[#allocation191_spill] sm:$0xff] }
 0x52d   : > { %10641 = vmatprep.subr.msk.mxu0 %vm2791_vm8, %v18385_v38  ;;  %10675 = vmatprep.subr.msk.mxu1 %vm2791_vm8, %v18528_v52  ;;  %v18674_v38 = vld [vmem:[#allocation193_spill] sm:$0xff]  ;;  %v18675_v52 = vld [vmem:[#allocation194_spill] sm:$0xff] }
 0x52f   : > { %10642 = vmatpush3.xpose.msk.msra.mxu0 %vm2791_vm8, %v18525_v30  ;;  %v18676_v30 = vld [vmem:[#allocation195_spill] sm:$0xff] }
 0x530   : > { %10676 = vmatpush3.xpose.msk.msra.mxu1 %vm2791_vm8, %v18530_v55  ;;  %10643 = vmatprep.subr.msk.mxu0 %vm2791_vm8, %v18527_v27  ;;  %v18677_v55 = vld [vmem:[#allocation196_spill] sm:$0xff]  ;;  %v18678_v27 = vld [vmem:[#allocation197_spill] sm:$0xff] }
 0x531   : > { %10677 = vmatprep.subr.msk.mxu1 %vm2791_vm8, %v18671_v18  ;;  %v10887_v18 = vld [vmem:[%s17443_s4 + $0x244] ss:$16 sps:$4 sm:$0xff]  }
 0x533   : > { %10644 = vmatpush3.xpose.msk.msra.mxu0 %vm2791_vm8, %v18672_v29  ;;  %v10882_v29 = vld [vmem:[%s17443_s4 + $0x40] ss:$16 sps:$4 sm:$0xff]  }
 0x534   : > { %10678 = vmatpush3.xpose.msk.msra.mxu1 %vm2791_vm8, %v18673_v42  ;;  %10645 = vmatprep.subr.msk.mxu0 %vm2791_vm8, %v18674_v38  ;;  %v10885_v42 = vld [vmem:[%s17443_s4 + $0x240] ss:$16 sps:$4 sm:$0xff]   ;;  %v10890_v38 = vld [vmem:[%s17443_s4 + $0x24] ss:$16 sps:$4 sm:$0xff]  }
 0x535   : > { %10679 = vmatprep.subr.msk.mxu1 %vm2791_vm8, %v18675_v52  ;;  %v10893_v52 = vld [vmem:[%s17443_s4 + $0x224] ss:$16 sps:$4 sm:$0xff]  }
 0x537   : > { %10646 = vmatpush3.xpose.msk.msra.mxu0 %vm2791_vm8, %v18676_v30  ;;  %v10888_v30 = vld [vmem:[%s17443_s4 + $0x20] ss:$16 sps:$4 sm:$0xff]  }
 0x538   : > { %10680 = vmatpush3.xpose.msk.msra.mxu1 %vm2791_vm8, %v18677_v55  ;;  %10647 = vmatprep.subr.msk.mxu0 %vm2791_vm8, %v18678_v27  ;;  %v10891_v55 = vld [vmem:[%s17443_s4 + $0x220] ss:$16 sps:$4 sm:$0xff]   ;;  %v10896_v27 = vld [vmem:[%s17443_s4 + $0x4] ss:$16 sps:$4 sm:$0xff]  }
 0x539   : > { %10681 = vmatprep.subr.msk.mxu1 %vm2791_vm8, %v18679_v3  ;;  %v10899_v3 = vld [vmem:[%s17443_s4 + $0x204] ss:$16 sps:$4 sm:$0xff]  }
 0x53b   : > { %10648 = vmatpush3.xpose.msk.msra.mxu0 %vm2791_vm8, %v18680_v60  ;;  %v10894_v60 = vld [vmem:[%s17443_s4] ss:$16 sps:$4 sm:$0xff]  }
 0x53c   : > { %10682 = vmatpush3.xpose.msk.msra.mxu1 %vm2791_vm8, %v18681_v34  ;;  %10649 = vmatprep.subr.msk.mxu0 %vm2791_vm8, %v18682_v33  ;;  %v10897_v34 = vld [vmem:[%s17443_s4 + $0x200] ss:$16 sps:$4 sm:$0xff]   ;;  %v10902_v33 = vld [vmem:[%s17443_s4 + $0x1e4] ss:$16 sps:$4 sm:$0xff]  }
 0x53d   : > { %10683 = vmatprep.subr.msk.mxu1 %vm2791_vm8, %v18543_v12  ;;  %v18687_v12 = vld [vmem:[#allocation211_spill] sm:$0xff] }
 0x53f   : > { %10650 = vmatpush3.xpose.msk.msra.mxu0 %vm2791_vm8, %v18683_v5  ;;  %v10905_v5 = vld [vmem:[%s17443_s4 + $0x3e4] ss:$16 sps:$4 sm:$0xff]  }
 0x540   : > { %10684 = vmatpush3.xpose.msk.msra.mxu1 %vm2791_vm8, %v18545_v17  ;;  %10651 = vmatprep.subr.msk.mxu0 %vm2791_vm8, %v18684_v32  ;;  %v18688_v17 = vld [vmem:[#allocation213_spill] sm:$0xff] }
 0x541   : > { %10685 = vmatprep.subr.msk.mxu1 %vm2791_vm8, %v18547_v45  ;;  %v18689_v45 = vld [vmem:[#allocation215_spill] sm:$0xff] }
 0x542   : > { %v10900_v32 = vld [vmem:[%s17443_s4 + $0x1e0] ss:$16 sps:$4 sm:$0xff]  }
 0x543   : > { %10652 = vmatpush3.xpose.msk.msra.mxu0 %vm2791_vm8, %v18685_v9  ;;  %v10903_v9 = vld [vmem:[%s17443_s4 + $0x3e0] ss:$16 sps:$4 sm:$0xff]  }
 0x544   : > { %10686 = vmatpush3.xpose.msk.msra.mxu1 %vm2791_vm8, %v18549_v44  ;;  %10653 = vmatprep.subr.msk.mxu0 %vm2791_vm8, %v18686_v59  ;;  %v18690_v44 = vld [vmem:[#allocation217_spill] sm:$0xff] }
 0x545   : > { %10687 = vmatprep.subr.msk.mxu1 %vm2791_vm8, %v18551_v13  ;;  %v18691_v13 = vld [vmem:[#allocation222_spill] sm:$0xff]  ;;  %v10908_v59 = vld [vmem:[%s17443_s4 + $0x1c4] ss:$16 sps:$4 sm:$0xff]  }
 0x547   : > { %10654 = vmatpush3.xpose.msk.msra.mxu0 %vm2791_vm8, %v18687_v12  ;;  %v10911_v12 = vld [vmem:[%s17443_s4 + $0x3c4] ss:$16 sps:$4 sm:$0xff]  }
 0x548   : > { %10688 = vmatpush3.xpose.msk.msra.mxu1 %vm2791_vm8, %v18553_v40  ;;  %10655 = vmatprep.subr.msk.mxu0 %vm2791_vm8, %v18688_v17  ;;  %v18692_v40 = vld [vmem:[#allocation224_spill] sm:$0xff] }
 0x549   : > { %10689 = vmatprep.subr.msk.mxu1 %vm2791_vm8, %v18554_v22  ;;  %v18693_v22 = vld [vmem:[#allocation225_spill] sm:$0xff] }
 0x54a   : > { %v10906_v17 = vld [vmem:[%s17443_s4 + $0x1c0] ss:$16 sps:$4 sm:$0xff]  }
 0x54b   : > { %10656 = vmatpush3.xpose.msk.msra.mxu0 %vm2791_vm8, %v18689_v45  ;;  %v10909_v45 = vld [vmem:[%s17443_s4 + $0x3c0] ss:$16 sps:$4 sm:$0xff]  }
 0x54c   : > { %10690 = vmatpush3.xpose.msk.msra.mxu1 %vm2791_vm8, %v18555_v62  ;;  %10657 = vmatprep.subr.msk.mxu0 %vm2791_vm8, %v18690_v44  ;;  %v18694_v62 = vld [vmem:[#allocation226_spill] sm:$0xff]  ;;  %v10914_v44 = vld [vmem:[%s17443_s4 + $0x1a4] ss:$16 sps:$4 sm:$0xff]  }
 0x54d   : > { %10691 = vmatprep.subr.msk.mxu1 %vm2791_vm8, %v18556_v23  ;;  %v18695_v23 = vld [vmem:[#allocation227_spill] sm:$0xff] }
 0x54f   : > { %10658 = vmatpush3.xpose.msk.msra.mxu0 %vm2791_vm8, %v18416_v8  ;;  %v18696_v8 = vld [vmem:[#allocation228_spill] sm:$0xff] }
 0x550   : > { %10692 = vmatpush3.xpose.msk.msra.mxu1 %vm2791_vm8, %v18417_v37  ;;  %10659 = vmatprep.subr.msk.mxu0 %vm2791_vm8, %v18418_v2  ;;  %v18697_v37 = vld [vmem:[#allocation229_spill] sm:$0xff]  ;;  %v18698_v2 = vld [vmem:[#allocation230_spill] sm:$0xff] }
 0x551   : > { %10693 = vmatprep.subr.msk.mxu1 %vm2791_vm8, %v18691_v13  ;;  %v10917_v13 = vld [vmem:[%s17443_s4 + $0x3a4] ss:$16 sps:$4 sm:$0xff]  }
 0x553   : > { %10660 = vmatpush3.xpose.msk.msra.mxu0 %vm2791_vm8, %v18692_v40  ;;  %v10912_v40 = vld [vmem:[%s17443_s4 + $0x1a0] ss:$16 sps:$4 sm:$0xff]  }
 0x554   : > { %10694 = vmatpush3.xpose.msk.msra.mxu1 %vm2791_vm8, %v18693_v22  ;;  %10661 = vmatprep.subr.msk.mxu0 %vm2791_vm8, %v18694_v62  ;;  %v10915_v22 = vld [vmem:[%s17443_s4 + $0x3a0] ss:$16 sps:$4 sm:$0xff]   ;;  %v10920_v62 = vld [vmem:[%s17443_s4 + $0x184] ss:$16 sps:$4 sm:$0xff]  }
 0x555   : > { %10695 = vmatprep.subr.msk.mxu1 %vm2791_vm8, %v18695_v23  ;;  %v10923_v23 = vld [vmem:[%s17443_s4 + $0x384] ss:$16 sps:$4 sm:$0xff]  }
 0x557   : > { %10662 = vmatpush3.xpose.msk.msra.mxu0 %vm2791_vm8, %v18696_v8  ;;  %v10918_v8 = vld [vmem:[%s17443_s4 + $0x180] ss:$16 sps:$4 sm:$0xff]  }
 0x558   : > { %10696 = vmatpush3.xpose.msk.msra.mxu1 %vm2791_vm8, %v18697_v37  ;;  %10663 = vmatprep.subr.msk.mxu0 %vm2791_vm8, %v18698_v2  ;;  %v10921_v37 = vld [vmem:[%s17443_s4 + $0x380] ss:$16 sps:$4 sm:$0xff]   ;;  %v10926_v2 = vld [vmem:[%s17443_s4 + $0x164] ss:$16 sps:$4 sm:$0xff]  }
 0x559   : > { %10697 = vmatprep.subr.msk.mxu1 %vm2791_vm8, %v18699_v49  ;;  %v10929_v49 = vld [vmem:[%s17443_s4 + $0x364] ss:$16 sps:$4 sm:$0xff]  }
 0x55b   : > { %10664 = vmatpush3.xpose.msk.msra.mxu0 %vm2791_vm8, %v18700_v51  ;;  %v10924_v51 = vld [vmem:[%s17443_s4 + $0x160] ss:$16 sps:$4 sm:$0xff]  }
 0x55c   : > { %10698 = vmatpush3.xpose.msk.msra.mxu1 %vm2791_vm8, %v18701_v21  ;;  %10665 = vmatprep.subr.msk.mxu0 %vm2791_vm8, %v18702_v53  ;;  %v10927_v21 = vld [vmem:[%s17443_s4 + $0x360] ss:$16 sps:$4 sm:$0xff]   ;;  %v10932_v53 = vld [vmem:[%s17443_s4 + $0x144] ss:$16 sps:$4 sm:$0xff]  }
 0x55d   : > { %10699 = vmatprep.subr.msk.mxu1 %vm2791_vm8, %v18703_v0  ;;  %v10935_v0 = vld [vmem:[%s17443_s4 + $0x344] ss:$16 sps:$4 sm:$0xff]  }
 0x55f   : > { %10666 = vmatpush3.xpose.msk.msra.mxu0 %vm2791_vm8, %v18704_v20  ;;  %v10930_v20 = vld [vmem:[%s17443_s4 + $0x140] ss:$16 sps:$4 sm:$0xff]  }
 0x560   : > { %10700 = vmatpush3.xpose.msk.msra.mxu1 %vm2791_vm8, %v18705_v7  ;;  %10667 = vmatprep.subr.msk.mxu0 %vm2791_vm8, %v18706_v1  ;;  %v10933_v7 = vld [vmem:[%s17443_s4 + $0x340] ss:$16 sps:$4 sm:$0xff]   ;;  %v10938_v1 = vld [vmem:[%s17443_s4 + $0x124] ss:$16 sps:$4 sm:$0xff]  }
 0x561   : > { %10701 = vmatprep.subr.msk.mxu1 %vm2791_vm8, %v18707_v54  ;;  %v10941_v54 = vld [vmem:[%s17443_s4 + $0x324] ss:$16 sps:$4 sm:$0xff]  }
 0x563   : > { %10668 = vmatpush3.xpose.msk.msra.mxu0 %vm2791_vm8, %v18708_v61  ;;  %v10936_v61 = vld [vmem:[%s17443_s4 + $0x120] ss:$16 sps:$4 sm:$0xff]  }
 0x564   : > { %10702 = vmatpush3.xpose.msk.msra.mxu1 %vm2791_vm8, %v18709_v6  ;;  %10669 = vmatprep.subr.msk.mxu0 %vm2791_vm8, %v18710_v10  ;;  %v10939_v6 = vld [vmem:[%s17443_s4 + $0x320] ss:$16 sps:$4 sm:$0xff]   ;;  %v10944_v10 = vld [vmem:[%s17443_s4 + $0x104] ss:$16 sps:$4 sm:$0xff]  }
 0x565   : > { %10703 = vmatprep.subr.msk.mxu1 %vm2791_vm8, %v18711_v16  ;;  %v10942_v16 = vld [vmem:[%s17443_s4 + $0x100] ss:$16 sps:$4 sm:$0xff]  }
 0x567   : > { %10670 = vmatpush3.xpose.msk.msra.mxu0 %vm2791_vm8, %v18712_v43  ;;  %v10950_v43 = vld [vmem:[%s17443_s4 + $0x4e4] ss:$16 sps:$4 sm:$0xff]  }
 0x568   : > { %10704 = vmatpush3.xpose.msk.msra.mxu1 %vm2791_vm8, %v18713_v24  ;;  %7258 = vmatprep.subr.bf16.mxu0 %v10854_v36  ;;  %v10947_v36 = vld [vmem:[%s17443_s4 + $0x304] ss:$16 sps:$4 sm:$0xff]  }
 0x569   : > { %7297 = vmatprep.subr.bf16.mxu1 %v10857_v46  ;;  %v10945_v46 = vld [vmem:[%s17443_s4 + $0x300] ss:$16 sps:$4 sm:$0xff]  }
 0x56a   : > { %10672 = vmatmul.mubr.msk.f32.vlgmr.msra.gmra.mxu0 %vm2791_vm8, %v15627_v48 }
 0x56b   : > { %10706 = vmatmul.mubr.msk.f32.vlgmr.msra.gmra.mxu1 %vm2791_vm8, %v15627_v48  ;;  %7259 = vmatpush1.bf16.msra.mxu0 %v10852_v31  ;;  %v10869_v48 = vld [vmem:[%s17443_s4 + $0x2a4] ss:$16 sps:$4 sm:$0xff]  }
 0x56c   : > { %7298 = vmatpush1.bf16.msra.mxu1 %v10855_v63  ;;  %7260 = vmatprep.subr.bf16.mxu0 %v10860_v39  ;;  %v10953_v31 = vld [vmem:[%s17443_s4 + $0x6e4] ss:$16 sps:$4 sm:$0xff]  }
 0x56d   : > { %7299 = vmatprep.subr.bf16.mxu1 %v10863_v35 }
 0x56f   : > { %7261 = vmatpush1.bf16.msra.mxu0 %v10858_v28 }
 0x570   : > { %7300 = vmatpush1.bf16.msra.mxu1 %v10861_v50  ;;  %7262 = vmatprep.subr.bf16.mxu0 %v10866_v11 }
 0x571   : > { %7301 = vmatprep.subr.bf16.mxu1 %v10869_v48 }
 0x573   : > { %7263 = vmatpush1.bf16.msra.mxu0 %v10864_v14 }
 0x574   : > { %7302 = vmatpush1.bf16.msra.mxu1 %v10867_v47  ;;  %7264 = vmatprep.subr.bf16.mxu0 %v10872_v4 }
 0x575   : > { %7303 = vmatprep.subr.bf16.mxu1 %v10875_v41 }
 0x577   : > { %7265 = vmatpush1.bf16.msra.mxu0 %v10870_v15 }
 0x578   : > { %7304 = vmatpush1.bf16.msra.mxu1 %v10873_v26  ;;  %7266 = vmatprep.subr.bf16.mxu0 %v10878_v19  ;;  %v18714_v19 = vld [vmem:[#allocation99_spill] sm:$0xff] }
 0x579   : > { %7305 = vmatprep.subr.bf16.mxu1 %v10881_v57 }
 0x57b   : > { %7267 = vmatpush1.bf16.msra.mxu0 %v10876_v56 }
 0x57c   : > { %7306 = vmatpush1.bf16.msra.mxu1 %v10879_v58  ;;  %7268 = vmatprep.subr.bf16.mxu0 %v10884_v25  ;;  %v18715_v25 = vld [vmem:[#allocation121_spill] sm:$0xff] }
 0x57d   : > { %7307 = vmatprep.subr.bf16.mxu1 %v10887_v18 }
 0x57f   : > { %7269 = vmatpush1.bf16.msra.mxu0 %v10882_v29 }
 0x580   : > { %7308 = vmatpush1.bf16.msra.mxu1 %v10885_v42  ;;  %7270 = vmatprep.subr.bf16.mxu0 %v10890_v38 }
 0x581   : > { %7309 = vmatprep.subr.bf16.mxu1 %v10893_v52  ;;  %v10948_v52 = vld [vmem:[%s17443_s4 + $0x4e0] ss:$16 sps:$4 sm:$0xff]  }
 0x583   : > { %7271 = vmatpush1.bf16.msra.mxu0 %v10888_v30 }
 0x584   : > { %7310 = vmatpush1.bf16.msra.mxu1 %v10891_v55  ;;  %7272 = vmatprep.subr.bf16.mxu0 %v10896_v27  ;;  %v10956_v55 = vld [vmem:[%s17443_s4 + $0x4c4] ss:$16 sps:$4 sm:$0xff]  }
 0x585   : > { %7311 = vmatprep.subr.bf16.mxu1 %v10899_v3  ;;  %v10951_v3 = vld [vmem:[%s17443_s4 + $0x6e0] ss:$16 sps:$4 sm:$0xff]  }
 0x587   : > { %7273 = vmatpush1.bf16.msra.mxu0 %v10894_v60  ;;  %v10959_v60 = vld [vmem:[%s17443_s4 + $0x6c4] ss:$16 sps:$4 sm:$0xff]  }
 0x588   : > { %7312 = vmatpush1.bf16.msra.mxu1 %v10897_v34  ;;  %7274 = vmatprep.subr.bf16.mxu0 %v10902_v33  ;;  %v10954_v34 = vld [vmem:[%s17443_s4 + $0x4c0] ss:$16 sps:$4 sm:$0xff]   ;;  %v10962_v33 = vld [vmem:[%s17443_s4 + $0x4a4] ss:$16 sps:$4 sm:$0xff]  }
 0x589   : > { %7313 = vmatprep.subr.bf16.mxu1 %v10905_v5  ;;  %v10957_v5 = vld [vmem:[%s17443_s4 + $0x6c0] ss:$16 sps:$4 sm:$0xff]  }
 0x58b   : > { %7275 = vmatpush2.bf16.msra.mxu0 %v10900_v32  ;;  %v10965_v32 = vld [vmem:[%s17443_s4 + $0x6a4] ss:$16 sps:$4 sm:$0xff]  }
 0x58c   : > { %7314 = vmatpush2.bf16.msra.mxu1 %v10903_v9  ;;  %7276 = vmatprep.subr.bf16.mxu0 %v10908_v59  ;;  %v10960_v9 = vld [vmem:[%s17443_s4 + $0x4a0] ss:$16 sps:$4 sm:$0xff]   ;;  %v10968_v59 = vld [vmem:[%s17443_s4 + $0x484] ss:$16 sps:$4 sm:$0xff]  }
 0x58d   : > { %7315 = vmatprep.subr.bf16.mxu1 %v10911_v12  ;;  %v10963_v12 = vld [vmem:[%s17443_s4 + $0x6a0] ss:$16 sps:$4 sm:$0xff]  }
 0x58f   : > { %7277 = vmatpush2.bf16.msra.mxu0 %v10906_v17  ;;  %v10971_v17 = vld [vmem:[%s17443_s4 + $0x684] ss:$16 sps:$4 sm:$0xff]  }
 0x590   : > { %7316 = vmatpush2.bf16.msra.mxu1 %v10909_v45  ;;  %7278 = vmatprep.subr.bf16.mxu0 %v10914_v44  ;;  %v10966_v45 = vld [vmem:[%s17443_s4 + $0x480] ss:$16 sps:$4 sm:$0xff]   ;;  %v10974_v44 = vld [vmem:[%s17443_s4 + $0x464] ss:$16 sps:$4 sm:$0xff]  }
 0x591   : > { %7317 = vmatprep.subr.bf16.mxu1 %v10917_v13  ;;  %v10969_v13 = vld [vmem:[%s17443_s4 + $0x680] ss:$16 sps:$4 sm:$0xff]  }
 0x593   : > { %7279 = vmatpush2.bf16.msra.mxu0 %v10912_v40  ;;  %v10977_v40 = vld [vmem:[%s17443_s4 + $0x664] ss:$16 sps:$4 sm:$0xff]  }
 0x594   : > { %7318 = vmatpush2.bf16.msra.mxu1 %v10915_v22  ;;  %7280 = vmatprep.subr.bf16.mxu0 %v10920_v62  ;;  %v10972_v22 = vld [vmem:[%s17443_s4 + $0x460] ss:$16 sps:$4 sm:$0xff]   ;;  %v10980_v62 = vld [vmem:[%s17443_s4 + $0x444] ss:$16 sps:$4 sm:$0xff]  }
 0x595   : > { %7319 = vmatprep.subr.bf16.mxu1 %v10923_v23  ;;  %v10975_v23 = vld [vmem:[%s17443_s4 + $0x660] ss:$16 sps:$4 sm:$0xff]  }
 0x597   : > { %7281 = vmatpush2.bf16.msra.mxu0 %v10918_v8  ;;  %v10983_v8 = vld [vmem:[%s17443_s4 + $0x644] ss:$16 sps:$4 sm:$0xff]  }
 0x598   : > { %7320 = vmatpush2.bf16.msra.mxu1 %v10921_v37  ;;  %7282 = vmatprep.subr.bf16.mxu0 %v10926_v2  ;;  %v10978_v37 = vld [vmem:[%s17443_s4 + $0x440] ss:$16 sps:$4 sm:$0xff]   ;;  %v10986_v2 = vld [vmem:[%s17443_s4 + $0x424] ss:$16 sps:$4 sm:$0xff]  }
 0x599   : > { %7321 = vmatprep.subr.bf16.mxu1 %v10929_v49  ;;  %v10981_v49 = vld [vmem:[%s17443_s4 + $0x640] ss:$16 sps:$4 sm:$0xff]  }
 0x59b   : > { %7283 = vmatpush2.bf16.msra.mxu0 %v10924_v51  ;;  %v10989_v51 = vld [vmem:[%s17443_s4 + $0x624] ss:$16 sps:$4 sm:$0xff]  }
 0x59c   : > { %7322 = vmatpush2.bf16.msra.mxu1 %v10927_v21  ;;  %7284 = vmatprep.subr.bf16.mxu0 %v10932_v53  ;;  %v10984_v21 = vld [vmem:[%s17443_s4 + $0x420] ss:$16 sps:$4 sm:$0xff]   ;;  %v10992_v53 = vld [vmem:[%s17443_s4 + $0x404] ss:$16 sps:$4 sm:$0xff]  }
 0x59d   : > { %7323 = vmatprep.subr.bf16.mxu1 %v10935_v0  ;;  %v10987_v0 = vld [vmem:[%s17443_s4 + $0x620] ss:$16 sps:$4 sm:$0xff]  }
 0x59f   : > { %7285 = vmatpush2.bf16.msra.mxu0 %v10930_v20  ;;  %v10995_v20 = vld [vmem:[%s17443_s4 + $0x604] ss:$16 sps:$4 sm:$0xff]  }
 0x5a0   : > { %7324 = vmatpush2.bf16.msra.mxu1 %v10933_v7  ;;  %7286 = vmatprep.subr.bf16.mxu0 %v10938_v1  ;;  %v10990_v7 = vld [vmem:[%s17443_s4 + $0x400] ss:$16 sps:$4 sm:$0xff]   ;;  %v10998_v1 = vld [vmem:[%s17443_s4 + $0x5e4] ss:$16 sps:$4 sm:$0xff]  }
 0x5a1   : > { %7325 = vmatprep.subr.bf16.mxu1 %v10941_v54  ;;  %v10993_v54 = vld [vmem:[%s17443_s4 + $0x600] ss:$16 sps:$4 sm:$0xff]  }
 0x5a3   : > { %7287 = vmatpush2.bf16.msra.mxu0 %v10936_v61  ;;  %v11001_v61 = vld [vmem:[%s17443_s4 + $0x7e4] ss:$16 sps:$4 sm:$0xff]  }
 0x5a4   : > { %7326 = vmatpush2.bf16.msra.mxu1 %v10939_v6  ;;  %7288 = vmatprep.subr.bf16.mxu0 %v10944_v10  ;;  %v10996_v6 = vld [vmem:[%s17443_s4 + $0x5e0] ss:$16 sps:$4 sm:$0xff]   ;;  %v11004_v10 = vld [vmem:[%s17443_s4 + $0x5c4] ss:$16 sps:$4 sm:$0xff]  }
 0x5a5   : > { %7327 = vmatprep.subr.bf16.mxu1 %v10947_v36 }
 0x5a7   : > { %7289 = vmatpush2.bf16.msra.mxu0 %v10942_v16 }
 0x5a8   : > { %7328 = vmatpush2.bf16.msra.mxu1 %v10945_v46  ;;  %7336 = vmatprep.subr.bf16.mxu0 %v10950_v43  ;;  %v10999_v46 = vld [vmem:[%s17443_s4 + $0x7e0] ss:$16 sps:$4 sm:$0xff]  }
 0x5a9   : > { %7375 = vmatprep.subr.bf16.mxu1 %v10953_v31 }
 0x5aa   : > { %v4425_v24 = vpop.f32.mrf.mxu0  ;;  %v4496_v63 = vpop.f32.mrf.mxu1 }
 0x5ab   : > { %v4426_v39 = vadd.f32 1e-05, %v4425_v24  ;;  %v4497_v35 = vadd.f32 1e-05, %v4496_v63  ;;  %v11007_v24 = vld [vmem:[%s17443_s4 + $0x7c4] ss:$16 sps:$4 sm:$0xff]  }
 0x5ac   : > { %v4427_v28 = vpop.f32.mrf.mxu0  ;;  %v4498_v50 = vpop.f32.mrf.mxu1 }
 0x5ad   : > { %11540 = vrsqrt.f32 %v4426_v39  ;;  %v4428_v11 = vadd.f32 1e-05, %v4427_v28  ;;  %v4499_v48 = vadd.f32 1e-05, %v4498_v50 }
 0x5ae   : > { %11542 = vrsqrt.f32 %v4497_v35  ;;  %v11002_v35 = vld [vmem:[%s17443_s4 + $0x5c0] ss:$16 sps:$4 sm:$0xff]  }
 0x5af   : > { %11544 = vrsqrt.f32 %v4428_v11  ;;  %v11010_v11 = vld [vmem:[%s17443_s4 + $0x5a4] ss:$16 sps:$4 sm:$0xff]  }
 0x5b0   : > { %11546 = vrsqrt.f32 %v4499_v48  ;;  %v11005_v48 = vld [vmem:[%s17443_s4 + $0x7c0] ss:$16 sps:$4 sm:$0xff]  }
 0x5ba   : > { %v11541_v14 = vpop.eup %11540 }
 0x5bb   : > { %v11543_v47 = vpop.eup %11542 }
 0x5bc   : > { %v11545_v4 = vpop.eup %11544 }
 0x5bd   : > { %v11547_v41 = vpop.eup %11546  ;;  %v4809_v15 = vcombine.low %v11541_v14, %v11545_v4  ;;  %v11013_v14 = vld [vmem:[%s17443_s4 + $0x7a4] ss:$16 sps:$4 sm:$0xff]  }
 0x5be   : > { %v4810_v26 = vcombine.low %v11543_v47, %v11547_v41  ;;  %v11008_v47 = vld [vmem:[%s17443_s4 + $0x5a0] ss:$16 sps:$4 sm:$0xff]   ;;  %v11016_v4 = vld [vmem:[%s17443_s4 + $0x584] ss:$16 sps:$4 sm:$0xff]  }
 0x5bf   : > { %v4817_v57 = vrot.slane %v4809_v15, %v18714_v19  ;;  %v11011_v41 = vld [vmem:[%s17443_s4 + $0x7a0] ss:$16 sps:$4 sm:$0xff]   ;;  %v11019_v15 = vld [vmem:[%s17443_s4 + $0x784] ss:$16 sps:$4 sm:$0xff]  }
 0x5c0   : > { %v4824_v56 = vrot.slane %v4810_v26, %v18714_v19  ;;  %v11014_v26 = vld [vmem:[%s17443_s4 + $0x580] ss:$16 sps:$4 sm:$0xff]  }
 0x5c2   : > { %v4825_v58 = vcombine.low %v4817_v57, %v4824_v56  ;;  %v11022_v57 = vld [vmem:[%s17443_s4 + $0x564] ss:$16 sps:$4 sm:$0xff]   ;;  %v11017_v56 = vld [vmem:[%s17443_s4 + $0x780] ss:$16 sps:$4 sm:$0xff]  }
 0x5c4   : > { %v4863_v18 = vmul.f32 %v4825_v58, %v18715_v25  ;;  %v11025_v58 = vld [vmem:[%s17443_s4 + $0x764] ss:$16 sps:$4 sm:$0xff]   ;;  %v11020_v25 = vld [vmem:[%s17443_s4 + $0x560] ss:$16 sps:$4 sm:$0xff]  }
 0x5c6   : > { %v16107_v29 = vrot.slane %v4863_v18, %v18714_v19  ;;  %v5275_v42 = vcombine.high %v4863_v18, %v4863_v18  ;;  %v11028_v18 = vld [vmem:[%s17443_s4 + $0x544] ss:$16 sps:$4 sm:$0xff]  }
 0x5c8   : > { %v16111_v38 = vcombine.high %v16107_v29, %v16107_v29  ;;  %v16117_v30 = vrot.slane %v5275_v42, %v18714_v19 }
 0x5ca   : > { %7290 = vmatprep.mubr.f32.mxu0 %v16111_v38  ;;  %v16125_v27 = vcombine.high %v16117_v30, %v16117_v30 }
 0x5cb   : > { %7291 = vmatmul.mubr.f32.vlgmr.msra.gmra.mxu0 %v16107_v29 }
 0x5cc   : > { %7337 = vmatpush1.bf16.msra.mxu0 %v10948_v52  ;;  %7329 = vmatprep.mubr.f32.mxu1 %v16125_v27  ;;  %v11023_v52 = vld [vmem:[%s17443_s4 + $0x760] ss:$16 sps:$4 sm:$0xff]  }
 0x5cd   : > { %7330 = vmatmul.mubr.f32.vlgmr.msra.gmra.mxu1 %v16117_v30  ;;  %7338 = vmatprep.subr.bf16.mxu0 %v10956_v55 }
 0x5ce   : > { %7376 = vmatpush1.bf16.msra.mxu1 %v10951_v3  ;;  %v11031_v3 = vld [vmem:[%s17443_s4 + $0x744] ss:$16 sps:$4 sm:$0xff]  }
 0x5cf   : > { %7377 = vmatprep.subr.bf16.mxu1 %v10959_v60 }
 0x5d0   : > { %7339 = vmatpush1.bf16.msra.mxu0 %v10954_v34  ;;  %v11026_v34 = vld [vmem:[%s17443_s4 + $0x540] ss:$16 sps:$4 sm:$0xff]  }
 0x5d1   : > { %7340 = vmatprep.subr.bf16.mxu0 %v10962_v33 }
 0x5d2   : > { %7378 = vmatpush1.bf16.msra.mxu1 %v10957_v5 }
 0x5d3   : > { %7379 = vmatprep.subr.bf16.mxu1 %v10965_v32  ;;  %v11034_v32 = vld [vmem:[%s17443_s4 + $0x524] ss:$16 sps:$4 sm:$0xff]  }
 0x5d4   : > { %7341 = vmatpush1.bf16.msra.mxu0 %v10960_v9 }
 0x5d5   : > { %7342 = vmatprep.subr.bf16.mxu0 %v10968_v59  ;;  %v11029_v59 = vld [vmem:[%s17443_s4 + $0x740] ss:$16 sps:$4 sm:$0xff]  }
 0x5d6   : > { %7380 = vmatpush1.bf16.msra.mxu1 %v10963_v12  ;;  %v11037_v12 = vld [vmem:[%s17443_s4 + $0x724] ss:$16 sps:$4 sm:$0xff]  }
 0x5d7   : > { %7381 = vmatprep.subr.bf16.mxu1 %v10971_v17 }
 0x5d8   : > { %7343 = vmatpush1.bf16.msra.mxu0 %v10966_v45  ;;  %v11032_v45 = vld [vmem:[%s17443_s4 + $0x520] ss:$16 sps:$4 sm:$0xff]  }
 0x5d9   : > { %7344 = vmatprep.subr.bf16.mxu0 %v10974_v44 }
 0x5da   : > { %7382 = vmatpush1.bf16.msra.mxu1 %v10969_v13  ;;  %v11040_v13 = vld [vmem:[%s17443_s4 + $0x504] ss:$16 sps:$4 sm:$0xff]  }
 0x5db   : > { %7383 = vmatprep.subr.bf16.mxu1 %v10977_v40  ;;  %v11035_v40 = vld [vmem:[%s17443_s4 + $0x720] ss:$16 sps:$4 sm:$0xff]  }
 0x5dc   : > { %7345 = vmatpush1.bf16.msra.mxu0 %v10972_v22 }
 0x5dd   : > { %7346 = vmatprep.subr.bf16.mxu0 %v10980_v62  ;;  %v11043_v62 = vld [vmem:[%s17443_s4 + $0x704] ss:$16 sps:$4 sm:$0xff]  }
 0x5de   : > { %7384 = vmatpush1.bf16.msra.mxu1 %v10975_v23  ;;  %v11038_v23 = vld [vmem:[%s17443_s4 + $0x500] ss:$16 sps:$4 sm:$0xff]  }
 0x5df   : > { %7385 = vmatprep.subr.bf16.mxu1 %v10983_v8  ;;  %v18716_v8 = vld [vmem:[#allocation123_spill] sm:$0xff] }
 0x5e0   : > { %7347 = vmatpush1.bf16.msra.mxu0 %v10978_v37 }
 0x5e1   : > { %7348 = vmatprep.subr.bf16.mxu0 %v10986_v2  ;;  %v11046_v2 = vld [vmem:[%s17443_s4 + $0x8e4] ss:$16 sps:$4 sm:$0xff]  }
 0x5e2   : > { %7386 = vmatpush1.bf16.msra.mxu1 %v10981_v49  ;;  %v11041_v49 = vld [vmem:[%s17443_s4 + $0x700] ss:$16 sps:$4 sm:$0xff]  }
 0x5e3   : > { %7387 = vmatprep.subr.bf16.mxu1 %v10989_v51 }
 0x5e4   : > { %7349 = vmatpush1.bf16.msra.mxu0 %v10984_v21 }
 0x5e5   : > { %7350 = vmatprep.subr.bf16.mxu0 %v10992_v53  ;;  %v11049_v53 = vld [vmem:[%s17443_s4 + $0xae4] ss:$16 sps:$4 sm:$0xff]  }
 0x5e6   : > { %7388 = vmatpush1.bf16.msra.mxu1 %v10987_v0 }
 0x5e7   : > { %7389 = vmatprep.subr.bf16.mxu1 %v10995_v20  ;;  %v11044_v20 = vld [vmem:[%s17443_s4 + $0x8e0] ss:$16 sps:$4 sm:$0xff]  }
 0x5e8   : > { %7351 = vmatpush1.bf16.msra.mxu0 %v10990_v7 }
 0x5e9   : > { %7352 = vmatprep.subr.bf16.mxu0 %v10998_v1  ;;  %v11052_v1 = vld [vmem:[%s17443_s4 + $0x8c4] ss:$16 sps:$4 sm:$0xff]  }
 0x5ea   : > { %7390 = vmatpush1.bf16.msra.mxu1 %v10993_v54  ;;  %v4567_v36 = vpop.f32.mrf.mxu0  ;;  %v4638_v16 = vpop.f32.mrf.mxu1 }
 0x5eb   : > { %v4568_v43 = vadd.f32 1e-05, %v4567_v36  ;;  %v4639_v31 = vadd.f32 1e-05, %v4638_v16  ;;  %7391 = vmatprep.subr.bf16.mxu1 %v11001_v61  ;;  %v11047_v61 = vld [vmem:[%s17443_s4 + $0xae0] ss:$16 sps:$4 sm:$0xff]  }
 0x5ec   : > { %7353 = vmatpush2.bf16.msra.mxu0 %v10996_v6  ;;  %v4569_v63 = vpop.f32.mrf.mxu0  ;;  %v4640_v39 = vpop.f32.mrf.mxu1  ;;  %v11055_v6 = vld [vmem:[%s17443_s4 + $0xac4] ss:$16 sps:$4 sm:$0xff]   ;;  %v11053_v16 = vld [vmem:[%s17443_s4 + $0xac0] ss:$16 sps:$4 sm:$0xff]  }
 0x5ed   : > { %11548 = vrsqrt.f32 %v4568_v43  ;;  %v4570_v28 = vadd.f32 1e-05, %v4569_v63  ;;  %v4641_v50 = vadd.f32 1e-05, %v4640_v39  ;;  %7354 = vmatprep.subr.bf16.mxu0 %v11004_v10  ;;  %v11050_v10 = vld [vmem:[%s17443_s4 + $0x8c0] ss:$16 sps:$4 sm:$0xff]  }
 0x5ee   : > { %11550 = vrsqrt.f32 %v4639_v31  ;;  %7392 = vmatpush2.bf16.msra.mxu1 %v10999_v46  ;;  %v11058_v36 = vld [vmem:[%s17443_s4 + $0x8a4] ss:$16 sps:$4 sm:$0xff]   ;;  %v11056_v43 = vld [vmem:[%s17443_s4 + $0x8a0] ss:$16 sps:$4 sm:$0xff]  }
 0x5ef   : > { %11552 = vrsqrt.f32 %v4570_v28  ;;  %7393 = vmatprep.subr.bf16.mxu1 %v11007_v24  ;;  %v11061_v46 = vld [vmem:[%s17443_s4 + $0xaa4] ss:$16 sps:$4 sm:$0xff]   ;;  %v11059_v24 = vld [vmem:[%s17443_s4 + $0xaa0] ss:$16 sps:$4 sm:$0xff]  }
 0x5f0   : > { %11554 = vrsqrt.f32 %v4641_v50  ;;  %7355 = vmatpush2.bf16.msra.mxu0 %v11002_v35  ;;  %v11064_v31 = vld [vmem:[%s17443_s4 + $0x884] ss:$16 sps:$4 sm:$0xff]   ;;  %v11062_v39 = vld [vmem:[%s17443_s4 + $0x880] ss:$16 sps:$4 sm:$0xff]  }
 0x5f1   : > { %7356 = vmatprep.subr.bf16.mxu0 %v11010_v11  ;;  %v11067_v63 = vld [vmem:[%s17443_s4 + $0xa84] ss:$16 sps:$4 sm:$0xff]   ;;  %v11065_v28 = vld [vmem:[%s17443_s4 + $0xa80] ss:$16 sps:$4 sm:$0xff]  }
 0x5f2   : > { %7394 = vmatpush2.bf16.msra.mxu1 %v11005_v48  ;;  %v11070_v35 = vld [vmem:[%s17443_s4 + $0x864] ss:$16 sps:$4 sm:$0xff]   ;;  %v11068_v11 = vld [vmem:[%s17443_s4 + $0x860] ss:$16 sps:$4 sm:$0xff]  }
 0x5f3   : > { %7395 = vmatprep.subr.bf16.mxu1 %v11013_v14  ;;  %v11073_v50 = vld [vmem:[%s17443_s4 + $0xa64] ss:$16 sps:$4 sm:$0xff]   ;;  %v11071_v14 = vld [vmem:[%s17443_s4 + $0xa60] ss:$16 sps:$4 sm:$0xff]  }
 0x5f4   : > { %7357 = vmatpush2.bf16.msra.mxu0 %v11008_v47  ;;  %v11076_v48 = vld [vmem:[%s17443_s4 + $0x844] ss:$16 sps:$4 sm:$0xff]  }
 0x5f5   : > { %7358 = vmatprep.subr.bf16.mxu0 %v11016_v4  ;;  %v11079_v47 = vld [vmem:[%s17443_s4 + $0xa44] ss:$16 sps:$4 sm:$0xff]   ;;  %v11074_v4 = vld [vmem:[%s17443_s4 + $0x840] ss:$16 sps:$4 sm:$0xff]  }
 0x5f6   : > { %7396 = vmatpush2.bf16.msra.mxu1 %v11011_v41  ;;  %v11082_v41 = vld [vmem:[%s17443_s4 + $0x824] ss:$16 sps:$4 sm:$0xff]  }
 0x5f7   : > { %7397 = vmatprep.subr.bf16.mxu1 %v11019_v15  ;;  %v11077_v15 = vld [vmem:[%s17443_s4 + $0xa40] ss:$16 sps:$4 sm:$0xff]  }
 0x5f8   : > { %7359 = vmatpush2.bf16.msra.mxu0 %v11014_v26  ;;  %v11085_v26 = vld [vmem:[%s17443_s4 + $0xa24] ss:$16 sps:$4 sm:$0xff]  }
 0x5f9   : > { %7360 = vmatprep.subr.bf16.mxu0 %v11022_v57  ;;  %v11080_v57 = vld [vmem:[%s17443_s4 + $0x820] ss:$16 sps:$4 sm:$0xff]  }
 0x5fa   : > { %v11549_v42 = vpop.eup %11548  ;;  %7398 = vmatpush2.bf16.msra.mxu1 %v11017_v56  ;;  %v11088_v56 = vld [vmem:[%s17443_s4 + $0x804] ss:$16 sps:$4 sm:$0xff]  }
 0x5fb   : > { %v11551_v55 = vpop.eup %11550  ;;  %7399 = vmatprep.subr.bf16.mxu1 %v11025_v58  ;;  %v11083_v58 = vld [vmem:[%s17443_s4 + $0xa20] ss:$16 sps:$4 sm:$0xff]  }
 0x5fc   : > { %v11553_v60 = vpop.eup %11552  ;;  %7361 = vmatpush2.bf16.msra.mxu0 %v11020_v25  ;;  %v11091_v25 = vld [vmem:[%s17443_s4 + $0xa04] ss:$16 sps:$4 sm:$0xff]  }
 0x5fd   : > { %v11555_v33 = vpop.eup %11554  ;;  %v4826_v5 = vcombine.low %v11549_v42, %v11553_v60  ;;  %7362 = vmatprep.subr.bf16.mxu0 %v11028_v18  ;;  %v11086_v18 = vld [vmem:[%s17443_s4 + $0x800] ss:$16 sps:$4 sm:$0xff]   ;;  %v11094_v42 = vld [vmem:[%s17443_s4 + $0x9e4] ss:$16 sps:$4 sm:$0xff]  }
 0x5fe   : > { %v4827_v9 = vcombine.low %v11551_v55, %v11555_v33  ;;  %7400 = vmatpush2.bf16.msra.mxu1 %v11023_v52  ;;  %v11089_v52 = vld [vmem:[%s17443_s4 + $0xa00] ss:$16 sps:$4 sm:$0xff]   ;;  %v11097_v55 = vld [vmem:[%s17443_s4 + $0xbe4] ss:$16 sps:$4 sm:$0xff]  }
 0x5ff   : > { %7401 = vmatprep.subr.bf16.mxu1 %v11031_v3  ;;  %v4834_v17 = vrot.slane %v4826_v5, %v18714_v19  ;;  %v11092_v3 = vld [vmem:[%s17443_s4 + $0x9e0] ss:$16 sps:$4 sm:$0xff]   ;;  %v11100_v60 = vld [vmem:[%s17443_s4 + $0x9c4] ss:$16 sps:$4 sm:$0xff]  }
 0x600   : > { %7363 = vmatpush2.bf16.msra.mxu0 %v11026_v34  ;;  %v4841_v44 = vrot.slane %v4827_v9, %v18714_v19  ;;  %v11095_v33 = vld [vmem:[%s17443_s4 + $0xbe0] ss:$16 sps:$4 sm:$0xff]   ;;  %v11103_v9 = vld [vmem:[%s17443_s4 + $0xbc4] ss:$16 sps:$4 sm:$0xff]  }
 0x601   : > { %7364 = vmatprep.subr.bf16.mxu0 %v11034_v32 }
 0x602   : > { %7402 = vmatpush2.bf16.msra.mxu1 %v11029_v59  ;;  %v4842_v22 = vcombine.low %v4834_v17, %v4841_v44  ;;  %v11098_v17 = vld [vmem:[%s17443_s4 + $0x9c0] ss:$16 sps:$4 sm:$0xff]  }
 0x603   : > { %7403 = vmatprep.subr.bf16.mxu1 %v11037_v12 }
 0x604   : > { %7365 = vmatpush2.bf16.msra.mxu0 %v11032_v45  ;;  %v4864_v37 = vmul.f32 %v4842_v22, %v18716_v8  ;;  %v11101_v22 = vld [vmem:[%s17443_s4 + $0xbc0] ss:$16 sps:$4 sm:$0xff]   ;;  %v11112_v8 = vld [vmem:[%s17443_s4 + $0x984] ss:$16 sps:$4 sm:$0xff]  }
 0x605   : > { %7366 = vmatprep.subr.bf16.mxu0 %v11040_v13  ;;  %v11106_v13 = vld [vmem:[%s17443_s4 + $0x9a4] ss:$16 sps:$4 sm:$0xff]  }
 0x606   : > { %7404 = vmatpush2.bf16.msra.mxu1 %v11035_v40  ;;  %v16317_v51 = vrot.slane %v4864_v37, %v18714_v19  ;;  %v5292_v21 = vcombine.high %v4864_v37, %v4864_v37  ;;  %v11107_v37 = vld [vmem:[%s17443_s4 + $0xba0] ss:$16 sps:$4 sm:$0xff]  }
 0x607   : > { %7405 = vmatprep.subr.bf16.mxu1 %v11043_v62  ;;  %v11109_v62 = vld [vmem:[%s17443_s4 + $0xba4] ss:$16 sps:$4 sm:$0xff]  }
 0x608   : > { %7367 = vmatpush2.bf16.msra.mxu0 %v11038_v23  ;;  %v16324_v0 = vcombine.high %v16317_v51, %v16317_v51  ;;  %v16330_v7 = vrot.slane %v5292_v21, %v18714_v19  ;;  %v11104_v23 = vld [vmem:[%s17443_s4 + $0x9a0] ss:$16 sps:$4 sm:$0xff]   ;;  %v11118_v21 = vld [vmem:[%s17443_s4 + $0x964] ss:$16 sps:$4 sm:$0xff]  }
 0x609   : > { %7414 = vmatprep.subr.bf16.mxu0 %v11046_v2  ;;  %v11115_v2 = vld [vmem:[%s17443_s4 + $0xb84] ss:$16 sps:$4 sm:$0xff]  }
 0x60a   : > { %7368 = vmatprep.mubr.f32.mxu0 %v16324_v0  ;;  %7406 = vmatpush2.bf16.msra.mxu1 %v11041_v49  ;;  %v16338_v54 = vcombine.high %v16330_v7, %v16330_v7  ;;  %v11110_v49 = vld [vmem:[%s17443_s4 + $0x980] ss:$16 sps:$4 sm:$0xff]  }
 0x60b   : > { %7369 = vmatmul.mubr.f32.vlgmr.msra.gmra.mxu0 %v16317_v51  ;;  %7453 = vmatprep.subr.bf16.mxu1 %v11049_v53  ;;  %v11113_v53 = vld [vmem:[%s17443_s4 + $0xb80] ss:$16 sps:$4 sm:$0xff]  }
 0x60c   : > { %7407 = vmatprep.mubr.f32.mxu1 %v16338_v54  ;;  %7415 = vmatpush1.bf16.msra.mxu0 %v11044_v20  ;;  %v11121_v20 = vld [vmem:[%s17443_s4 + $0xb64] ss:$16 sps:$4 sm:$0xff]  }
 0x60d   : > { %7408 = vmatmul.mubr.f32.vlgmr.msra.gmra.mxu1 %v16330_v7  ;;  %7416 = vmatprep.subr.bf16.mxu0 %v11052_v1  ;;  %v11116_v1 = vld [vmem:[%s17443_s4 + $0x960] ss:$16 sps:$4 sm:$0xff]  }
 0x60e   : > { %7454 = vmatpush1.bf16.msra.mxu1 %v11047_v61  ;;  %v11124_v61 = vld [vmem:[%s17443_s4 + $0x944] ss:$16 sps:$4 sm:$0xff]  }
 0x60f   : > { %7455 = vmatprep.subr.bf16.mxu1 %v11055_v6 }
 0x610   : > { %7417 = vmatpush1.bf16.msra.mxu0 %v11050_v10  ;;  %v11119_v10 = vld [vmem:[%s17443_s4 + $0xb60] ss:$16 sps:$4 sm:$0xff]  }
 0x611   : > { %7418 = vmatprep.subr.bf16.mxu0 %v11058_v36 }
 0x612   : > { %7456 = vmatpush1.bf16.msra.mxu1 %v11053_v16  ;;  %v11127_v16 = vld [vmem:[%s17443_s4 + $0xb44] ss:$16 sps:$4 sm:$0xff]  }
 0x613   : > { %7457 = vmatprep.subr.bf16.mxu1 %v11061_v46 }
 0x614   : > { %7419 = vmatpush1.bf16.msra.mxu0 %v11056_v43  ;;  %v11122_v43 = vld [vmem:[%s17443_s4 + $0x940] ss:$16 sps:$4 sm:$0xff]  }
 0x615   : > { %7420 = vmatprep.subr.bf16.mxu0 %v11064_v31 }
 0x616   : > { %7458 = vmatpush1.bf16.msra.mxu1 %v11059_v24 }
 0x617   : > { %7459 = vmatprep.subr.bf16.mxu1 %v11067_v63  ;;  %v11130_v63 = vld [vmem:[%s17443_s4 + $0x924] ss:$16 sps:$4 sm:$0xff]  }
 0x618   : > { %7421 = vmatpush1.bf16.msra.mxu0 %v11062_v39 }
 0x619   : > { %7422 = vmatprep.subr.bf16.mxu0 %v11070_v35  ;;  %v11125_v35 = vld [vmem:[%s17443_s4 + $0xb40] ss:$16 sps:$4 sm:$0xff]  }
 0x61a   : > { %7460 = vmatpush1.bf16.msra.mxu1 %v11065_v28  ;;  %v11133_v28 = vld [vmem:[%s17443_s4 + $0xb24] ss:$16 sps:$4 sm:$0xff]  }
 0x61b   : > { %7461 = vmatprep.subr.bf16.mxu1 %v11073_v50 }
 0x61c   : > { %7423 = vmatpush1.bf16.msra.mxu0 %v11068_v11  ;;  %v11128_v11 = vld [vmem:[%s17443_s4 + $0x920] ss:$16 sps:$4 sm:$0xff]  }
 0x61d   : > { %7424 = vmatprep.subr.bf16.mxu0 %v11076_v48 }
 0x61e   : > { %7462 = vmatpush1.bf16.msra.mxu1 %v11071_v14  ;;  %v11136_v14 = vld [vmem:[%s17443_s4 + $0x904] ss:$16 sps:$4 sm:$0xff]  }
 0x61f   : > { %7463 = vmatprep.subr.bf16.mxu1 %v11079_v47  ;;  %v11131_v47 = vld [vmem:[%s17443_s4 + $0xb20] ss:$16 sps:$4 sm:$0xff]  }
 0x620   : > { %7425 = vmatpush1.bf16.msra.mxu0 %v11074_v4 }
 0x621   : > { %7426 = vmatprep.subr.bf16.mxu0 %v11082_v41  ;;  %v11139_v41 = vld [vmem:[%s17443_s4 + $0xb04] ss:$16 sps:$4 sm:$0xff]  }
 0x622   : > { %7464 = vmatpush1.bf16.msra.mxu1 %v11077_v15  ;;  %v11134_v15 = vld [vmem:[%s17443_s4 + $0x900] ss:$16 sps:$4 sm:$0xff]  }
 0x623   : > { %7465 = vmatprep.subr.bf16.mxu1 %v11085_v26  ;;  %v18717_v26 = vld [vmem:[#allocation122_spill] sm:$0xff] }
 0x624   : > { %7427 = vmatpush1.bf16.msra.mxu0 %v11080_v57 }
 0x625   : > { %7428 = vmatprep.subr.bf16.mxu0 %v11088_v56  ;;  %v11142_v56 = vld [vmem:[%s17443_s4 + $0xec] ss:$16 sps:$4 sm:$0xff]  }
 0x626   : > { %7466 = vmatpush1.bf16.msra.mxu1 %v11083_v58  ;;  %v11137_v58 = vld [vmem:[%s17443_s4 + $0xb00] ss:$16 sps:$4 sm:$0xff]  }
 0x627   : > { %7467 = vmatprep.subr.bf16.mxu1 %v11091_v25 }
 0x628   : > { %7429 = vmatpush1.bf16.msra.mxu0 %v11086_v18 }
 0x629   : > { %7430 = vmatprep.subr.bf16.mxu0 %v11094_v42  ;;  %v11145_v42 = vld [vmem:[%s17443_s4 + $0x2ec] ss:$16 sps:$4 sm:$0xff]  }
 0x62a   : > { %7468 = vmatpush1.bf16.msra.mxu1 %v11089_v52  ;;  %v4709_v34 = vpop.f32.mrf.mxu0 }
 0x62b   : > { %v4710_v5 = vadd.f32 1e-05, %v4709_v34  ;;  %v4780_v32 = vpop.f32.mrf.mxu1  ;;  %7469 = vmatprep.subr.bf16.mxu1 %v11097_v55  ;;  %v11140_v55 = vld [vmem:[%s17443_s4 + $0xe8] ss:$16 sps:$4 sm:$0xff]  }
 0x62c   : > { %v4781_v59 = vadd.f32 1e-05, %v4780_v32  ;;  %7431 = vmatpush2.bf16.msra.mxu0 %v11092_v3  ;;  %v4711_v12 = vpop.f32.mrf.mxu0  ;;  %v11143_v34 = vld [vmem:[%s17443_s4 + $0x2e8] ss:$16 sps:$4 sm:$0xff]   ;;  %v11154_v32 = vld [vmem:[%s17443_s4 + $0xac] ss:$16 sps:$4 sm:$0xff]  }
 0x62d   : > { %11556 = vrsqrt.f32 %v4710_v5  ;;  %v4712_v45 = vadd.f32 1e-05, %v4711_v12  ;;  %v4782_v44 = vpop.f32.mrf.mxu1  ;;  %7432 = vmatprep.subr.bf16.mxu0 %v11100_v60  ;;  %v11146_v5 = vld [vmem:[%s17443_s4 + $0xc8] ss:$16 sps:$4 sm:$0xff]  }
 0x62e   : > { %11558 = vrsqrt.f32 %v4781_v59  ;;  %v4783_v40 = vadd.f32 1e-05, %v4782_v44  ;;  %7470 = vmatpush2.bf16.msra.mxu1 %v11095_v33  ;;  %v11151_v33 = vld [vmem:[%s17443_s4 + $0x2cc] ss:$16 sps:$4 sm:$0xff]   ;;  %v11155_v12 = vld [vmem:[%s17443_s4 + $0x2a8] ss:$16 sps:$4 sm:$0xff]  }
 0x62f   : > { %11560 = vrsqrt.f32 %v4712_v45  ;;  %7471 = vmatprep.subr.bf16.mxu1 %v11103_v9  ;;  %v11149_v9 = vld [vmem:[%s17443_s4 + $0x2c8] ss:$16 sps:$4 sm:$0xff]   ;;  %v11157_v59 = vld [vmem:[%s17443_s4 + $0x2ac] ss:$16 sps:$4 sm:$0xff]  }
 0x630   : > { %11562 = vrsqrt.f32 %v4783_v40  ;;  %7433 = vmatpush2.bf16.msra.mxu0 %v11098_v17  ;;  %v11163_v17 = vld [vmem:[%s17443_s4 + $0x28c] ss:$16 sps:$4 sm:$0xff]   ;;  %v11158_v45 = vld [vmem:[%s17443_s4 + $0x88] ss:$16 sps:$4 sm:$0xff]  }
 0x631   : > { %7434 = vmatprep.subr.bf16.mxu0 %v11106_v13  ;;  %v11166_v44 = vld [vmem:[%s17443_s4 + $0x6c] ss:$16 sps:$4 sm:$0xff]   ;;  %v11161_v13 = vld [vmem:[%s17443_s4 + $0x288] ss:$16 sps:$4 sm:$0xff]  }
 0x632   : > { %7472 = vmatpush2.bf16.msra.mxu1 %v11101_v22  ;;  %v11169_v40 = vld [vmem:[%s17443_s4 + $0x26c] ss:$16 sps:$4 sm:$0xff]   ;;  %v11164_v22 = vld [vmem:[%s17443_s4 + $0x68] ss:$16 sps:$4 sm:$0xff]  }
 0x633   : > { %7473 = vmatprep.subr.bf16.mxu1 %v11109_v62  ;;  %v11172_v62 = vld [vmem:[%s17443_s4 + $0x4c] ss:$16 sps:$4 sm:$0xff]  }
 0x634   : > { %7435 = vmatpush2.bf16.msra.mxu0 %v11104_v23  ;;  %v11167_v23 = vld [vmem:[%s17443_s4 + $0x268] ss:$16 sps:$4 sm:$0xff]  }
 0x635   : > { %7436 = vmatprep.subr.bf16.mxu0 %v11112_v8  ;;  %v11175_v8 = vld [vmem:[%s17443_s4 + $0x24c] ss:$16 sps:$4 sm:$0xff]  }
 0x636   : > { %7474 = vmatpush2.bf16.msra.mxu1 %v11107_v37  ;;  %v11170_v37 = vld [vmem:[%s17443_s4 + $0x48] ss:$16 sps:$4 sm:$0xff]  }
 0x637   : > { %7475 = vmatprep.subr.bf16.mxu1 %v11115_v2  ;;  %v11178_v2 = vld [vmem:[%s17443_s4 + $0x2c] ss:$16 sps:$4 sm:$0xff]  }
 0x638   : > { %7437 = vmatpush2.bf16.msra.mxu0 %v11110_v49  ;;  %v11173_v49 = vld [vmem:[%s17443_s4 + $0x248] ss:$16 sps:$4 sm:$0xff]  }
 0x639   : > { %7438 = vmatprep.subr.bf16.mxu0 %v11118_v21  ;;  %v11181_v21 = vld [vmem:[%s17443_s4 + $0x22c] ss:$16 sps:$4 sm:$0xff]  }
 0x63a   : > { %v11557_v6 = vpop.eup %11556  ;;  %7476 = vmatpush2.bf16.msra.mxu1 %v11113_v53  ;;  %v11176_v53 = vld [vmem:[%s17443_s4 + $0x28] ss:$16 sps:$4 sm:$0xff]  }
 0x63b   : > { %v11559_v36 = vpop.eup %11558  ;;  %7477 = vmatprep.subr.bf16.mxu1 %v11121_v20  ;;  %v11184_v20 = vld [vmem:[%s17443_s4 + $0xc] ss:$16 sps:$4 sm:$0xff]  }
 0x63c   : > { %v11561_v46 = vpop.eup %11560  ;;  %7439 = vmatpush2.bf16.msra.mxu0 %v11116_v1  ;;  %v11179_v1 = vld [vmem:[%s17443_s4 + $0x228] ss:$16 sps:$4 sm:$0xff]  }
 0x63d   : > { %v11563_v31 = vpop.eup %11562  ;;  %v4843_v24 = vcombine.low %v11557_v6, %v11561_v46  ;;  %7440 = vmatprep.subr.bf16.mxu0 %v11124_v61  ;;  %v11187_v61 = vld [vmem:[%s17443_s4 + $0x20c] ss:$16 sps:$4 sm:$0xff]   ;;  %v11182_v6 = vld [vmem:[%s17443_s4 + $0x8] ss:$16 sps:$4 sm:$0xff]  }
 0x63e   : > { %v4844_v39 = vcombine.low %v11559_v36, %v11563_v31  ;;  %7478 = vmatpush2.bf16.msra.mxu1 %v11119_v10  ;;  %v11190_v10 = vld [vmem:[%s17443_s4 + $0x1ec] ss:$16 sps:$4 sm:$0xff]   ;;  %v11185_v36 = vld [vmem:[%s17443_s4 + $0x208] ss:$16 sps:$4 sm:$0xff]  }
 0x63f   : > { %7479 = vmatprep.subr.bf16.mxu1 %v11127_v16  ;;  %v4851_v50 = vrot.slane %v4843_v24, %v18714_v19  ;;  %v11193_v16 = vld [vmem:[%s17443_s4 + $0x3ec] ss:$16 sps:$4 sm:$0xff]   ;;  %v11188_v46 = vld [vmem:[%s17443_s4 + $0x1e8] ss:$16 sps:$4 sm:$0xff]  }
 0x640   : > { %7441 = vmatpush2.bf16.msra.mxu0 %v11122_v43  ;;  %v4858_v48 = vrot.slane %v4844_v39, %v18714_v19  ;;  %v11196_v43 = vld [vmem:[%s17443_s4 + $0x1cc] ss:$16 sps:$4 sm:$0xff]   ;;  %v11191_v31 = vld [vmem:[%s17443_s4 + $0x3e8] ss:$16 sps:$4 sm:$0xff]  }
 0x641   : > { %7442 = vmatprep.subr.bf16.mxu0 %v11130_v63  ;;  %v11199_v24 = vld [vmem:[%s17443_s4 + $0x3cc] ss:$16 sps:$4 sm:$0xff]   ;;  %v11194_v63 = vld [vmem:[%s17443_s4 + $0x1c8] ss:$16 sps:$4 sm:$0xff]  }
 0x642   : > { %7480 = vmatpush2.bf16.msra.mxu1 %v11125_v35  ;;  %v4859_v4 = vcombine.low %v4851_v50, %v4858_v48  ;;  %v11202_v39 = vld [vmem:[%s17443_s4 + $0x1ac] ss:$16 sps:$4 sm:$0xff]   ;;  %v11197_v35 = vld [vmem:[%s17443_s4 + $0x3c8] ss:$16 sps:$4 sm:$0xff]  }
 0x643   : > { %7481 = vmatprep.subr.bf16.mxu1 %v11133_v28  ;;  %v11205_v28 = vld [vmem:[%s17443_s4 + $0x3ac] ss:$16 sps:$4 sm:$0xff]   ;;  %v11200_v50 = vld [vmem:[%s17443_s4 + $0x1a8] ss:$16 sps:$4 sm:$0xff]  }
 0x644   : > { %7443 = vmatpush2.bf16.msra.mxu0 %v11128_v11  ;;  %v4865_v57 = vmul.f32 %v4859_v4, %v18717_v26  ;;  %v11208_v11 = vld [vmem:[%s17443_s4 + $0x18c] ss:$16 sps:$4 sm:$0xff]   ;;  %v11203_v48 = vld [vmem:[%s17443_s4 + $0x3a8] ss:$16 sps:$4 sm:$0xff]  }
 0x645   : > { %7444 = vmatprep.subr.bf16.mxu0 %v11136_v14  ;;  %v11211_v14 = vld [vmem:[%s17443_s4 + $0x38c] ss:$16 sps:$4 sm:$0xff]   ;;  %v11212_v26 = vld [vmem:[%s17443_s4 + $0x168] ss:$16 sps:$4 sm:$0xff]  }
 0x646   : > { %7482 = vmatpush2.bf16.msra.mxu1 %v11131_v47  ;;  %v16530_v25 = vrot.slane %v4865_v57, %v18714_v19  ;;  %v5309_v18 = vcombine.high %v4865_v57, %v4865_v57  ;;  %v11206_v47 = vld [vmem:[%s17443_s4 + $0x188] ss:$16 sps:$4 sm:$0xff]   ;;  %v11214_v4 = vld [vmem:[%s17443_s4 + $0x16c] ss:$16 sps:$4 sm:$0xff]  }
 0x647   : > { %7483 = vmatprep.subr.bf16.mxu1 %v11139_v41  ;;  %v11209_v41 = vld [vmem:[%s17443_s4 + $0x388] ss:$16 sps:$4 sm:$0xff]   ;;  %v11220_v57 = vld [vmem:[%s17443_s4 + $0x14c] ss:$16 sps:$4 sm:$0xff]  }
 0x648   : > { %7445 = vmatpush2.bf16.msra.mxu0 %v11134_v15  ;;  %v16537_v52 = vcombine.high %v16530_v25, %v16530_v25  ;;  %v16543_v3 = vrot.slane %v5309_v18, %v18714_v19  ;;  %v11148_v19 = vld [vmem:[%s17443_s4 + $0xcc] ss:$16 sps:$4 sm:$0xff]   ;;  %v11218_v18 = vld [vmem:[%s17443_s4 + $0x148] ss:$16 sps:$4 sm:$0xff]  }
 0x649   : > { %7492 = vmatprep.subr.bf16.mxu0 %v11142_v56  ;;  %v11217_v15 = vld [vmem:[%s17443_s4 + $0x36c] ss:$16 sps:$4 sm:$0xff]   ;;  %v11215_v56 = vld [vmem:[%s17443_s4 + $0x368] ss:$16 sps:$4 sm:$0xff]  }
 0x64a   : > { %7446 = vmatprep.mubr.f32.mxu0 %v16537_v52  ;;  %7484 = vmatpush2.bf16.msra.mxu1 %v11137_v58  ;;  %v16548_v60 = vcombine.high %v16543_v3, %v16543_v3  ;;  %v11223_v58 = vld [vmem:[%s17443_s4 + $0x34c] ss:$16 sps:$4 sm:$0xff]  }
 0x64b   : > { %7447 = vmatmul.mubr.f32.vlgmr.msra.gmra.mxu0 %v16530_v25  ;;  %7531 = vmatprep.subr.bf16.mxu1 %v11145_v42  ;;  %v11226_v42 = vld [vmem:[%s17443_s4 + $0x12c] ss:$16 sps:$4 sm:$0xff]  }
 0x64c   : > { %7485 = vmatprep.mubr.f32.mxu1 %v16548_v60  ;;  %7493 = vmatpush1.bf16.msra.mxu0 %v11140_v55  ;;  %v11221_v55 = vld [vmem:[%s17443_s4 + $0x348] ss:$16 sps:$4 sm:$0xff]  }
 0x64d   : > { %7524 = vmatprep.mubr.f32.mxu0 %v16111_v38  ;;  %7486 = vmatmul.mubr.f32.vlgmr.msra.gmra.mxu1 %v16543_v3  ;;  %v11152_v38 = vld [vmem:[%s17443_s4 + $0xa8] ss:$16 sps:$4 sm:$0xff]  }
 0x64e   : > { %7532 = vmatpush1.bf16.msra.mxu1 %v11143_v34  ;;  %7563 = vmatprep.mubr.f32.mxu1 %v16125_v27  ;;  %v11160_v27 = vld [vmem:[%s17443_s4 + $0x8c] ss:$16 sps:$4 sm:$0xff]  }
 0x64f   : > { %7494 = vmatprep.subr.bf16.mxu0 %v11148_v19  ;;  %7533 = vmatprep.subr.bf16.mxu1 %v11151_v33  ;;  %v11229_v34 = vld [vmem:[%s17443_s4 + $0x32c] ss:$16 sps:$4 sm:$0xff]   ;;  %v11224_v19 = vld [vmem:[%s17443_s4 + $0x128] ss:$16 sps:$4 sm:$0xff]  }
 0x650   : > { %7495 = vmatpush1.bf16.msra.mxu0 %v11146_v5  ;;  %v11232_v33 = vld [vmem:[%s17443_s4 + $0x10c] ss:$16 sps:$4 sm:$0xff]   ;;  %v11227_v5 = vld [vmem:[%s17443_s4 + $0x328] ss:$16 sps:$4 sm:$0xff]  }
 0x651   : > { %7496 = vmatprep.subr.bf16.mxu0 %v11154_v32  ;;  %v11235_v32 = vld [vmem:[%s17443_s4 + $0x30c] ss:$16 sps:$4 sm:$0xff]  }
 0x652   : > { %7534 = vmatpush1.bf16.msra.mxu1 %v11149_v9  ;;  %v11230_v9 = vld [vmem:[%s17443_s4 + $0x108] ss:$16 sps:$4 sm:$0xff]  }
 0x653   : > { %7535 = vmatprep.subr.bf16.mxu1 %v11157_v59  ;;  %v11238_v59 = vld [vmem:[%s17443_s4 + $0x4ec] ss:$16 sps:$4 sm:$0xff]  }
 0x654   : > { %7497 = vmatpush1.bf16.msra.mxu0 %v11152_v38  ;;  %v11233_v38 = vld [vmem:[%s17443_s4 + $0x308] ss:$16 sps:$4 sm:$0xff]  }
 0x655   : > { %7498 = vmatprep.subr.bf16.mxu0 %v11160_v27  ;;  %v11241_v27 = vld [vmem:[%s17443_s4 + $0x6ec] ss:$16 sps:$4 sm:$0xff]  }
 0x656   : > { %7536 = vmatpush1.bf16.msra.mxu1 %v11155_v12  ;;  %v11236_v12 = vld [vmem:[%s17443_s4 + $0x4e8] ss:$16 sps:$4 sm:$0xff]  }
 0x657   : > { %7537 = vmatprep.subr.bf16.mxu1 %v11163_v17  ;;  %v11244_v17 = vld [vmem:[%s17443_s4 + $0x4cc] ss:$16 sps:$4 sm:$0xff]  }
 0x658   : > { %7499 = vmatpush1.bf16.msra.mxu0 %v11158_v45  ;;  %v11239_v45 = vld [vmem:[%s17443_s4 + $0x6e8] ss:$16 sps:$4 sm:$0xff]  }
 0x659   : > { %7500 = vmatprep.subr.bf16.mxu0 %v11166_v44  ;;  %v11247_v44 = vld [vmem:[%s17443_s4 + $0x6cc] ss:$16 sps:$4 sm:$0xff]  }
 0x65a   : > { %7538 = vmatpush1.bf16.msra.mxu1 %v11161_v13  ;;  %v11242_v13 = vld [vmem:[%s17443_s4 + $0x4c8] ss:$16 sps:$4 sm:$0xff]  }
 0x65b   : > { %7539 = vmatprep.subr.bf16.mxu1 %v11169_v40  ;;  %v11250_v40 = vld [vmem:[%s17443_s4 + $0x4ac] ss:$16 sps:$4 sm:$0xff]  }
 0x65c   : > { %7501 = vmatpush1.bf16.msra.mxu0 %v11164_v22  ;;  %v11256_v22 = vld [vmem:[%s17443_s4 + $0x48c] ss:$16 sps:$4 sm:$0xff]  }
 0x65d   : > { %7502 = vmatprep.subr.bf16.mxu0 %v11172_v62  ;;  %v11259_v62 = vld [vmem:[%s17443_s4 + $0x68c] ss:$16 sps:$4 sm:$0xff]  }
 0x65e   : > { %7540 = vmatpush1.bf16.msra.mxu1 %v11167_v23  ;;  %v11254_v23 = vld [vmem:[%s17443_s4 + $0x488] ss:$16 sps:$4 sm:$0xff]  }
 0x65f   : > { %7541 = vmatprep.subr.bf16.mxu1 %v11175_v8  ;;  %v11262_v8 = vld [vmem:[%s17443_s4 + $0x46c] ss:$16 sps:$4 sm:$0xff]  }
 0x660   : > { %7503 = vmatpush1.bf16.msra.mxu0 %v11170_v37  ;;  %v11257_v37 = vld [vmem:[%s17443_s4 + $0x688] ss:$16 sps:$4 sm:$0xff]  }
 0x661   : > { %7504 = vmatprep.subr.bf16.mxu0 %v11178_v2  ;;  %v11265_v2 = vld [vmem:[%s17443_s4 + $0x66c] ss:$16 sps:$4 sm:$0xff]  }
 0x662   : > { %7542 = vmatpush1.bf16.msra.mxu1 %v11173_v49  ;;  %v11260_v49 = vld [vmem:[%s17443_s4 + $0x468] ss:$16 sps:$4 sm:$0xff]  }
 0x663   : > { %7543 = vmatprep.subr.bf16.mxu1 %v11181_v21  ;;  %v11268_v21 = vld [vmem:[%s17443_s4 + $0x44c] ss:$16 sps:$4 sm:$0xff]  }
 0x664   : > { %7505 = vmatpush1.bf16.msra.mxu0 %v11176_v53  ;;  %v11263_v53 = vld [vmem:[%s17443_s4 + $0x668] ss:$16 sps:$4 sm:$0xff]  }
 0x665   : > { %7506 = vmatprep.subr.bf16.mxu0 %v11184_v20  ;;  %v11271_v20 = vld [vmem:[%s17443_s4 + $0x64c] ss:$16 sps:$4 sm:$0xff]  }
 0x666   : > { %7544 = vmatpush1.bf16.msra.mxu1 %v11179_v1  ;;  %v11266_v1 = vld [vmem:[%s17443_s4 + $0x448] ss:$16 sps:$4 sm:$0xff]  }
 0x667   : > { %7545 = vmatprep.subr.bf16.mxu1 %v11187_v61  ;;  %v11274_v61 = vld [vmem:[%s17443_s4 + $0x42c] ss:$16 sps:$4 sm:$0xff]  }
 0x668   : > { %7507 = vmatpush1.bf16.msra.mxu0 %v11182_v6  ;;  %v11269_v6 = vld [vmem:[%s17443_s4 + $0x648] ss:$16 sps:$4 sm:$0xff]  }
 0x669   : > { %7508 = vmatprep.subr.bf16.mxu0 %v11190_v10  ;;  %v11277_v10 = vld [vmem:[%s17443_s4 + $0x62c] ss:$16 sps:$4 sm:$0xff]  }
 0x66a   : > { %7546 = vmatpush1.bf16.msra.mxu1 %v11185_v36  ;;  %v11272_v36 = vld [vmem:[%s17443_s4 + $0x428] ss:$16 sps:$4 sm:$0xff]  }
 0x66b   : > { %7547 = vmatprep.subr.bf16.mxu1 %v11193_v16  ;;  %v11280_v16 = vld [vmem:[%s17443_s4 + $0x40c] ss:$16 sps:$4 sm:$0xff]  }
 0x66c   : > { %7509 = vmatpush2.bf16.msra.mxu0 %v11188_v46  ;;  %v11275_v46 = vld [vmem:[%s17443_s4 + $0x628] ss:$16 sps:$4 sm:$0xff]  }
 0x66d   : > { %7510 = vmatprep.subr.bf16.mxu0 %v11196_v43  ;;  %v11283_v43 = vld [vmem:[%s17443_s4 + $0x60c] ss:$16 sps:$4 sm:$0xff]  }
 0x66e   : > { %7548 = vmatpush2.bf16.msra.mxu1 %v11191_v31  ;;  %v11278_v31 = vld [vmem:[%s17443_s4 + $0x408] ss:$16 sps:$4 sm:$0xff]  }
 0x66f   : > { %7549 = vmatprep.subr.bf16.mxu1 %v11199_v24  ;;  %v11286_v24 = vld [vmem:[%s17443_s4 + $0x5ec] ss:$16 sps:$4 sm:$0xff]  }
 0x670   : > { %7511 = vmatpush2.bf16.msra.mxu0 %v11194_v63  ;;  %v11281_v63 = vld [vmem:[%s17443_s4 + $0x608] ss:$16 sps:$4 sm:$0xff]  }
 0x671   : > { %7512 = vmatprep.subr.bf16.mxu0 %v11202_v39  ;;  %v11289_v39 = vld [vmem:[%s17443_s4 + $0x7ec] ss:$16 sps:$4 sm:$0xff]  }
 0x672   : > { %7550 = vmatpush2.bf16.msra.mxu1 %v11197_v35  ;;  %v11284_v35 = vld [vmem:[%s17443_s4 + $0x5e8] ss:$16 sps:$4 sm:$0xff]  }
 0x673   : > { %7551 = vmatprep.subr.bf16.mxu1 %v11205_v28  ;;  %v11292_v28 = vld [vmem:[%s17443_s4 + $0x5cc] ss:$16 sps:$4 sm:$0xff]  }
 0x674   : > { %7513 = vmatpush2.bf16.msra.mxu0 %v11200_v50  ;;  %v11287_v50 = vld [vmem:[%s17443_s4 + $0x7e8] ss:$16 sps:$4 sm:$0xff]  }
 0x675   : > { %7514 = vmatprep.subr.bf16.mxu0 %v11208_v11  ;;  %v11295_v11 = vld [vmem:[%s17443_s4 + $0x7cc] ss:$16 sps:$4 sm:$0xff]  }
 0x676   : > { %7552 = vmatpush2.bf16.msra.mxu1 %v11203_v48  ;;  %v11290_v48 = vld [vmem:[%s17443_s4 + $0x5c8] ss:$16 sps:$4 sm:$0xff]  }
 0x677   : > { %7553 = vmatprep.subr.bf16.mxu1 %v11211_v14  ;;  %v11298_v14 = vld [vmem:[%s17443_s4 + $0x5ac] ss:$16 sps:$4 sm:$0xff]  }
 0x678   : > { %7515 = vmatpush2.bf16.msra.mxu0 %v11206_v47  ;;  %v11293_v47 = vld [vmem:[%s17443_s4 + $0x7c8] ss:$16 sps:$4 sm:$0xff]  }
 0x679   : > { %7516 = vmatprep.subr.bf16.mxu0 %v11214_v4  ;;  %v11301_v4 = vld [vmem:[%s17443_s4 + $0x7ac] ss:$16 sps:$4 sm:$0xff]  }
 0x67a   : > { %7554 = vmatpush2.bf16.msra.mxu1 %v11209_v41  ;;  %v11296_v41 = vld [vmem:[%s17443_s4 + $0x5a8] ss:$16 sps:$4 sm:$0xff]  }
 0x67b   : > { %7555 = vmatprep.subr.bf16.mxu1 %v11217_v15  ;;  %v11304_v15 = vld [vmem:[%s17443_s4 + $0x58c] ss:$16 sps:$4 sm:$0xff]  }
 0x67c   : > { %7517 = vmatpush2.bf16.msra.mxu0 %v11212_v26  ;;  %v11299_v26 = vld [vmem:[%s17443_s4 + $0x7a8] ss:$16 sps:$4 sm:$0xff]  }
 0x67d   : > { %7518 = vmatprep.subr.bf16.mxu0 %v11220_v57  ;;  %v11307_v57 = vld [vmem:[%s17443_s4 + $0x78c] ss:$16 sps:$4 sm:$0xff]  }
 0x67e   : > { %7556 = vmatpush2.bf16.msra.mxu1 %v11215_v56  ;;  %v11302_v56 = vld [vmem:[%s17443_s4 + $0x588] ss:$16 sps:$4 sm:$0xff]  }
 0x67f   : > { %7557 = vmatprep.subr.bf16.mxu1 %v11223_v58  ;;  %v11310_v58 = vld [vmem:[%s17443_s4 + $0x56c] ss:$16 sps:$4 sm:$0xff]  }
 0x680   : > { %7519 = vmatpush2.bf16.msra.mxu0 %v11218_v18  ;;  %v11305_v18 = vld [vmem:[%s17443_s4 + $0x788] ss:$16 sps:$4 sm:$0xff]  }
 0x681   : > { %7520 = vmatprep.subr.bf16.mxu0 %v11226_v42  ;;  %v11313_v42 = vld [vmem:[%s17443_s4 + $0x76c] ss:$16 sps:$4 sm:$0xff]  }
 0x682   : > { %7558 = vmatpush2.bf16.msra.mxu1 %v11221_v55  ;;  %v11308_v55 = vld [vmem:[%s17443_s4 + $0x568] ss:$16 sps:$4 sm:$0xff]  }
 0x683   : > { %7559 = vmatprep.subr.bf16.mxu1 %v11229_v34  ;;  %v11316_v34 = vld [vmem:[%s17443_s4 + $0x54c] ss:$16 sps:$4 sm:$0xff]  }
 0x684   : > { %7521 = vmatpush2.bf16.msra.mxu0 %v11224_v19  ;;  %v11311_v19 = vld [vmem:[%s17443_s4 + $0x768] ss:$16 sps:$4 sm:$0xff]  }
 0x685   : > { %7522 = vmatprep.subr.bf16.mxu0 %v11232_v33  ;;  %v11319_v33 = vld [vmem:[%s17443_s4 + $0x74c] ss:$16 sps:$4 sm:$0xff]  }
 0x686   : > { %7560 = vmatpush2.bf16.msra.mxu1 %v11227_v5  ;;  %v11314_v5 = vld [vmem:[%s17443_s4 + $0x548] ss:$16 sps:$4 sm:$0xff]  }
 0x687   : > { %7561 = vmatprep.subr.bf16.mxu1 %v11235_v32  ;;  %v11322_v32 = vld [vmem:[%s17443_s4 + $0x52c] ss:$16 sps:$4 sm:$0xff]  }
 0x688   : > { %7523 = vmatpush2.bf16.msra.mxu0 %v11230_v9  ;;  %v11317_v9 = vld [vmem:[%s17443_s4 + $0x748] ss:$16 sps:$4 sm:$0xff]  }
 0x689   : > { %7570 = vmatprep.subr.bf16.mxu0 %v11238_v59  ;;  %v11325_v59 = vld [vmem:[%s17443_s4 + $0x72c] ss:$16 sps:$4 sm:$0xff]  }
 0x68a   : > { %7562 = vmatpush2.bf16.msra.mxu1 %v11233_v38  ;;  %v11320_v38 = vld [vmem:[%s17443_s4 + $0x528] ss:$16 sps:$4 sm:$0xff]  }
 0x68b   : > { %7525 = vmatmul.mubr.f32.vlgmr.msra.gmra.mxu0 %v16107_v29  ;;  %7609 = vmatprep.subr.bf16.mxu1 %v11241_v27  ;;  %v11245_v29 = vld [vmem:[%s17443_s4 + $0x6c8] ss:$16 sps:$4 sm:$0xff]   ;;  %v11328_v27 = vld [vmem:[%s17443_s4 + $0x50c] ss:$16 sps:$4 sm:$0xff]  }
 0x68c   : > { %7571 = vmatpush1.bf16.msra.mxu0 %v11236_v12  ;;  %7602 = vmatprep.mubr.f32.mxu0 %v16324_v0  ;;  %v11253_v0 = vld [vmem:[%s17443_s4 + $0x6ac] ss:$16 sps:$4 sm:$0xff]   ;;  %v11323_v12 = vld [vmem:[%s17443_s4 + $0x728] ss:$16 sps:$4 sm:$0xff]  }
 0x68d   : > { %7564 = vmatmul.mubr.f32.vlgmr.msra.gmra.mxu1 %v16117_v30  ;;  %7572 = vmatprep.subr.bf16.mxu0 %v11244_v17  ;;  %v11248_v30 = vld [vmem:[%s17443_s4 + $0x4a8] ss:$16 sps:$4 sm:$0xff]   ;;  %v11331_v17 = vld [vmem:[%s17443_s4 + $0x70c] ss:$16 sps:$4 sm:$0xff]  }
 0x68e   : > { %7610 = vmatpush1.bf16.msra.mxu1 %v11239_v45  ;;  %7641 = vmatprep.mubr.f32.mxu1 %v16338_v54  ;;  %v11251_v54 = vld [vmem:[%s17443_s4 + $0x6a8] ss:$16 sps:$4 sm:$0xff]  }
 0x68f   : > { %7611 = vmatprep.subr.bf16.mxu1 %v11247_v44  ;;  %v11326_v45 = vld [vmem:[%s17443_s4 + $0x508] ss:$16 sps:$4 sm:$0xff]   ;;  %v11334_v44 = vld [vmem:[%s17443_s4 + $0x8ec] ss:$16 sps:$4 sm:$0xff]  }
 0x690   : > { %7573 = vmatpush1.bf16.msra.mxu0 %v11242_v13  ;;  %v11329_v13 = vld [vmem:[%s17443_s4 + $0x708] ss:$16 sps:$4 sm:$0xff]  }
 0x691   : > { %7574 = vmatprep.subr.bf16.mxu0 %v11250_v40  ;;  %v11337_v40 = vld [vmem:[%s17443_s4 + $0xaec] ss:$16 sps:$4 sm:$0xff]  }
 0x692   : > { %7612 = vmatpush1.bf16.msra.mxu1 %v11245_v29  ;;  %v11332_v29 = vld [vmem:[%s17443_s4 + $0x8e8] ss:$16 sps:$4 sm:$0xff]  }
 0x693   : > { %7613 = vmatprep.subr.bf16.mxu1 %v11253_v0  ;;  %v11340_v0 = vld [vmem:[%s17443_s4 + $0x8cc] ss:$16 sps:$4 sm:$0xff]  }
 0x694   : > { %7575 = vmatpush1.bf16.msra.mxu0 %v11248_v30  ;;  %v11335_v30 = vld [vmem:[%s17443_s4 + $0xae8] ss:$16 sps:$4 sm:$0xff]  }
 0x695   : > { %7576 = vmatprep.subr.bf16.mxu0 %v11256_v22  ;;  %v11343_v22 = vld [vmem:[%s17443_s4 + $0xacc] ss:$16 sps:$4 sm:$0xff]  }
 0x696   : > { %7614 = vmatpush1.bf16.msra.mxu1 %v11251_v54  ;;  %v11338_v54 = vld [vmem:[%s17443_s4 + $0x8c8] ss:$16 sps:$4 sm:$0xff]  }
 0x697   : > { %7615 = vmatprep.subr.bf16.mxu1 %v11259_v62  ;;  %v11346_v62 = vld [vmem:[%s17443_s4 + $0x8ac] ss:$16 sps:$4 sm:$0xff]  }
 0x698   : > { %7577 = vmatpush1.bf16.msra.mxu0 %v11254_v23  ;;  %v11352_v23 = vld [vmem:[%s17443_s4 + $0x88c] ss:$16 sps:$4 sm:$0xff]  }
 0x699   : > { %7578 = vmatprep.subr.bf16.mxu0 %v11262_v8  ;;  %v11355_v8 = vld [vmem:[%s17443_s4 + $0xa8c] ss:$16 sps:$4 sm:$0xff]  }
 0x69a   : > { %7616 = vmatpush1.bf16.msra.mxu1 %v11257_v37  ;;  %v11350_v37 = vld [vmem:[%s17443_s4 + $0x888] ss:$16 sps:$4 sm:$0xff]  }
 0x69b   : > { %7617 = vmatprep.subr.bf16.mxu1 %v11265_v2  ;;  %v11358_v2 = vld [vmem:[%s17443_s4 + $0x86c] ss:$16 sps:$4 sm:$0xff]  }
 0x69c   : > { %7579 = vmatpush1.bf16.msra.mxu0 %v11260_v49  ;;  %v11353_v49 = vld [vmem:[%s17443_s4 + $0xa88] ss:$16 sps:$4 sm:$0xff]  }
 0x69d   : > { %7580 = vmatprep.subr.bf16.mxu0 %v11268_v21  ;;  %v11361_v21 = vld [vmem:[%s17443_s4 + $0xa6c] ss:$16 sps:$4 sm:$0xff]  }
 0x69e   : > { %7618 = vmatpush1.bf16.msra.mxu1 %v11263_v53  ;;  %v11356_v53 = vld [vmem:[%s17443_s4 + $0x868] ss:$16 sps:$4 sm:$0xff]  }
 0x69f   : > { %7619 = vmatprep.subr.bf16.mxu1 %v11271_v20  ;;  %v11364_v20 = vld [vmem:[%s17443_s4 + $0x84c] ss:$16 sps:$4 sm:$0xff]  }
 0x6a0   : > { %7581 = vmatpush1.bf16.msra.mxu0 %v11266_v1  ;;  %v11359_v1 = vld [vmem:[%s17443_s4 + $0xa68] ss:$16 sps:$4 sm:$0xff]  }
 0x6a1   : > { %7582 = vmatprep.subr.bf16.mxu0 %v11274_v61  ;;  %v11367_v61 = vld [vmem:[%s17443_s4 + $0xa4c] ss:$16 sps:$4 sm:$0xff]  }
 0x6a2   : > { %7620 = vmatpush1.bf16.msra.mxu1 %v11269_v6  ;;  %v11362_v6 = vld [vmem:[%s17443_s4 + $0x848] ss:$16 sps:$4 sm:$0xff]  }
 0x6a3   : > { %7621 = vmatprep.subr.bf16.mxu1 %v11277_v10  ;;  %v11370_v10 = vld [vmem:[%s17443_s4 + $0x82c] ss:$16 sps:$4 sm:$0xff]  }
 0x6a4   : > { %7583 = vmatpush1.bf16.msra.mxu0 %v11272_v36  ;;  %v11365_v36 = vld [vmem:[%s17443_s4 + $0xa48] ss:$16 sps:$4 sm:$0xff]  }
 0x6a5   : > { %7584 = vmatprep.subr.bf16.mxu0 %v11280_v16  ;;  %v11373_v16 = vld [vmem:[%s17443_s4 + $0xa2c] ss:$16 sps:$4 sm:$0xff]  }
 0x6a6   : > { %7622 = vmatpush1.bf16.msra.mxu1 %v11275_v46  ;;  %v11368_v46 = vld [vmem:[%s17443_s4 + $0x828] ss:$16 sps:$4 sm:$0xff]  }
 0x6a7   : > { %7623 = vmatprep.subr.bf16.mxu1 %v11283_v43  ;;  %v11376_v43 = vld [vmem:[%s17443_s4 + $0x80c] ss:$16 sps:$4 sm:$0xff]  }
 0x6a8   : > { %7585 = vmatpush1.bf16.msra.mxu0 %v11278_v31  ;;  %v11371_v31 = vld [vmem:[%s17443_s4 + $0xa28] ss:$16 sps:$4 sm:$0xff]  }
 0x6a9   : > { %7586 = vmatprep.subr.bf16.mxu0 %v11286_v24  ;;  %v11379_v24 = vld [vmem:[%s17443_s4 + $0xa0c] ss:$16 sps:$4 sm:$0xff]  }
 0x6aa   : > { %7624 = vmatpush1.bf16.msra.mxu1 %v11281_v63  ;;  %v11374_v63 = vld [vmem:[%s17443_s4 + $0x808] ss:$16 sps:$4 sm:$0xff]  }
 0x6ab   : > { %7625 = vmatprep.subr.bf16.mxu1 %v11289_v39  ;;  %v11382_v39 = vld [vmem:[%s17443_s4 + $0x9ec] ss:$16 sps:$4 sm:$0xff]  }
 0x6ac   : > { %7587 = vmatpush2.bf16.msra.mxu0 %v11284_v35  ;;  %v11377_v35 = vld [vmem:[%s17443_s4 + $0xa08] ss:$16 sps:$4 sm:$0xff]  }
 0x6ad   : > { %7588 = vmatprep.subr.bf16.mxu0 %v11292_v28  ;;  %v11385_v28 = vld [vmem:[%s17443_s4 + $0xbec] ss:$16 sps:$4 sm:$0xff]  }
 0x6ae   : > { %7626 = vmatpush2.bf16.msra.mxu1 %v11287_v50  ;;  %v11380_v50 = vld [vmem:[%s17443_s4 + $0x9e8] ss:$16 sps:$4 sm:$0xff]  }
 0x6af   : > { %7627 = vmatprep.subr.bf16.mxu1 %v11295_v11  ;;  %v11388_v11 = vld [vmem:[%s17443_s4 + $0x9cc] ss:$16 sps:$4 sm:$0xff]  }
 0x6b0   : > { %7589 = vmatpush2.bf16.msra.mxu0 %v11290_v48  ;;  %v11383_v48 = vld [vmem:[%s17443_s4 + $0xbe8] ss:$16 sps:$4 sm:$0xff]  }
 0x6b1   : > { %7590 = vmatprep.subr.bf16.mxu0 %v11298_v14  ;;  %v11391_v14 = vld [vmem:[%s17443_s4 + $0xbcc] ss:$16 sps:$4 sm:$0xff]  }
 0x6b2   : > { %7628 = vmatpush2.bf16.msra.mxu1 %v11293_v47  ;;  %v11386_v47 = vld [vmem:[%s17443_s4 + $0x9c8] ss:$16 sps:$4 sm:$0xff]  }
 0x6b3   : > { %7629 = vmatprep.subr.bf16.mxu1 %v11301_v4  ;;  %v11394_v4 = vld [vmem:[%s17443_s4 + $0x9ac] ss:$16 sps:$4 sm:$0xff]  }
 0x6b4   : > { %7591 = vmatpush2.bf16.msra.mxu0 %v11296_v41  ;;  %v11389_v41 = vld [vmem:[%s17443_s4 + $0xbc8] ss:$16 sps:$4 sm:$0xff]  }
 0x6b5   : > { %7592 = vmatprep.subr.bf16.mxu0 %v11304_v15  ;;  %v11397_v15 = vld [vmem:[%s17443_s4 + $0xbac] ss:$16 sps:$4 sm:$0xff]  }
 0x6b6   : > { %7630 = vmatpush2.bf16.msra.mxu1 %v11299_v26  ;;  %v11392_v26 = vld [vmem:[%s17443_s4 + $0x9a8] ss:$16 sps:$4 sm:$0xff]  }
 0x6b7   : > { %7631 = vmatprep.subr.bf16.mxu1 %v11307_v57  ;;  %v11400_v57 = vld [vmem:[%s17443_s4 + $0x98c] ss:$16 sps:$4 sm:$0xff]  }
 0x6b8   : > { %7593 = vmatpush2.bf16.msra.mxu0 %v11302_v56  ;;  %v11395_v56 = vld [vmem:[%s17443_s4 + $0xba8] ss:$16 sps:$4 sm:$0xff]  }
 0x6b9   : > { %7594 = vmatprep.subr.bf16.mxu0 %v11310_v58  ;;  %v11403_v58 = vld [vmem:[%s17443_s4 + $0xb8c] ss:$16 sps:$4 sm:$0xff]  }
 0x6ba   : > { %7632 = vmatpush2.bf16.msra.mxu1 %v11305_v18  ;;  %v11398_v18 = vld [vmem:[%s17443_s4 + $0x988] ss:$16 sps:$4 sm:$0xff]  }
 0x6bb   : > { %7633 = vmatprep.subr.bf16.mxu1 %v11313_v42  ;;  %v11406_v42 = vld [vmem:[%s17443_s4 + $0x96c] ss:$16 sps:$4 sm:$0xff]  }
 0x6bc   : > { %7595 = vmatpush2.bf16.msra.mxu0 %v11308_v55  ;;  %v11401_v55 = vld [vmem:[%s17443_s4 + $0xb88] ss:$16 sps:$4 sm:$0xff]  }
 0x6bd   : > { %7596 = vmatprep.subr.bf16.mxu0 %v11316_v34  ;;  %v11409_v34 = vld [vmem:[%s17443_s4 + $0xb6c] ss:$16 sps:$4 sm:$0xff]  }
 0x6be   : > { %7634 = vmatpush2.bf16.msra.mxu1 %v11311_v19  ;;  %v11404_v19 = vld [vmem:[%s17443_s4 + $0x968] ss:$16 sps:$4 sm:$0xff]  }
 0x6bf   : > { %7635 = vmatprep.subr.bf16.mxu1 %v11319_v33  ;;  %v11412_v33 = vld [vmem:[%s17443_s4 + $0x94c] ss:$16 sps:$4 sm:$0xff]  }
 0x6c0   : > { %7597 = vmatpush2.bf16.msra.mxu0 %v11314_v5  ;;  %v11407_v5 = vld [vmem:[%s17443_s4 + $0xb68] ss:$16 sps:$4 sm:$0xff]  }
 0x6c1   : > { %7598 = vmatprep.subr.bf16.mxu0 %v11322_v32  ;;  %v17097_v32 = vpop.f32.mrf.mxu0 }
 0x6c2   : > { %7636 = vmatpush2.bf16.msra.mxu1 %v11317_v9  ;;  %v11415_v9 = vld [vmem:[%s17443_s4 + $0xb4c] ss:$16 sps:$4 sm:$0xff]  }
 0x6c3   : > { %7637 = vmatprep.subr.bf16.mxu1 %v11325_v59  ;;  %v11410_v59 = vld [vmem:[%s17443_s4 + $0x948] ss:$16 sps:$4 sm:$0xff]  }
 0x6c4   : > { %7599 = vmatpush2.bf16.msra.mxu0 %v11320_v38  ;;  %v17108_v38 = vld [vmem:[%s17444_s5] sm:$0xf] }
 0x6c5   : > { %7600 = vmatprep.subr.bf16.mxu0 %v11328_v27  ;;  %v11418_v27 = vld [vmem:[%s17443_s4 + $0x92c] ss:$16 sps:$4 sm:$0xff]  }
 0x6c6   : > { %7638 = vmatpush2.bf16.msra.mxu1 %v11323_v12  ;;  %v18718_v12 = vld [vmem:[#allocation90_spill] sm:$0xff] }
 0x6c7   : > { %7639 = vmatprep.subr.bf16.mxu1 %v11331_v17  ;;  %v5259_v17 = vrot.slane %v17108_v38, %v18718_v12 }
 0x6c8   : > { %7601 = vmatpush2.bf16.msra.mxu0 %v11326_v45  ;;  %v11413_v45 = vld [vmem:[%s17443_s4 + $0xb48] ss:$16 sps:$4 sm:$0xff]  }
 0x6c9   : > { %7648 = vmatprep.subr.bf16.mxu0 %v11334_v44  ;;  %v7294_v44 = vpop.f32.mrf.mxu0 }
 0x6ca   : > { %7640 = vmatpush2.bf16.msra.mxu1 %v11329_v13  ;;  %v17118_v13 = vpop.f32.mrf.mxu1 }
 0x6cb   : > { %7603 = vmatmul.mubr.f32.vlgmr.msra.gmra.mxu0 %v16317_v51  ;;  %7687 = vmatprep.subr.bf16.mxu1 %v11337_v40  ;;  %v11341_v51 = vld [vmem:[%s17443_s4 + $0xac8] ss:$16 sps:$4 sm:$0xff]   ;;  %v11421_v40 = vld [vmem:[%s17443_s4 + $0xb2c] ss:$16 sps:$4 sm:$0xff]  }
 0x6cc   : > { %7649 = vmatpush1.bf16.msra.mxu0 %v11332_v29  ;;  %7680 = vmatprep.mubr.f32.mxu0 %v16537_v52  ;;  %v11349_v52 = vld [vmem:[%s17443_s4 + $0xaac] ss:$16 sps:$4 sm:$0xff]   ;;  %v11416_v29 = vld [vmem:[%s17443_s4 + $0x928] ss:$16 sps:$4 sm:$0xff]  }
 0x6cd   : > { %7642 = vmatmul.mubr.f32.vlgmr.msra.gmra.mxu1 %v16330_v7  ;;  %7650 = vmatprep.subr.bf16.mxu0 %v11340_v0  ;;  %v11344_v7 = vld [vmem:[%s17443_s4 + $0x8a8] ss:$16 sps:$4 sm:$0xff]   ;;  %v17126_v0 = vpop.f32.mrf.mxu0 }
 0x6ce   : > { %7688 = vmatpush1.bf16.msra.mxu1 %v11335_v30  ;;  %7719 = vmatprep.mubr.f32.mxu1 %v16548_v60  ;;  %v11347_v60 = vld [vmem:[%s17443_s4 + $0xaa8] ss:$16 sps:$4 sm:$0xff]   ;;  %v11424_v30 = vld [vmem:[%s17443_s4 + $0x90c] ss:$16 sps:$4 sm:$0xff]  }
 0x6cf   : > { %7689 = vmatprep.subr.bf16.mxu1 %v11343_v22  ;;  %v7295_v22 = vadd.f32 %v7294_v44, %v5259_v17  ;;  %v11497_v17 = vld [vmem:[%s17445_s6 + $0x100] ss:$8 sps:$4 sm:$0xff]   ;;  %v11502_v44 = vld [vmem:[%s17445_s6 + $0x1f4] ss:$8 sps:$4 sm:$0xff]  }
 0x6d0   : > { %7651 = vmatpush1.bf16.msra.mxu0 %v11338_v54  ;;  %v11419_v54 = vld [vmem:[%s17443_s4 + $0xb28] ss:$16 sps:$4 sm:$0xff]  }
 0x6d1   : > { %7652 = vmatprep.subr.bf16.mxu0 %v11346_v62  ;;  %v7333_v62 = vpop.f32.mrf.mxu1 }
 0x6d2   : > { %7690 = vmatpush1.bf16.msra.mxu1 %v11341_v51  ;;  %v11427_v51 = vld [vmem:[%s17443_s4 + $0xb0c] ss:$16 sps:$4 sm:$0xff]  }
 0x6d3   : > { %7691 = vmatprep.subr.bf16.mxu1 %v11349_v52  ;;  %v11422_v52 = vld [vmem:[%s17443_s4 + $0x908] ss:$16 sps:$4 sm:$0xff]  }
 0x6d4   : > { %7653 = vmatpush1.bf16.msra.mxu0 %v11344_v7  ;;  %v7372_v7 = vpop.f32.mrf.mxu0 }
 0x6d5   : > { %7654 = vmatprep.subr.bf16.mxu0 %v11352_v23  ;;  %v17140_v23 = vpop.f32.mrf.mxu1 }
 0x6d6   : > { %7692 = vmatpush1.bf16.msra.mxu1 %v11347_v60  ;;  %v11430_v60 = vld [vmem:[%s17445_s6 + $0x74] ss:$8 sps:$4 sm:$0xff]  }
 0x6d7   : > { %7693 = vmatprep.subr.bf16.mxu1 %v11355_v8  ;;  %v7334_v8 = vadd.f32 %v7333_v62, %v7295_v22  ;;  %v11505_v22 = vld [vmem:[%s17445_s6 + $0x1e4] ss:$8 sps:$4 sm:$0xff]  }
 0x6d8   : > { %7655 = vmatpush1.bf16.msra.mxu0 %v11350_v37  ;;  %v11425_v37 = vld [vmem:[%s17443_s4 + $0xb08] ss:$16 sps:$4 sm:$0xff]  }
 0x6d9   : > { %7656 = vmatprep.subr.bf16.mxu0 %v11358_v2  ;;  %v7373_v2 = vadd.f32 %v7372_v7, %v7334_v8  ;;  %v11461_v7 = vld [vmem:[%s17445_s6 + $0xc0] ss:$8 sps:$4 sm:$0xff]  }
 0x6da   : > { %7694 = vmatpush1.bf16.msra.mxu1 %v11353_v49  ;;  %v11428_v49 = vld [vmem:[%s17445_s6 + $0x70] ss:$8 sps:$4 sm:$0xff]  }
 0x6db   : > { %7695 = vmatprep.subr.bf16.mxu1 %v11361_v21  ;;  %v7411_v21 = vpop.f32.mrf.mxu1 }
 0x6dc   : > { %7657 = vmatpush1.bf16.msra.mxu0 %v11356_v53  ;;  %v11433_v53 = vld [vmem:[%s17445_s6 + $0x64] ss:$8 sps:$4 sm:$0xff]  }
 0x6dd   : > { %7658 = vmatprep.subr.bf16.mxu0 %v11364_v20 }
 0x6de   : > { %7696 = vmatpush1.bf16.msra.mxu1 %v11359_v1  ;;  %v7412_v1 = vadd.f32 %v7411_v21, %v7373_v2  ;;  %v11506_v2 = vld [vmem:[%s17445_s6 + $0x1d0] ss:$8 sps:$4 sm:$0xff]  }
 0x6df   : > { %7697 = vmatprep.subr.bf16.mxu1 %v11367_v61  ;;  %v11431_v61 = vld [vmem:[%s17445_s6 + $0x60] ss:$8 sps:$4 sm:$0xff]  }
 0x6e0   : > { %7659 = vmatpush1.bf16.msra.mxu0 %v11362_v6 }
 0x6e1   : > { %7660 = vmatprep.subr.bf16.mxu0 %v11370_v10 }
 0x6e2   : > { %7698 = vmatpush1.bf16.msra.mxu1 %v11365_v36  ;;  %v11436_v36 = vld [vmem:[%s17445_s6 + $0x54] ss:$8 sps:$4 sm:$0xff]  }
 0x6e3   : > { %7699 = vmatprep.subr.bf16.mxu1 %v11373_v16 }
 0x6e4   : > { %7661 = vmatpush1.bf16.msra.mxu0 %v11368_v46 }
 0x6e5   : > { %7662 = vmatprep.subr.bf16.mxu0 %v11376_v43 }
 0x6e6   : > { %7700 = vmatpush1.bf16.msra.mxu1 %v11371_v31  ;;  %v11476_v31 = vld [vmem:[%s17445_s6 + $0x170] ss:$8 sps:$4 sm:$0xff]  }
 0x6e7   : > { %7701 = vmatprep.subr.bf16.mxu1 %v11379_v24  ;;  %v11439_v24 = vld [vmem:[%s17445_s6 + $0x44] ss:$8 sps:$4 sm:$0xff]  }
 0x6e8   : > { %7663 = vmatpush1.bf16.msra.mxu0 %v11374_v63  ;;  %v11481_v63 = vld [vmem:[%s17445_s6 + $0x164] ss:$8 sps:$4 sm:$0xff]  }
 0x6e9   : > { %7664 = vmatprep.subr.bf16.mxu0 %v11382_v39 }
 0x6ea   : > { %7702 = vmatpush1.bf16.msra.mxu1 %v11377_v35  ;;  %v11479_v35 = vld [vmem:[%s17445_s6 + $0x160] ss:$8 sps:$4 sm:$0xff]  }
 0x6eb   : > { %7703 = vmatprep.subr.bf16.mxu1 %v11385_v28  ;;  %v11437_v28 = vld [vmem:[%s17445_s6 + $0x40] ss:$8 sps:$4 sm:$0xff]  }
 0x6ec   : > { %7665 = vmatpush2.bf16.msra.mxu0 %v11380_v50  ;;  %v11484_v50 = vld [vmem:[%s17445_s6 + $0x154] ss:$8 sps:$4 sm:$0xff]  }
 0x6ed   : > { %7666 = vmatprep.subr.bf16.mxu0 %v11388_v11  ;;  %v11442_v11 = vld [vmem:[%s17445_s6 + $0x34] ss:$8 sps:$4 sm:$0xff]  }
 0x6ee   : > { %7704 = vmatpush2.bf16.msra.mxu1 %v11383_v48  ;;  %v11482_v48 = vld [vmem:[%s17445_s6 + $0x150] ss:$8 sps:$4 sm:$0xff]  }
 0x6ef   : > { %7705 = vmatprep.subr.bf16.mxu1 %v11391_v14  ;;  %v11440_v14 = vld [vmem:[%s17445_s6 + $0x30] ss:$8 sps:$4 sm:$0xff]  }
 0x6f0   : > { %7667 = vmatpush2.bf16.msra.mxu0 %v11386_v47  ;;  %v11487_v47 = vld [vmem:[%s17445_s6 + $0x144] ss:$8 sps:$4 sm:$0xff]  }
 0x6f1   : > { %7668 = vmatprep.subr.bf16.mxu0 %v11394_v4  ;;  %v11445_v4 = vld [vmem:[%s17445_s6 + $0x24] ss:$8 sps:$4 sm:$0xff]  }
 0x6f2   : > { %7706 = vmatpush2.bf16.msra.mxu1 %v11389_v41  ;;  %v11485_v41 = vld [vmem:[%s17445_s6 + $0x140] ss:$8 sps:$4 sm:$0xff]  }
 0x6f3   : > { %7707 = vmatprep.subr.bf16.mxu1 %v11397_v15  ;;  %v11443_v15 = vld [vmem:[%s17445_s6 + $0x20] ss:$8 sps:$4 sm:$0xff]  }
 0x6f4   : > { %7669 = vmatpush2.bf16.msra.mxu0 %v11392_v26  ;;  %v11490_v26 = vld [vmem:[%s17445_s6 + $0x134] ss:$8 sps:$4 sm:$0xff]  }
 0x6f5   : > { %7670 = vmatprep.subr.bf16.mxu0 %v11400_v57  ;;  %v11448_v57 = vld [vmem:[%s17445_s6 + $0x14] ss:$8 sps:$4 sm:$0xff]  }
 0x6f6   : > { %7708 = vmatpush2.bf16.msra.mxu1 %v11395_v56  ;;  %v11488_v56 = vld [vmem:[%s17445_s6 + $0x130] ss:$8 sps:$4 sm:$0xff]  }
 0x6f7   : > { %7709 = vmatprep.subr.bf16.mxu1 %v11403_v58  ;;  %v11446_v58 = vld [vmem:[%s17445_s6 + $0x10] ss:$8 sps:$4 sm:$0xff]  }
 0x6f8   : > { %7671 = vmatpush2.bf16.msra.mxu0 %v11398_v18  ;;  %v11493_v18 = vld [vmem:[%s17445_s6 + $0x124] ss:$8 sps:$4 sm:$0xff]  }
 0x6f9   : > { %7672 = vmatprep.subr.bf16.mxu0 %v11406_v42  ;;  %v11451_v42 = vld [vmem:[%s17445_s6 + $0x4] ss:$8 sps:$4 sm:$0xff]  }
 0x6fa   : > { %7710 = vmatpush2.bf16.msra.mxu1 %v11401_v55  ;;  %v11491_v55 = vld [vmem:[%s17445_s6 + $0x120] ss:$8 sps:$4 sm:$0xff]  }
 0x6fb   : > { %7711 = vmatprep.subr.bf16.mxu1 %v11409_v34  ;;  %v11449_v34 = vld [vmem:[%s17445_s6] ss:$8 sps:$4 sm:$0xff]  }
 0x6fc   : > { %7673 = vmatpush2.bf16.msra.mxu0 %v11404_v19  ;;  %v11496_v19 = vld [vmem:[%s17445_s6 + $0x114] ss:$8 sps:$4 sm:$0xff]  }
 0x6fd   : > { %7674 = vmatprep.subr.bf16.mxu0 %v11412_v33  ;;  %v11454_v33 = vld [vmem:[%s17445_s6 + $0xf4] ss:$8 sps:$4 sm:$0xff]  }
 0x6fe   : > { %7712 = vmatpush2.bf16.msra.mxu1 %v11407_v5  ;;  %v11494_v5 = vld [vmem:[%s17445_s6 + $0x110] ss:$8 sps:$4 sm:$0xff]  }
 0x6ff   : > { %7713 = vmatprep.subr.bf16.mxu1 %v11415_v9  ;;  %v11452_v9 = vld [vmem:[%s17445_s6 + $0xf0] ss:$8 sps:$4 sm:$0xff]  }
 0x700   : > { %7675 = vmatpush2.bf16.msra.mxu0 %v11410_v59  ;;  %v11499_v59 = vld [vmem:[%s17445_s6 + $0x104] ss:$8 sps:$4 sm:$0xff]  }
 0x701   : > { %7676 = vmatprep.subr.bf16.mxu0 %v11418_v27  ;;  %v11457_v27 = vld [vmem:[%s17445_s6 + $0xe4] ss:$8 sps:$4 sm:$0xff]  }
 0x702   : > { %7714 = vmatpush2.bf16.msra.mxu1 %v11413_v45  ;;  %v11455_v45 = vld [vmem:[%s17445_s6 + $0xe0] ss:$8 sps:$4 sm:$0xff]  }
 0x703   : > { %7715 = vmatprep.subr.bf16.mxu1 %v11421_v40  ;;  %v11460_v40 = vld [vmem:[%s17445_s6 + $0xd4] ss:$8 sps:$4 sm:$0xff]  }
 0x704   : > { %7677 = vmatpush2.bf16.msra.mxu0 %v11416_v29  ;;  %v11500_v29 = vld [vmem:[%s17445_s6 + $0x1f0] ss:$8 sps:$4 sm:$0xff]  }
 0x705   : > { %7678 = vmatprep.subr.bf16.mxu0 %v11424_v30  ;;  %v11458_v30 = vld [vmem:[%s17445_s6 + $0xd0] ss:$8 sps:$4 sm:$0xff]  }
 0x706   : > { %7716 = vmatpush2.bf16.msra.mxu1 %v11419_v54  ;;  %v18719_v54 = vld [vmem:[#allocation89_spill] sm:$0xff] }
 0x707   : > { %7717 = vmatprep.subr.bf16.mxu1 %v11427_v51  ;;  %v5255_v62 = vrot.slane %v17108_v38, %v18719_v54  ;;  %v11463_v51 = vld [vmem:[%s17445_s6 + $0xc4] ss:$8 sps:$4 sm:$0xff]  }
 0x708   : > { %7679 = vmatpush2.bf16.msra.mxu0 %v11422_v52  ;;  %v11503_v52 = vld [vmem:[%s17445_s6 + $0x1e0] ss:$8 sps:$4 sm:$0xff]  }
 0x709   : > { %8126 = vmatprep.subr.bf16.mxu0 %v11430_v60  ;;  %v11508_v60 = vld [vmem:[%s17445_s6 + $0x1d4] ss:$8 sps:$4 sm:$0xff]   ;;  %v7293_v8 = vadd.f32 %v17097_v32, %v5255_v62  ;;  %v11511_v32 = vld [vmem:[%s17445_s6 + $0x1c4] ss:$8 sps:$4 sm:$0xff]  }
 0x70a   : > { %7718 = vmatpush2.bf16.msra.mxu1 %v11425_v37  ;;  %v11466_v37 = vld [vmem:[%s17445_s6 + $0xb4] ss:$8 sps:$4 sm:$0xff]  }
 0x70b   : > { %v17154_v20 = vpop.f32.mrf.mxu0  ;;  %7681 = vmatmul.mubr.f32.vlgmr.msra.gmra.mxu0 %v16530_v25  ;;  %v11434_v25 = vld [vmem:[%s17445_s6 + $0x50] ss:$8 sps:$4 sm:$0xff]   ;;  %v7332_v21 = vadd.f32 %v17118_v13, %v7293_v8  ;;  %v11514_v13 = vld [vmem:[%s17445_s6 + $0x1b4] ss:$8 sps:$4 sm:$0xff]  }
 0x70c   : > { %8127 = vmatpush1.bf16.msra.mxu0 %v11428_v49  ;;  %v11464_v49 = vld [vmem:[%s17445_s6 + $0xb0] ss:$8 sps:$4 sm:$0xff]  }
 0x70d   : > { %v7450_v6 = vpop.f32.mrf.mxu0  ;;  %v17160_v10 = vpop.f32.mrf.mxu1  ;;  %7720 = vmatmul.mubr.f32.vlgmr.msra.gmra.mxu1 %v16543_v3  ;;  %8128 = vmatprep.subr.bf16.mxu0 %v11433_v53  ;;  %v11478_v3 = vld [vmem:[%s17445_s6 + $0x174] ss:$8 sps:$4 sm:$0xff]   ;;  %v11469_v53 = vld [vmem:[%s17445_s6 + $0xa4] ss:$8 sps:$4 sm:$0xff]  }
 0x70e   : > { %v7451_v16 = vadd.f32 %v7450_v6, %v7412_v1  ;;  %8165 = vmatprep.subr.bf16.mxu1 %v11478_v3  ;;  %v7371_v1 = vadd.f32 %v17126_v0, %v7332_v21  ;;  %v11467_v6 = vld [vmem:[%s17445_s6 + $0xa0] ss:$8 sps:$4 sm:$0xff]   ;;  %v11472_v0 = vld [vmem:[%s17445_s6 + $0x94] ss:$8 sps:$4 sm:$0xff]  }
 0x70f   : > { %v7489_v46 = vpop.f32.mrf.mxu1  ;;  %8166 = vmatpush1.bf16.msra.mxu1 %v11476_v31  ;;  %v11515_v31 = vld [vmem:[%s17445_s6 + $0x1a0] ss:$8 sps:$4 sm:$0xff]  }
 0x710   : > { %v7490_v43 = vadd.f32 %v7489_v46, %v7451_v16  ;;  %8129 = vmatpush1.bf16.msra.mxu0 %v11431_v61  ;;  %8167 = vmatprep.subr.bf16.mxu1 %v11481_v63  ;;  %v11509_v61 = vld [vmem:[%s17445_s6 + $0x1c0] ss:$8 sps:$4 sm:$0xff]   ;;  %v11512_v16 = vld [vmem:[%s17445_s6 + $0x1b0] ss:$8 sps:$4 sm:$0xff]   ;;  %v11520_v63 = vld [vmem:[%s17445_s6 + $0x194] ss:$8 sps:$4 sm:$0xff]  }
 0x711   : > { %8130 = vmatprep.subr.bf16.mxu0 %v11436_v36  ;;  %v7410_v36 = vadd.f32 %v17140_v23, %v7371_v1  ;;  %v11470_v46 = vld [vmem:[%s17445_s6 + $0x90] ss:$8 sps:$4 sm:$0xff]   ;;  %v11475_v23 = vld [vmem:[%s17445_s6 + $0x84] ss:$8 sps:$4 sm:$0xff]   ;;  %v11473_v3 = vld [vmem:[%s17445_s6 + $0x80] ss:$8 sps:$4 sm:$0xff]  }
 0x712   : > { %v7727_v39 = vmax.f32 %v7490_v43, 0.0  ;;  %v11517_v43 = vld [vmem:[%s17445_s6 + $0x1a4] ss:$8 sps:$4 sm:$0xff]  }
 0x713   : > { %8168 = vmatpush1.bf16.msra.mxu1 %v11479_v35  ;;  %v11523_v35 = vld [vmem:[%s17445_s6 + $0x184] ss:$8 sps:$4 sm:$0xff]  }
 0x714   : > { %8131 = vmatpush1.bf16.msra.mxu0 %v11434_v25  ;;  %8158 = vmatprep.mubr.f32.mxu0 %v7727_v39  ;;  %v7449_v25 = vadd.f32 %v17154_v20, %v7410_v36  ;;  %v11518_v39 = vld [vmem:[%s17445_s6 + $0x190] ss:$8 sps:$4 sm:$0xff]   ;;  %v11537_v1 = vld [vmem:[%s17447_s8 + $0x8] sm:$0xff]  }
 0x715   : > { %8132 = vmatprep.subr.bf16.mxu0 %v11439_v24  ;;  %8169 = vmatprep.subr.bf16.mxu1 %v11484_v50  ;;  %v11525_v50 = vld [vmem:[%s17447_s8 + $0x38] sm:$0xff]  }
 0x716   : > { %v7488_v24 = vadd.f32 %v17160_v10, %v7449_v25  ;;  %v11521_v10 = vld [vmem:[%s17445_s6 + $0x180] ss:$8 sps:$4 sm:$0xff]  }
 0x717   : > { %8170 = vmatpush1.bf16.msra.mxu1 %v11482_v48  ;;  %v11527_v48 = vld [vmem:[%s17447_s8 + $0x30] sm:$0xff]  }
 0x718   : > { %8133 = vmatpush1.bf16.msra.mxu0 %v11437_v28  ;;  %8171 = vmatprep.subr.bf16.mxu1 %v11487_v47  ;;  %v7726_v20 = vmax.f32 %v7488_v24, 0.0  ;;  %v11524_v28 = vld [vmem:[%s17447_s8 + $0x78] sm:$0xff]   ;;  %v11529_v47 = vld [vmem:[%s17447_s8 + $0x28] sm:$0xff]  }
 0x719   : > { %8134 = vmatprep.subr.bf16.mxu0 %v11442_v11  ;;  %v11526_v11 = vld [vmem:[%s17447_s8 + $0x70] sm:$0xff]  }
 0x71b   : > { %8172 = vmatpush1.bf16.msra.mxu1 %v11485_v41  ;;  %v11531_v41 = vld [vmem:[%s17447_s8 + $0x20] sm:$0xff]  }
 0x71c   : > { %8135 = vmatpush1.bf16.msra.mxu0 %v11440_v14  ;;  %8173 = vmatprep.subr.bf16.mxu1 %v11490_v26  ;;  %v11528_v14 = vld [vmem:[%s17447_s8 + $0x68] sm:$0xff]   ;;  %v11533_v26 = vld [vmem:[%s17447_s8 + $0x18] sm:$0xff]  }
 0x71d   : > { %8136 = vmatprep.subr.bf16.mxu0 %v11445_v4  ;;  %v11530_v4 = vld [vmem:[%s17447_s8 + $0x60] sm:$0xff]  }
 0x71f   : > { %8174 = vmatpush1.bf16.msra.mxu1 %v11488_v56  ;;  %v11535_v56 = vld [vmem:[%s17447_s8 + $0x10] sm:$0xff]  }
 0x720   : > { %8137 = vmatpush1.bf16.msra.mxu0 %v11443_v15  ;;  %8175 = vmatprep.subr.bf16.mxu1 %v11493_v18  ;;  %v11532_v15 = vld [vmem:[%s17447_s8 + $0x58] sm:$0xff]   ;;  %v18720_v18 = vld [vmem:[#allocation91_spill] sm:$0xff] }
 0x721   : > { %8138 = vmatprep.subr.bf16.mxu0 %v11448_v57  ;;  %v11534_v57 = vld [vmem:[%s17447_s8 + $0x50] sm:$0xff]  }
 0x723   : > { %8176 = vmatpush1.bf16.msra.mxu1 %v11491_v55  ;;  %v18721_v55 = vld [vmem:[#allocation92_spill] sm:$0xff] }
 0x724   : > { %8139 = vmatpush1.bf16.msra.mxu0 %v11446_v58  ;;  %8177 = vmatprep.subr.bf16.mxu1 %v11496_v19 }
 0x725   : > { %8140 = vmatprep.subr.bf16.mxu0 %v11451_v42  ;;  %v5263_v42 = vrot.slane %v17108_v38, %v18720_v18 }
 0x727   : > { %8178 = vmatpush1.bf16.msra.mxu1 %v11494_v5 }
 0x728   : > { %8141 = vmatpush1.bf16.msra.mxu0 %v11449_v34  ;;  %8179 = vmatprep.subr.bf16.mxu1 %v11499_v59  ;;  %v5267_v34 = vrot.slane %v17108_v38, %v18721_v55 }
 0x729   : > { %8142 = vmatprep.subr.bf16.mxu0 %v11454_v33 }
 0x72b   : > { %8180 = vmatpush1.bf16.msra.mxu1 %v11497_v17 }
 0x72c   : > { %8143 = vmatpush2.bf16.msra.mxu0 %v11452_v9  ;;  %8181 = vmatprep.subr.bf16.mxu1 %v11502_v44 }
 0x72d   : > { %8144 = vmatprep.subr.bf16.mxu0 %v11457_v27 }
 0x72f   : > { %8182 = vmatpush2.bf16.msra.mxu1 %v11500_v29 }
 0x730   : > { %8145 = vmatpush2.bf16.msra.mxu0 %v11455_v45  ;;  %8183 = vmatprep.subr.bf16.mxu1 %v11505_v22 }
 0x731   : > { %8146 = vmatprep.subr.bf16.mxu0 %v11460_v40 }
 0x733   : > { %8184 = vmatpush2.bf16.msra.mxu1 %v11503_v52 }
 0x734   : > { %8147 = vmatpush2.bf16.msra.mxu0 %v11458_v30  ;;  %8185 = vmatprep.subr.bf16.mxu1 %v11508_v60 }
 0x735   : > { %8148 = vmatprep.subr.bf16.mxu0 %v11463_v51 }
 0x737   : > { %8186 = vmatpush2.bf16.msra.mxu1 %v11506_v2 }
 0x738   : > { %8149 = vmatpush2.bf16.msra.mxu0 %v11461_v7  ;;  %8187 = vmatprep.subr.bf16.mxu1 %v11511_v32 }
 0x739   : > { %8150 = vmatprep.subr.bf16.mxu0 %v11466_v37 }
 0x73b   : > { %8188 = vmatpush2.bf16.msra.mxu1 %v11509_v61  ;;  %v11538_v61 = vld [vmem:[%s17447_s8 + $0x40] sm:$0xff]  }
 0x73c   : > { %8151 = vmatpush2.bf16.msra.mxu0 %v11464_v49  ;;  %8189 = vmatprep.subr.bf16.mxu1 %v11514_v13  ;;  %v7794_v13 = vld [vmem:[%s17446_s7] sm:$0x3] }
 0x73d   : > { %8152 = vmatprep.subr.bf16.mxu0 %v11469_v53  ;;  %v11536_v53 = vld [vmem:[%s17447_s8 + $0x48] sm:$0xff]   ;;  %v7799_v36 = vrot.slane %v7794_v13, %v18719_v54 }
 0x73f   : > { %8190 = vmatpush2.bf16.msra.mxu1 %v11512_v16  ;;  %v7803_v16 = vrot.slane %v7794_v13, %v18718_v12 }
 0x740   : > { %8153 = vmatpush2.bf16.msra.mxu0 %v11467_v6  ;;  %8191 = vmatprep.subr.bf16.mxu1 %v11517_v43  ;;  %v11539_v6 = vld [vmem:[%s17447_s8] sm:$0xff]  }
 0x741   : > { %8154 = vmatprep.subr.bf16.mxu0 %v11472_v0 }
 0x743   : > { %8192 = vmatpush2.bf16.msra.mxu1 %v11515_v31 }
 0x744   : > { %8155 = vmatpush2.bf16.msra.mxu0 %v11470_v46  ;;  %8193 = vmatprep.subr.bf16.mxu1 %v11520_v63 }
 0x745   : > { %8156 = vmatprep.subr.bf16.mxu0 %v11475_v23 }
 0x747   : > { %8194 = vmatpush2.bf16.msra.mxu1 %v11518_v39 }
 0x748   : > { %8157 = vmatpush2.bf16.msra.mxu0 %v11473_v3  ;;  %8195 = vmatprep.subr.bf16.mxu1 %v11523_v35  ;;  %v9373_v35 = vld [vmem:[%s17448_s9] ss:$0 sm:$0xff] }
 0x749   : > { %10707 = vmatprep.subr.bf16.mxu0 %v11524_v28 }
 0x74b   : > { %8159 = vmatmul.mubr.f32.vlgmr.msra.gmra.mxu0 %v7726_v20  ;;  %8196 = vmatpush2.bf16.msra.mxu1 %v11521_v10  ;;  %v7526_v58 = vpop.f32.mrf.mxu0 }
 0x74c   : > { %10708 = vmatpush3.bf16.msra.mxu0 %v11525_v50  ;;  %v7527_v5 = vadd.f32 %v7526_v58, %v5263_v42 }
 0x74d   : > { %10709 = vmatprep.subr.bf16.mxu0 %v11526_v11  ;;  %v7528_v19 = vpop.f32.mrf.mxu0  ;;  %v7565_v33 = vpop.f32.mrf.mxu1 }
 0x74e   : > { %v7529_v59 = vadd.f32 %v7528_v19, %v5267_v34  ;;  %v7566_v17 = vadd.f32 %v7565_v33, %v7527_v5 }
 0x74f   : > { %v7567_v27 = vpop.f32.mrf.mxu1 }
 0x750   : > { %10710 = vmatpush3.bf16.msra.mxu0 %v11527_v48  ;;  %v7568_v40 = vadd.f32 %v7567_v27, %v7529_v59 }
 0x751   : > { %10711 = vmatprep.subr.bf16.mxu0 %v11528_v14 }
 0x754   : > { %10712 = vmatpush3.bf16.msra.mxu0 %v11529_v47 }
 0x755   : > { %10713 = vmatprep.subr.bf16.mxu0 %v11530_v4 }
 0x758   : > { %10714 = vmatpush3.bf16.msra.mxu0 %v11531_v41 }
 0x759   : > { %10715 = vmatprep.subr.bf16.mxu0 %v11532_v15 }
 0x75c   : > { %10716 = vmatpush3.bf16.msra.mxu0 %v11533_v26 }
 0x75d   : > { %10717 = vmatprep.subr.bf16.mxu0 %v11534_v57 }
 0x760   : > { %10718 = vmatpush3.bf16.msra.mxu0 %v11535_v56 }
 0x761   : > { %10719 = vmatprep.subr.bf16.mxu0 %v11536_v53 }
 0x764   : > { %10720 = vmatpush3.bf16.msra.mxu0 %v11537_v1 }
 0x765   : > { %10721 = vmatprep.subr.bf16.mxu0 %v11538_v61 }
 0x768   : > { %10722 = vmatpush3.bf16.msra.mxu0 %v11539_v6 }
 0x78b   : > { %v7604_v9 = vpop.f32.mrf.mxu0 }
 0x78c   : > { %v7605_v29 = vadd.f32 %v7604_v9, %v7566_v17 }
 0x78d   : > { %v7606_v45 = vpop.f32.mrf.mxu0  ;;  %v7643_v44 = vpop.f32.mrf.mxu1 }
 0x78e   : > { %v7607_v30 = vadd.f32 %v7606_v45, %v7568_v40  ;;  %v7644_v62 = vadd.f32 %v7643_v44, %v7605_v29 }
 0x78f   : > { %v7645_v22 = vpop.f32.mrf.mxu1 }
 0x790   : > { %v7646_v52 = vadd.f32 %v7645_v22, %v7607_v30 }
 0x7cb   : > { %v7682_v51 = vpop.f32.mrf.mxu0 }
 0x7cc   : > { %v7683_v7 = vadd.f32 %v7682_v51, %v7644_v62 }
 0x7cd   : > { %v7684_v60 = vpop.f32.mrf.mxu0  ;;  %v7721_v8 = vpop.f32.mrf.mxu1 }
 0x7ce   : > { %v7685_v38 = vadd.f32 %v7684_v60, %v7646_v52  ;;  %v7722_v37 = vadd.f32 %v7721_v8, %v7683_v7 }
 0x7cf   : > { %v7723_v2 = vpop.f32.mrf.mxu1 }
 0x7d0   : > { %v7724_v49 = vadd.f32 %v7723_v2, %v7685_v38  ;;  %v7728_v21 = vmax.f32 %v7722_v37, 0.0 }
 0x7d2   : > { %v7729_v32 = vmax.f32 %v7724_v49, 0.0 }
 0x7d4   : > { %8197 = vmatprep.mubr.f32.mxu1 %v7729_v32 }
 0x7d5   : > { %8198 = vmatmul.mubr.f32.vlgmr.msra.gmra.mxu1 %v7728_v21 }
 0x80b   : > { %v8160_v0 = vpop.f32.mrf.mxu0 }
 0x80c   : > { %v8161_v43 = vadd.f32 %v8160_v0, %v7799_v36 }
 0x80d   : > { %v8162_v46 = vpop.f32.mrf.mxu0 }
 0x80e   : > { %v8163_v23 = vadd.f32 %v8162_v46, %v7803_v16 }
 0x895   : > { %v8199_v25 = vpop.f32.mrf.mxu1 }
 0x896   : > { %v8200_v31 = vadd.f32 %v8199_v25, %v8161_v43 }
 0x897   : > { %v8201_v3 = vpop.f32.mrf.mxu1 }
 0x898   : > { %v8202_v24 = vadd.f32 %v8201_v3, %v8163_v23  ;;  %v8204_v63 = vmax.f32 %v8200_v31, 0.0 }
 0x89a   : > { %v8205_v20 = vmax.f32 %v8202_v24, 0.0 }
 0x89c   : > { %8373 = vmatprep.mubr.f32.mxu0 %v8205_v20 }
 0x89d   : > { %8374 = vmatmul.mubr.f32.vlgmr.msra.gmra.mxu0 %v8204_v63 }
 0x95d   : > { %v10723_v39 = vpop.f32.mrf.mxu0 }
 0x95f   : > { %v10724_v10 = vpop.f32.mrf.mxu0 }
 0x960   : > { %v10725_v54 = vadd.f32 %v10724_v10, %v10723_v39 }
 0x962   : > { %v8376_v28 = vadd.f32 %v10725_v54, %v9373_v35 }
 0x964   : > { %8379 = vst [vmem:[#allocation5] sm:$0x3] %v8376_v28 }
 0x965 PF: > { %p10736_p1 = scmp.eq.s32.totalorder %s11782_s18, 5  ;;  %s11700_s19 = smov [#allocation5]  }
 0x966   : > { %s8387_s26 = sshll.u32 %s11700_s19, 4  ;;  %s8388_s26 = int_to_ptr.vmem [resolvable:$true] %s8387_s26 }
 0x967   : > { %s11564_s29 = scalar_lea.vmem %s8388_s26, 32  ;;  %p11571_p5 = scmp.lt.s32.totalorder %s8388_s26, %s8388_s26 }
 0x968   : > { %p11565_p2 = scmp.ne.s32.totalorder %s8388_s26, %s11564_s29  ;;  %p11572_p6 = scmp.lt.s32.totalorder %s11564_s29, %s11564_s29 }
 0x96a   : > { %p11566_p3 = pnand %p11565_p2, %p10736_p1  ;;  %p11573_p7 = por %p11572_p6, %p11571_p5 }
 0x96c   : > { %p11567_p4 = pneg %p11566_p3 }
 0x96e   : > { %p11574_p8 = pnand %p11573_p7, %p11567_p4 }
 0x970   : > { %11577 = shalt.err (!%p11574_p8)
}
 0x971   : > { %s18722_s13 = sld [smem:[#allocation247_spill]] }
 0x977   : > { %10733 = dma.vmem_to_hbm [thread:$0]  (%p10736_p1), %s8388_s26, 32, %s18722_s13, [#allocation6]  }
 0x978   : > { %11641 = dma.done.wait (%p10736_p1), [#allocation6], 32  }
 0x979   : > { %11643 = vsyncadd (%p10736_p1), [#allocation6], 4294967264 }
 0x97a PF: > { %s18723_s17 = sld [smem:[#allocation9_spill]]  ;;  %s18727_s13 = smov %s11650_s14 }
 0x97b   : > { %s18724_s15 = sld [smem:[#allocation11_spill]] }
 0x97c   : > { %s18725_s20 = sld [smem:[#allocation8_spill]] }
 0x97d   : > { %s18726_s16 = sld [smem:[#allocation10_spill]] }
 0x980   : > { %p18_p9 = scmp.ge.s32.totalorder %s18723_s17, 8  }
 0x981   : > { %s18728_s14 = smov %s18724_s15 }
 0x982   : > { %s18729_s15 = smov %s18725_s20  ;;  %20 = sbr.rel (!%p18_p9) target bundleno = 6 (0x6), region = 193 }
 0x987   :  { %8400 = vsyncpa [#allocation6], 1 }
 0x988   :  { %8402 = vsyncpa [#allocation6 + $0x1], 1 }

</bundles_post_ra>
